<compile_context>
chip_gen: v7x
topology: tpu7x:2x2x1
jax: 0.10.0
libtpu: 0.0.40
codegen_flags: <defaults>
</compile_context>

<pallas_src>
import math

import jax
import jax.numpy as jnp
from jax.experimental import pallas as pl
from jax.experimental.pallas import tpu as pltpu

BN_EPS = 1e-5


def _make_divisible(v, divisor, min_value=None):
    if min_value is None:
        min_value = divisor
    new_v = max(min_value, int(v + divisor / 2) // divisor * divisor)
    if new_v < 0.9 * v:
        new_v += divisor
    return new_v


def _silu(x):
    return x * jax.nn.sigmoid(x)


def _vmem_spec():
    return pl.BlockSpec(memory_space=pltpu.MemorySpace.VMEM)


# --------------------------- in-kernel building blocks ---------------------------

def _fill_padded(pad_ref, x4):
    """Write x4 into the interior of a 1-px padded f32 scratch; zero only the halo."""
    n, h, w, c = x4.shape
    zrow = jnp.zeros((n, 1, w + 2, c), jnp.float32)
    zcol = jnp.zeros((n, h, 1, c), jnp.float32)
    pad_ref[:, 0:1, :, :] = zrow
    pad_ref[:, h + 1:h + 2, :, :] = zrow
    pad_ref[:, 1:h + 1, 0:1, :] = zcol
    pad_ref[:, 1:h + 1, w + 1:w + 2, :] = zcol
    pad_ref[:, 1:h + 1, 1:w + 1, :] = x4


def _tap(pad_ref, dy, dx, h, w, stride):
    """(N, Ho, Wo, C) tap of the padded scratch; only kept output rows are read."""
    ho = (h - 1) // stride + 1
    wo = (w - 1) // stride + 1
    if stride == 1:
        return pad_ref[:, dy:dy + h, dx:dx + w, :]
    return pad_ref[:, pl.ds(dy, ho, stride=stride),
                   pl.ds(dx, wo, stride=stride), :]


def _conv3x3_bn(x4, pad_ref, w_ref, b_ref, stride, act):
    """3x3 conv (padding=1) + folded-BN bias (+ SiLU).

    One (M, 9*Cin) im2col slab, one bf16 cast, one MXU matmul.
    Returns ((N*Ho*Wo, Cout) f32, Ho, Wo).
    """
    n, h, w, c = x4.shape
    ho = (h - 1) // stride + 1
    wo = (w - 1) // stride + 1
    m = n * ho * wo
    _fill_padded(pad_ref, x4)
    taps = [_tap(pad_ref, dy, dx, h, w, stride).reshape(m, c)
            for dy in range(3) for dx in range(3)]
    slab = jnp.concatenate(taps, axis=-1)                      # (M, 9*Cin) f32
    y = jnp.dot(slab.astype(jnp.bfloat16), w_ref[...],
                preferred_element_type=jnp.float32) + b_ref[...]
    return (_silu(y) if act else y), ho, wo


def _conv1x1_bn(x2, w_ref, b_ref, act):
    """1x1 conv as a bf16 MXU matmul + folded-BN bias (+ SiLU)."""
    y = jnp.dot(x2.astype(jnp.bfloat16), w_ref[...],
                preferred_element_type=jnp.float32) + b_ref[...]
    return _silu(y) if act else y


def _dwconv3x3_bn_silu(h4, pad_ref, w_dw_ref, b_dw_ref, stride):
    """Depthwise 3x3 (padding=1) + folded-BN bias + SiLU, accumulated in NHWC."""
    n, h, w, c = h4.shape
    ho = (h - 1) // stride + 1
    wo = (w - 1) // stride + 1
    _fill_padded(pad_ref, h4)
    acc = jnp.zeros((n, ho, wo, c), jnp.float32)
    for dy in range(3):
        for dx in range(3):
            t = dy * 3 + dx
            w_row = w_dw_ref[t:t + 1, :].reshape(1, 1, 1, c)   # (1,1,1,C)
            acc = acc + _tap(pad_ref, dy, dx, h, w, stride) * w_row
    d4 = _silu(acc + b_dw_ref[...].reshape(1, 1, 1, c))
    return d4, ho, wo


# --------------------------- fused whole-network kernel ---------------------------

def _make_effnet_kernel(stages, n, n_inputs):
    """Builds the fused whole-network kernel for a static stage plan."""

    def kernel(*refs):
        params = iter(refs[:n_inputs])
        o_ref = refs[n_inputs]
        scratch = iter(refs[n_inputs + 1:])

        x_ref = next(params)
        cur4 = x_ref[...]                                  # (N, H0, W0, C0) f32
        _, h, w, c = cur4.shape
        cur2 = None

        for st in stages:
            kind = st["kind"]
            if kind == "stem":
                w_s, b_s = next(params), next(params)
                cur2, ho, wo = _conv3x3_bn(cur4, next(scratch), w_s, b_s,
                                           st["stride"], act=True)
                h, w, c = ho, wo, w_s.shape[1]
                cur4 = cur2.reshape(n, h, w, c)
            elif kind == "plain":
                w_e, b_e, w_p, b_p = [next(params) for _ in range(4)]
                hid, ho, wo = _conv3x3_bn(cur4, next(scratch), w_e, b_e,
                                          st["stride"], act=True)
                y2 = _conv1x1_bn(hid, w_p, b_p, act=False)
                if st["identity"]:           # stride == 1 and Cin == Cout
                    y2 = y2 + cur2
                h, w, c = ho, wo, w_p.shape[1]
                cur2 = y2
                cur4 = y2.reshape(n, h, w, c)
            elif kind == "se":
                (w_e, b_e, w_dw, b_dw, w_se1, b_se1, w_se2, b_se2,
                 w_p, b_p) = [next(params) for _ in range(10)]
                chid = w_e.shape[1]
                hid = _conv1x1_bn(cur2, w_e, b_e, act=True)     # (M, Chid)
                hid4 = hid.reshape(n, h, w, chid)
                d4, ho, wo = _dwconv3x3_bn_silu(hid4, next(scratch),
                                                w_dw, b_dw, st["stride"])
                # Squeeze-and-excite: XLU mean + broadcast gate (no constant matmuls).
                pooled = jnp.mean(d4.reshape(n, ho * wo, chid), axis=1)  # (N, Chid)
                g = _silu(jnp.dot(pooled.astype(jnp.bfloat16), w_se1[...],
                                  preferred_element_type=jnp.float32) + b_se1[...])
                g = jax.nn.sigmoid(jnp.dot(g.astype(jnp.bfloat16), w_se2[...],
                                           preferred_element_type=jnp.float32)
                                   + b_se2[...])                          # (N, Chid)
                d4 = d4 * g.reshape(n, 1, 1, chid)
                y2 = _conv1x1_bn(d4.reshape(n * ho * wo, chid), w_p, b_p,
                                 act=False)
                if st["identity"]:           # stride == 1 and Cin == Cout
                    y2 = y2 + cur2
                h, w, c = ho, wo, w_p.shape[1]
                cur2 = y2
                cur4 = y2.reshape(n, h, w, c)
            else:  # head: conv1x1 + BN + SiLU -> global avg-pool -> classifier
                w_h, b_h, w_cls, b_cls = [next(params) for _ in range(4)]
                hh = _conv1x1_bn(cur2, w_h, b_h, act=True)      # (M, Chead)
                pooled = jnp.mean(hh.reshape(n, h * w, w_h.shape[1]), axis=1)
                o_ref[...] = (jnp.dot(pooled, w_cls[...],
                                      preferred_element_type=jnp.float32)
                              + b_cls[...])

    return kernel


# --------------------------------- forward wrapper ---------------------------------

def effnetv2_forward(params, x_nchw):
    x = jnp.transpose(x_nchw, (0, 2, 3, 1)).astype(jnp.float32)  # NCHW -> NHWC
    n, h, w, c = x.shape

    flat = [x]
    scratch_shapes = []
    stages = []

    stem = params["stem"]
    flat += [stem["w"], stem["b"]]
    scratch_shapes.append(pltpu.VMEM((n, h + 2, w + 2, c), jnp.float32))
    stages.append({"kind": "stem", "stride": 2})
    h, w = (h - 1) // 2 + 1, (w - 1) // 2 + 1
    c = stem["w"].shape[1]

    for blk in params["blocks"]:
        stride = blk["stride"]
        if blk["type"] == "plain":
            flat += [blk["w_exp"], blk["b_exp"], blk["w_proj"], blk["b_proj"]]
            scratch_shapes.append(
                pltpu.VMEM((n, h + 2, w + 2, c), jnp.float32))
            stages.append({"kind": "plain", "stride": stride,
                           "identity": blk["identity"]})
        else:
            chid = blk["w_exp"].shape[1]
            flat += [blk["w_exp"], blk["b_exp"], blk["w_dw"], blk["b_dw"],
                     blk["w1"], blk["b1"], blk["w2"], blk["b2"],
                     blk["w_proj"], blk["b_proj"]]
            scratch_shapes.append(
                pltpu.VMEM((n, h + 2, w + 2, chid), jnp.float32))
            stages.append({"kind": "se", "stride": stride,
                           "identity": blk["identity"]})
        h, w = (h - 1) // stride + 1, (w - 1) // stride + 1
        c = blk["w_proj"].shape[1]

    head = params["head"]
    flat += [head["w"], head["b"], head["w_cls"], head["b_cls"]]
    stages.append({"kind": "head"})
    dim_out = head["w_cls"].shape[1]

    n_inputs = len(flat)
    kernel = _make_effnet_kernel(stages, n, n_inputs)
    return pl.pallas_call(
        kernel,
        out_shape=jax.ShapeDtypeStruct((n, dim_out), jnp.float32),
        in_specs=[_vmem_spec()] * n_inputs,
        out_specs=_vmem_spec(),
        scratch_shapes=scratch_shapes,
    )(*flat)


# --------------------------------- parameter init ---------------------------------

def init_effnetv2_params(key, cfgs, nb_channels_in=3, dim_output=1,
                         width_mult=1.0):
    keys = iter(jax.random.split(key, 64))
    # Eval-mode BN fold (gamma=1, beta=0, mean=0, var=1 from _initialize_weights):
    # the per-channel scale folds into the conv weight, the bias is zero.
    bn_scale = 1.0 / math.sqrt(1.0 + BN_EPS)

    def conv3x3_w(cin, cout):                    # (9*Cin, Cout) bf16, BN folded
        nfan = 3 * 3 * cout
        w = math.sqrt(2.0 / nfan) * jax.random.normal(
            next(keys), (3, 3, cin, cout), jnp.float32)
        return (w * bn_scale).reshape(9 * cin, cout).astype(jnp.bfloat16)

    def conv1x1_w(cin, cout):                    # (Cin, Cout) bf16, BN folded
        nfan = cout
        w = math.sqrt(2.0 / nfan) * jax.random.normal(
            next(keys), (cin, cout), jnp.float32)
        return (w * bn_scale).astype(jnp.bfloat16)

    def dw3x3_w(cc):                             # (9, C) f32 (VPU path), BN folded
        nfan = 3 * 3 * cc
        w = math.sqrt(2.0 / nfan) * jax.random.normal(
            next(keys), (3, 3, cc), jnp.float32)
        return (w * bn_scale).reshape(9, cc)

    def zeros_row(cc):
        return jnp.zeros((1, cc), jnp.float32)

    def linear_wb(cin, cout, bf16=True):
        w = 0.001 * jax.random.normal(next(keys), (cin, cout), jnp.float32)
        b = jnp.zeros((1, cout), jnp.float32)
        return (w.astype(jnp.bfloat16) if bf16 else w), b

    params = {}
    input_channel = _make_divisible(24 * width_mult, 8)
    params["stem"] = {"w": conv3x3_w(nb_channels_in, input_channel),
                      "b": zeros_row(input_channel)}

    blocks = []
    for t, cch, nrep, s_, use_se in cfgs:
        output_channel = _make_divisible(cch * width_mult, 8)
        for i in range(nrep):
            stride = s_ if i == 0 else 1
            hidden_dim = round(input_channel * t)
            blk = {"stride": stride,
                   "identity": stride == 1 and input_channel == output_channel}
            if use_se:
                blk["type"] = "se"
                blk["w_exp"] = conv1x1_w(input_channel, hidden_dim)
                blk["b_exp"] = zeros_row(hidden_dim)
                blk["w_dw"] = dw3x3_w(hidden_dim)
                blk["b_dw"] = zeros_row(hidden_dim)
                se_hid = _make_divisible(input_channel // 4, 8)
                blk["w1"], blk["b1"] = linear_wb(hidden_dim, se_hid)
                blk["w2"], blk["b2"] = linear_wb(se_hid, hidden_dim)
                blk["w_proj"] = conv1x1_w(hidden_dim, output_channel)
                blk["b_proj"] = zeros_row(output_channel)
            else:
                blk["type"] = "plain"
                blk["w_exp"] = conv3x3_w(input_channel, hidden_dim)
                blk["b_exp"] = zeros_row(hidden_dim)
                blk["w_proj"] = conv1x1_w(hidden_dim, output_channel)
                blk["b_proj"] = zeros_row(output_channel)
            blocks.append(blk)
            input_channel = output_channel
    params["blocks"] = blocks

    head_channel = (_make_divisible(1792 * width_mult, 8)
                    if width_mult > 1.0 else 1792)
    wc, bc = linear_wb(head_channel, dim_output, bf16=False)
    params["head"] = {"w": conv1x1_w(input_channel, head_channel),
                      "b": zeros_row(head_channel), "w_cls": wc, "b_cls": bc}
    return params


if __name__ == "__main__":
    key = jax.random.PRNGKey(0)
    pkey, xkey = jax.random.split(key)

    # (expand_ratio t, channels c, repeats n, stride s, use_se) -- tiny config
    # exercising both MBConv variants (plain and SE-gated depthwise).
    cfgs = [
        [1, 24, 1, 1, 0],
        [2, 32, 1, 2, 1],
    ]
    params = init_effnetv2_params(pkey, cfgs, nb_channels_in=4, dim_output=1,
                                  width_mult=1.0)

    x = jax.random.normal(xkey, (2, 4, 16, 16), jnp.float32)  # NCHW input
    fwd = jax.jit(lambda inp: effnetv2_forward(params, inp))
    out = fwd(x)
    jax.block_until_ready(out)
    assert out.shape == (2, 1) and out.dtype == jnp.float32
    print("KERNEL_OK")
</pallas_src>

<mosaic_0001>
module attributes {stable_mosaic.version = 11 : i64} {
  func.func @kernel(%arg0: memref<2x16x16x4xf32, #tpu.memory_space<vmem>>, %arg1: memref<36x24xbf16, #tpu.memory_space<vmem>>, %arg2: memref<1x24xf32, #tpu.memory_space<vmem>>, %arg3: memref<216x24xbf16, #tpu.memory_space<vmem>>, %arg4: memref<1x24xf32, #tpu.memory_space<vmem>>, %arg5: memref<24x24xbf16, #tpu.memory_space<vmem>>, %arg6: memref<1x24xf32, #tpu.memory_space<vmem>>, %arg7: memref<24x48xbf16, #tpu.memory_space<vmem>>, %arg8: memref<1x48xf32, #tpu.memory_space<vmem>>, %arg9: memref<9x48xf32, #tpu.memory_space<vmem>>, %arg10: memref<1x48xf32, #tpu.memory_space<vmem>>, %arg11: memref<48x8xbf16, #tpu.memory_space<vmem>>, %arg12: memref<1x8xf32, #tpu.memory_space<vmem>>, %arg13: memref<8x48xbf16, #tpu.memory_space<vmem>>, %arg14: memref<1x48xf32, #tpu.memory_space<vmem>>, %arg15: memref<48x32xbf16, #tpu.memory_space<vmem>>, %arg16: memref<1x32xf32, #tpu.memory_space<vmem>>, %arg17: memref<32x1792xbf16, #tpu.memory_space<vmem>>, %arg18: memref<1x1792xf32, #tpu.memory_space<vmem>>, %arg19: memref<1792x1xf32, #tpu.memory_space<vmem>>, %arg20: memref<1x1xf32, #tpu.memory_space<vmem>>, %arg21: memref<2x1xf32, #tpu.memory_space<vmem>>, %arg22: memref<2x18x18x4xf32, #tpu.memory_space<vmem>>, %arg23: memref<2x10x10x24xf32, #tpu.memory_space<vmem>>, %arg24: memref<2x10x10x48xf32, #tpu.memory_space<vmem>>) attributes {dimension_semantics = [], scalar_prefetch = 0 : i64, scratch_operands = 3 : i64, tpu.core_type = #tpu.core_type<tc>} {
    %c0 = arith.constant 0 : index
    %c0_0 = arith.constant 0 : index
    %c0_1 = arith.constant 0 : index
    %c0_2 = arith.constant 0 : index
    %0 = vector.load %arg0[%c0, %c0_0, %c0_1, %c0_2] : memref<2x16x16x4xf32, #tpu.memory_space<vmem>>, vector<2x16x16x4xf32>
    %cst = arith.constant 0.000000e+00 : f32
    %1 = vector.broadcast %cst : f32 to vector<2x1x18x4xf32>
    %cst_3 = arith.constant 0.000000e+00 : f32
    %2 = vector.broadcast %cst_3 : f32 to vector<2x16x1x4xf32>
    %c0_4 = arith.constant 0 : index
    %c0_5 = arith.constant 0 : index
    %c0_6 = arith.constant 0 : index
    %c0_7 = arith.constant 0 : index
    %3 = vector.load %arg22[%c0_4, %c0_5, %c0_6, %c0_7] : memref<2x18x18x4xf32, #tpu.memory_space<vmem>>, vector<2x1x18x4xf32>
    tpu.vector_store %arg22[%c0_4, %c0_5, %c0_6, %c0_7], %1 {strides = array<i32>} : memref<2x18x18x4xf32, #tpu.memory_space<vmem>>, vector<2x1x18x4xf32>,
    %c0_8 = arith.constant 0 : index
    %c17 = arith.constant 17 : index
    %c0_9 = arith.constant 0 : index
    %c0_10 = arith.constant 0 : index
    %4 = vector.load %arg22[%c0_8, %c17, %c0_9, %c0_10] : memref<2x18x18x4xf32, #tpu.memory_space<vmem>>, vector<2x1x18x4xf32>
    tpu.vector_store %arg22[%c0_8, %c17, %c0_9, %c0_10], %1 {strides = array<i32>} : memref<2x18x18x4xf32, #tpu.memory_space<vmem>>, vector<2x1x18x4xf32>,
    %c0_11 = arith.constant 0 : index
    %c1 = arith.constant 1 : index
    %c0_12 = arith.constant 0 : index
    %c0_13 = arith.constant 0 : index
    %5 = vector.load %arg22[%c0_11, %c1, %c0_12, %c0_13] : memref<2x18x18x4xf32, #tpu.memory_space<vmem>>, vector<2x16x1x4xf32>
    tpu.vector_store %arg22[%c0_11, %c1, %c0_12, %c0_13], %2 {strides = array<i32>} : memref<2x18x18x4xf32, #tpu.memory_space<vmem>>, vector<2x16x1x4xf32>,
    %c0_14 = arith.constant 0 : index
    %c1_15 = arith.constant 1 : index
    %c17_16 = arith.constant 17 : index
    %c0_17 = arith.constant 0 : index
    %6 = vector.load %arg22[%c0_14, %c1_15, %c17_16, %c0_17] : memref<2x18x18x4xf32, #tpu.memory_space<vmem>>, vector<2x16x1x4xf32>
    tpu.vector_store %arg22[%c0_14, %c1_15, %c17_16, %c0_17], %2 {strides = array<i32>} : memref<2x18x18x4xf32, #tpu.memory_space<vmem>>, vector<2x16x1x4xf32>,
    %c0_18 = arith.constant 0 : index
    %c1_19 = arith.constant 1 : index
    %c1_20 = arith.constant 1 : index
    %c0_21 = arith.constant 0 : index
    %7 = vector.load %arg22[%c0_18, %c1_19, %c1_20, %c0_21] : memref<2x18x18x4xf32, #tpu.memory_space<vmem>>, vector<2x16x16x4xf32>
    tpu.vector_store %arg22[%c0_18, %c1_19, %c1_20, %c0_21], %0 {strides = array<i32>} : memref<2x18x18x4xf32, #tpu.memory_space<vmem>>, vector<2x16x16x4xf32>,
    %c0_22 = arith.constant 0 : index
    %c0_23 = arith.constant 0 : index
    %c0_24 = arith.constant 0 : index
    %c0_25 = arith.constant 0 : index
    %8 = tpu.strided_load %arg22[%c0_22, %c0_23, %c0_24, %c0_25] {strides = array<i32: 1, 2, 2, 1>} : memref<2x18x18x4xf32, #tpu.memory_space<vmem>>, vector<2x8x8x4xf32>
    %9 = vector.shape_cast %8 : vector<2x8x8x4xf32> to vector<128x4xf32>
    %c0_26 = arith.constant 0 : index
    %c0_27 = arith.constant 0 : index
    %c1_28 = arith.constant 1 : index
    %c0_29 = arith.constant 0 : index
    %10 = tpu.strided_load %arg22[%c0_26, %c0_27, %c1_28, %c0_29] {strides = array<i32: 1, 2, 2, 1>} : memref<2x18x18x4xf32, #tpu.memory_space<vmem>>, vector<2x8x8x4xf32>
    %11 = vector.shape_cast %10 : vector<2x8x8x4xf32> to vector<128x4xf32>
    %c0_30 = arith.constant 0 : index
    %c0_31 = arith.constant 0 : index
    %c2 = arith.constant 2 : index
    %c0_32 = arith.constant 0 : index
    %12 = tpu.strided_load %arg22[%c0_30, %c0_31, %c2, %c0_32] {strides = array<i32: 1, 2, 2, 1>} : memref<2x18x18x4xf32, #tpu.memory_space<vmem>>, vector<2x8x8x4xf32>
    %13 = vector.shape_cast %12 : vector<2x8x8x4xf32> to vector<128x4xf32>
    %c0_33 = arith.constant 0 : index
    %c1_34 = arith.constant 1 : index
    %c0_35 = arith.constant 0 : index
    %c0_36 = arith.constant 0 : index
    %14 = tpu.strided_load %arg22[%c0_33, %c1_34, %c0_35, %c0_36] {strides = array<i32: 1, 2, 2, 1>} : memref<2x18x18x4xf32, #tpu.memory_space<vmem>>, vector<2x8x8x4xf32>
    %15 = vector.shape_cast %14 : vector<2x8x8x4xf32> to vector<128x4xf32>
    %c0_37 = arith.constant 0 : index
    %c1_38 = arith.constant 1 : index
    %c1_39 = arith.constant 1 : index
    %c0_40 = arith.constant 0 : index
    %16 = tpu.strided_load %arg22[%c0_37, %c1_38, %c1_39, %c0_40] {strides = array<i32: 1, 2, 2, 1>} : memref<2x18x18x4xf32, #tpu.memory_space<vmem>>, vector<2x8x8x4xf32>
    %17 = vector.shape_cast %16 : vector<2x8x8x4xf32> to vector<128x4xf32>
    %c0_41 = arith.constant 0 : index
    %c1_42 = arith.constant 1 : index
    %c2_43 = arith.constant 2 : index
    %c0_44 = arith.constant 0 : index
    %18 = tpu.strided_load %arg22[%c0_41, %c1_42, %c2_43, %c0_44] {strides = array<i32: 1, 2, 2, 1>} : memref<2x18x18x4xf32, #tpu.memory_space<vmem>>, vector<2x8x8x4xf32>
    %19 = vector.shape_cast %18 : vector<2x8x8x4xf32> to vector<128x4xf32>
    %c0_45 = arith.constant 0 : index
    %c2_46 = arith.constant 2 : index
    %c0_47 = arith.constant 0 : index
    %c0_48 = arith.constant 0 : index
    %20 = tpu.strided_load %arg22[%c0_45, %c2_46, %c0_47, %c0_48] {strides = array<i32: 1, 2, 2, 1>} : memref<2x18x18x4xf32, #tpu.memory_space<vmem>>, vector<2x8x8x4xf32>
    %21 = vector.shape_cast %20 : vector<2x8x8x4xf32> to vector<128x4xf32>
    %c0_49 = arith.constant 0 : index
    %c2_50 = arith.constant 2 : index
    %c1_51 = arith.constant 1 : index
    %c0_52 = arith.constant 0 : index
    %22 = tpu.strided_load %arg22[%c0_49, %c2_50, %c1_51, %c0_52] {strides = array<i32: 1, 2, 2, 1>} : memref<2x18x18x4xf32, #tpu.memory_space<vmem>>, vector<2x8x8x4xf32>
    %23 = vector.shape_cast %22 : vector<2x8x8x4xf32> to vector<128x4xf32>
    %c0_53 = arith.constant 0 : index
    %c2_54 = arith.constant 2 : index
    %c2_55 = arith.constant 2 : index
    %c0_56 = arith.constant 0 : index
    %24 = tpu.strided_load %arg22[%c0_53, %c2_54, %c2_55, %c0_56] {strides = array<i32: 1, 2, 2, 1>} : memref<2x18x18x4xf32, #tpu.memory_space<vmem>>, vector<2x8x8x4xf32>
    %25 = vector.shape_cast %24 : vector<2x8x8x4xf32> to vector<128x4xf32>
    %26 = tpu.concatenate %9, %11, %13, %15, %17, %19, %21, %23, %25 in 1 : vector<128x4xf32>, vector<128x4xf32>, vector<128x4xf32>, vector<128x4xf32>, vector<128x4xf32>, vector<128x4xf32>, vector<128x4xf32>, vector<128x4xf32>, vector<128x4xf32> -> vector<128x36xf32>
    %27 = arith.truncf %26 : vector<128x36xf32> to vector<128x36xbf16>
    %c0_57 = arith.constant 0 : index
    %c0_58 = arith.constant 0 : index
    %28 = vector.load %arg1[%c0_57, %c0_58] : memref<36x24xbf16, #tpu.memory_space<vmem>>, vector<36x24xbf16>
    %cst_59 = arith.constant dense<0.000000e+00> : vector<128x24xf32>
    %29 = tpu.matmul %27, %28, %cst_59 {dimension_numbers = #tpu.dot_dimension_numbers<[1], [0], [0], [1], [0, 0, 1, 1], [], []>} : vector<128x36xbf16>, vector<36x24xbf16>, vector<128x24xf32> -> vector<128x24xf32>
    %c0_60 = arith.constant 0 : index
    %c0_61 = arith.constant 0 : index
    %30 = vector.load %arg2[%c0_60, %c0_61] : memref<1x24xf32, #tpu.memory_space<vmem>>, vector<1x24xf32>
    %31 = vector.broadcast %30 : vector<1x24xf32> to vector<128x24xf32>
    %32 = arith.addf %29, %31 : vector<128x24xf32>
    %33 = arith.negf %32 : vector<128x24xf32>
    %34 = math.exp %33 : vector<128x24xf32>
    %cst_62 = arith.constant 1.000000e+00 : f32
    %35 = vector.broadcast %cst_62 : f32 to vector<128x24xf32>
    %36 = arith.addf %35, %34 : vector<128x24xf32>
    %37 = arith.divf %35, %36 : vector<128x24xf32>
    %38 = arith.mulf %32, %37 : vector<128x24xf32>
    %39 = vector.shape_cast %38 : vector<128x24xf32> to vector<2x8x8x24xf32>
    %cst_63 = arith.constant 0.000000e+00 : f32
    %40 = vector.broadcast %cst_63 : f32 to vector<2x1x10x24xf32>
    %cst_64 = arith.constant 0.000000e+00 : f32
    %41 = vector.broadcast %cst_64 : f32 to vector<2x8x1x24xf32>
    %c0_65 = arith.constant 0 : index
    %c0_66 = arith.constant 0 : index
    %c0_67 = arith.constant 0 : index
    %c0_68 = arith.constant 0 : index
    %42 = vector.load %arg23[%c0_65, %c0_66, %c0_67, %c0_68] : memref<2x10x10x24xf32, #tpu.memory_space<vmem>>, vector<2x1x10x24xf32>
    tpu.vector_store %arg23[%c0_65, %c0_66, %c0_67, %c0_68], %40 {strides = array<i32>} : memref<2x10x10x24xf32, #tpu.memory_space<vmem>>, vector<2x1x10x24xf32>,
    %c0_69 = arith.constant 0 : index
    %c9 = arith.constant 9 : index
    %c0_70 = arith.constant 0 : index
    %c0_71 = arith.constant 0 : index
    %43 = vector.load %arg23[%c0_69, %c9, %c0_70, %c0_71] : memref<2x10x10x24xf32, #tpu.memory_space<vmem>>, vector<2x1x10x24xf32>
    tpu.vector_store %arg23[%c0_69, %c9, %c0_70, %c0_71], %40 {strides = array<i32>} : memref<2x10x10x24xf32, #tpu.memory_space<vmem>>, vector<2x1x10x24xf32>,
    %c0_72 = arith.constant 0 : index
    %c1_73 = arith.constant 1 : index
    %c0_74 = arith.constant 0 : index
    %c0_75 = arith.constant 0 : index
    %44 = vector.load %arg23[%c0_72, %c1_73, %c0_74, %c0_75] : memref<2x10x10x24xf32, #tpu.memory_space<vmem>>, vector<2x8x1x24xf32>
    tpu.vector_store %arg23[%c0_72, %c1_73, %c0_74, %c0_75], %41 {strides = array<i32>} : memref<2x10x10x24xf32, #tpu.memory_space<vmem>>, vector<2x8x1x24xf32>,
    %c0_76 = arith.constant 0 : index
    %c1_77 = arith.constant 1 : index
    %c9_78 = arith.constant 9 : index
    %c0_79 = arith.constant 0 : index
    %45 = vector.load %arg23[%c0_76, %c1_77, %c9_78, %c0_79] : memref<2x10x10x24xf32, #tpu.memory_space<vmem>>, vector<2x8x1x24xf32>
    tpu.vector_store %arg23[%c0_76, %c1_77, %c9_78, %c0_79], %41 {strides = array<i32>} : memref<2x10x10x24xf32, #tpu.memory_space<vmem>>, vector<2x8x1x24xf32>,
    %c0_80 = arith.constant 0 : index
    %c1_81 = arith.constant 1 : index
    %c1_82 = arith.constant 1 : index
    %c0_83 = arith.constant 0 : index
    %46 = vector.load %arg23[%c0_80, %c1_81, %c1_82, %c0_83] : memref<2x10x10x24xf32, #tpu.memory_space<vmem>>, vector<2x8x8x24xf32>
    tpu.vector_store %arg23[%c0_80, %c1_81, %c1_82, %c0_83], %39 {strides = array<i32>} : memref<2x10x10x24xf32, #tpu.memory_space<vmem>>, vector<2x8x8x24xf32>,
    %c0_84 = arith.constant 0 : index
    %c0_85 = arith.constant 0 : index
    %c0_86 = arith.constant 0 : index
    %c0_87 = arith.constant 0 : index
    %47 = vector.load %arg23[%c0_84, %c0_85, %c0_86, %c0_87] : memref<2x10x10x24xf32, #tpu.memory_space<vmem>>, vector<2x8x8x24xf32>
    %48 = vector.shape_cast %47 : vector<2x8x8x24xf32> to vector<128x24xf32>
    %c0_88 = arith.constant 0 : index
    %c0_89 = arith.constant 0 : index
    %c1_90 = arith.constant 1 : index
    %c0_91 = arith.constant 0 : index
    %49 = vector.load %arg23[%c0_88, %c0_89, %c1_90, %c0_91] : memref<2x10x10x24xf32, #tpu.memory_space<vmem>>, vector<2x8x8x24xf32>
    %50 = vector.shape_cast %49 : vector<2x8x8x24xf32> to vector<128x24xf32>
    %c0_92 = arith.constant 0 : index
    %c0_93 = arith.constant 0 : index
    %c2_94 = arith.constant 2 : index
    %c0_95 = arith.constant 0 : index
    %51 = vector.load %arg23[%c0_92, %c0_93, %c2_94, %c0_95] : memref<2x10x10x24xf32, #tpu.memory_space<vmem>>, vector<2x8x8x24xf32>
    %52 = vector.shape_cast %51 : vector<2x8x8x24xf32> to vector<128x24xf32>
    %c0_96 = arith.constant 0 : index
    %c1_97 = arith.constant 1 : index
    %c0_98 = arith.constant 0 : index
    %c0_99 = arith.constant 0 : index
    %53 = vector.load %arg23[%c0_96, %c1_97, %c0_98, %c0_99] : memref<2x10x10x24xf32, #tpu.memory_space<vmem>>, vector<2x8x8x24xf32>
    %54 = vector.shape_cast %53 : vector<2x8x8x24xf32> to vector<128x24xf32>
    %c0_100 = arith.constant 0 : index
    %c1_101 = arith.constant 1 : index
    %c1_102 = arith.constant 1 : index
    %c0_103 = arith.constant 0 : index
    %55 = vector.load %arg23[%c0_100, %c1_101, %c1_102, %c0_103] : memref<2x10x10x24xf32, #tpu.memory_space<vmem>>, vector<2x8x8x24xf32>
    %56 = vector.shape_cast %55 : vector<2x8x8x24xf32> to vector<128x24xf32>
    %c0_104 = arith.constant 0 : index
    %c1_105 = arith.constant 1 : index
    %c2_106 = arith.constant 2 : index
    %c0_107 = arith.constant 0 : index
    %57 = vector.load %arg23[%c0_104, %c1_105, %c2_106, %c0_107] : memref<2x10x10x24xf32, #tpu.memory_space<vmem>>, vector<2x8x8x24xf32>
    %58 = vector.shape_cast %57 : vector<2x8x8x24xf32> to vector<128x24xf32>
    %c0_108 = arith.constant 0 : index
    %c2_109 = arith.constant 2 : index
    %c0_110 = arith.constant 0 : index
    %c0_111 = arith.constant 0 : index
    %59 = vector.load %arg23[%c0_108, %c2_109, %c0_110, %c0_111] : memref<2x10x10x24xf32, #tpu.memory_space<vmem>>, vector<2x8x8x24xf32>
    %60 = vector.shape_cast %59 : vector<2x8x8x24xf32> to vector<128x24xf32>
    %c0_112 = arith.constant 0 : index
    %c2_113 = arith.constant 2 : index
    %c1_114 = arith.constant 1 : index
    %c0_115 = arith.constant 0 : index
    %61 = vector.load %arg23[%c0_112, %c2_113, %c1_114, %c0_115] : memref<2x10x10x24xf32, #tpu.memory_space<vmem>>, vector<2x8x8x24xf32>
    %62 = vector.shape_cast %61 : vector<2x8x8x24xf32> to vector<128x24xf32>
    %c0_116 = arith.constant 0 : index
    %c2_117 = arith.constant 2 : index
    %c2_118 = arith.constant 2 : index
    %c0_119 = arith.constant 0 : index
    %63 = vector.load %arg23[%c0_116, %c2_117, %c2_118, %c0_119] : memref<2x10x10x24xf32, #tpu.memory_space<vmem>>, vector<2x8x8x24xf32>
    %64 = vector.shape_cast %63 : vector<2x8x8x24xf32> to vector<128x24xf32>
    %65 = tpu.concatenate %48, %50, %52, %54, %56, %58, %60, %62, %64 in 1 : vector<128x24xf32>, vector<128x24xf32>, vector<128x24xf32>, vector<128x24xf32>, vector<128x24xf32>, vector<128x24xf32>, vector<128x24xf32>, vector<128x24xf32>, vector<128x24xf32> -> vector<128x216xf32>
    %66 = arith.truncf %65 : vector<128x216xf32> to vector<128x216xbf16>
    %c0_120 = arith.constant 0 : index
    %c0_121 = arith.constant 0 : index
    %67 = vector.load %arg3[%c0_120, %c0_121] : memref<216x24xbf16, #tpu.memory_space<vmem>>, vector<216x24xbf16>
    %cst_122 = arith.constant dense<0.000000e+00> : vector<128x24xf32>
    %68 = tpu.matmul %66, %67, %cst_122 {dimension_numbers = #tpu.dot_dimension_numbers<[1], [0], [0], [1], [0, 0, 1, 1], [], []>} : vector<128x216xbf16>, vector<216x24xbf16>, vector<128x24xf32> -> vector<128x24xf32>
    %c0_123 = arith.constant 0 : index
    %c0_124 = arith.constant 0 : index
    %69 = vector.load %arg4[%c0_123, %c0_124] : memref<1x24xf32, #tpu.memory_space<vmem>>, vector<1x24xf32>
    %70 = vector.broadcast %69 : vector<1x24xf32> to vector<128x24xf32>
    %71 = arith.addf %68, %70 : vector<128x24xf32>
    %72 = arith.negf %71 : vector<128x24xf32>
    %73 = math.exp %72 : vector<128x24xf32>
    %cst_125 = arith.constant 1.000000e+00 : f32
    %74 = vector.broadcast %cst_125 : f32 to vector<128x24xf32>
    %75 = arith.addf %74, %73 : vector<128x24xf32>
    %76 = arith.divf %74, %75 : vector<128x24xf32>
    %77 = arith.mulf %71, %76 : vector<128x24xf32>
    %78 = arith.truncf %77 : vector<128x24xf32> to vector<128x24xbf16>
    %c0_126 = arith.constant 0 : index
    %c0_127 = arith.constant 0 : index
    %79 = vector.load %arg5[%c0_126, %c0_127] : memref<24x24xbf16, #tpu.memory_space<vmem>>, vector<24x24xbf16>
    %cst_128 = arith.constant dense<0.000000e+00> : vector<128x24xf32>
    %80 = tpu.matmul %78, %79, %cst_128 {dimension_numbers = #tpu.dot_dimension_numbers<[1], [0], [0], [1], [0, 0, 1, 1], [], []>} : vector<128x24xbf16>, vector<24x24xbf16>, vector<128x24xf32> -> vector<128x24xf32>
    %c0_129 = arith.constant 0 : index
    %c0_130 = arith.constant 0 : index
    %81 = vector.load %arg6[%c0_129, %c0_130] : memref<1x24xf32, #tpu.memory_space<vmem>>, vector<1x24xf32>
    %82 = vector.broadcast %81 : vector<1x24xf32> to vector<128x24xf32>
    %83 = arith.addf %80, %82 : vector<128x24xf32>
    %84 = arith.addf %83, %38 : vector<128x24xf32>
    %85 = arith.truncf %84 : vector<128x24xf32> to vector<128x24xbf16>
    %c0_131 = arith.constant 0 : index
    %c0_132 = arith.constant 0 : index
    %86 = vector.load %arg7[%c0_131, %c0_132] : memref<24x48xbf16, #tpu.memory_space<vmem>>, vector<24x48xbf16>
    %cst_133 = arith.constant dense<0.000000e+00> : vector<128x48xf32>
    %87 = tpu.matmul %85, %86, %cst_133 {dimension_numbers = #tpu.dot_dimension_numbers<[1], [0], [0], [1], [0, 0, 1, 1], [], []>} : vector<128x24xbf16>, vector<24x48xbf16>, vector<128x48xf32> -> vector<128x48xf32>
    %c0_134 = arith.constant 0 : index
    %c0_135 = arith.constant 0 : index
    %88 = vector.load %arg8[%c0_134, %c0_135] : memref<1x48xf32, #tpu.memory_space<vmem>>, vector<1x48xf32>
    %89 = vector.broadcast %88 : vector<1x48xf32> to vector<128x48xf32>
    %90 = arith.addf %87, %89 : vector<128x48xf32>
    %91 = arith.negf %90 : vector<128x48xf32>
    %92 = math.exp %91 : vector<128x48xf32>
    %cst_136 = arith.constant 1.000000e+00 : f32
    %93 = vector.broadcast %cst_136 : f32 to vector<128x48xf32>
    %94 = arith.addf %93, %92 : vector<128x48xf32>
    %95 = arith.divf %93, %94 : vector<128x48xf32>
    %96 = arith.mulf %90, %95 : vector<128x48xf32>
    %97 = vector.shape_cast %96 : vector<128x48xf32> to vector<2x8x8x48xf32>
    %cst_137 = arith.constant 0.000000e+00 : f32
    %98 = vector.broadcast %cst_137 : f32 to vector<2x1x10x48xf32>
    %cst_138 = arith.constant 0.000000e+00 : f32
    %99 = vector.broadcast %cst_138 : f32 to vector<2x8x1x48xf32>
    %c0_139 = arith.constant 0 : index
    %c0_140 = arith.constant 0 : index
    %c0_141 = arith.constant 0 : index
    %c0_142 = arith.constant 0 : index
    %100 = vector.load %arg24[%c0_139, %c0_140, %c0_141, %c0_142] : memref<2x10x10x48xf32, #tpu.memory_space<vmem>>, vector<2x1x10x48xf32>
    tpu.vector_store %arg24[%c0_139, %c0_140, %c0_141, %c0_142], %98 {strides = array<i32>} : memref<2x10x10x48xf32, #tpu.memory_space<vmem>>, vector<2x1x10x48xf32>,
    %c0_143 = arith.constant 0 : index
    %c9_144 = arith.constant 9 : index
    %c0_145 = arith.constant 0 : index
    %c0_146 = arith.constant 0 : index
    %101 = vector.load %arg24[%c0_143, %c9_144, %c0_145, %c0_146] : memref<2x10x10x48xf32, #tpu.memory_space<vmem>>, vector<2x1x10x48xf32>
    tpu.vector_store %arg24[%c0_143, %c9_144, %c0_145, %c0_146], %98 {strides = array<i32>} : memref<2x10x10x48xf32, #tpu.memory_space<vmem>>, vector<2x1x10x48xf32>,
    %c0_147 = arith.constant 0 : index
    %c1_148 = arith.constant 1 : index
    %c0_149 = arith.constant 0 : index
    %c0_150 = arith.constant 0 : index
    %102 = vector.load %arg24[%c0_147, %c1_148, %c0_149, %c0_150] : memref<2x10x10x48xf32, #tpu.memory_space<vmem>>, vector<2x8x1x48xf32>
    tpu.vector_store %arg24[%c0_147, %c1_148, %c0_149, %c0_150], %99 {strides = array<i32>} : memref<2x10x10x48xf32, #tpu.memory_space<vmem>>, vector<2x8x1x48xf32>,
    %c0_151 = arith.constant 0 : index
    %c1_152 = arith.constant 1 : index
    %c9_153 = arith.constant 9 : index
    %c0_154 = arith.constant 0 : index
    %103 = vector.load %arg24[%c0_151, %c1_152, %c9_153, %c0_154] : memref<2x10x10x48xf32, #tpu.memory_space<vmem>>, vector<2x8x1x48xf32>
    tpu.vector_store %arg24[%c0_151, %c1_152, %c9_153, %c0_154], %99 {strides = array<i32>} : memref<2x10x10x48xf32, #tpu.memory_space<vmem>>, vector<2x8x1x48xf32>,
    %c0_155 = arith.constant 0 : index
    %c1_156 = arith.constant 1 : index
    %c1_157 = arith.constant 1 : index
    %c0_158 = arith.constant 0 : index
    %104 = vector.load %arg24[%c0_155, %c1_156, %c1_157, %c0_158] : memref<2x10x10x48xf32, #tpu.memory_space<vmem>>, vector<2x8x8x48xf32>
    tpu.vector_store %arg24[%c0_155, %c1_156, %c1_157, %c0_158], %97 {strides = array<i32>} : memref<2x10x10x48xf32, #tpu.memory_space<vmem>>, vector<2x8x8x48xf32>,
    %cst_159 = arith.constant 0.000000e+00 : f32
    %105 = vector.broadcast %cst_159 : f32 to vector<2x4x4x48xf32>
    %c0_160 = arith.constant 0 : index
    %c0_161 = arith.constant 0 : index
    %106 = vector.load %arg9[%c0_160, %c0_161] : memref<9x48xf32, #tpu.memory_space<vmem>>, vector<1x48xf32>
    %107 = vector.shape_cast %106 : vector<1x48xf32> to vector<1x1x1x48xf32>
    %c0_162 = arith.constant 0 : index
    %c0_163 = arith.constant 0 : index
    %c0_164 = arith.constant 0 : index
    %c0_165 = arith.constant 0 : index
    %108 = tpu.strided_load %arg24[%c0_162, %c0_163, %c0_164, %c0_165] {strides = array<i32: 1, 2, 2, 1>} : memref<2x10x10x48xf32, #tpu.memory_space<vmem>>, vector<2x4x4x48xf32>
    %109 = vector.broadcast %107 : vector<1x1x1x48xf32> to vector<2x4x4x48xf32>
    %110 = arith.mulf %108, %109 : vector<2x4x4x48xf32>
    %111 = arith.addf %105, %110 : vector<2x4x4x48xf32>
    %c1_166 = arith.constant 1 : index
    %c0_167 = arith.constant 0 : index
    %112 = vector.load %arg9[%c1_166, %c0_167] : memref<9x48xf32, #tpu.memory_space<vmem>>, vector<1x48xf32>
    %113 = vector.shape_cast %112 : vector<1x48xf32> to vector<1x1x1x48xf32>
    %c0_168 = arith.constant 0 : index
    %c0_169 = arith.constant 0 : index
    %c1_170 = arith.constant 1 : index
    %c0_171 = arith.constant 0 : index
    %114 = tpu.strided_load %arg24[%c0_168, %c0_169, %c1_170, %c0_171] {strides = array<i32: 1, 2, 2, 1>} : memref<2x10x10x48xf32, #tpu.memory_space<vmem>>, vector<2x4x4x48xf32>
    %115 = vector.broadcast %113 : vector<1x1x1x48xf32> to vector<2x4x4x48xf32>
    %116 = arith.mulf %114, %115 : vector<2x4x4x48xf32>
    %117 = arith.addf %111, %116 : vector<2x4x4x48xf32>
    %c2_172 = arith.constant 2 : index
    %c0_173 = arith.constant 0 : index
    %118 = vector.load %arg9[%c2_172, %c0_173] : memref<9x48xf32, #tpu.memory_space<vmem>>, vector<1x48xf32>
    %119 = vector.shape_cast %118 : vector<1x48xf32> to vector<1x1x1x48xf32>
    %c0_174 = arith.constant 0 : index
    %c0_175 = arith.constant 0 : index
    %c2_176 = arith.constant 2 : index
    %c0_177 = arith.constant 0 : index
    %120 = tpu.strided_load %arg24[%c0_174, %c0_175, %c2_176, %c0_177] {strides = array<i32: 1, 2, 2, 1>} : memref<2x10x10x48xf32, #tpu.memory_space<vmem>>, vector<2x4x4x48xf32>
    %121 = vector.broadcast %119 : vector<1x1x1x48xf32> to vector<2x4x4x48xf32>
    %122 = arith.mulf %120, %121 : vector<2x4x4x48xf32>
    %123 = arith.addf %117, %122 : vector<2x4x4x48xf32>
    %c3 = arith.constant 3 : index
    %c0_178 = arith.constant 0 : index
    %124 = vector.load %arg9[%c3, %c0_178] : memref<9x48xf32, #tpu.memory_space<vmem>>, vector<1x48xf32>
    %125 = vector.shape_cast %124 : vector<1x48xf32> to vector<1x1x1x48xf32>
    %c0_179 = arith.constant 0 : index
    %c1_180 = arith.constant 1 : index
    %c0_181 = arith.constant 0 : index
    %c0_182 = arith.constant 0 : index
    %126 = tpu.strided_load %arg24[%c0_179, %c1_180, %c0_181, %c0_182] {strides = array<i32: 1, 2, 2, 1>} : memref<2x10x10x48xf32, #tpu.memory_space<vmem>>, vector<2x4x4x48xf32>
    %127 = vector.broadcast %125 : vector<1x1x1x48xf32> to vector<2x4x4x48xf32>
    %128 = arith.mulf %126, %127 : vector<2x4x4x48xf32>
    %129 = arith.addf %123, %128 : vector<2x4x4x48xf32>
    %c4 = arith.constant 4 : index
    %c0_183 = arith.constant 0 : index
    %130 = vector.load %arg9[%c4, %c0_183] : memref<9x48xf32, #tpu.memory_space<vmem>>, vector<1x48xf32>
    %131 = vector.shape_cast %130 : vector<1x48xf32> to vector<1x1x1x48xf32>
    %c0_184 = arith.constant 0 : index
    %c1_185 = arith.constant 1 : index
    %c1_186 = arith.constant 1 : index
    %c0_187 = arith.constant 0 : index
    %132 = tpu.strided_load %arg24[%c0_184, %c1_185, %c1_186, %c0_187] {strides = array<i32: 1, 2, 2, 1>} : memref<2x10x10x48xf32, #tpu.memory_space<vmem>>, vector<2x4x4x48xf32>
    %133 = vector.broadcast %131 : vector<1x1x1x48xf32> to vector<2x4x4x48xf32>
    %134 = arith.mulf %132, %133 : vector<2x4x4x48xf32>
    %135 = arith.addf %129, %134 : vector<2x4x4x48xf32>
    %c5 = arith.constant 5 : index
    %c0_188 = arith.constant 0 : index
    %136 = vector.load %arg9[%c5, %c0_188] : memref<9x48xf32, #tpu.memory_space<vmem>>, vector<1x48xf32>
    %137 = vector.shape_cast %136 : vector<1x48xf32> to vector<1x1x1x48xf32>
    %c0_189 = arith.constant 0 : index
    %c1_190 = arith.constant 1 : index
    %c2_191 = arith.constant 2 : index
    %c0_192 = arith.constant 0 : index
    %138 = tpu.strided_load %arg24[%c0_189, %c1_190, %c2_191, %c0_192] {strides = array<i32: 1, 2, 2, 1>} : memref<2x10x10x48xf32, #tpu.memory_space<vmem>>, vector<2x4x4x48xf32>
    %139 = vector.broadcast %137 : vector<1x1x1x48xf32> to vector<2x4x4x48xf32>
    %140 = arith.mulf %138, %139 : vector<2x4x4x48xf32>
    %141 = arith.addf %135, %140 : vector<2x4x4x48xf32>
    %c6 = arith.constant 6 : index
    %c0_193 = arith.constant 0 : index
    %142 = vector.load %arg9[%c6, %c0_193] : memref<9x48xf32, #tpu.memory_space<vmem>>, vector<1x48xf32>
    %143 = vector.shape_cast %142 : vector<1x48xf32> to vector<1x1x1x48xf32>
    %c0_194 = arith.constant 0 : index
    %c2_195 = arith.constant 2 : index
    %c0_196 = arith.constant 0 : index
    %c0_197 = arith.constant 0 : index
    %144 = tpu.strided_load %arg24[%c0_194, %c2_195, %c0_196, %c0_197] {strides = array<i32: 1, 2, 2, 1>} : memref<2x10x10x48xf32, #tpu.memory_space<vmem>>, vector<2x4x4x48xf32>
    %145 = vector.broadcast %143 : vector<1x1x1x48xf32> to vector<2x4x4x48xf32>
    %146 = arith.mulf %144, %145 : vector<2x4x4x48xf32>
    %147 = arith.addf %141, %146 : vector<2x4x4x48xf32>
    %c7 = arith.constant 7 : index
    %c0_198 = arith.constant 0 : index
    %148 = vector.load %arg9[%c7, %c0_198] : memref<9x48xf32, #tpu.memory_space<vmem>>, vector<1x48xf32>
    %149 = vector.shape_cast %148 : vector<1x48xf32> to vector<1x1x1x48xf32>
    %c0_199 = arith.constant 0 : index
    %c2_200 = arith.constant 2 : index
    %c1_201 = arith.constant 1 : index
    %c0_202 = arith.constant 0 : index
    %150 = tpu.strided_load %arg24[%c0_199, %c2_200, %c1_201, %c0_202] {strides = array<i32: 1, 2, 2, 1>} : memref<2x10x10x48xf32, #tpu.memory_space<vmem>>, vector<2x4x4x48xf32>
    %151 = vector.broadcast %149 : vector<1x1x1x48xf32> to vector<2x4x4x48xf32>
    %152 = arith.mulf %150, %151 : vector<2x4x4x48xf32>
    %153 = arith.addf %147, %152 : vector<2x4x4x48xf32>
    %c8 = arith.constant 8 : index
    %c0_203 = arith.constant 0 : index
    %154 = vector.load %arg9[%c8, %c0_203] : memref<9x48xf32, #tpu.memory_space<vmem>>, vector<1x48xf32>
    %155 = vector.shape_cast %154 : vector<1x48xf32> to vector<1x1x1x48xf32>
    %c0_204 = arith.constant 0 : index
    %c2_205 = arith.constant 2 : index
    %c2_206 = arith.constant 2 : index
    %c0_207 = arith.constant 0 : index
    %156 = tpu.strided_load %arg24[%c0_204, %c2_205, %c2_206, %c0_207] {strides = array<i32: 1, 2, 2, 1>} : memref<2x10x10x48xf32, #tpu.memory_space<vmem>>, vector<2x4x4x48xf32>
    %157 = vector.broadcast %155 : vector<1x1x1x48xf32> to vector<2x4x4x48xf32>
    %158 = arith.mulf %156, %157 : vector<2x4x4x48xf32>
    %159 = arith.addf %153, %158 : vector<2x4x4x48xf32>
    %c0_208 = arith.constant 0 : index
    %c0_209 = arith.constant 0 : index
    %160 = vector.load %arg10[%c0_208, %c0_209] : memref<1x48xf32, #tpu.memory_space<vmem>>, vector<1x48xf32>
    %161 = vector.shape_cast %160 : vector<1x48xf32> to vector<1x1x1x48xf32>
    %162 = vector.broadcast %161 : vector<1x1x1x48xf32> to vector<2x4x4x48xf32>
    %163 = arith.addf %159, %162 : vector<2x4x4x48xf32>
    %164 = arith.negf %163 : vector<2x4x4x48xf32>
    %165 = math.exp %164 : vector<2x4x4x48xf32>
    %cst_210 = arith.constant 1.000000e+00 : f32
    %166 = vector.broadcast %cst_210 : f32 to vector<2x4x4x48xf32>
    %167 = arith.addf %166, %165 : vector<2x4x4x48xf32>
    %168 = arith.divf %166, %167 : vector<2x4x4x48xf32>
    %169 = arith.mulf %163, %168 : vector<2x4x4x48xf32>
    %170 = vector.shape_cast %169 : vector<2x4x4x48xf32> to vector<2x16x48xf32>
    %cst_211 = arith.constant dense<0.000000e+00> : vector<2x48xf32>
    %171 = vector.multi_reduction <add>, %170, %cst_211 [1] : vector<2x16x48xf32> to vector<2x48xf32>
    %cst_212 = arith.constant 1.600000e+01 : f32
    %172 = vector.broadcast %cst_212 : f32 to vector<2x48xf32>
    %173 = arith.divf %171, %172 : vector<2x48xf32>
    %174 = arith.truncf %173 : vector<2x48xf32> to vector<2x48xbf16>
    %c0_213 = arith.constant 0 : index
    %c0_214 = arith.constant 0 : index
    %175 = vector.load %arg11[%c0_213, %c0_214] : memref<48x8xbf16, #tpu.memory_space<vmem>>, vector<48x8xbf16>
    %cst_215 = arith.constant dense<0.000000e+00> : vector<2x8xf32>
    %176 = tpu.matmul %174, %175, %cst_215 {dimension_numbers = #tpu.dot_dimension_numbers<[1], [0], [0], [1], [0, 0, 1, 1], [], []>} : vector<2x48xbf16>, vector<48x8xbf16>, vector<2x8xf32> -> vector<2x8xf32>
    %c0_216 = arith.constant 0 : index
    %c0_217 = arith.constant 0 : index
    %177 = vector.load %arg12[%c0_216, %c0_217] : memref<1x8xf32, #tpu.memory_space<vmem>>, vector<1x8xf32>
    %178 = vector.broadcast %177 : vector<1x8xf32> to vector<2x8xf32>
    %179 = arith.addf %176, %178 : vector<2x8xf32>
    %180 = arith.negf %179 : vector<2x8xf32>
    %181 = math.exp %180 : vector<2x8xf32>
    %cst_218 = arith.constant 1.000000e+00 : f32
    %182 = vector.broadcast %cst_218 : f32 to vector<2x8xf32>
    %183 = arith.addf %182, %181 : vector<2x8xf32>
    %184 = arith.divf %182, %183 : vector<2x8xf32>
    %185 = arith.mulf %179, %184 : vector<2x8xf32>
    %186 = arith.truncf %185 : vector<2x8xf32> to vector<2x8xbf16>
    %c0_219 = arith.constant 0 : index
    %c0_220 = arith.constant 0 : index
    %187 = vector.load %arg13[%c0_219, %c0_220] : memref<8x48xbf16, #tpu.memory_space<vmem>>, vector<8x48xbf16>
    %cst_221 = arith.constant dense<0.000000e+00> : vector<2x48xf32>
    %188 = tpu.matmul %186, %187, %cst_221 {dimension_numbers = #tpu.dot_dimension_numbers<[1], [0], [0], [1], [0, 0, 1, 1], [], []>} : vector<2x8xbf16>, vector<8x48xbf16>, vector<2x48xf32> -> vector<2x48xf32>
    %c0_222 = arith.constant 0 : index
    %c0_223 = arith.constant 0 : index
    %189 = vector.load %arg14[%c0_222, %c0_223] : memref<1x48xf32, #tpu.memory_space<vmem>>, vector<1x48xf32>
    %190 = vector.broadcast %189 : vector<1x48xf32> to vector<2x48xf32>
    %191 = arith.addf %188, %190 : vector<2x48xf32>
    %192 = arith.negf %191 : vector<2x48xf32>
    %193 = math.exp %192 : vector<2x48xf32>
    %cst_224 = arith.constant 1.000000e+00 : f32
    %194 = vector.broadcast %cst_224 : f32 to vector<2x48xf32>
    %195 = arith.addf %194, %193 : vector<2x48xf32>
    %196 = arith.divf %194, %195 : vector<2x48xf32>
    %197 = vector.shape_cast %196 : vector<2x48xf32> to vector<2x1x1x48xf32>
    %198 = vector.broadcast %197 : vector<2x1x1x48xf32> to vector<2x4x4x48xf32>
    %199 = arith.mulf %169, %198 : vector<2x4x4x48xf32>
    %200 = vector.shape_cast %199 : vector<2x4x4x48xf32> to vector<32x48xf32>
    %201 = arith.truncf %200 : vector<32x48xf32> to vector<32x48xbf16>
    %c0_225 = arith.constant 0 : index
    %c0_226 = arith.constant 0 : index
    %202 = vector.load %arg15[%c0_225, %c0_226] : memref<48x32xbf16, #tpu.memory_space<vmem>>, vector<48x32xbf16>
    %cst_227 = arith.constant dense<0.000000e+00> : vector<32x32xf32>
    %203 = tpu.matmul %201, %202, %cst_227 {dimension_numbers = #tpu.dot_dimension_numbers<[1], [0], [0], [1], [0, 0, 1, 1], [], []>} : vector<32x48xbf16>, vector<48x32xbf16>, vector<32x32xf32> -> vector<32x32xf32>
    %c0_228 = arith.constant 0 : index
    %c0_229 = arith.constant 0 : index
    %204 = vector.load %arg16[%c0_228, %c0_229] : memref<1x32xf32, #tpu.memory_space<vmem>>, vector<1x32xf32>
    %205 = vector.broadcast %204 : vector<1x32xf32> to vector<32x32xf32>
    %206 = arith.addf %203, %205 : vector<32x32xf32>
    %207 = arith.truncf %206 : vector<32x32xf32> to vector<32x32xbf16>
    %c0_230 = arith.constant 0 : index
    %c0_231 = arith.constant 0 : index
    %208 = vector.load %arg17[%c0_230, %c0_231] : memref<32x1792xbf16, #tpu.memory_space<vmem>>, vector<32x1792xbf16>
    %cst_232 = arith.constant dense<0.000000e+00> : vector<32x1792xf32>
    %209 = tpu.matmul %207, %208, %cst_232 {dimension_numbers = #tpu.dot_dimension_numbers<[1], [0], [0], [1], [0, 0, 1, 1], [], []>} : vector<32x32xbf16>, vector<32x1792xbf16>, vector<32x1792xf32> -> vector<32x1792xf32>
    %c0_233 = arith.constant 0 : index
    %c0_234 = arith.constant 0 : index
    %210 = vector.load %arg18[%c0_233, %c0_234] : memref<1x1792xf32, #tpu.memory_space<vmem>>, vector<1x1792xf32>
    %211 = vector.broadcast %210 : vector<1x1792xf32> to vector<32x1792xf32>
    %212 = arith.addf %209, %211 : vector<32x1792xf32>
    %213 = arith.negf %212 : vector<32x1792xf32>
    %214 = math.exp %213 : vector<32x1792xf32>
    %cst_235 = arith.constant 1.000000e+00 : f32
    %215 = vector.broadcast %cst_235 : f32 to vector<32x1792xf32>
    %216 = arith.addf %215, %214 : vector<32x1792xf32>
    %217 = arith.divf %215, %216 : vector<32x1792xf32>
    %218 = arith.mulf %212, %217 : vector<32x1792xf32>
    %219 = vector.shape_cast %218 : vector<32x1792xf32> to vector<2x16x1792xf32>
    %cst_236 = arith.constant dense<0.000000e+00> : vector<2x1792xf32>
    %220 = vector.multi_reduction <add>, %219, %cst_236 [1] : vector<2x16x1792xf32> to vector<2x1792xf32>
    %cst_237 = arith.constant 1.600000e+01 : f32
    %221 = vector.broadcast %cst_237 : f32 to vector<2x1792xf32>
    %222 = arith.divf %220, %221 : vector<2x1792xf32>
    %c0_238 = arith.constant 0 : index
    %c0_239 = arith.constant 0 : index
    %223 = vector.load %arg19[%c0_238, %c0_239] : memref<1792x1xf32, #tpu.memory_space<vmem>>, vector<1792x1xf32>
    %cst_240 = arith.constant dense<0.000000e+00> : vector<2x1xf32>
    %224 = tpu.matmul %222, %223, %cst_240 {dimension_numbers = #tpu.dot_dimension_numbers<[1], [0], [0], [1], [0, 0, 1, 1], [], []>} : vector<2x1792xf32>, vector<1792x1xf32>, vector<2x1xf32> -> vector<2x1xf32>
    %c0_241 = arith.constant 0 : index
    %c0_242 = arith.constant 0 : index
    %225 = vector.load %arg20[%c0_241, %c0_242] : memref<1x1xf32, #tpu.memory_space<vmem>>, vector<1x1xf32>
    %226 = vector.broadcast %225 : vector<1x1xf32> to vector<2x1xf32>
    %227 = arith.addf %224, %226 : vector<2x1xf32>
    %c0_243 = arith.constant 0 : index
    %c0_244 = arith.constant 0 : index
    %228 = vector.load %arg21[%c0_243, %c0_244] : memref<2x1xf32, #tpu.memory_space<vmem>>, vector<2x1xf32>
    tpu.vector_store %arg21[%c0_243, %c0_244], %227 {strides = array<i32>} : memref<2x1xf32, #tpu.memory_space<vmem>>, vector<2x1xf32>,
    return
  }
}

</mosaic_0001>

<bundles_post_ra>
// kernel: _lambda_.1
= control target key start
LH: loop header
LB: loop body
LE: loop exit
PB: predicated region body
PF: predicated region fallthrough
CT: control target
= control target key end

     0   :  { %s10943_s0 = inlined_call_operand.vmem [shape: f32[2,16,16,4], index: 0, kind: input, shape index: {}]   ;;  %s10944_s1 = inlined_call_operand.vmem [shape: bf16[36,24], index: 1, kind: input, shape index: {}]   ;;  %s10945_s2 = inlined_call_operand.vmem [shape: f32[1,24], index: 2, kind: input, shape index: {}, may-alias: {2,4,6}]   ;;  %s10946_s3 = inlined_call_operand.vmem [shape: bf16[216,24], index: 3, kind: input, shape index: {}]   ;;  %s10947_s4 = inlined_call_operand.vmem [shape: f32[1,24], index: 4, kind: input, shape index: {}, may-alias: {2,4,6}]   ;;  %s10948_s5 = inlined_call_operand.vmem [shape: bf16[24,24], index: 5, kind: input, shape index: {}]   ;;  %s10949_s6 = inlined_call_operand.vmem [shape: f32[1,24], index: 6, kind: input, shape index: {}, may-alias: {2,4,6}]   ;;  %s10950_s7 = inlined_call_operand.vmem [shape: bf16[24,48], index: 7, kind: input, shape index: {}]   ;;  %s10951_s8 = inlined_call_operand.vmem [shape: f32[1,48], index: 8, kind: input, shape index: {}, may-alias: {8,10,14}]   ;;  %s10952_s9 = inlined_call_operand.vmem [shape: f32[9,48], index: 9, kind: input, shape index: {}]   ;;  %s10953_s10 = inlined_call_operand.vmem [shape: f32[1,48], index: 10, kind: input, shape index: {}, may-alias: {8,10,14}]   ;;  %s10954_s11 = inlined_call_operand.vmem [shape: bf16[48,8], index: 11, kind: input, shape index: {}]   ;;  %s10955_s12 = inlined_call_operand.vmem [shape: f32[1,8], index: 12, kind: input, shape index: {}]   ;;  %s10956_s13 = inlined_call_operand.vmem [shape: bf16[8,48], index: 13, kind: input, shape index: {}]   ;;  %s10957_s14 = inlined_call_operand.vmem [shape: f32[1,48], index: 14, kind: input, shape index: {}, may-alias: {8,10,14}]   ;;  %s10958_s15 = inlined_call_operand.vmem [shape: bf16[48,32], index: 15, kind: input, shape index: {}]   ;;  %s10959_s16 = inlined_call_operand.vmem [shape: f32[1,32], index: 16, kind: input, shape index: {}]   ;;  %s10960_s17 = inlined_call_operand.vmem [shape: bf16[32,1792], index: 17, kind: input, shape index: {}]   ;;  %s10961_s18 = inlined_call_operand.vmem [shape: f32[1,1792], index: 18, kind: input, shape index: {}]   ;;  %s10962_s19 = inlined_call_operand.hbm [shape: f32[1792,1], index: 19, kind: input, shape index: {}]   ;;  %s10963_s20 = inlined_call_operand.<no memory space> [shape: f32[1,1], index: 20, kind: input, shape index: {}]   ;;  %s10964_s21 = inlined_call_operand.vmem [shape: f32[2,1], index: 21, kind: output, shape index: {}]  }
   0x1   :  { %11043 = sst [smem:[#allocation82_spill]] %s10943_s0  ;;  %v26_v0 = vstv %s10963_s20 }
   0x2   :  { %11044 = sst [smem:[#allocation83_spill]] %s10944_s1  ;;  %27 = vst [vmem:[#allocation5] sm:$0x1] %v26_v0 }
   0x3   :  { %11045 = sst [smem:[#allocation84_spill]] %s10945_s2 }
   0x4   :  { %11046 = sst [smem:[#allocation85_spill]] %s10946_s3 }
   0x5   :  { %11047 = sst [smem:[#allocation86_spill]] %s10947_s4 }
   0x6   :  { %11048 = sst [smem:[#allocation87_spill]] %s10948_s5 }
   0x7   :  { %28 = vsyncpa [#allocation7], 0  ;;  %s8154_s26 = smov [#allocation6]   ;;  %s8130_s29 = scalar_lea.hbm %s10962_s19, 28672 }
   0x8   :  { %s72_s27 = sshll.u32 %s8154_s26, 4  ;;  %p8131_p0 = scmp.ne.s32.totalorder %s10962_s19, %s8130_s29  ;;  %s73_s27 = int_to_ptr.vmem [resolvable:$true] %s72_s27 }
   0x9   :  { %p8134_p1 = scmp.lt.u32.totalorder %s8130_s29, %s10962_s19 }
   0xb   :  { %p8136_p2 = pnand %p8134_p1, %p8131_p0 }
   0xd   :  { %8139 = shalt.err (!%p8136_p2)
}
   0xe   :  { %s8140_s20 = scalar_lea.vmem %s73_s27, 28672  ;;  %p8145_p4 = scmp.lt.s32.totalorder %s73_s27, %s73_s27 }
   0xf   :  { %p8141_p3 = scmp.ne.s32.totalorder %s73_s27, %s8140_s20  ;;  %p8146_p5 = scmp.lt.s32.totalorder %s8140_s20, %s8140_s20 }
  0x11   :  { %p8147_p6 = por %p8146_p5, %p8145_p4 }
  0x13   :  { %p8148_p7 = pnand %p8147_p6, %p8141_p3 }
  0x15   :  { %8151 = shalt.err (!%p8148_p7)
}
  0x16   :  { %s8155_s22 = smov 128   ;;  %s8156_s23 = smov 8  }
  0x17   :  { %78 = dma.hbm_to_vmem [thread:$0]  %s10962_s19, 28672, %s73_s27, [#allocation7], %s8155_s22, %s8155_s22, %s8156_s23  }
  0x18   :  { %8152 = dma.done.wait [#allocation7], 28672  }
  0x19   :  { %8153 = vsyncadd [#allocation7], 4294938624  ;;  %vm149_vm0 = vcmask 31744   ;;  %vm165_vm1 = vcmask 24576   ;;  %vm2233_vm2 = vcmask 392192   ;;  %vm3161_vm3 = vcmask 385024  }
  0x1a   :  { %v8157_v1 = vmov 0.0   ;;  %vm152_vm4 = vcmask 25600   ;;  %s11049_s25 = sld [smem:[#allocation82_spill]]  ;;  %s8158_s24 = smov 4   ;;  %vm1176_vm5 = vcmask 195584   ;;  %vm1287_vm6 = vcmask 1041408  }
  0x1b   :  { %150 = vst.msk [vmem:[#allocation2] sm:$0xff] %vm149_vm0, %v8157_v1  ;;  %151 = vst.msk [vmem:[#allocation2 + $0x8] sm:$0xff] %vm149_vm0, %v8157_v1  ;;  %s10971_s19 = smov 12   ;;  %s8160_s26 = smov 16   ;;  %vm1108_vm7 = vcmask 64512   ;;  %vm1125_vm8 = vcmask 97280  }
  0x1c   :  { %154 = vst.msk [vmem:[#allocation2 + $0x1b0] sm:$0xff] %vm149_vm0, %v8157_v1  ;;  %155 = vst.msk [vmem:[#allocation2 + $0x1b8] sm:$0xff] %vm149_vm0, %v8157_v1  ;;  %s8161_s30 = smov 20   ;;  %s8162_s4 = smov 24   ;;  %vm1142_vm9 = vcmask 130048   ;;  %vm1159_vm10 = vcmask 162816  }
  0x1d   :  { %166 = vst.msk [vmem:[#allocation2 + $0x18] sm:$0x1] %vm165_vm1, %v8157_v1  ;;  %167 = vst.msk [vmem:[#allocation2 + $0x30] sm:$0x1] %vm165_vm1, %v8157_v1  ;;  %s10969_s2 = smov 28   ;;  %s8164_s20 = smov 32  }
  0x1e   :  { %168 = vst.msk [vmem:[#allocation2 + $0x48] sm:$0x1] %vm165_vm1, %v8157_v1  ;;  %169 = vst.msk [vmem:[#allocation2 + $0x60] sm:$0x1] %vm165_vm1, %v8157_v1  ;;  %s11050_s29 = sld [smem:[#allocation83_spill]]  ;;  %s11051_s0 = smov 28  }
  0x1f   :  { %170 = vst.msk [vmem:[#allocation2 + $0x78] sm:$0x1] %vm165_vm1, %v8157_v1  ;;  %171 = vst.msk [vmem:[#allocation2 + $0x90] sm:$0x1] %vm165_vm1, %v8157_v1  ;;  %s11052_s1 = smov 12   ;;  %vm1193_vm11 = vcmask 228352  }
  0x20   :  { %172 = vst.msk [vmem:[#allocation2 + $0xa8] sm:$0x1] %vm165_vm1, %v8157_v1  ;;  %173 = vst.msk [vmem:[#allocation2 + $0xc0] sm:$0x1] %vm165_vm1, %v8157_v1  ;;  %v87_v2 = vld [vmem:[%s11049_s25 + $0x10] sm:$0xff]  ;;  %v88_v3 = vld [vmem:[%s11049_s25 + $0x18] sm:$0xff] }
  0x21   :  { %174 = vst.msk [vmem:[#allocation2 + $0xd8] sm:$0x1] %vm165_vm1, %v8157_v1  ;;  %175 = vst.msk [vmem:[#allocation2 + $0xf0] sm:$0x1] %vm165_vm1, %v8157_v1  ;;  %v91_v4 = vld [vmem:[%s11049_s25 + $0x30] sm:$0xff]  ;;  %v92_v5 = vld [vmem:[%s11049_s25 + $0x38] sm:$0xff] }
  0x22   :  { %176 = vst.msk [vmem:[#allocation2 + $0x108] sm:$0x1] %vm165_vm1, %v8157_v1  ;;  %177 = vst.msk [vmem:[#allocation2 + $0x120] sm:$0x1] %vm165_vm1, %v8157_v1  ;;  %v95_v6 = vld [vmem:[%s11049_s25 + $0x50] sm:$0xff]  ;;  %v96_v7 = vld [vmem:[%s11049_s25 + $0x58] sm:$0xff] }
  0x23   :  { %178 = vst.msk [vmem:[#allocation2 + $0x138] sm:$0x1] %vm165_vm1, %v8157_v1  ;;  %179 = vst.msk [vmem:[#allocation2 + $0x150] sm:$0x1] %vm165_vm1, %v8157_v1  ;;  %v93_v8 = vld [vmem:[%s11049_s25 + $0x40] sm:$0xff]  ;;  %v94_v9 = vld [vmem:[%s11049_s25 + $0x48] sm:$0xff] }
  0x24   :  { %180 = vst.msk [vmem:[#allocation2 + $0x168] sm:$0x1] %vm165_vm1, %v8157_v1  ;;  %181 = vst.msk [vmem:[#allocation2 + $0x180] sm:$0x1] %vm165_vm1, %v8157_v1  ;;  %v97_v10 = vld [vmem:[%s11049_s25 + $0x60] sm:$0xff]  ;;  %v98_v11 = vld [vmem:[%s11049_s25 + $0x68] sm:$0xff] }
  0x25   :  { %182 = vst.msk [vmem:[#allocation2 + $0x1c8] sm:$0x1] %vm165_vm1, %v8157_v1  ;;  %183 = vst.msk [vmem:[#allocation2 + $0x1e0] sm:$0x1] %vm165_vm1, %v8157_v1  ;;  %v326_v13 = vld [vmem:[#allocation2 + $0x1] ss:$2 sm:$0xff] }
  0x26   :  { %184 = vst.msk [vmem:[#allocation2 + $0x1f8] sm:$0x1] %vm165_vm1, %v8157_v1  ;;  %185 = vst.msk [vmem:[#allocation2 + $0x210] sm:$0x1] %vm165_vm1, %v8157_v1  ;;  %v85_v14 = vld [vmem:[%s11049_s25] sm:$0xff]  ;;  %v86_v15 = vld [vmem:[%s11049_s25 + $0x8] sm:$0xff] }
  0x27   :  { %186 = vst.msk [vmem:[#allocation2 + $0x228] sm:$0x1] %vm165_vm1, %v8157_v1  ;;  %187 = vst.msk [vmem:[#allocation2 + $0x240] sm:$0x1] %vm165_vm1, %v8157_v1  ;;  %v89_v16 = vld [vmem:[%s11049_s25 + $0x20] sm:$0xff]  ;;  %v90_v17 = vld [vmem:[%s11049_s25 + $0x28] sm:$0xff] }
  0x28   :  { %188 = vst.msk [vmem:[#allocation2 + $0x258] sm:$0x1] %vm165_vm1, %v8157_v1  ;;  %189 = vst.msk [vmem:[#allocation2 + $0x270] sm:$0x1] %vm165_vm1, %v8157_v1  ;;  %v99_v18 = vld [vmem:[%s11049_s25 + $0x70] sm:$0xff]  ;;  %v100_v19 = vld [vmem:[%s11049_s25 + $0x78] sm:$0xff] }
  0x29   :  { %190 = vst.msk [vmem:[#allocation2 + $0x288] sm:$0x1] %vm165_vm1, %v8157_v1  ;;  %191 = vst.msk [vmem:[#allocation2 + $0x2a0] sm:$0x1] %vm165_vm1, %v8157_v1  ;;  %v107_v20 = vld [vmem:[%s11049_s25 + $0xb0] sm:$0xff]  ;;  %v108_v21 = vld [vmem:[%s11049_s25 + $0xb8] sm:$0xff] }
  0x2a   :  { %192 = vst.msk [vmem:[#allocation2 + $0x2b8] sm:$0x1] %vm165_vm1, %v8157_v1  ;;  %193 = vst.msk [vmem:[#allocation2 + $0x2d0] sm:$0x1] %vm165_vm1, %v8157_v1  ;;  %v111_v22 = vld [vmem:[%s11049_s25 + $0xd0] sm:$0xff]  ;;  %v112_v23 = vld [vmem:[%s11049_s25 + $0xd8] sm:$0xff] }
  0x2b   :  { %194 = vst.msk [vmem:[#allocation2 + $0x2e8] sm:$0x1] %vm165_vm1, %v8157_v1  ;;  %195 = vst.msk [vmem:[#allocation2 + $0x300] sm:$0x1] %vm165_vm1, %v8157_v1  ;;  %v103_v24 = vld [vmem:[%s11049_s25 + $0x90] sm:$0xff]  ;;  %v104_v25 = vld [vmem:[%s11049_s25 + $0x98] sm:$0xff] }
  0x2c   :  { %196 = vst.msk [vmem:[#allocation2 + $0x318] sm:$0x1] %vm165_vm1, %v8157_v1  ;;  %197 = vst.msk [vmem:[#allocation2 + $0x330] sm:$0x1] %vm165_vm1, %v8157_v1  ;;  %v109_v52 = vld [vmem:[%s11049_s25 + $0xc0] sm:$0xff]  ;;  %v110_v53 = vld [vmem:[%s11049_s25 + $0xc8] sm:$0xff] }
  0x2d   :  { %3150 = vst.msk [vmem:[#allocation4] sm:$0xff] %vm2233_vm2, %v8157_v1  ;;  %3153 = vst.msk [vmem:[#allocation4 + $0xa0] sm:$0xff] %vm2233_vm2, %v8157_v1  ;;  %v113_v54 = vld [vmem:[%s11049_s25 + $0xe0] sm:$0xff]  ;;  %v114_v55 = vld [vmem:[%s11049_s25 + $0xe8] sm:$0xff]  ;;  %vm1210_vm12 = vcmask 261120   ;;  %vm1262_vm13 = vcmask 293888  }
  0x2e   :  { %3162 = vst.msk [vmem:[#allocation4 + $0x10] sm:$0x1] %vm3161_vm3, %v8157_v1  ;;  %3163 = vst.msk [vmem:[#allocation4 + $0x20] sm:$0x1] %vm3161_vm3, %v8157_v1  ;;  %v101_v57 = vld [vmem:[%s11049_s25 + $0x80] sm:$0xff]  ;;  %v102_v58 = vld [vmem:[%s11049_s25 + $0x88] sm:$0xff] }
  0x2f   :  { %3164 = vst.msk [vmem:[#allocation4 + $0x30] sm:$0x1] %vm3161_vm3, %v8157_v1  ;;  %3165 = vst.msk [vmem:[#allocation4 + $0x40] sm:$0x1] %vm3161_vm3, %v8157_v1  ;;  %v105_v59 = vld [vmem:[%s11049_s25 + $0xa0] sm:$0xff]  ;;  %v106_v63 = vld [vmem:[%s11049_s25 + $0xa8] sm:$0xff] }
  0x30   :  { %3166 = vst.msk [vmem:[#allocation4 + $0x50] sm:$0x1] %vm3161_vm3, %v8157_v1  ;;  %3167 = vst.msk [vmem:[#allocation4 + $0x60] sm:$0x1] %vm3161_vm3, %v8157_v1  ;;  %v115_v0 = vld [vmem:[%s11049_s25 + $0xf0] sm:$0xff]  ;;  %vm1511_vm14 = vcmask 188416  }
  0x31   :  { %3168 = vst.msk [vmem:[#allocation4 + $0x70] sm:$0x1] %vm3161_vm3, %v8157_v1  ;;  %3169 = vst.msk [vmem:[#allocation4 + $0x80] sm:$0x1] %vm3161_vm3, %v8157_v1  ;;  %vm1501_vm15 = vcmask 189440   ;;  %s11054_s3 = sld [smem:[#allocation85_spill]] }
  0x32   :  { %3170 = vst.msk [vmem:[#allocation4 + $0xb0] sm:$0x1] %vm3161_vm3, %v8157_v1  ;;  %3171 = vst.msk [vmem:[#allocation4 + $0xc0] sm:$0x1] %vm3161_vm3, %v8157_v1  ;;  %s8171_s28 = smov 96   ;;  %vm2317_vm1 = vcmask 326656  }
  0x33   :  { %3172 = vst.msk [vmem:[#allocation4 + $0xd0] sm:$0x1] %vm3161_vm3, %v8157_v1  ;;  %3173 = vst.msk [vmem:[#allocation4 + $0xe0] sm:$0x1] %vm3161_vm3, %v8157_v1 }
  0x34   :  { %3174 = vst.msk [vmem:[#allocation4 + $0xf0] sm:$0x1] %vm3161_vm3, %v8157_v1  ;;  %3175 = vst.msk [vmem:[#allocation4 + $0x100] sm:$0x1] %vm3161_vm3, %v8157_v1 }
  0x35   :  { %3176 = vst.msk [vmem:[#allocation4 + $0x110] sm:$0x1] %vm3161_vm3, %v8157_v1  ;;  %3177 = vst.msk [vmem:[#allocation4 + $0x120] sm:$0x1] %vm3161_vm3, %v8157_v1  ;;  %vm2334_vm3 = vcmask 523264  }
  0x36   :  { %153 = vst.msk [vmem:[#allocation2 + $0x10] sm:$0x3] %vm152_vm4, %v8157_v1  ;;  %156 = vst.msk [vmem:[#allocation2 + $0x1c0] sm:$0x3] %vm152_vm4, %v8157_v1  ;;  %vm2482_vm4 = vcmask 719872  }
  0x37   :  { %232 = vst.msk [vmem:[#allocation2 + $0x31] sm:$0xff] %vm149_vm0, %v87_v2  ;;  %233 = vst.msk [vmem:[#allocation2 + $0x39] sm:$0xff] %vm149_vm0, %v88_v3 }
  0x38   :  { %236 = vst.msk [vmem:[#allocation2 + $0x61] sm:$0xff] %vm149_vm0, %v91_v4  ;;  %237 = vst.msk [vmem:[#allocation2 + $0x69] sm:$0xff] %vm149_vm0, %v92_v5  ;;  %v116_v4 = vld [vmem:[%s11049_s25 + $0xf8] sm:$0xff] }
  0x39   :  { %240 = vst.msk [vmem:[#allocation2 + $0x91] sm:$0xff] %vm149_vm0, %v95_v6  ;;  %241 = vst.msk [vmem:[#allocation2 + $0x99] sm:$0xff] %vm149_vm0, %v96_v7 }
  0x3a   :  { %238 = vst.msk [vmem:[#allocation2 + $0x79] sm:$0xff] %vm149_vm0, %v93_v8  ;;  %239 = vst.msk [vmem:[#allocation2 + $0x81] sm:$0xff] %vm149_vm0, %v94_v9 }
  0x3b   :  { %242 = vst.msk [vmem:[#allocation2 + $0xa9] sm:$0xff] %vm149_vm0, %v97_v10  ;;  %243 = vst.msk [vmem:[#allocation2 + $0xb1] sm:$0xff] %vm149_vm0, %v98_v11  ;;  %v123_v11 = vld [vmem:[%s11049_s25 + $0x130] sm:$0xff] }
  0x3c   :  { %230 = vst.msk [vmem:[#allocation2 + $0x19] sm:$0xff] %vm149_vm0, %v85_v14  ;;  %231 = vst.msk [vmem:[#allocation2 + $0x21] sm:$0xff] %vm149_vm0, %v86_v15  ;;  %v128_v14 = vld [vmem:[%s11049_s25 + $0x158] sm:$0xff]  ;;  %v119_v15 = vld [vmem:[%s11049_s25 + $0x110] sm:$0xff] }
  0x3d   :  { %v358_v12 = vld [vmem:[#allocation2 + $0x2] ss:$2 sm:$0xff]  ;;  %234 = vst.msk [vmem:[#allocation2 + $0x49] sm:$0xff] %vm149_vm0, %v89_v16  ;;  %235 = vst.msk [vmem:[#allocation2 + $0x51] sm:$0xff] %vm149_vm0, %v90_v17 }
  0x3e   :  { %244 = vst.msk [vmem:[#allocation2 + $0xc1] sm:$0xff] %vm149_vm0, %v99_v18  ;;  %245 = vst.msk [vmem:[#allocation2 + $0xc9] sm:$0xff] %vm149_vm0, %v100_v19  ;;  %v360_v26 = vld [vmem:[#allocation2 + $0x32] ss:$2 sm:$0xff]  ;;  %v328_v27 = vld [vmem:[#allocation2 + $0x31] ss:$2 sm:$0xff] }
  0x3f   :  { %252 = vst.msk [vmem:[#allocation2 + $0x121] sm:$0xff] %vm149_vm0, %v107_v20  ;;  %253 = vst.msk [vmem:[#allocation2 + $0x129] sm:$0xff] %vm149_vm0, %v108_v21  ;;  %v6975_v28 = vpack.i.bf16 %v360_v26, %v358_v12  ;;  %v6965_v29 = vpack.i.bf16 %v328_v27, %v326_v13  ;;  %v362_v30 = vld [vmem:[#allocation2 + $0x62] ss:$2 sm:$0xff]  ;;  %v330_v31 = vld [vmem:[#allocation2 + $0x61] ss:$2 sm:$0xff] }
  0x40   :  { %256 = vst.msk [vmem:[#allocation2 + $0x151] sm:$0xff] %vm149_vm0, %v111_v22  ;;  %257 = vst.msk [vmem:[#allocation2 + $0x159] sm:$0xff] %vm149_vm0, %v112_v23  ;;  %v364_v32 = vld [vmem:[#allocation2 + $0x92] ss:$2 sm:$0xff]  ;;  %v332_v33 = vld [vmem:[#allocation2 + $0x91] ss:$2 sm:$0xff] }
  0x41   :  { %248 = vst.msk [vmem:[#allocation2 + $0xf1] sm:$0xff] %vm149_vm0, %v103_v24  ;;  %249 = vst.msk [vmem:[#allocation2 + $0xf9] sm:$0xff] %vm149_vm0, %v104_v25  ;;  %6976 = vrot.lane.b32.xlu1 %v6975_v28, %s8156_s23  ;;  %6966 = vrot.lane.b32.xlu0 %v6965_v29, %s8158_s24  ;;  %v6980_v34 = vpack.i.bf16 %v364_v32, %v362_v30  ;;  %v6970_v35 = vpack.i.bf16 %v332_v33, %v330_v31  ;;  %v393_v36 = vld [vmem:[#allocation2 + $0x78] ss:$2 sm:$0xff]  ;;  %v425_v42 = vld [vmem:[#allocation2 + $0x79] ss:$2 sm:$0xff] }
  0x42   :  { %v395_v37 = vld [vmem:[#allocation2 + $0xa8] ss:$2 sm:$0xff]  ;;  %v427_v43 = vld [vmem:[#allocation2 + $0xa9] ss:$2 sm:$0xff]  ;;  %254 = vst.msk [vmem:[#allocation2 + $0x139] sm:$0xff] %vm149_vm0, %v109_v52  ;;  %255 = vst.msk [vmem:[#allocation2 + $0x141] sm:$0xff] %vm149_vm0, %v110_v53 }
  0x43   :  { %v389_v38 = vld [vmem:[#allocation2 + $0x18] ss:$2 sm:$0xff]  ;;  %v6990_v40 = vpack.i.bf16 %v395_v37, %v393_v36  ;;  %v421_v44 = vld [vmem:[#allocation2 + $0x19] ss:$2 sm:$0xff]  ;;  %v7000_v46 = vpack.i.bf16 %v427_v43, %v425_v42  ;;  %258 = vst.msk [vmem:[#allocation2 + $0x169] sm:$0xff] %vm149_vm0, %v113_v54  ;;  %259 = vst.msk [vmem:[#allocation2 + $0x171] sm:$0xff] %vm149_vm0, %v114_v55 }
  0x44   :  { %v391_v39 = vld [vmem:[#allocation2 + $0x48] ss:$2 sm:$0xff]  ;;  %v423_v45 = vld [vmem:[#allocation2 + $0x49] ss:$2 sm:$0xff]  ;;  %1500 = vst.msk [vmem:[#allocation3] sm:$0xff] %vm1176_vm5, %v8157_v1  ;;  %1503 = vst.msk [vmem:[#allocation3 + $0xa0] sm:$0xff] %vm1176_vm5, %v8157_v1 }
  0x45   :  { %6981 = vrot.lane.b32.xlu1 %v6980_v34, %s8156_s23  ;;  %6971 = vrot.lane.b32.xlu0 %v6970_v35, %s8158_s24  ;;  %v6985_v41 = vpack.i.bf16 %v391_v39, %v389_v38  ;;  %v6995_v47 = vpack.i.bf16 %v423_v45, %v421_v44  ;;  %v457_v48 = vld [vmem:[#allocation2 + $0x7a] ss:$2 sm:$0xff]  ;;  %v459_v49 = vld [vmem:[#allocation2 + $0xaa] ss:$2 sm:$0xff]  ;;  %1506 = vst.msk [vmem:[#allocation3 + $0x90] sm:$0xff] %vm1176_vm5, %v8157_v1  ;;  %1508 = vst.msk [vmem:[#allocation3 + $0x130] sm:$0xff] %vm1176_vm5, %v8157_v1 }
  0x46   :  { %v453_v50 = vld [vmem:[#allocation2 + $0x1a] ss:$2 sm:$0xff]  ;;  %v455_v51 = vld [vmem:[#allocation2 + $0x4a] ss:$2 sm:$0xff]  ;;  %v7010_v60 = vpack.i.bf16 %v459_v49, %v457_v48  ;;  %246 = vst.msk [vmem:[#allocation2 + $0xd9] sm:$0xff] %vm149_vm0, %v101_v57  ;;  %247 = vst.msk [vmem:[#allocation2 + $0xe1] sm:$0xff] %vm149_vm0, %v102_v58 }
  0x47   :  { %v485_v56 = vld [vmem:[#allocation2 + $0x30] ss:$2 sm:$0xff]  ;;  %v7005_v61 = vpack.i.bf16 %v455_v51, %v453_v50  ;;  %v487_v62 = vld [vmem:[#allocation2 + $0x60] ss:$2 sm:$0xff]  ;;  %250 = vst.msk [vmem:[#allocation2 + $0x109] sm:$0xff] %vm149_vm0, %v105_v59  ;;  %251 = vst.msk [vmem:[#allocation2 + $0x111] sm:$0xff] %vm149_vm0, %v106_v63 }
  0x48   :  { %v489_v2 = vld [vmem:[#allocation2 + $0x90] ss:$2 sm:$0xff]  ;;  %v491_v3 = vld [vmem:[#allocation2 + $0xc0] ss:$2 sm:$0xff]  ;;  %260 = vst.msk [vmem:[#allocation2 + $0x181] sm:$0xff] %vm149_vm0, %v115_v0  ;;  %261 = vst.msk [vmem:[#allocation2 + $0x189] sm:$0xff] %vm149_vm0, %v116_v4  ;;  %v7015_v9 = vpack.i.bf16 %v487_v62, %v485_v56 }
  0x49   :  { %6991 = vrot.lane.b32.xlu1 %v6990_v40, %s10971_s19  ;;  %6986 = vrot.lane.b32.xlu0 %v6985_v41, %s10971_s19  ;;  %v521_v5 = vld [vmem:[#allocation2 + $0x91] ss:$2 sm:$0xff]  ;;  %v523_v6 = vld [vmem:[#allocation2 + $0xc1] ss:$2 sm:$0xff]  ;;  %v7020_v8 = vpack.i.bf16 %v491_v3, %v489_v2  ;;  %268 = vst.msk [vmem:[#allocation2 + $0x211] sm:$0xff] %vm149_vm0, %v123_v11  ;;  %273 = vst.msk [vmem:[#allocation2 + $0x249] sm:$0xff] %vm149_vm0, %v128_v14 }
  0x4a   :  { %v517_v7 = vld [vmem:[#allocation2 + $0x31] ss:$2 sm:$0xff]  ;;  %v519_v10 = vld [vmem:[#allocation2 + $0x61] ss:$2 sm:$0xff]  ;;  %264 = vst.msk [vmem:[#allocation2 + $0x1e1] sm:$0xff] %vm149_vm0, %v119_v15  ;;  %v7030_v16 = vpack.i.bf16 %v523_v6, %v521_v5 }
  0x4b   :  { %v124_v12 = vld [vmem:[%s11049_s25 + $0x138] sm:$0xff]  ;;  %v127_v13 = vld [vmem:[%s11049_s25 + $0x150] sm:$0xff]  ;;  %v7025_v17 = vpack.i.bf16 %v519_v10, %v517_v7  ;;  %v125_v23 = vld [vmem:[%s11049_s25 + $0x140] sm:$0xff]  ;;  %1528 = vst.msk [vmem:[#allocation3 + $0x19] sm:$0x1] %vm1511_vm14, %v8157_v1 }
  0x4c   :  { %269 = vst.msk [vmem:[#allocation2 + $0x219] sm:$0xff] %vm149_vm0, %v124_v12  ;;  %272 = vst.msk [vmem:[#allocation2 + $0x241] sm:$0xff] %vm149_vm0, %v127_v13  ;;  %v553_v18 = vld [vmem:[#allocation2 + $0x92] ss:$2 sm:$0xff]  ;;  %v555_v19 = vld [vmem:[#allocation2 + $0xc2] ss:$2 sm:$0xff] }
  0x4d   :  { %7001 = vrot.lane.b32.xlu1 %v7000_v46, %s8160_s26  ;;  %6996 = vrot.lane.b32.xlu0 %v6995_v47, %s8160_s26  ;;  %v549_v20 = vld [vmem:[#allocation2 + $0x32] ss:$2 sm:$0xff]  ;;  %v551_v21 = vld [vmem:[#allocation2 + $0x62] ss:$2 sm:$0xff]  ;;  %v7040_v24 = vpack.i.bf16 %v555_v19, %v553_v18  ;;  %v338_v26 = vld [vmem:[#allocation2 + $0x121] ss:$2 sm:$0xff] }
  0x4e   :  { %v120_v22 = vld [vmem:[%s11049_s25 + $0x118] sm:$0xff]  ;;  %v7035_v25 = vpack.i.bf16 %v551_v21, %v549_v20  ;;  %v126_v28 = vld [vmem:[%s11049_s25 + $0x148] sm:$0xff]  ;;  %270 = vst.msk [vmem:[#allocation2 + $0x229] sm:$0xff] %vm149_vm0, %v125_v23  ;;  %v129_v31 = vld [vmem:[%s11049_s25 + $0x160] sm:$0xff] }
  0x4f   :  { %v340_v27 = vld [vmem:[#allocation2 + $0x151] ss:$2 sm:$0xff]  ;;  %265 = vst.msk [vmem:[#allocation2 + $0x1e9] sm:$0xff] %vm149_vm0, %v120_v22  ;;  %v334_v29 = vld [vmem:[#allocation2 + $0xc1] ss:$2 sm:$0xff]  ;;  %271 = vst.msk [vmem:[#allocation2 + $0x231] sm:$0xff] %vm149_vm0, %v126_v28 }
  0x50   :  { %v336_v30 = vld [vmem:[#allocation2 + $0xf1] ss:$2 sm:$0xff]  ;;  %v130_v32 = vld [vmem:[%s11049_s25 + $0x168] sm:$0xff]  ;;  %274 = vst.msk [vmem:[#allocation2 + $0x259] sm:$0xff] %vm149_vm0, %v129_v31  ;;  %v117_v33 = vld [vmem:[%s11049_s25 + $0x100] sm:$0xff]  ;;  %v7050_v38 = vpack.i.bf16 %v340_v27, %v338_v26 }
  0x51   :  { %7011 = vrot.lane.b32.xlu1 %v7010_v60, %s8161_s30  ;;  %7006 = vrot.lane.b32.xlu0 %v7005_v61, %s8161_s30  ;;  %v118_v34 = vld [vmem:[%s11049_s25 + $0x108] sm:$0xff]  ;;  %275 = vst.msk [vmem:[#allocation2 + $0x261] sm:$0xff] %vm149_vm0, %v130_v32  ;;  %v121_v35 = vld [vmem:[%s11049_s25 + $0x120] sm:$0xff]  ;;  %262 = vst.msk [vmem:[#allocation2 + $0x1c9] sm:$0xff] %vm149_vm0, %v117_v33  ;;  %v7045_v39 = vpack.i.bf16 %v336_v30, %v334_v29 }
  0x52   :  { %v122_v36 = vld [vmem:[%s11049_s25 + $0x128] sm:$0xff]  ;;  %263 = vst.msk [vmem:[#allocation2 + $0x1d1] sm:$0xff] %vm149_vm0, %v118_v34  ;;  %v131_v37 = vld [vmem:[%s11049_s25 + $0x170] sm:$0xff]  ;;  %266 = vst.msk [vmem:[#allocation2 + $0x1f9] sm:$0xff] %vm149_vm0, %v121_v35 }
  0x53   :  { %v370_v40 = vld [vmem:[#allocation2 + $0x122] ss:$2 sm:$0xff]  ;;  %267 = vst.msk [vmem:[#allocation2 + $0x201] sm:$0xff] %vm149_vm0, %v122_v36  ;;  %v132_v41 = vld [vmem:[%s11049_s25 + $0x178] sm:$0xff]  ;;  %276 = vst.msk [vmem:[#allocation2 + $0x271] sm:$0xff] %vm149_vm0, %v131_v37 }
  0x54   :  { %v372_v42 = vld [vmem:[#allocation2 + $0x152] ss:$2 sm:$0xff]  ;;  %v366_v43 = vld [vmem:[#allocation2 + $0xc2] ss:$2 sm:$0xff]  ;;  %277 = vst.msk [vmem:[#allocation2 + $0x279] sm:$0xff] %vm149_vm0, %v132_v41 }
  0x55   :  { %7021 = vrot.lane.b32.xlu1 %v7020_v8, %s8162_s4  ;;  %7016 = vrot.lane.b32.xlu0 %v7015_v9, %s8162_s4  ;;  %v368_v44 = vld [vmem:[#allocation2 + $0xf2] ss:$2 sm:$0xff]  ;;  %v7060_v47 = vpack.i.bf16 %v372_v42, %v370_v40  ;;  %v433_v56 = vld [vmem:[#allocation2 + $0x139] ss:$2 sm:$0xff]  ;;  %v435_v57 = vld [vmem:[#allocation2 + $0x169] ss:$2 sm:$0xff] }
  0x56   :  { %v139_v45 = vld [vmem:[%s11049_s25 + $0x1b0] sm:$0xff]  ;;  %v140_v46 = vld [vmem:[%s11049_s25 + $0x1b8] sm:$0xff]  ;;  %v7055_v48 = vpack.i.bf16 %v368_v44, %v366_v43  ;;  %v7080_v3 = vpack.i.bf16 %v435_v57, %v433_v56  ;;  %v141_v6 = vld [vmem:[%s11049_s25 + $0x1c0] sm:$0xff]  ;;  %1512 = vst.msk [vmem:[#allocation3 + $0x10] sm:$0x1] %vm1511_vm14, %v8157_v1 }
  0x57   :  { %284 = vst.msk [vmem:[#allocation2 + $0x2d1] sm:$0xff] %vm149_vm0, %v139_v45  ;;  %285 = vst.msk [vmem:[#allocation2 + $0x2d9] sm:$0xff] %vm149_vm0, %v140_v46  ;;  %v401_v49 = vld [vmem:[#allocation2 + $0x138] ss:$2 sm:$0xff]  ;;  %v403_v50 = vld [vmem:[#allocation2 + $0x168] ss:$2 sm:$0xff] }
  0x58   :  { %v397_v51 = vld [vmem:[#allocation2 + $0xd8] ss:$2 sm:$0xff]  ;;  %v399_v52 = vld [vmem:[#allocation2 + $0x108] ss:$2 sm:$0xff]  ;;  %v7070_v54 = vpack.i.bf16 %v403_v50, %v401_v49  ;;  %v429_v58 = vld [vmem:[#allocation2 + $0xd9] ss:$2 sm:$0xff] }
  0x59   :  { %7031 = vrot.lane.b32.xlu1 %v7030_v16, %s10969_s2  ;;  %7026 = vrot.lane.b32.xlu0 %v7025_v17, %s10969_s2  ;;  %v143_v53 = vld [vmem:[%s11049_s25 + $0x1d0] sm:$0xff]  ;;  %v7065_v55 = vpack.i.bf16 %v399_v52, %v397_v51  ;;  %v144_v60 = vld [vmem:[%s11049_s25 + $0x1d8] sm:$0xff]  ;;  %286 = vst.msk [vmem:[#allocation2 + $0x2e9] sm:$0xff] %vm149_vm0, %v141_v6  ;;  %v499_v19 = vld [vmem:[#allocation2 + $0x180] ss:$2 sm:$0xff] }
  0x5a   :  { %288 = vst.msk [vmem:[#allocation2 + $0x301] sm:$0xff] %vm149_vm0, %v143_v53  ;;  %v431_v59 = vld [vmem:[#allocation2 + $0x109] ss:$2 sm:$0xff]  ;;  %v465_v62 = vld [vmem:[#allocation2 + $0x13a] ss:$2 sm:$0xff]  ;;  %289 = vst.msk [vmem:[#allocation2 + $0x309] sm:$0xff] %vm149_vm0, %v144_v60 }
  0x5b   :  { %v135_v61 = vld [vmem:[%s11049_s25 + $0x190] sm:$0xff]  ;;  %v461_v0 = vld [vmem:[#allocation2 + $0xda] ss:$2 sm:$0xff]  ;;  %v7075_v4 = vpack.i.bf16 %v431_v59, %v429_v58  ;;  %v527_v27 = vld [vmem:[#allocation2 + $0x121] ss:$2 sm:$0xff] }
  0x5c   :  { %v467_v63 = vld [vmem:[#allocation2 + $0x16a] ss:$2 sm:$0xff]  ;;  %280 = vst.msk [vmem:[#allocation2 + $0x2a1] sm:$0xff] %vm149_vm0, %v135_v61  ;;  %v145_v8 = vld [vmem:[%s11049_s25 + $0x1e0] sm:$0xff]  ;;  %v525_v26 = vld [vmem:[#allocation2 + $0xf1] ss:$2 sm:$0xff] }
  0x5d   :  { %7041 = vrot.lane.b32.xlu1 %v7040_v24, %s8164_s20  ;;  %7036 = vrot.lane.b32.xlu0 %v7035_v25, %s8164_s20  ;;  %v136_v2 = vld [vmem:[%s11049_s25 + $0x198] sm:$0xff]  ;;  %v142_v7 = vld [vmem:[%s11049_s25 + $0x1c8] sm:$0xff]  ;;  %290 = vst.msk [vmem:[#allocation2 + $0x319] sm:$0xff] %vm149_vm0, %v145_v8  ;;  %v7090_v15 = vpack.i.bf16 %v467_v63, %v465_v62  ;;  %v7105_v29 = vpack.i.bf16 %v527_v27, %v525_v26 }
  0x5e   :  { %v463_v5 = vld [vmem:[#allocation2 + $0x10a] ss:$2 sm:$0xff]  ;;  %281 = vst.msk [vmem:[#allocation2 + $0x2a9] sm:$0xff] %vm149_vm0, %v136_v2  ;;  %287 = vst.msk [vmem:[#allocation2 + $0x2f1] sm:$0xff] %vm149_vm0, %v142_v7  ;;  %v133_v10 = vld [vmem:[%s11049_s25 + $0x180] sm:$0xff] }
  0x5f   :  { %v146_v9 = vld [vmem:[%s11049_s25 + $0x1e8] sm:$0xff]  ;;  %v137_v12 = vld [vmem:[%s11049_s25 + $0x1a0] sm:$0xff]  ;;  %278 = vst.msk [vmem:[#allocation2 + $0x289] sm:$0xff] %vm149_vm0, %v133_v10  ;;  %v147_v14 = vld [vmem:[%s11049_s25 + $0x1f0] sm:$0xff]  ;;  %v7085_v16 = vpack.i.bf16 %v463_v5, %v461_v0 }
  0x60   :  { %291 = vst.msk [vmem:[#allocation2 + $0x321] sm:$0xff] %vm149_vm0, %v146_v9  ;;  %v134_v11 = vld [vmem:[%s11049_s25 + $0x188] sm:$0xff]  ;;  %282 = vst.msk [vmem:[#allocation2 + $0x2b9] sm:$0xff] %vm149_vm0, %v137_v12  ;;  %v497_v17 = vld [vmem:[#allocation2 + $0x150] ss:$2 sm:$0xff] }
  0x61   :  { %7051 = vrot.lane.b32.xlu1 %v7050_v38, %s8158_s24  ;;  %7046 = vrot.lane.b32.xlu0 %v7045_v39, %s8158_s24  ;;  %v138_v13 = vld [vmem:[%s11049_s25 + $0x1a8] sm:$0xff]  ;;  %279 = vst.msk [vmem:[#allocation2 + $0x291] sm:$0xff] %vm149_vm0, %v134_v11  ;;  %v148_v18 = vld [vmem:[%s11049_s25 + $0x1f8] sm:$0xff]  ;;  %292 = vst.msk [vmem:[#allocation2 + $0x331] sm:$0xff] %vm149_vm0, %v147_v14  ;;  %v7100_v22 = vpack.i.bf16 %v499_v19, %v497_v17  ;;  %s8170_s25 = smov 64  }
  0x62   :  { %283 = vst.msk [vmem:[#allocation2 + $0x2c1] sm:$0xff] %vm149_vm0, %v138_v13  ;;  %v493_v20 = vld [vmem:[#allocation2 + $0xf0] ss:$2 sm:$0xff]  ;;  %v495_v21 = vld [vmem:[#allocation2 + $0x120] ss:$2 sm:$0xff]  ;;  %293 = vst.msk [vmem:[#allocation2 + $0x339] sm:$0xff] %vm149_vm0, %v148_v18 }
  0x63   :  { %v7095_v23 = vpack.i.bf16 %v495_v21, %v493_v20  ;;  %v529_v24 = vld [vmem:[#allocation2 + $0x151] ss:$2 sm:$0xff]  ;;  %v531_v25 = vld [vmem:[#allocation2 + $0x181] ss:$2 sm:$0xff]  ;;  %v561_v30 = vld [vmem:[#allocation2 + $0x152] ss:$2 sm:$0xff] }
  0x64   :  { %v7110_v28 = vpack.i.bf16 %v531_v25, %v529_v24  ;;  %v563_v31 = vld [vmem:[#allocation2 + $0x182] ss:$2 sm:$0xff]  ;;  %v557_v32 = vld [vmem:[#allocation2 + $0xf2] ss:$2 sm:$0xff]  ;;  %v346_v34 = vld [vmem:[#allocation2 + $0x211] ss:$2 sm:$0xff] }
  0x65   :  { %7061 = vrot.lane.b32.xlu1 %v7060_v47, %s8156_s23  ;;  %7056 = vrot.lane.b32.xlu0 %v7055_v48, %s8156_s23  ;;  %v559_v33 = vld [vmem:[#allocation2 + $0x122] ss:$2 sm:$0xff]  ;;  %v342_v35 = vld [vmem:[#allocation2 + $0x1b1] ss:$2 sm:$0xff]  ;;  %v7120_v37 = vpack.i.bf16 %v563_v31, %v561_v30  ;;  %v348_v39 = vld [vmem:[#allocation2 + $0x241] ss:$2 sm:$0xff] }
  0x66   :  { %v7605_v36 = vld [vmem:[%s11050_s29] sm:$0xff]   ;;  %v7115_v38 = vpack.i.bf16 %v559_v33, %v557_v32  ;;  %v7606_v40 = vld [vmem:[%s11050_s29 + $0x8] sm:$0xff]   ;;  %v7607_v42 = vld [vmem:[%s11050_s29 + $0x10] ss:$0 sps:$4 sm:$0x33]   ;;  %v7130_v47 = vpack.i.bf16 %v348_v39, %v346_v34  ;;  %s8166_s29 = smov 48  }
  0x67   :  { %v344_v41 = vld [vmem:[#allocation2 + $0x1e1] ss:$2 sm:$0xff]  ;;  %6630 = vmatprep.subr.bf16.mxu0 %v7605_v36  ;;  %v378_v43 = vld [vmem:[#allocation2 + $0x212] ss:$2 sm:$0xff]  ;;  %v380_v44 = vld [vmem:[#allocation2 + $0x242] ss:$2 sm:$0xff] }
  0x68   :  { %6631 = vmatpush3.bf16.msra.mxu0 %v7605_v36  ;;  %v374_v45 = vld [vmem:[#allocation2 + $0x1b2] ss:$2 sm:$0xff]  ;;  %v376_v46 = vld [vmem:[#allocation2 + $0x1e2] ss:$2 sm:$0xff]  ;;  %v7125_v48 = vpack.i.bf16 %v344_v41, %v342_v35  ;;  %v1289_v49 = vsel %vm1287_vm6, %v7607_v42, 0  ;;  %v7140_v53 = vpack.i.bf16 %v380_v44, %v378_v43 }
  0x69   :  { %7071 = vrot.lane.b32.xlu1 %v7070_v54, %s10971_s19  ;;  %7066 = vrot.lane.b32.xlu0 %v7065_v55, %s10971_s19  ;;  %v409_v50 = vld [vmem:[#allocation2 + $0x228] ss:$2 sm:$0xff]  ;;  %v411_v51 = vld [vmem:[#allocation2 + $0x258] ss:$2 sm:$0xff]  ;;  %v7135_v54 = vpack.i.bf16 %v376_v46, %v374_v45  ;;  %v441_v56 = vld [vmem:[#allocation2 + $0x229] ss:$2 sm:$0xff] }
  0x6a   :  { %6632 = vmatprep.subr.bf16.mxu0 %v7606_v40  ;;  %v405_v52 = vld [vmem:[#allocation2 + $0x1c8] ss:$2 sm:$0xff]  ;;  %v407_v55 = vld [vmem:[#allocation2 + $0x1f8] ss:$2 sm:$0xff]  ;;  %v443_v57 = vld [vmem:[#allocation2 + $0x259] ss:$2 sm:$0xff]  ;;  %v7150_v59 = vpack.i.bf16 %v411_v51, %v409_v50 }
  0x6b   :  { %v437_v58 = vld [vmem:[#allocation2 + $0x1c9] ss:$2 sm:$0xff]  ;;  %v7145_v60 = vpack.i.bf16 %v407_v55, %v405_v52  ;;  %v439_v61 = vld [vmem:[#allocation2 + $0x1f9] ss:$2 sm:$0xff]  ;;  %v473_v62 = vld [vmem:[#allocation2 + $0x22a] ss:$2 sm:$0xff]  ;;  %v7160_v2 = vpack.i.bf16 %v443_v57, %v441_v56 }
  0x6c   :  { %6633 = vmatpush3.bf16.msra.mxu0 %v7606_v40  ;;  %v475_v63 = vld [vmem:[#allocation2 + $0x25a] ss:$2 sm:$0xff]  ;;  %v469_v0 = vld [vmem:[#allocation2 + $0x1ca] ss:$2 sm:$0xff]  ;;  %v537_v11 = vld [vmem:[#allocation2 + $0x241] ss:$2 sm:$0xff] }
  0x6d   :  { %7081 = vrot.lane.b32.xlu1 %v7080_v3, %s8160_s26  ;;  %7076 = vrot.lane.b32.xlu0 %v7075_v4, %s8160_s26  ;;  %v7155_v3 = vpack.i.bf16 %v439_v61, %v437_v58  ;;  %v471_v4 = vld [vmem:[#allocation2 + $0x1fa] ss:$2 sm:$0xff]  ;;  %v7170_v8 = vpack.i.bf16 %v475_v63, %v473_v62  ;;  %v533_v12 = vld [vmem:[#allocation2 + $0x1e1] ss:$2 sm:$0xff]  ;;  %v535_v13 = vld [vmem:[#allocation2 + $0x211] ss:$2 sm:$0xff] }
  0x6e   :  { %6942 = vmatprep.subr.msk.bf16.mxu0 %vm1287_vm6, %v7607_v42  ;;  %v505_v5 = vld [vmem:[#allocation2 + $0x240] ss:$2 sm:$0xff]  ;;  %v503_v7 = vld [vmem:[#allocation2 + $0x210] ss:$2 sm:$0xff]  ;;  %v7165_v9 = vpack.i.bf16 %v471_v4, %v469_v0  ;;  %v7185_v20 = vpack.i.bf16 %v535_v13, %v533_v12  ;;  %v354_v25 = vld [vmem:[#allocation2 + $0x2d1] ss:$2 sm:$0xff] }
  0x6f   :  { %v501_v6 = vld [vmem:[#allocation2 + $0x1e0] ss:$2 sm:$0xff]  ;;  %v507_v10 = vld [vmem:[#allocation2 + $0x270] ss:$2 sm:$0xff]  ;;  %v356_v26 = vld [vmem:[#allocation2 + $0x301] ss:$2 sm:$0xff] }
  0x70   :  { %6635 = vmatpush3.bf16.msra.mxu0 %v1289_v49  ;;  %v7180_v14 = vpack.i.bf16 %v507_v10, %v505_v5  ;;  %v569_v17 = vld [vmem:[#allocation2 + $0x242] ss:$2 sm:$0xff]  ;;  %v567_v18 = vld [vmem:[#allocation2 + $0x212] ss:$2 sm:$0xff]  ;;  %v350_v27 = vld [vmem:[#allocation2 + $0x271] ss:$2 sm:$0xff] }
  0x71   :  { %7091 = vrot.lane.b32.xlu1 %v7090_v15, %s8161_s30  ;;  %7086 = vrot.lane.b32.xlu0 %v7085_v16, %s8161_s30  ;;  %v7175_v15 = vpack.i.bf16 %v503_v7, %v501_v6  ;;  %v539_v16 = vld [vmem:[#allocation2 + $0x271] ss:$2 sm:$0xff]  ;;  %v571_v21 = vld [vmem:[#allocation2 + $0x272] ss:$2 sm:$0xff]  ;;  %v388_v32 = vld [vmem:[#allocation2 + $0x302] ss:$2 sm:$0xff] }
  0x72   :  { %v7190_v19 = vpack.i.bf16 %v539_v16, %v537_v11  ;;  %v386_v31 = vld [vmem:[#allocation2 + $0x2d2] ss:$2 sm:$0xff]  ;;  %v384_v34 = vld [vmem:[#allocation2 + $0x2a2] ss:$2 sm:$0xff]  ;;  %v449_v43 = vld [vmem:[#allocation2 + $0x2e9] ss:$2 sm:$0xff] }
  0x73   :  { %v382_v33 = vld [vmem:[#allocation2 + $0x272] ss:$2 sm:$0xff]  ;;  %v7220_v35 = vpack.i.bf16 %v388_v32, %v386_v31  ;;  %v451_v44 = vld [vmem:[#allocation2 + $0x319] ss:$2 sm:$0xff]  ;;  %v445_v45 = vld [vmem:[#allocation2 + $0x289] ss:$2 sm:$0xff] }
  0x74   :  { %v7215_v36 = vpack.i.bf16 %v384_v34, %v382_v33  ;;  %v413_v39 = vld [vmem:[#allocation2 + $0x288] ss:$2 sm:$0xff]  ;;  %v415_v40 = vld [vmem:[#allocation2 + $0x2b8] ss:$2 sm:$0xff]  ;;  %v447_v46 = vld [vmem:[#allocation2 + $0x2b9] ss:$2 sm:$0xff] }
  0x75   :  { %7101 = vrot.lane.b32.xlu1 %v7100_v22, %s8162_s4  ;;  %7096 = vrot.lane.b32.xlu0 %v7095_v23, %s8162_s4  ;;  %v565_v22 = vld [vmem:[#allocation2 + $0x1e2] ss:$2 sm:$0xff]  ;;  %v7200_v23 = vpack.i.bf16 %v571_v21, %v569_v17  ;;  %v7225_v42 = vpack.i.bf16 %v415_v40, %v413_v39  ;;  %v543_v61 = vld [vmem:[#allocation2 + $0x2d1] ss:$2 sm:$0xff]  ;;  %v545_v62 = vld [vmem:[#allocation2 + $0x301] ss:$2 sm:$0xff] }
  0x76   :  { %v7195_v24 = vpack.i.bf16 %v567_v18, %v565_v22  ;;  %v481_v49 = vld [vmem:[#allocation2 + $0x2ea] ss:$2 sm:$0xff]  ;;  %v483_v50 = vld [vmem:[#allocation2 + $0x31a] ss:$2 sm:$0xff]  ;;  %v547_v63 = vld [vmem:[#allocation2 + $0x331] ss:$2 sm:$0xff] }
  0x77   :  { %v477_v51 = vld [vmem:[#allocation2 + $0x28a] ss:$2 sm:$0xff]  ;;  %v479_v52 = vld [vmem:[#allocation2 + $0x2ba] ss:$2 sm:$0xff]  ;;  %v541_v0 = vld [vmem:[#allocation2 + $0x2a1] ss:$2 sm:$0xff]  ;;  %v7270_v4 = vpack.i.bf16 %v547_v63, %v545_v62 }
  0x78   :  { %v511_v55 = vld [vmem:[#allocation2 + $0x2d0] ss:$2 sm:$0xff]  ;;  %v513_v56 = vld [vmem:[#allocation2 + $0x300] ss:$2 sm:$0xff]  ;;  %v7265_v5 = vpack.i.bf16 %v543_v61, %v541_v0  ;;  %1513 = vst.msk [vmem:[#allocation3 + $0x20] sm:$0x1] %vm1511_vm14, %v8157_v1 }
  0x79   :  { %7111 = vrot.lane.b32.xlu1 %v7110_v28, %s11051_s0  ;;  %7106 = vrot.lane.b32.xlu0 %v7105_v29, %s11051_s0  ;;  %v352_v28 = vld [vmem:[#allocation2 + $0x2a1] ss:$2 sm:$0xff]  ;;  %v7210_v29 = vpack.i.bf16 %v356_v26, %v354_v25  ;;  %v515_v57 = vld [vmem:[#allocation2 + $0x330] ss:$2 sm:$0xff]  ;;  %v509_v58 = vld [vmem:[#allocation2 + $0x2a0] ss:$2 sm:$0xff] }
  0x7a   :  { %v7205_v30 = vpack.i.bf16 %v352_v28, %v350_v27  ;;  %v575_v6 = vld [vmem:[#allocation2 + $0x2d2] ss:$2 sm:$0xff]  ;;  %v577_v7 = vld [vmem:[#allocation2 + $0x302] ss:$2 sm:$0xff]  ;;  %1514 = vst.msk [vmem:[#allocation3 + $0x30] sm:$0x1] %vm1511_vm14, %v8157_v1 }
  0x7b   :  { %v294_v18 = vld [vmem:[#allocation2] ss:$2 sm:$0xff]  ;;  %v300_v25 = vld [vmem:[#allocation2 + $0x90] ss:$2 sm:$0xff]  ;;  %1515 = vst.msk [vmem:[#allocation3 + $0x40] sm:$0x1] %vm1511_vm14, %v8157_v1 }
  0x7c   :  { %1516 = vst.msk [vmem:[#allocation3 + $0x50] sm:$0x1] %vm1511_vm14, %v8157_v1  ;;  %1517 = vst.msk [vmem:[#allocation3 + $0x60] sm:$0x1] %vm1511_vm14, %v8157_v1  ;;  %s8167_s19 = smov 120   ;;  %vm2250_vm6 = vcmask 588800  }
  0x7d   :  { %7121 = vrot.lane.b32.xlu1 %v7120_v37, %s8164_s20  ;;  %7116 = vrot.lane.b32.xlu0 %v7115_v38, %s8164_s20  ;;  %v417_v37 = vld [vmem:[#allocation2 + $0x2e8] ss:$2 sm:$0xff]  ;;  %v419_v38 = vld [vmem:[#allocation2 + $0x318] ss:$2 sm:$0xff]  ;;  %1518 = vst.msk [vmem:[#allocation3 + $0x70] sm:$0x1] %vm1511_vm14, %v8157_v1 }
  0x7e   :  { %v7230_v41 = vpack.i.bf16 %v419_v38, %v417_v37  ;;  %1519 = vst.msk [vmem:[#allocation3 + $0x80] sm:$0x1] %vm1511_vm14, %v8157_v1  ;;  %1520 = vst.msk [vmem:[#allocation3 + $0xb0] sm:$0x1] %vm1511_vm14, %v8157_v1 }
  0x7f   :  { %1521 = vst.msk [vmem:[#allocation3 + $0xc0] sm:$0x1] %vm1511_vm14, %v8157_v1  ;;  %1522 = vst.msk [vmem:[#allocation3 + $0xd0] sm:$0x1] %vm1511_vm14, %v8157_v1 }
  0x80   :  { %1523 = vst.msk [vmem:[#allocation3 + $0xe0] sm:$0x1] %vm1511_vm14, %v8157_v1  ;;  %1524 = vst.msk [vmem:[#allocation3 + $0xf0] sm:$0x1] %vm1511_vm14, %v8157_v1 }
  0x81   :  { %7131 = vrot.lane.b32.xlu1 %v7130_v47, %s8158_s24  ;;  %7126 = vrot.lane.b32.xlu0 %v7125_v48, %s8158_s24  ;;  %v7240_v47 = vpack.i.bf16 %v451_v44, %v449_v43  ;;  %v7235_v48 = vpack.i.bf16 %v447_v46, %v445_v45  ;;  %1525 = vst.msk [vmem:[#allocation3 + $0x100] sm:$0x1] %vm1511_vm14, %v8157_v1  ;;  %1526 = vst.msk [vmem:[#allocation3 + $0x110] sm:$0x1] %vm1511_vm14, %v8157_v1 }
  0x82   :  { %1527 = vst.msk [vmem:[#allocation3 + $0x120] sm:$0x1] %vm1511_vm14, %v8157_v1  ;;  %1529 = vst.msk [vmem:[#allocation3 + $0x29] sm:$0x1] %vm1511_vm14, %v8157_v1 }
  0x83   :  { %1530 = vst.msk [vmem:[#allocation3 + $0x39] sm:$0x1] %vm1511_vm14, %v8157_v1  ;;  %1531 = vst.msk [vmem:[#allocation3 + $0x49] sm:$0x1] %vm1511_vm14, %v8157_v1 }
  0x84   :  { %1532 = vst.msk [vmem:[#allocation3 + $0x59] sm:$0x1] %vm1511_vm14, %v8157_v1  ;;  %1533 = vst.msk [vmem:[#allocation3 + $0x69] sm:$0x1] %vm1511_vm14, %v8157_v1 }
  0x85   :  { %7141 = vrot.lane.b32.xlu1 %v7140_v53, %s8156_s23  ;;  %7136 = vrot.lane.b32.xlu0 %v7135_v54, %s8156_s23  ;;  %v7250_v53 = vpack.i.bf16 %v483_v50, %v481_v49  ;;  %v7245_v54 = vpack.i.bf16 %v479_v52, %v477_v51  ;;  %1534 = vst.msk [vmem:[#allocation3 + $0x79] sm:$0x1] %vm1511_vm14, %v8157_v1  ;;  %1535 = vst.msk [vmem:[#allocation3 + $0x89] sm:$0x1] %vm1511_vm14, %v8157_v1 }
  0x86   :  { %1536 = vst.msk [vmem:[#allocation3 + $0xb9] sm:$0x1] %vm1511_vm14, %v8157_v1  ;;  %1537 = vst.msk [vmem:[#allocation3 + $0xc9] sm:$0x1] %vm1511_vm14, %v8157_v1 }
  0x87   :  { %1538 = vst.msk [vmem:[#allocation3 + $0xd9] sm:$0x1] %vm1511_vm14, %v8157_v1  ;;  %1539 = vst.msk [vmem:[#allocation3 + $0xe9] sm:$0x1] %vm1511_vm14, %v8157_v1 }
  0x88   :  { %1540 = vst.msk [vmem:[#allocation3 + $0xf9] sm:$0x1] %vm1511_vm14, %v8157_v1  ;;  %1541 = vst.msk [vmem:[#allocation3 + $0x109] sm:$0x1] %vm1511_vm14, %v8157_v1 }
  0x89   :  { %7151 = vrot.lane.b32.xlu1 %v7150_v59, %s11052_s1  ;;  %7146 = vrot.lane.b32.xlu0 %v7145_v60, %s11052_s1  ;;  %v7260_v59 = vpack.i.bf16 %v515_v57, %v513_v56  ;;  %v7255_v60 = vpack.i.bf16 %v511_v55, %v509_v58  ;;  %1542 = vst.msk [vmem:[#allocation3 + $0x119] sm:$0x1] %vm1511_vm14, %v8157_v1  ;;  %1543 = vst.msk [vmem:[#allocation3 + $0x129] sm:$0x1] %vm1511_vm14, %v8157_v1 }
  0x8a   :  { %1502 = vst.msk [vmem:[#allocation3 + $0x8] sm:$0x3] %vm1501_vm15, %v8157_v1  ;;  %1504 = vst.msk [vmem:[#allocation3 + $0xa8] sm:$0x3] %vm1501_vm15, %v8157_v1 }
  0x8b   :  { %1507 = vst.msk [vmem:[#allocation3 + $0x98] sm:$0x3] %vm1501_vm15, %v8157_v1  ;;  %1509 = vst.msk [vmem:[#allocation3 + $0x138] sm:$0x3] %vm1501_vm15, %v8157_v1 }
  0x8d   :  { %7161 = vrot.lane.b32.xlu1 %v7160_v2, %s8160_s26  ;;  %7156 = vrot.lane.b32.xlu0 %v7155_v3, %s8160_s26 }
  0x91   :  { %7171 = vrot.lane.b32.xlu1 %v7170_v8, %s8161_s30  ;;  %7166 = vrot.lane.b32.xlu0 %v7165_v9, %s8161_s30  ;;  %v579_v8 = vld [vmem:[#allocation2 + $0x332] ss:$2 sm:$0xff]  ;;  %v573_v9 = vld [vmem:[#allocation2 + $0x2a2] ss:$2 sm:$0xff] }
  0x92   :  { %v7280_v12 = vpack.i.bf16 %v579_v8, %v577_v7  ;;  %v7275_v13 = vpack.i.bf16 %v575_v6, %v573_v9 }
  0x95   :  { %7181 = vrot.lane.b32.xlu1 %v7180_v14, %s8162_s4  ;;  %7176 = vrot.lane.b32.xlu0 %v7175_v15, %s8162_s4 }
  0x99   :  { %7191 = vrot.lane.b32.xlu1 %v7190_v19, %s11051_s0  ;;  %7186 = vrot.lane.b32.xlu0 %v7185_v20, %s11051_s0 }
  0x9d   :  { %7201 = vrot.lane.b32.xlu1 %v7200_v23, %s8164_s20  ;;  %7196 = vrot.lane.b32.xlu0 %v7195_v24, %s8164_s20  ;;  %v296_v23 = vld [vmem:[#allocation2 + $0x30] ss:$2 sm:$0xff]  ;;  %v298_v24 = vld [vmem:[#allocation2 + $0x60] ss:$2 sm:$0xff] }
  0xa1   :  { %7211 = vrot.lane.b32.xlu1 %v7210_v29, %s8158_s24  ;;  %7206 = vrot.lane.b32.xlu0 %v7205_v30, %s8158_s24  ;;  %s8168_s24 = smov 40  }
  0xa5   :  { %7221 = vrot.lane.b32.xlu1 %v7220_v35, %s8156_s23  ;;  %7216 = vrot.lane.b32.xlu0 %v7215_v36, %s8156_s23 }
  0xa9   :  { %7231 = vrot.lane.b32.xlu1 %v7230_v41, %s11052_s1  ;;  %7226 = vrot.lane.b32.xlu0 %v7225_v42, %s11052_s1  ;;  %s11056_s1 = sld [smem:[#allocation86_spill]] }
  0xad   :  { %7241 = vrot.lane.b32.xlu1 %v7240_v47, %s8160_s26  ;;  %7236 = vrot.lane.b32.xlu0 %v7235_v48, %s8160_s26 }
  0xb1   :  { %7251 = vrot.lane.b32.xlu1 %v7250_v53, %s8161_s30  ;;  %7246 = vrot.lane.b32.xlu0 %v7245_v54, %s8161_s30  ;;  %s11053_s30 = sld [smem:[#allocation84_spill]] }
  0xb3   :  { %v6977_v2 = vpop.permute.xlu1 %6976  ;;  %v6967_v3 = vpop.permute.xlu0 %6966 }
  0xb4   :  { %v6969_v19 = vunpack.i.h.bf16 %v6967_v3  ;;  %v6968_v20 = vunpack.i.l.bf16 %v6967_v3  ;;  %v6979_v26 = vunpack.i.h.bf16 %v6977_v2  ;;  %v6978_v27 = vunpack.i.l.bf16 %v6977_v2 }
  0xb5   :  { %7261 = vrot.lane.b32.xlu1 %v7260_v59, %s8162_s4  ;;  %7256 = vrot.lane.b32.xlu0 %v7255_v60, %s8162_s4 }
  0xb6   :  { %v1092_v32 = vsel %vm149_vm0, %v294_v18, %v6968_v20  ;;  %v1093_v33 = vsel %vm149_vm0, %v296_v23, %v6969_v19 }
  0xb7   :  { %v6982_v10 = vpop.permute.xlu1 %6981  ;;  %v6972_v11 = vpop.permute.xlu0 %6971  ;;  %v1109_v42 = vsel %vm1108_vm7, %v1092_v32, %v6978_v27  ;;  %v1110_v43 = vsel %vm1108_vm7, %v1093_v33, %v6979_v26 }
  0xb8   :  { %v6974_v21 = vunpack.i.h.bf16 %v6972_v11  ;;  %v6973_v22 = vunpack.i.l.bf16 %v6972_v11  ;;  %v6984_v28 = vunpack.i.h.bf16 %v6982_v10  ;;  %v6983_v29 = vunpack.i.l.bf16 %v6982_v10 }
  0xb9   :  { %7271 = vrot.lane.b32.xlu1 %v7270_v4, %s11051_s0  ;;  %7266 = vrot.lane.b32.xlu0 %v7265_v5, %s11051_s0 }
  0xba   :  { %v1095_v34 = vsel %vm149_vm0, %v300_v25, %v6974_v21  ;;  %v1094_v35 = vsel %vm149_vm0, %v298_v24, %v6973_v22 }
  0xbb   :  { %v6992_v14 = vpop.permute.xlu1 %6991  ;;  %v6987_v15 = vpop.permute.xlu0 %6986  ;;  %v1111_v40 = vsel %vm1108_vm7, %v1094_v35, %v6983_v29  ;;  %v1112_v41 = vsel %vm1108_vm7, %v1095_v34, %v6984_v28 }
  0xbc   :  { %v6994_v36 = vunpack.i.h.bf16 %v6992_v14  ;;  %v6993_v37 = vunpack.i.l.bf16 %v6992_v14  ;;  %v6989_v38 = vunpack.i.h.bf16 %v6987_v15  ;;  %v6988_v39 = vunpack.i.l.bf16 %v6987_v15 }
  0xbd   :  { %7281 = vrot.lane.b32.xlu1 %v7280_v12, %s8164_s20  ;;  %7276 = vrot.lane.b32.xlu0 %v7275_v13, %s8164_s20 }
  0xbe   :  { %v1128_v50 = vsel %vm1125_vm8, %v1111_v40, %v6993_v37  ;;  %v1129_v51 = vsel %vm1125_vm8, %v1112_v41, %v6994_v36  ;;  %v1127_v52 = vsel %vm1125_vm8, %v1110_v43, %v6989_v38  ;;  %v1126_v53 = vsel %vm1125_vm8, %v1109_v42, %v6988_v39  ;;  %v306_v41 = vld [vmem:[#allocation2 + $0x120] ss:$2 sm:$0xff] }
  0xbf   :  { %v7002_v16 = vpop.permute.xlu1 %7001  ;;  %v6997_v17 = vpop.permute.xlu0 %6996 }
  0xc0   :  { %v7004_v46 = vunpack.i.h.bf16 %v7002_v16  ;;  %v7003_v47 = vunpack.i.l.bf16 %v7002_v16  ;;  %v6999_v48 = vunpack.i.h.bf16 %v6997_v17  ;;  %v6998_v49 = vunpack.i.l.bf16 %v6997_v17 }
  0xc2   :  { %v1145_v0 = vsel %vm1142_vm9, %v1128_v50, %v7003_v47  ;;  %v1146_v2 = vsel %vm1142_vm9, %v1129_v51, %v7004_v46  ;;  %v1143_v3 = vsel %vm1142_vm9, %v1126_v53, %v6998_v49  ;;  %v1144_v4 = vsel %vm1142_vm9, %v1127_v52, %v6999_v48  ;;  %v308_v46 = vld [vmem:[#allocation2 + $0x150] ss:$2 sm:$0xff]  ;;  %v302_v47 = vld [vmem:[#allocation2 + $0xc0] ss:$2 sm:$0xff] }
  0xc3   :  { %v7012_v30 = vpop.permute.xlu1 %7011  ;;  %v7007_v31 = vpop.permute.xlu0 %7006  ;;  %v304_v48 = vld [vmem:[#allocation2 + $0xf0] ss:$2 sm:$0xff] }
  0xc4   :  { %v7014_v54 = vunpack.i.h.bf16 %v7012_v30  ;;  %v7013_v55 = vunpack.i.l.bf16 %v7012_v30  ;;  %v7009_v56 = vunpack.i.h.bf16 %v7007_v31  ;;  %v7008_v57 = vunpack.i.l.bf16 %v7007_v31 }
  0xc6   :  { %v1162_v9 = vsel %vm1159_vm10, %v1145_v0, %v7013_v55  ;;  %v1163_v10 = vsel %vm1159_vm10, %v1146_v2, %v7014_v54  ;;  %v1160_v11 = vsel %vm1159_vm10, %v1143_v3, %v7008_v57  ;;  %v1161_v12 = vsel %vm1159_vm10, %v1144_v4, %v7009_v56 }
  0xc7   :  { %v7022_v44 = vpop.permute.xlu1 %7021  ;;  %v7017_v45 = vpop.permute.xlu0 %7016 }
  0xc8   :  { %v7024_v58 = vunpack.i.h.bf16 %v7022_v44  ;;  %v7023_v59 = vunpack.i.l.bf16 %v7022_v44  ;;  %v7019_v60 = vunpack.i.h.bf16 %v7017_v45  ;;  %v7018_v61 = vunpack.i.l.bf16 %v7017_v45 }
  0xca   :  { %v1179_v13 = vsel %vm1176_vm5, %v1162_v9, %v7023_v59  ;;  %v1180_v14 = vsel %vm1176_vm5, %v1163_v10, %v7024_v58  ;;  %v1177_v17 = vsel %vm1176_vm5, %v1160_v11, %v7018_v61  ;;  %v1178_v18 = vsel %vm1176_vm5, %v1161_v12, %v7019_v60 }
  0xcb   :  { %v7032_v62 = vpop.permute.xlu1 %7031  ;;  %v7027_v63 = vpop.permute.xlu0 %7026 }
  0xcc   :  { %v7034_v5 = vunpack.i.h.bf16 %v7032_v62  ;;  %v7033_v6 = vunpack.i.l.bf16 %v7032_v62  ;;  %v7029_v7 = vunpack.i.h.bf16 %v7027_v63  ;;  %v7028_v8 = vunpack.i.l.bf16 %v7027_v63 }
  0xce   :  { %v1196_v23 = vsel %vm1193_vm11, %v1179_v13, %v7033_v6  ;;  %v1197_v24 = vsel %vm1193_vm11, %v1180_v14, %v7034_v5  ;;  %v1194_v25 = vsel %vm1193_vm11, %v1177_v17, %v7028_v8  ;;  %v1195_v26 = vsel %vm1193_vm11, %v1178_v18, %v7029_v7 }
  0xcf   :  { %v7042_v15 = vpop.permute.xlu1 %7041  ;;  %v7037_v16 = vpop.permute.xlu0 %7036 }
  0xd0   :  { %v7044_v19 = vunpack.i.h.bf16 %v7042_v15  ;;  %v7043_v20 = vunpack.i.l.bf16 %v7042_v15  ;;  %v7039_v21 = vunpack.i.h.bf16 %v7037_v16  ;;  %v7038_v22 = vunpack.i.l.bf16 %v7037_v16 }
  0xd2   :  { %v1213_v27 = vsel %vm1210_vm12, %v1196_v23, %v7043_v20  ;;  %v1214_v28 = vsel %vm1210_vm12, %v1197_v24, %v7044_v19  ;;  %v1211_v29 = vsel %vm1210_vm12, %v1194_v25, %v7038_v22  ;;  %v1212_v30 = vsel %vm1210_vm12, %v1195_v26, %v7039_v21 }
  0xd3   :  { %v7052_v31 = vpop.permute.xlu1 %7051  ;;  %v7047_v32 = vpop.permute.xlu0 %7046  ;;  %v1227_v33 = vpack.c.bf16 %v1212_v30, %v1211_v29  ;;  %v1228_v34 = vpack.c.bf16 %v1214_v28, %v1213_v27 }
  0xd4   :  { %v7054_v42 = vunpack.i.h.bf16 %v7052_v31  ;;  %v7053_v43 = vunpack.i.l.bf16 %v7052_v31  ;;  %v7049_v44 = vunpack.i.h.bf16 %v7047_v32  ;;  %v7048_v45 = vunpack.i.l.bf16 %v7047_v32 }
  0xd5   :  { %6636 = vmatprep.mubr.msk.bf16.mxu0 %vm1262_vm13, %v1227_v33 }
  0xd6   :  { %6637 = vmatmul.mubr.msk.bf16.vlgmr.msra.gmra.mrb[0].mxu0 %vm1262_vm13, %v1228_v34  ;;  %v1099_v59 = vsel %vm149_vm0, %v308_v46, %v7054_v42  ;;  %v1098_v60 = vsel %vm149_vm0, %v306_v41, %v7053_v43  ;;  %v1097_v61 = vsel %vm149_vm0, %v304_v48, %v7049_v44  ;;  %v1096_v62 = vsel %vm149_vm0, %v302_v47, %v7048_v45 }
  0xd7   :  { %v7062_v35 = vpop.permute.xlu1 %7061  ;;  %v7057_v36 = vpop.permute.xlu0 %7056 }
  0xd8   :  { %v7064_v49 = vunpack.i.h.bf16 %v7062_v35  ;;  %v7063_v50 = vunpack.i.l.bf16 %v7062_v35  ;;  %v7059_v51 = vunpack.i.h.bf16 %v7057_v36  ;;  %v7058_v52 = vunpack.i.l.bf16 %v7057_v36 }
  0xda   :  { %v1115_v63 = vsel %vm1108_vm7, %v1098_v60, %v7063_v50  ;;  %v1116_v0 = vsel %vm1108_vm7, %v1099_v59, %v7064_v49  ;;  %v1113_v2 = vsel %vm1108_vm7, %v1096_v62, %v7058_v52  ;;  %v1114_v3 = vsel %vm1108_vm7, %v1097_v61, %v7059_v51 }
  0xdb   :  { %v7072_v37 = vpop.permute.xlu1 %7071  ;;  %v7067_v38 = vpop.permute.xlu0 %7066 }
  0xdc   :  { %v7074_v55 = vunpack.i.h.bf16 %v7072_v37  ;;  %v7073_v56 = vunpack.i.l.bf16 %v7072_v37  ;;  %v7069_v57 = vunpack.i.h.bf16 %v7067_v38  ;;  %v7068_v58 = vunpack.i.l.bf16 %v7067_v38 }
  0xde   :  { %v1132_v10 = vsel %vm1125_vm8, %v1115_v63, %v7073_v56  ;;  %v1133_v11 = vsel %vm1125_vm8, %v1116_v0, %v7074_v55  ;;  %v1130_v12 = vsel %vm1125_vm8, %v1113_v2, %v7068_v58  ;;  %v1131_v13 = vsel %vm1125_vm8, %v1114_v3, %v7069_v57  ;;  %v314_v0 = vld [vmem:[#allocation2 + $0x210] ss:$2 sm:$0xff] }
  0xdf   :  { %v7082_v39 = vpop.permute.xlu1 %7081  ;;  %v7077_v40 = vpop.permute.xlu0 %7076 }
  0xe0   :  { %v7084_v6 = vunpack.i.h.bf16 %v7082_v39  ;;  %v7083_v7 = vunpack.i.l.bf16 %v7082_v39  ;;  %v7079_v8 = vunpack.i.h.bf16 %v7077_v40  ;;  %v7078_v9 = vunpack.i.l.bf16 %v7077_v40 }
  0xe2   :  { %v1149_v24 = vsel %vm1142_vm9, %v1132_v10, %v7083_v7  ;;  %v1150_v25 = vsel %vm1142_vm9, %v1133_v11, %v7084_v6  ;;  %v1147_v26 = vsel %vm1142_vm9, %v1130_v12, %v7078_v9  ;;  %v1148_v27 = vsel %vm1142_vm9, %v1131_v13, %v7079_v8  ;;  %v316_v6 = vld [vmem:[#allocation2 + $0x240] ss:$2 sm:$0xff]  ;;  %v310_v7 = vld [vmem:[#allocation2 + $0x1b0] ss:$2 sm:$0xff] }
  0xe3   :  { %v7092_v53 = vpop.permute.xlu1 %7091  ;;  %v7087_v54 = vpop.permute.xlu0 %7086  ;;  %v312_v8 = vld [vmem:[#allocation2 + $0x1e0] ss:$2 sm:$0xff] }
  0xe4   :  { %v7094_v14 = vunpack.i.h.bf16 %v7092_v53  ;;  %v7093_v15 = vunpack.i.l.bf16 %v7092_v53  ;;  %v7089_v16 = vunpack.i.h.bf16 %v7087_v54  ;;  %v7088_v17 = vunpack.i.l.bf16 %v7087_v54 }
  0xe6   :  { %v1166_v32 = vsel %vm1159_vm10, %v1149_v24, %v7093_v15  ;;  %v1167_v33 = vsel %vm1159_vm10, %v1150_v25, %v7094_v14  ;;  %v1164_v34 = vsel %vm1159_vm10, %v1147_v26, %v7088_v17  ;;  %v1165_v35 = vsel %vm1159_vm10, %v1148_v27, %v7089_v16 }
  0xe7   :  { %v7102_v4 = vpop.permute.xlu1 %7101  ;;  %v7097_v5 = vpop.permute.xlu0 %7096 }
  0xe8   :  { %v7104_v18 = vunpack.i.h.bf16 %v7102_v4  ;;  %v7103_v19 = vunpack.i.l.bf16 %v7102_v4  ;;  %v7099_v20 = vunpack.i.h.bf16 %v7097_v5  ;;  %v7098_v21 = vunpack.i.l.bf16 %v7097_v5 }
  0xea   :  { %v1183_v36 = vsel %vm1176_vm5, %v1166_v32, %v7103_v19  ;;  %v1184_v37 = vsel %vm1176_vm5, %v1167_v33, %v7104_v18  ;;  %v1181_v38 = vsel %vm1176_vm5, %v1164_v34, %v7098_v21  ;;  %v1182_v39 = vsel %vm1176_vm5, %v1165_v35, %v7099_v20 }
  0xeb   :  { %v7112_v22 = vpop.permute.xlu1 %7111  ;;  %v7107_v23 = vpop.permute.xlu0 %7106 }
  0xec   :  { %v7114_v28 = vunpack.i.h.bf16 %v7112_v22  ;;  %v7113_v29 = vunpack.i.l.bf16 %v7112_v22  ;;  %v7109_v30 = vunpack.i.h.bf16 %v7107_v23  ;;  %v7108_v31 = vunpack.i.l.bf16 %v7107_v23 }
  0xee   :  { %v1200_v46 = vsel %vm1193_vm11, %v1183_v36, %v7113_v29  ;;  %v1201_v47 = vsel %vm1193_vm11, %v1184_v37, %v7114_v28  ;;  %v1198_v48 = vsel %vm1193_vm11, %v1181_v38, %v7108_v31  ;;  %v1199_v49 = vsel %vm1193_vm11, %v1182_v39, %v7109_v30 }
  0xef   :  { %v7122_v40 = vpop.permute.xlu1 %7121  ;;  %v7117_v41 = vpop.permute.xlu0 %7116 }
  0xf0   :  { %v7124_v42 = vunpack.i.h.bf16 %v7122_v40  ;;  %v7123_v43 = vunpack.i.l.bf16 %v7122_v40  ;;  %v7119_v44 = vunpack.i.h.bf16 %v7117_v41  ;;  %v7118_v45 = vunpack.i.l.bf16 %v7117_v41 }
  0xf2   :  { %v1217_v50 = vsel %vm1210_vm12, %v1200_v46, %v7123_v43  ;;  %v1218_v51 = vsel %vm1210_vm12, %v1201_v47, %v7124_v42  ;;  %v1215_v52 = vsel %vm1210_vm12, %v1198_v48, %v7118_v45  ;;  %v1216_v53 = vsel %vm1210_vm12, %v1199_v49, %v7119_v44 }
  0xf3   :  { %v1230_v54 = vpack.c.bf16 %v1218_v51, %v1217_v50  ;;  %v1229_v55 = vpack.c.bf16 %v1216_v53, %v1215_v52  ;;  %v7132_v56 = vpop.permute.xlu1 %7131  ;;  %v7127_v57 = vpop.permute.xlu0 %7126 }
  0xf4   :  { %v7134_v2 = vunpack.i.h.bf16 %v7132_v56  ;;  %v7133_v3 = vunpack.i.l.bf16 %v7132_v56  ;;  %v7129_v4 = vunpack.i.h.bf16 %v7127_v57  ;;  %v7128_v5 = vunpack.i.l.bf16 %v7127_v57 }
  0xf5   :  { %6640 = vmatprep.mubr.msk.bf16.mxu0 %vm1262_vm13, %v1229_v55 }
  0xf6   :  { %6641 = vmatmul.mubr.msk.bf16.gmra.mrb[4].mxu0 %vm1262_vm13, %v1230_v54  ;;  %v1103_v19 = vsel %vm149_vm0, %v316_v6, %v7134_v2  ;;  %v1102_v20 = vsel %vm149_vm0, %v314_v0, %v7133_v3  ;;  %v1101_v21 = vsel %vm149_vm0, %v312_v8, %v7129_v4  ;;  %v1100_v22 = vsel %vm149_vm0, %v310_v7, %v7128_v5 }
  0xf7   :  { %v7142_v58 = vpop.permute.xlu1 %7141  ;;  %v7137_v59 = vpop.permute.xlu0 %7136 }
  0xf8   :  { %v7144_v9 = vunpack.i.h.bf16 %v7142_v58  ;;  %v7143_v10 = vunpack.i.l.bf16 %v7142_v58  ;;  %v7139_v11 = vunpack.i.h.bf16 %v7137_v59  ;;  %v7138_v12 = vunpack.i.l.bf16 %v7137_v59 }
  0xfa   :  { %v1119_v23 = vsel %vm1108_vm7, %v1102_v20, %v7143_v10  ;;  %v1120_v24 = vsel %vm1108_vm7, %v1103_v19, %v7144_v9  ;;  %v1117_v25 = vsel %vm1108_vm7, %v1100_v22, %v7138_v12  ;;  %v1118_v26 = vsel %vm1108_vm7, %v1101_v21, %v7139_v11 }
  0xfb   :  { %v7152_v60 = vpop.permute.xlu1 %7151  ;;  %v7147_v61 = vpop.permute.xlu0 %7146 }
  0xfc   :  { %v7154_v15 = vunpack.i.h.bf16 %v7152_v60  ;;  %v7153_v16 = vunpack.i.l.bf16 %v7152_v60  ;;  %v7149_v17 = vunpack.i.h.bf16 %v7147_v61  ;;  %v7148_v18 = vunpack.i.l.bf16 %v7147_v61 }
  0xfe   :  { %v1136_v33 = vsel %vm1125_vm8, %v1119_v23, %v7153_v16  ;;  %v1137_v34 = vsel %vm1125_vm8, %v1120_v24, %v7154_v15  ;;  %v1134_v35 = vsel %vm1125_vm8, %v1117_v25, %v7148_v18  ;;  %v1135_v36 = vsel %vm1125_vm8, %v1118_v26, %v7149_v17  ;;  %v322_v24 = vld [vmem:[#allocation2 + $0x2d0] ss:$2 sm:$0xff] }
  0xff   :  { %v7162_v62 = vpop.permute.xlu1 %7161  ;;  %v7157_v63 = vpop.permute.xlu0 %7156 }
 0x100   :  { %v7164_v29 = vunpack.i.h.bf16 %v7162_v62  ;;  %v7163_v30 = vunpack.i.l.bf16 %v7162_v62  ;;  %v7159_v31 = vunpack.i.h.bf16 %v7157_v63  ;;  %v7158_v32 = vunpack.i.l.bf16 %v7157_v63 }
 0x102   :  { %v1153_v47 = vsel %vm1142_vm9, %v1136_v33, %v7163_v30  ;;  %v1154_v48 = vsel %vm1142_vm9, %v1137_v34, %v7164_v29  ;;  %v1151_v49 = vsel %vm1142_vm9, %v1134_v35, %v7158_v32  ;;  %v1152_v50 = vsel %vm1142_vm9, %v1135_v36, %v7159_v31  ;;  %v324_v29 = vld [vmem:[#allocation2 + $0x300] ss:$2 sm:$0xff]  ;;  %v318_v30 = vld [vmem:[#allocation2 + $0x270] ss:$2 sm:$0xff] }
 0x103   :  { %v7172_v13 = vpop.permute.xlu1 %7171  ;;  %v7167_v14 = vpop.permute.xlu0 %7166  ;;  %v320_v31 = vld [vmem:[#allocation2 + $0x2a0] ss:$2 sm:$0xff] }
 0x104   :  { %v7174_v37 = vunpack.i.h.bf16 %v7172_v13  ;;  %v7173_v38 = vunpack.i.l.bf16 %v7172_v13  ;;  %v7169_v39 = vunpack.i.h.bf16 %v7167_v14  ;;  %v7168_v40 = vunpack.i.l.bf16 %v7167_v14 }
 0x106   :  { %v1170_v55 = vsel %vm1159_vm10, %v1153_v47, %v7173_v38  ;;  %v1171_v56 = vsel %vm1159_vm10, %v1154_v48, %v7174_v37  ;;  %v1168_v57 = vsel %vm1159_vm10, %v1151_v49, %v7168_v40  ;;  %v1169_v58 = vsel %vm1159_vm10, %v1152_v50, %v7169_v39 }
 0x107   :  { %v7182_v27 = vpop.permute.xlu1 %7181  ;;  %v7177_v28 = vpop.permute.xlu0 %7176 }
 0x108   :  { %v7184_v41 = vunpack.i.h.bf16 %v7182_v27  ;;  %v7183_v42 = vunpack.i.l.bf16 %v7182_v27  ;;  %v7179_v43 = vunpack.i.h.bf16 %v7177_v28  ;;  %v7178_v44 = vunpack.i.l.bf16 %v7177_v28 }
 0x10a   :  { %v1187_v59 = vsel %vm1176_vm5, %v1170_v55, %v7183_v42  ;;  %v1188_v60 = vsel %vm1176_vm5, %v1171_v56, %v7184_v41  ;;  %v1185_v61 = vsel %vm1176_vm5, %v1168_v57, %v7178_v44  ;;  %v1186_v62 = vsel %vm1176_vm5, %v1169_v58, %v7179_v43 }
 0x10b   :  { %v7192_v45 = vpop.permute.xlu1 %7191  ;;  %v7187_v46 = vpop.permute.xlu0 %7186 }
 0x10c   :  { %v7194_v51 = vunpack.i.h.bf16 %v7192_v45  ;;  %v7193_v52 = vunpack.i.l.bf16 %v7192_v45  ;;  %v7189_v53 = vunpack.i.h.bf16 %v7187_v46  ;;  %v7188_v54 = vunpack.i.l.bf16 %v7187_v46 }
 0x10e   :  { %v1204_v6 = vsel %vm1193_vm11, %v1187_v59, %v7193_v52  ;;  %v1205_v7 = vsel %vm1193_vm11, %v1188_v60, %v7194_v51  ;;  %v1202_v8 = vsel %vm1193_vm11, %v1185_v61, %v7188_v54  ;;  %v1203_v9 = vsel %vm1193_vm11, %v1186_v62, %v7189_v53 }
 0x10f   :  { %v7202_v63 = vpop.permute.xlu1 %7201  ;;  %v7197_v0 = vpop.permute.xlu0 %7196 }
 0x110   :  { %v7204_v2 = vunpack.i.h.bf16 %v7202_v63  ;;  %v7203_v3 = vunpack.i.l.bf16 %v7202_v63  ;;  %v7199_v4 = vunpack.i.h.bf16 %v7197_v0  ;;  %v7198_v5 = vunpack.i.l.bf16 %v7197_v0 }
 0x112   :  { %v1221_v10 = vsel %vm1210_vm12, %v1204_v6, %v7203_v3  ;;  %v1222_v11 = vsel %vm1210_vm12, %v1205_v7, %v7204_v2  ;;  %v1219_v12 = vsel %vm1210_vm12, %v1202_v8, %v7198_v5  ;;  %v1220_v13 = vsel %vm1210_vm12, %v1203_v9, %v7199_v4 }
 0x113   :  { %v1232_v14 = vpack.c.bf16 %v1222_v11, %v1221_v10  ;;  %v1231_v15 = vpack.c.bf16 %v1220_v13, %v1219_v12  ;;  %v7212_v16 = vpop.permute.xlu1 %7211  ;;  %v7207_v17 = vpop.permute.xlu0 %7206 }
 0x114   :  { %v7214_v25 = vunpack.i.h.bf16 %v7212_v16  ;;  %v7213_v26 = vunpack.i.l.bf16 %v7212_v16  ;;  %v7209_v27 = vunpack.i.h.bf16 %v7207_v17  ;;  %v7208_v28 = vunpack.i.l.bf16 %v7207_v17 }
 0x115   :  { %6644 = vmatprep.mubr.msk.bf16.mxu0 %vm1262_vm13, %v1231_v15 }
 0x116   :  { %6645 = vmatmul.mubr.msk.bf16.gmra.mrb[8].mxu0 %vm1262_vm13, %v1232_v14  ;;  %v1107_v42 = vsel %vm149_vm0, %v324_v29, %v7214_v25  ;;  %v1106_v43 = vsel %vm149_vm0, %v322_v24, %v7213_v26  ;;  %v1105_v44 = vsel %vm149_vm0, %v320_v31, %v7209_v27  ;;  %v1104_v45 = vsel %vm149_vm0, %v318_v30, %v7208_v28 }
 0x117   :  { %v7222_v18 = vpop.permute.xlu1 %7221  ;;  %v7217_v19 = vpop.permute.xlu0 %7216  ;;  %vm2507_vm0 = vcmask 1043456  }
 0x118   :  { %v7224_v32 = vunpack.i.h.bf16 %v7222_v18  ;;  %v7223_v33 = vunpack.i.l.bf16 %v7222_v18  ;;  %v7219_v34 = vunpack.i.h.bf16 %v7217_v19  ;;  %v7218_v35 = vunpack.i.l.bf16 %v7217_v19 }
 0x11a   :  { %v1123_v46 = vsel %vm1108_vm7, %v1106_v43, %v7223_v33  ;;  %v1124_v47 = vsel %vm1108_vm7, %v1107_v42, %v7224_v32  ;;  %v1121_v48 = vsel %vm1108_vm7, %v1104_v45, %v7218_v35  ;;  %v1122_v49 = vsel %vm1108_vm7, %v1105_v44, %v7219_v34  ;;  %v7608_v45 = vld [vmem:[%s11054_s3] sm:$0xff]  }
 0x11b   :  { %v7232_v20 = vpop.permute.xlu1 %7231  ;;  %v7227_v21 = vpop.permute.xlu0 %7226 }
 0x11c   :  { %v7234_v38 = vunpack.i.h.bf16 %v7232_v20  ;;  %v7233_v39 = vunpack.i.l.bf16 %v7232_v20  ;;  %v7229_v40 = vunpack.i.h.bf16 %v7227_v21  ;;  %v7228_v41 = vunpack.i.l.bf16 %v7227_v21 }
 0x11e   :  { %v1140_v56 = vsel %vm1125_vm8, %v1123_v46, %v7233_v39  ;;  %v1141_v57 = vsel %vm1125_vm8, %v1124_v47, %v7234_v38  ;;  %v1138_v58 = vsel %vm1125_vm8, %v1121_v48, %v7228_v41  ;;  %v1139_v59 = vsel %vm1125_vm8, %v1122_v49, %v7229_v40  ;;  %v8962_v39 = vld [vmem:[%s11053_s30] ss:$0 sm:$0xff]  ;;  %s8169_s30 = smov 72  }
 0x11f   :  { %v7242_v22 = vpop.permute.xlu1 %7241  ;;  %v7237_v23 = vpop.permute.xlu0 %7236  ;;  %v8165_v49 = vmov 0   ;;  %vm2267_vm8 = vcmask 785408  }
 0x120   :  { %v7244_v52 = vunpack.i.h.bf16 %v7242_v22  ;;  %v7243_v53 = vunpack.i.l.bf16 %v7242_v22  ;;  %v7239_v54 = vunpack.i.h.bf16 %v7237_v23  ;;  %v7238_v55 = vunpack.i.l.bf16 %v7237_v23  ;;  %2511 = vmatprep.subr.bf16.mxu1 %v8165_v49 }
 0x121   :  { %2512 = vmatpush1.bf16.msra.mxu1 %v7608_v45 }
 0x122   :  { %v1157_v7 = vsel %vm1142_vm9, %v1140_v56, %v7243_v53  ;;  %v1158_v8 = vsel %vm1142_vm9, %v1141_v57, %v7244_v52  ;;  %v1155_v9 = vsel %vm1142_vm9, %v1138_v58, %v7238_v55  ;;  %v1156_v10 = vsel %vm1142_vm9, %v1139_v59, %v7239_v54  ;;  %2513 = vmatprep.subr.bf16.mxu1 %v8165_v49  ;;  %v7609_v54 = vld [vmem:[%s11054_s3 + $0x8] sm:$0xff]   ;;  %v7610_v55 = vld [vmem:[%s11054_s3 + $0x10] sm:$0xff]   ;;  %v7611_v56 = vld [vmem:[%s11054_s3 + $0x18] sm:$0xff]  }
 0x123   :  { %v7252_v36 = vpop.permute.xlu1 %7251  ;;  %v7247_v37 = vpop.permute.xlu0 %7246 }
 0x124   :  { %v7254_v60 = vunpack.i.h.bf16 %v7252_v36  ;;  %v7253_v61 = vunpack.i.l.bf16 %v7252_v36  ;;  %v7249_v62 = vunpack.i.h.bf16 %v7247_v37  ;;  %v7248_v63 = vunpack.i.l.bf16 %v7247_v37 }
 0x125   :  { %2514 = vmatpush1.bf16.msra.mxu1 %v7609_v54 }
 0x126   :  { %v1174_v15 = vsel %vm1159_vm10, %v1157_v7, %v7253_v61  ;;  %v1175_v16 = vsel %vm1159_vm10, %v1158_v8, %v7254_v60  ;;  %v1172_v17 = vsel %vm1159_vm10, %v1155_v9, %v7248_v63  ;;  %v1173_v18 = vsel %vm1159_vm10, %v1156_v10, %v7249_v62  ;;  %2515 = vmatprep.subr.bf16.mxu1 %v8165_v49 }
 0x127   :  { %v7262_v50 = vpop.permute.xlu1 %7261  ;;  %v7257_v51 = vpop.permute.xlu0 %7256  ;;  %vm2284_vm10 = vcmask 982016  }
 0x128   :  { %v7264_v0 = vunpack.i.h.bf16 %v7262_v50  ;;  %v7263_v2 = vunpack.i.l.bf16 %v7262_v50  ;;  %v7259_v3 = vunpack.i.h.bf16 %v7257_v51  ;;  %v7258_v4 = vunpack.i.l.bf16 %v7257_v51 }
 0x129   :  { %2516 = vmatpush1.bf16.msra.mxu1 %v7610_v55 }
 0x12a   :  { %v1191_v19 = vsel %vm1176_vm5, %v1174_v15, %v7263_v2  ;;  %v1192_v20 = vsel %vm1176_vm5, %v1175_v16, %v7264_v0  ;;  %v1189_v21 = vsel %vm1176_vm5, %v1172_v17, %v7258_v4  ;;  %v1190_v22 = vsel %vm1176_vm5, %v1173_v18, %v7259_v3  ;;  %2517 = vmatprep.subr.bf16.mxu1 %v8165_v49  ;;  %v7612_v0 = vld [vmem:[%s11054_s3 + $0x20] sm:$0xff]   ;;  %v7613_v3 = vld [vmem:[%s11054_s3 + $0x28] sm:$0xff]   ;;  %v7614_v4 = vld [vmem:[%s11054_s3 + $0x30] sm:$0xff]  }
 0x12b   :  { %v7272_v5 = vpop.permute.xlu1 %7271  ;;  %v7267_v6 = vpop.permute.xlu0 %7266 }
 0x12c   :  { %v7274_v11 = vunpack.i.h.bf16 %v7272_v5  ;;  %v7273_v12 = vunpack.i.l.bf16 %v7272_v5  ;;  %v7269_v13 = vunpack.i.h.bf16 %v7267_v6  ;;  %v7268_v14 = vunpack.i.l.bf16 %v7267_v6 }
 0x12d   :  { %2518 = vmatpush1.bf16.msra.mxu1 %v7611_v56 }
 0x12e   :  { %v1208_v29 = vsel %vm1193_vm11, %v1191_v19, %v7273_v12  ;;  %v1209_v30 = vsel %vm1193_vm11, %v1192_v20, %v7274_v11  ;;  %v1206_v31 = vsel %vm1193_vm11, %v1189_v21, %v7268_v14  ;;  %v1207_v32 = vsel %vm1193_vm11, %v1190_v22, %v7269_v13  ;;  %2519 = vmatprep.subr.bf16.mxu1 %v8165_v49  ;;  %v7615_v12 = vld [vmem:[%s11054_s3 + $0x38] sm:$0xff]   ;;  %v7616_v19 = vld [vmem:[%s11054_s3 + $0x40] sm:$0xff]  }
 0x12f   :  { %v7282_v23 = vpop.permute.xlu1 %7281  ;;  %v7277_v24 = vpop.permute.xlu0 %7276  ;;  %vm3668_vm11 = vcmask 1041409  }
 0x130   :  { %v7284_v25 = vunpack.i.h.bf16 %v7282_v23  ;;  %v7283_v26 = vunpack.i.l.bf16 %v7282_v23  ;;  %v7279_v27 = vunpack.i.h.bf16 %v7277_v24  ;;  %v7278_v28 = vunpack.i.l.bf16 %v7277_v24 }
 0x131   :  { %2520 = vmatpush1.bf16.msra.mxu1 %v7612_v0 }
 0x132   :  { %v1225_v33 = vsel %vm1210_vm12, %v1208_v29, %v7283_v26  ;;  %v1226_v34 = vsel %vm1210_vm12, %v1209_v30, %v7284_v25  ;;  %v1223_v35 = vsel %vm1210_vm12, %v1206_v31, %v7278_v28  ;;  %v1224_v36 = vsel %vm1210_vm12, %v1207_v32, %v7279_v27  ;;  %2521 = vmatprep.subr.bf16.mxu1 %v8165_v49  ;;  %v1592_v26 = vld [vmem:[#allocation3 + $0x2] sm:$0xff] }
 0x133   :  { %v1234_v37 = vpack.c.bf16 %v1226_v34, %v1225_v33  ;;  %v1233_v38 = vpack.c.bf16 %v1224_v36, %v1223_v35  ;;  %v1576_v27 = vld [vmem:[#allocation3 + $0x1] sm:$0xff] }
 0x134   :  { %v7617_v35 = vld [vmem:[%s11054_s3 + $0x48] sm:$0xff]  }
 0x135   :  { %6648 = vmatprep.mubr.msk.bf16.mxu0 %vm1262_vm13, %v1233_v38  ;;  %2522 = vmatpush1.bf16.msra.mxu1 %v7613_v3 }
 0x136   :  { %6649 = vmatmul.mubr.msk.bf16.gmra.mrb[12].mxu0 %vm1262_vm13, %v1234_v37  ;;  %2523 = vmatprep.subr.bf16.mxu1 %v8165_v49 }
 0x139   :  { %2524 = vmatpush1.bf16.msra.mxu1 %v7614_v4 }
 0x13a   :  { %2525 = vmatprep.subr.bf16.mxu1 %v8165_v49 }
 0x13d   :  { %2526 = vmatpush1.bf16.msra.mxu1 %v7615_v12 }
 0x13e   :  { %2527 = vmatprep.subr.bf16.mxu1 %v8165_v49 }
 0x141   :  { %2528 = vmatpush1.bf16.msra.mxu1 %v7616_v19 }
 0x142   :  { %2529 = vmatprep.subr.bf16.mxu1 %v8165_v49 }
 0x145   :  { %2530 = vmatpush1.bf16.msra.mxu1 %v7617_v35 }
 0x146   :  { %2531 = vmatprep.subr.bf16.mxu1 %v8165_v49 }
 0x1a9   :  { %v6638_v40 = vpop.f32.mrb[0].mxu0 }
 0x1aa   :  { %v1334_v41 = vadd.f32 %v6638_v40, %v8962_v39  ;;  %v1325_v42 = vpop.f32.mrb[1].mxu0 }
 0x1ab   :  { %v1326_v43 = vadd.f32 %v8962_v39, %v1325_v42  ;;  %v6639_v44 = vpop.f32.mrb[2].mxu0 }
 0x1ac   :  { %v6120_v46 = vmul.f32 -1.442695, %v1334_v41  ;;  %v1337_v47 = vadd.f32 %v6639_v44, %v8962_v39  ;;  %v1328_v48 = vpop.f32.mrb[3].mxu0 }
 0x1ad   :  { %v6118_v50 = vmul.f32 -1.442695, %v1326_v43  ;;  %v1329_v51 = vadd.f32 %v8962_v39, %v1328_v48 }
 0x1ae   :  { %7674 = vpow2.f32 %v6120_v46  ;;  %v6121_v52 = vmul.f32 -1.442695, %v1337_v47 }
 0x1af   :  { %7676 = vpow2.f32 %v6118_v50  ;;  %v6119_v53 = vmul.f32 -1.442695, %v1329_v51 }
 0x1b0   :  { %7678 = vpow2.f32 %v6121_v52 }
 0x1b1   :  { %7680 = vpow2.f32 %v6119_v53 }
 0x1b8   :  { %v7675_v57 = vpop.eup %7674 }
 0x1b9   :  { %v7677_v58 = vpop.eup %7676  ;;  %v1438_v59 = vadd.f32 1.0, %v7675_v57 }
 0x1ba   :  { %v7679_v60 = vpop.eup %7678  ;;  %v1436_v61 = vadd.f32 1.0, %v7677_v58 }
 0x1bb   :  { %v7681_v62 = vpop.eup %7680  ;;  %7682 = vrcp.f32 %v1438_v59  ;;  %v1439_v63 = vadd.f32 1.0, %v7679_v60 }
 0x1bc   :  { %7684 = vrcp.f32 %v1436_v61  ;;  %v1437_v2 = vadd.f32 1.0, %v7681_v62  ;;  %v7620_v61 = vld [vmem:[%s11054_s3 + $0x60] sm:$0xff]   ;;  %v7621_v62 = vld [vmem:[%s11054_s3 + $0x68] ss:$0 sps:$4 sm:$0xff]  }
 0x1bd   :  { %7686 = vrcp.f32 %v1439_v63  ;;  %v2509_v0 = vsel %vm2507_vm0, %v7621_v62, 0 }
 0x1be   :  { %7688 = vrcp.f32 %v1437_v2 }
 0x1c5   :  { %v7683_v5 = vpop.eup %7682 }
 0x1c6   :  { %v7685_v6 = vpop.eup %7684  ;;  %v8996_v7 = vmul.f32 %v7683_v5, %v1334_v41  ;;  %v7618_v41 = vld [vmem:[%s11054_s3 + $0x50] sm:$0xff]  }
 0x1c7   :  { %v7687_v8 = vpop.eup %7686  ;;  %v8999_v9 = vmul.f32 %v7685_v6, %v1326_v43  ;;  %2532 = vmatpush1.bf16.msra.mxu1 %v7618_v41 }
 0x1c8   :  { %v7689_v10 = vpop.eup %7688  ;;  %1546 = vst.msk [vmem:[#allocation3 + $0x31] sm:$0xff] %vm1176_vm5, %v8996_v7  ;;  %v9003_v11 = vmul.f32 %v7687_v8, %v1337_v47  ;;  %2533 = vmatprep.subr.bf16.mxu1 %v8165_v49 }
 0x1c9   :  { %1544 = vst.msk [vmem:[#allocation3 + $0x11] sm:$0xff] %vm1176_vm5, %v8999_v9  ;;  %v9010_v13 = vmul.f32 %v7689_v10, %v1329_v51  ;;  %v6642_v14 = vpop.f32.mrb[4].mxu0  ;;  %v7619_v51 = vld [vmem:[%s11054_s3 + $0x58] sm:$0xff]   ;;  %s11055_s3 = sld [smem:[#allocation87_spill]] }
 0x1ca   :  { %1547 = vst.msk [vmem:[#allocation3 + $0x41] sm:$0xff] %vm1176_vm5, %v9003_v11  ;;  %v9015_v15 = vadd.f32 %v6642_v14, %v8962_v39  ;;  %v1341_v16 = vpop.f32.mrb[5].mxu0 }
 0x1cb   :  { %1545 = vst.msk [vmem:[#allocation3 + $0x21] sm:$0xff] %vm1176_vm5, %v9010_v13  ;;  %v9020_v17 = vadd.f32 %v8962_v39, %v1341_v16  ;;  %v6643_v18 = vpop.f32.mrb[6].mxu0  ;;  %2534 = vmatpush1.bf16.msra.mxu1 %v7619_v51 }
 0x1cc   :  { %v6124_v20 = vmul.f32 -1.442695, %v9015_v15  ;;  %v9028_v21 = vadd.f32 %v6643_v18, %v8962_v39  ;;  %v1344_v22 = vpop.f32.mrb[7].mxu0  ;;  %2535 = vmatprep.subr.bf16.mxu1 %v8165_v49 }
 0x1cd   :  { %v6122_v23 = vmul.f32 -1.442695, %v9020_v17  ;;  %v9032_v24 = vadd.f32 %v8962_v39, %v1344_v22 }
 0x1ce   :  { %7690 = vpow2.f32 %v6124_v20  ;;  %v6125_v25 = vmul.f32 -1.442695, %v9028_v21 }
 0x1cf   :  { %7692 = vpow2.f32 %v6122_v23  ;;  %v6123_v28 = vmul.f32 -1.442695, %v9032_v24  ;;  %v9052_v36 = vld [vmem:[#allocation3 + $0x30] sm:$0xff]  ;;  %2536 = vmatpush1.bf16.msra.mxu1 %v7620_v61 }
 0x1d0   :  { %7694 = vpow2.f32 %v6125_v25  ;;  %v9037_v29 = vld [vmem:[#allocation3 + $0x12] sm:$0xff]  ;;  %2537 = vmatprep.subr.bf16.mxu1 %v8165_v49 }
 0x1d1   :  { %v9039_v30 = vld [vmem:[#allocation3 + $0x11] sm:$0xff]  ;;  %7696 = vpow2.f32 %v6123_v28  ;;  %v7290_v31 = vpack.i.bf16 %v9037_v29, %v1592_v26  ;;  %v9045_v34 = vld [vmem:[#allocation3 + $0x42] sm:$0xff] }
 0x1d2   :  { %v7285_v32 = vpack.i.bf16 %v9039_v30, %v1576_v27  ;;  %v9043_v33 = vld [vmem:[#allocation3 + $0x20] sm:$0xff]  ;;  %v1642_v37 = vld [vmem:[#allocation3 + $0x32] sm:$0xff] }
 0x1d3   :  { %7291 = vrot.lane.b32.xlu1 %v7290_v31, %s8166_s29  ;;  %v7315_v38 = vpack.i.bf16 %v9052_v36, %v9043_v33  ;;  %v7295_v40 = vpack.i.bf16 %v9045_v34, %v1642_v37  ;;  %v9060_v42 = vld [vmem:[#allocation3 + $0x21] sm:$0xff]  ;;  %v1674_v45 = vld [vmem:[#allocation3 + $0x31] sm:$0xff]  ;;  %2538 = vmatpush1.bf16.msra.mxu1 %v2509_v0 }
 0x1d4   :  { %7286 = vrot.lane.b32.xlu0 %v7285_v32, %s8162_s4  ;;  %v9062_v43 = vld [vmem:[#allocation3 + $0x40] sm:$0xff]  ;;  %v9068_v48 = vpack.i.bf16 %v1674_v45, %v9060_v42  ;;  %v9096_v2 = vld [vmem:[#allocation3 + $0x10] sm:$0xff] }
 0x1d5   :  { %v7300_v50 = vpack.i.bf16 %v9062_v43, %v9052_v36  ;;  %v1689_v54 = vld [vmem:[#allocation3 + $0x22] sm:$0xff]  ;;  %v7320_v4 = vpack.i.bf16 %v9043_v33, %v9096_v2  ;;  %v1680_v61 = vld [vmem:[#allocation3 + $0x91] sm:$0xff] }
 0x1d6   :  { %v9075_v55 = vld [vmem:[#allocation3 + $0x41] sm:$0xff]  ;;  %v7335_v59 = vpack.i.bf16 %v1642_v37, %v1689_v54  ;;  %v7310_v63 = vpack.i.bf16 %v1689_v54, %v9037_v29 }
 0x1d7   :  { %7316 = vrot.lane.b32.xlu1 %v7315_v38, %s8160_s26  ;;  %v7305_v60 = vpack.i.bf16 %v9075_v55, %v1674_v45 }
 0x1d8   :  { %7296 = vrot.lane.b32.xlu0 %v7295_v40, %s8167_s19  ;;  %v7691_v44 = vpop.eup %7690 }
 0x1d9   :  { %v7693_v46 = vpop.eup %7692  ;;  %v1442_v47 = vadd.f32 1.0, %v7691_v44 }
 0x1da   :  { %v7695_v52 = vpop.eup %7694  ;;  %v1440_v53 = vadd.f32 1.0, %v7693_v46 }
 0x1db   :  { %v7697_v56 = vpop.eup %7696  ;;  %7698 = vrcp.f32 %v1442_v47  ;;  %v1443_v57 = vadd.f32 1.0, %v7695_v52  ;;  %7326 = vrot.lane.b32.xlu1 %v9068_v48, %s8168_s24 }
 0x1dc   :  { %7301 = vrot.lane.b32.xlu0 %v7300_v50, %s8169_s30  ;;  %7700 = vrcp.f32 %v1440_v53  ;;  %v1441_v58 = vadd.f32 1.0, %v7697_v56 }
 0x1dd   :  { %7702 = vrcp.f32 %v1443_v57 }
 0x1de   :  { %7704 = vrcp.f32 %v1441_v58  ;;  %v1664_v58 = vld [vmem:[#allocation3 + $0x90] sm:$0xff] }
 0x1df   :  { %7336 = vrot.lane.b32.xlu1 %v7335_v59, %s8170_s25 }
 0x1e0   :  { %7306 = vrot.lane.b32.xlu0 %v7305_v60, %s8171_s28 }
 0x1e3   :  { %7346 = vrot.lane.b32.xlu1 %v7335_v59, %s8166_s29 }
 0x1e4   :  { %7311 = vrot.lane.b32.xlu0 %v7310_v63, %s8167_s19 }
 0x1e5   :  { %v7699_v3 = vpop.eup %7698 }
 0x1e6   :  { %v7701_v5 = vpop.eup %7700  ;;  %v9101_v6 = vmul.f32 %v7699_v3, %v9015_v15 }
 0x1e7   :  { %v7703_v8 = vpop.eup %7702  ;;  %v9104_v10 = vmul.f32 %v7701_v5, %v9020_v17  ;;  %v7330_v17 = vpack.i.bf16 %v9060_v42, %v9039_v30 }
 0x1e8   :  { %7321 = vrot.lane.b32.xlu0 %v7320_v4, %s8169_s30  ;;  %v7705_v12 = vpop.eup %7704  ;;  %1550 = vst.msk [vmem:[#allocation3 + $0x71] sm:$0xff] %vm1176_vm5, %v9101_v6  ;;  %v9110_v14 = vmul.f32 %v7703_v8, %v9028_v21  ;;  %v1696_v8 = vld [vmem:[#allocation3 + $0x92] sm:$0xff] }
 0x1e9   :  { %1548 = vst.msk [vmem:[#allocation3 + $0x51] sm:$0xff] %vm1176_vm5, %v9104_v10  ;;  %v9115_v16 = vmul.f32 %v7705_v12, %v9032_v24  ;;  %v6646_v15 = vpop.f32.mrb[8].mxu0 }
 0x1ea   :  { %1551 = vst.msk [vmem:[#allocation3 + $0x81] sm:$0xff] %vm1176_vm5, %v9110_v14  ;;  %v9122_v18 = vadd.f32 %v6646_v15, %v8962_v39  ;;  %v1357_v19 = vpop.f32.mrb[9].mxu0 }
 0x1eb   :  { %1549 = vst.msk [vmem:[#allocation3 + $0x61] sm:$0xff] %vm1176_vm5, %v9115_v16  ;;  %v9127_v20 = vadd.f32 %v8962_v39, %v1357_v19  ;;  %v6647_v21 = vpop.f32.mrb[10].mxu0 }
 0x1ec   :  { %7331 = vrot.lane.b32.xlu0 %v7330_v17, %s8171_s28  ;;  %v6128_v22 = vmul.f32 -1.442695, %v9122_v18  ;;  %v9132_v23 = vadd.f32 %v6647_v21, %v8962_v39  ;;  %v1360_v24 = vpop.f32.mrb[11].mxu0 }
 0x1ed   :  { %v6126_v25 = vmul.f32 -1.442695, %v9127_v20  ;;  %v9136_v26 = vadd.f32 %v8962_v39, %v1360_v24 }
 0x1ee   :  { %7706 = vpow2.f32 %v6128_v22  ;;  %v6129_v27 = vmul.f32 -1.442695, %v9132_v23 }
 0x1ef   :  { %7708 = vpow2.f32 %v6126_v25  ;;  %v6127_v28 = vmul.f32 -1.442695, %v9136_v26  ;;  %v9154_v37 = vld [vmem:[#allocation3 + $0x72] sm:$0xff] }
 0x1f0   :  { %7341 = vrot.lane.b32.xlu0 %v9068_v48, %s8162_s4  ;;  %7710 = vpow2.f32 %v6129_v27  ;;  %v9142_v29 = vld [vmem:[#allocation3 + $0x50] sm:$0xff] }
 0x1f1   :  { %v9144_v30 = vld [vmem:[#allocation3 + $0x51] sm:$0xff]  ;;  %7712 = vpow2.f32 %v6127_v28  ;;  %v7350_v31 = vpack.i.bf16 %v9142_v29, %v9062_v43  ;;  %v9150_v35 = vld [vmem:[#allocation3 + $0x82] sm:$0xff] }
 0x1f2   :  { %v7365_v32 = vpack.i.bf16 %v9144_v30, %v9075_v55  ;;  %v7375_v38 = vpack.i.bf16 %v9150_v35, %v9154_v37  ;;  %v1692_v40 = vld [vmem:[#allocation3 + $0x52] sm:$0xff]  ;;  %v1615_v41 = vld [vmem:[#allocation3 + $0x80] sm:$0xff] }
 0x1f3   :  { %7351 = vrot.lane.b32.xlu1 %v7350_v31, %s8160_s26  ;;  %v9160_v44 = vld [vmem:[#allocation3 + $0x70] sm:$0xff]  ;;  %v7360_v47 = vpack.i.bf16 %v1692_v40, %v9045_v34  ;;  %v1631_v52 = vld [vmem:[#allocation3 + $0x81] sm:$0xff]  ;;  %v7380_v59 = vpack.i.bf16 %v1664_v58, %v1615_v41 }
 0x1f4   :  { %7366 = vrot.lane.b32.xlu0 %v7365_v32, %s8162_s4  ;;  %v7385_v48 = vpack.i.bf16 %v1615_v41, %v9160_v44  ;;  %v1630_v56 = vld [vmem:[#allocation3 + $0x71] sm:$0xff]  ;;  %v1645_v34 = vld [vmem:[#allocation3 + $0x62] sm:$0xff]  ;;  %v7390_v0 = vpack.i.bf16 %v1680_v61, %v1631_v52 }
 0x1f5   :  { %v7395_v57 = vpack.i.bf16 %v1631_v52, %v1630_v56  ;;  %v7405_v60 = vpack.i.bf16 %v1645_v34, %v1692_v40  ;;  %v9168_v62 = vld [vmem:[#allocation3 + $0x60] sm:$0xff] }
 0x1f6   :  { %v7415_v3 = vpack.i.bf16 %v9168_v62, %v9142_v29  ;;  %v1629_v12 = vld [vmem:[#allocation3 + $0x61] sm:$0xff] }
 0x1f7   :  { %7356 = vrot.lane.b32.xlu1 %v7365_v32, %s8168_s24  ;;  %v7425_v24 = vpack.i.bf16 %v1629_v12, %v9144_v30  ;;  %v7435_v40 = vpack.i.bf16 %v1630_v56, %v1629_v12 }
 0x1f8   :  { %7376 = vrot.lane.b32.xlu0 %v7375_v38, %s8167_s19  ;;  %v7707_v42 = vpop.eup %7706  ;;  %v7410_v38 = vpack.i.bf16 %v9160_v44, %v9168_v62 }
 0x1f9   :  { %v7709_v45 = vpop.eup %7708  ;;  %v1446_v46 = vadd.f32 1.0, %v7707_v42  ;;  %v1584_v42 = vld [vmem:[#allocation3 + $0xa1] sm:$0xff] }
 0x1fa   :  { %v7711_v50 = vpop.eup %7710  ;;  %v1444_v51 = vadd.f32 1.0, %v7709_v45 }
 0x1fb   :  { %v7713_v53 = vpop.eup %7712  ;;  %7714 = vrcp.f32 %v1446_v46  ;;  %v1447_v54 = vadd.f32 1.0, %v7711_v50  ;;  %7361 = vrot.lane.b32.xlu1 %v7360_v47, %s8170_s25  ;;  %v7430_v50 = vpack.i.bf16 %v9154_v37, %v1645_v34 }
 0x1fc   :  { %7386 = vrot.lane.b32.xlu0 %v7385_v48, %s8169_s30  ;;  %7716 = vrcp.f32 %v1444_v51  ;;  %v1445_v55 = vadd.f32 1.0, %v7713_v53 }
 0x1fd   :  { %7718 = vrcp.f32 %v1447_v54 }
 0x1fe   :  { %7720 = vrcp.f32 %v1445_v55 }
 0x1ff   :  { %7371 = vrot.lane.b32.xlu1 %v7360_v47, %s8166_s29 }
 0x200   :  { %7396 = vrot.lane.b32.xlu0 %v7395_v57, %s8171_s28 }
 0x203   :  { %7381 = vrot.lane.b32.xlu1 %v7380_v59, %s8160_s26 }
 0x204   :  { %7406 = vrot.lane.b32.xlu0 %v7405_v60, %s8167_s19  ;;  %v1600_v60 = vld [vmem:[#allocation3 + $0xa2] sm:$0xff] }
 0x205   :  { %v7715_v63 = vpop.eup %7714 }
 0x206   :  { %v7717_v4 = vpop.eup %7716  ;;  %v9175_v5 = vmul.f32 %v7715_v63, %v9122_v18 }
 0x207   :  { %v7719_v15 = vpop.eup %7718  ;;  %v9178_v17 = vmul.f32 %v7717_v4, %v9127_v20  ;;  %7391 = vrot.lane.b32.xlu1 %v7390_v0, %s8168_s24  ;;  %v7400_v20 = vpack.i.bf16 %v1696_v8, %v9150_v35 }
 0x208   :  { %7416 = vrot.lane.b32.xlu0 %v7415_v3, %s8169_s30  ;;  %v7721_v19 = vpop.eup %7720  ;;  %1554 = vst.msk [vmem:[#allocation3 + $0xd1] sm:$0xff] %vm1176_vm5, %v9175_v5  ;;  %v9185_v21 = vmul.f32 %v7719_v15, %v9132_v23 }
 0x209   :  { %1552 = vst.msk [vmem:[#allocation3 + $0xb1] sm:$0xff] %vm1176_vm5, %v9178_v17  ;;  %v9190_v18 = vmul.f32 %v7721_v19, %v9136_v26  ;;  %v6650_v22 = vpop.f32.mrb[12].mxu0 }
 0x20a   :  { %1555 = vst.msk [vmem:[#allocation3 + $0xe1] sm:$0xff] %vm1176_vm5, %v9185_v21  ;;  %v9197_v25 = vadd.f32 %v6650_v22, %v8962_v39  ;;  %v1373_v27 = vpop.f32.mrb[13].mxu0 }
 0x20b   :  { %1553 = vst.msk [vmem:[#allocation3 + $0xc1] sm:$0xff] %vm1176_vm5, %v9190_v18  ;;  %v9202_v23 = vadd.f32 %v8962_v39, %v1373_v27  ;;  %v6651_v26 = vpop.f32.mrb[14].mxu0  ;;  %7401 = vrot.lane.b32.xlu1 %v7400_v20, %s8170_s25 }
 0x20c   :  { %7426 = vrot.lane.b32.xlu0 %v7425_v24, %s8171_s28  ;;  %v6132_v28 = vmul.f32 -1.442695, %v9197_v25  ;;  %v9208_v30 = vadd.f32 %v6651_v26, %v8962_v39  ;;  %v1376_v31 = vpop.f32.mrb[15].mxu0 }
 0x20d   :  { %v6130_v32 = vmul.f32 -1.442695, %v9202_v23  ;;  %v9212_v35 = vadd.f32 %v8962_v39, %v1376_v31 }
 0x20e   :  { %7722 = vpow2.f32 %v6132_v28  ;;  %v6133_v41 = vmul.f32 -1.442695, %v9208_v30 }
 0x20f   :  { %7724 = vpow2.f32 %v6130_v32  ;;  %v6131_v45 = vmul.f32 -1.442695, %v9212_v35  ;;  %7411 = vrot.lane.b32.xlu1 %v7410_v38, %s8160_s26  ;;  %v1650_v48 = vld [vmem:[#allocation3 + $0xd2] sm:$0xff] }
 0x210   :  { %7436 = vrot.lane.b32.xlu0 %v7435_v40, %s8162_s4  ;;  %7726 = vpow2.f32 %v6133_v41  ;;  %v9220_v46 = vld [vmem:[#allocation3 + $0xb1] sm:$0xff] }
 0x211   :  { %7728 = vpow2.f32 %v6131_v45  ;;  %v7445_v39 = vpack.i.bf16 %v9220_v46, %v1584_v42  ;;  %v9223_v47 = vld [vmem:[#allocation3 + $0xe2] sm:$0xff]  ;;  %v9233_v54 = vld [vmem:[#allocation3 + $0xd0] sm:$0xff] }
 0x212   :  { %v7455_v51 = vpack.i.bf16 %v9223_v47, %v1650_v48  ;;  %v9229_v52 = vld [vmem:[#allocation3 + $0xe0] sm:$0xff]  ;;  %v1601_v37 = vld [vmem:[#allocation3 + $0xb2] sm:$0xff] }
 0x213   :  { %7421 = vrot.lane.b32.xlu1 %v7435_v40, %s8168_s24  ;;  %v7460_v57 = vpack.i.bf16 %v9229_v52, %v9233_v54  ;;  %v1635_v34 = vld [vmem:[#allocation3 + $0xe1] sm:$0xff]  ;;  %v1634_v3 = vld [vmem:[#allocation3 + $0xd1] sm:$0xff]  ;;  %v7450_v4 = vpack.i.bf16 %v1601_v37, %v1600_v60 }
 0x214   :  { %7446 = vrot.lane.b32.xlu0 %v7445_v39, %s8162_s4  ;;  %v7465_v8 = vpack.i.bf16 %v1635_v34, %v1634_v3  ;;  %v9239_v12 = vld [vmem:[#allocation3 + $0xc0] sm:$0xff]  ;;  %v9247_v24 = vld [vmem:[#allocation3 + $0xb0] sm:$0xff] }
 0x215   :  { %v1649_v15 = vld [vmem:[#allocation3 + $0xc2] sm:$0xff]  ;;  %v7475_v19 = vpack.i.bf16 %v9233_v54, %v9239_v12  ;;  %v7480_v28 = vpack.i.bf16 %v9239_v12, %v9247_v24 }
 0x216   :  { %v7470_v22 = vpack.i.bf16 %v1649_v15, %v1601_v37  ;;  %v1681_v20 = vld [vmem:[#allocation3 + $0xc1] sm:$0xff]  ;;  %v7495_v45 = vpack.i.bf16 %v1650_v48, %v1649_v15  ;;  %v1672_v37 = vld [vmem:[#allocation3 + $0x130] sm:$0xff] }
 0x217   :  { %7431 = vrot.lane.b32.xlu1 %v7430_v50, %s8170_s25  ;;  %v7485_v26 = vpack.i.bf16 %v1634_v3, %v1681_v20 }
 0x218   :  { %7456 = vrot.lane.b32.xlu0 %v7455_v51, %s8167_s19  ;;  %v7723_v53 = vpop.eup %7722 }
 0x219   :  { %v7725_v55 = vpop.eup %7724  ;;  %v1450_v56 = vadd.f32 1.0, %v7723_v53 }
 0x21a   :  { %v7727_v58 = vpop.eup %7726  ;;  %v1448_v59 = vadd.f32 1.0, %v7725_v55 }
 0x21b   :  { %v7729_v61 = vpop.eup %7728  ;;  %7730 = vrcp.f32 %v1450_v56  ;;  %v1451_v63 = vadd.f32 1.0, %v7727_v58  ;;  %7441 = vrot.lane.b32.xlu1 %v7430_v50, %s8166_s29 }
 0x21c   :  { %7461 = vrot.lane.b32.xlu0 %v7460_v57, %s8169_s30  ;;  %7732 = vrcp.f32 %v1448_v59  ;;  %v1449_v0 = vadd.f32 1.0, %v7729_v61 }
 0x21d   :  { %7734 = vrcp.f32 %v1451_v63 }
 0x21e   :  { %7736 = vrcp.f32 %v1449_v0  ;;  %v1688_v0 = vld [vmem:[#allocation3 + $0x131] sm:$0xff] }
 0x21f   :  { %7451 = vrot.lane.b32.xlu1 %v7450_v4, %s8166_s29 }
 0x220   :  { %7466 = vrot.lane.b32.xlu0 %v7465_v8, %s8171_s28 }
 0x223   :  { %7476 = vrot.lane.b32.xlu1 %v7475_v19, %s8160_s26 }
 0x224   :  { %7471 = vrot.lane.b32.xlu0 %v7470_v22, %s8167_s19 }
 0x225   :  { %v7731_v27 = vpop.eup %7730 }
 0x226   :  { %v7733_v31 = vpop.eup %7732  ;;  %v9252_v32 = vmul.f32 %v7731_v27, %v9197_v25 }
 0x227   :  { %v7735_v38 = vpop.eup %7734  ;;  %v9255_v40 = vmul.f32 %v7733_v31, %v9202_v23  ;;  %7486 = vrot.lane.b32.xlu1 %v7485_v26, %s8168_s24  ;;  %v7490_v23 = vpack.i.bf16 %v1681_v20, %v9220_v46 }
 0x228   :  { %7481 = vrot.lane.b32.xlu0 %v7480_v28, %s8169_s30  ;;  %v7737_v41 = vpop.eup %7736  ;;  %1558 = vst.msk [vmem:[#allocation3 + $0x111] sm:$0xff] %vm1176_vm5, %v9252_v32  ;;  %v9262_v42 = vmul.f32 %v7735_v38, %v9208_v30 }
 0x229   :  { %1556 = vst.msk [vmem:[#allocation3 + $0xf1] sm:$0xff] %vm1176_vm5, %v9255_v40  ;;  %v9267_v25 = vmul.f32 %v7737_v41, %v9212_v35 }
 0x22a   :  { %1559 = vst.msk [vmem:[#allocation3 + $0x121] sm:$0xff] %vm1176_vm5, %v9262_v42 }
 0x22b   :  { %1557 = vst.msk [vmem:[#allocation3 + $0x101] sm:$0xff] %vm1176_vm5, %v9267_v25  ;;  %7496 = vrot.lane.b32.xlu1 %v7495_v45, %s8170_s25 }
 0x22c   :  { %7491 = vrot.lane.b32.xlu0 %v7490_v23, %s8171_s28 }
 0x22f   :  { %7506 = vrot.lane.b32.xlu1 %v7495_v45, %s8166_s29  ;;  %v1654_v50 = vld [vmem:[#allocation3 + $0x112] sm:$0xff] }
 0x230   :  { %7501 = vrot.lane.b32.xlu0 %v7485_v26, %s8162_s4  ;;  %v9278_v30 = vld [vmem:[#allocation3 + $0xf0] sm:$0xff] }
 0x231   :  { %v1589_v35 = vld [vmem:[#allocation3 + $0xf1] sm:$0xff]  ;;  %v7510_v46 = vpack.i.bf16 %v9278_v30, %v9229_v52  ;;  %v9282_v48 = vld [vmem:[#allocation3 + $0x122] sm:$0xff] }
 0x232   :  { %v7525_v39 = vpack.i.bf16 %v1589_v35, %v1635_v34  ;;  %v7535_v51 = vpack.i.bf16 %v9282_v48, %v1654_v50  ;;  %v1700_v53 = vld [vmem:[#allocation3 + $0xf2] sm:$0xff]  ;;  %v1623_v55 = vld [vmem:[#allocation3 + $0x120] sm:$0xff] }
 0x233   :  { %7511 = vrot.lane.b32.xlu1 %v7510_v46, %s8160_s26  ;;  %v9289_v56 = vld [vmem:[#allocation3 + $0x110] sm:$0xff]  ;;  %v7520_v57 = vpack.i.bf16 %v1700_v53, %v9223_v47  ;;  %v1653_v59 = vld [vmem:[#allocation3 + $0x102] sm:$0xff]  ;;  %v7540_v61 = vpack.i.bf16 %v1672_v37, %v1623_v55 }
 0x234   :  { %7526 = vrot.lane.b32.xlu0 %v7525_v39, %s8162_s4  ;;  %v7545_v58 = vpack.i.bf16 %v1623_v55, %v9289_v56  ;;  %v7555_v60 = vpack.i.bf16 %v1653_v59, %v1700_v53  ;;  %v9295_v34 = vld [vmem:[#allocation3 + $0x100] sm:$0xff]  ;;  %v1591_v22 = vld [vmem:[#allocation3 + $0x111] sm:$0xff]  ;;  %v7580_v23 = vpack.i.bf16 %v1654_v50, %v1653_v59 }
 0x235   :  { %v7565_v63 = vpack.i.bf16 %v9295_v34, %v9278_v30  ;;  %v1687_v47 = vld [vmem:[#allocation3 + $0x121] sm:$0xff]  ;;  %v7560_v26 = vpack.i.bf16 %v9289_v56, %v9295_v34 }
 0x236   :  { %v1637_v3 = vld [vmem:[#allocation3 + $0x101] sm:$0xff]  ;;  %v7550_v15 = vpack.i.bf16 %v1688_v0, %v1687_v47  ;;  %v7595_v38 = vpack.i.bf16 %v1687_v47, %v1591_v22 }
 0x237   :  { %7516 = vrot.lane.b32.xlu1 %v7525_v39, %s8168_s24  ;;  %v7575_v19 = vpack.i.bf16 %v1637_v3, %v1589_v35  ;;  %v7585_v28 = vpack.i.bf16 %v1591_v22, %v1637_v3 }
 0x238   :  { %7536 = vrot.lane.b32.xlu0 %v7535_v51, %s8167_s19 }
 0x23b   :  { %7521 = vrot.lane.b32.xlu1 %v7520_v57, %s8170_s25 }
 0x23c   :  { %7546 = vrot.lane.b32.xlu0 %v7545_v58, %s8169_s30  ;;  %v1704_v58 = vld [vmem:[#allocation3 + $0x132] sm:$0xff] }
 0x23f   :  { %7531 = vrot.lane.b32.xlu1 %v7520_v57, %s8166_s29 }
 0x240   :  { %7556 = vrot.lane.b32.xlu0 %v7555_v60, %s8167_s19  ;;  %v1560_v60 = vld [vmem:[#allocation3] sm:$0xff] }
 0x243   :  { %7541 = vrot.lane.b32.xlu1 %v7540_v61, %s8160_s26 }
 0x244   :  { %7566 = vrot.lane.b32.xlu0 %v7565_v63, %s8169_s30 }
 0x245   :  { %v9303_v4 = vpop.permute.xlu1 %7291 }
 0x246   :  { %v7287_v8 = vpop.permute.xlu0 %7286  ;;  %v7294_v3 = vunpack.i.h.bf16 %v9303_v4 }
 0x247   :  { %7551 = vrot.lane.b32.xlu1 %v7550_v15, %s8168_s24  ;;  %v7288_v35 = vunpack.i.l.bf16 %v7287_v8  ;;  %v7289_v37 = vunpack.i.h.bf16 %v7287_v8 }
 0x248   :  { %7576 = vrot.lane.b32.xlu0 %v7575_v19, %s8171_s28  ;;  %v7600_v19 = vpack.i.bf16 %v1704_v58, %v9282_v48 }
 0x249   :  { %v7317_v20 = vpop.permute.xlu1 %7316 }
 0x24a   :  { %v9307_v27 = vpop.permute.xlu0 %7296  ;;  %v7319_v51 = vunpack.i.h.bf16 %v7317_v20  ;;  %v7318_v53 = vunpack.i.l.bf16 %v7317_v20  ;;  %v7293_v20 = vunpack.i.l.bf16 %v9303_v4 }
 0x24b   :  { %7561 = vrot.lane.b32.xlu1 %v7560_v26, %s8160_s26  ;;  %v2217_v26 = vsel %vm1176_vm5, %v1560_v60, %v7288_v35 }
 0x24c   :  { %7586 = vrot.lane.b32.xlu0 %v7585_v28, %s8162_s4  ;;  %v2234_v4 = vsel %vm2233_vm2, %v2217_v26, %v7293_v20 }
 0x24d   :  { %v7327_v41 = vpop.permute.xlu1 %7326 }
 0x24e   :  { %v9313_v31 = vpop.permute.xlu0 %7301  ;;  %v7329_v61 = vunpack.i.h.bf16 %v7327_v41  ;;  %v7328_v63 = vunpack.i.l.bf16 %v7327_v41  ;;  %v2218_v41 = vsel %vm1176_vm5, %v9096_v2, %v7289_v37 }
 0x24f   :  { %7571 = vrot.lane.b32.xlu1 %v7585_v28, %s8168_s24  ;;  %v2235_v35 = vsel %vm2233_vm2, %v2218_v41, %v7294_v3 }
 0x250   :  { %7596 = vrot.lane.b32.xlu0 %v7595_v38, %s8171_s28 }
 0x251   :  { %v7337_v46 = vpop.permute.xlu1 %7336 }
 0x252   :  { %v9317_v45 = vpop.permute.xlu0 %7306  ;;  %v7339_v50 = vunpack.i.h.bf16 %v7337_v46  ;;  %v7338_v59 = vunpack.i.l.bf16 %v7337_v46 }
 0x253   :  { %7581 = vrot.lane.b32.xlu1 %v7580_v23, %s8170_s25 }
 0x256   :  { %v7312_v39 = vpop.permute.xlu0 %7311 }
 0x257   :  { %v7314_v55 = vunpack.i.h.bf16 %v7312_v39  ;;  %v7313_v57 = vunpack.i.l.bf16 %v7312_v39  ;;  %7591 = vrot.lane.b32.xlu1 %v7580_v23, %s8166_s29 }
 0x259   :  { %v2302_v47 = vsel %vm1142_vm9, %v7314_v55, %v7319_v51  ;;  %v2301_v0 = vsel %vm1142_vm9, %v7313_v57, %v7318_v53 }
 0x25a   :  { %v7322_v15 = vpop.permute.xlu0 %7321  ;;  %v2318_v22 = vsel %vm2317_vm1, %v2301_v0, %v7328_v63  ;;  %v2319_v8 = vsel %vm2317_vm1, %v2302_v47, %v7329_v61  ;;  %v7347_v61 = vpop.permute.xlu1 %7346 }
 0x25b   :  { %v2335_v28 = vsel %vm2334_vm3, %v2318_v22, %v7338_v59  ;;  %v2336_v38 = vsel %vm2334_vm3, %v2319_v8, %v7339_v50  ;;  %v7324_v23 = vunpack.i.h.bf16 %v7322_v15  ;;  %v7323_v46 = vunpack.i.l.bf16 %v7322_v15  ;;  %7601 = vrot.lane.b32.xlu1 %v7600_v19, %s8170_s25 }
 0x25c   :  { %v2352_v48 = vpack.c.bf16 %v2336_v38, %v2335_v28  ;;  %v7349_v3 = vunpack.i.h.bf16 %v7347_v61  ;;  %v7348_v19 = vunpack.i.l.bf16 %v7347_v61  ;;  %v7303_v38 = vunpack.i.l.bf16 %v9313_v31 }
 0x25d   :  { %v2251_v58 = vsel %vm2250_vm6, %v2234_v4, %v7323_v46  ;;  %v2252_v2 = vsel %vm2250_vm6, %v2235_v35, %v7324_v23 }
 0x25e   :  { %v7332_v39 = vpop.permute.xlu0 %7331  ;;  %6149 = vmatprep.mubr.msk.bf16.mxu1 %vm2482_vm4, %v2352_v48  ;;  %v7308_v48 = vunpack.i.l.bf16 %v9317_v45 }
 0x25f   :  { %v7334_v51 = vunpack.i.h.bf16 %v7332_v39  ;;  %v7333_v53 = vunpack.i.l.bf16 %v7332_v39 }
 0x261   :  { %v2268_v60 = vsel %vm2267_vm8, %v2251_v58, %v7333_v53  ;;  %v2269_v37 = vsel %vm2267_vm8, %v2252_v2, %v7334_v51  ;;  %v7299_v53 = vunpack.i.h.bf16 %v9307_v27  ;;  %v7298_v58 = vunpack.i.l.bf16 %v9307_v27 }
 0x262   :  { %v7342_v63 = vpop.permute.xlu0 %7341  ;;  %v2285_v50 = vsel %vm2284_vm10, %v2268_v60, %v7313_v57  ;;  %v2286_v59 = vsel %vm2284_vm10, %v2269_v37, %v7314_v55  ;;  %v7304_v55 = vunpack.i.h.bf16 %v9313_v31 }
 0x263   :  { %v7344_v47 = vunpack.i.h.bf16 %v7342_v63  ;;  %v7343_v0 = vunpack.i.l.bf16 %v7342_v63  ;;  %v2351_v15 = vpack.c.bf16 %v2286_v59, %v2285_v50 }
 0x265   :  { %v2220_v22 = vsel %vm1176_vm5, %v9052_v36, %v7344_v47  ;;  %v2219_v8 = vsel %vm1176_vm5, %v9043_v33, %v7343_v0  ;;  %2544 = vmatmul.mubr.bf16.vlgmr.msra.gmra.mrb[0].mxu1 %v2351_v15  ;;  %v7352_v20 = vpop.permute.xlu1 %7351  ;;  %v7309_v33 = vunpack.i.h.bf16 %v9317_v45 }
 0x266   :  { %v7367_v26 = vpop.permute.xlu0 %7366  ;;  %v2237_v28 = vsel %vm2233_vm2, %v2220_v22, %v7349_v3  ;;  %v2236_v57 = vsel %vm2233_vm2, %v2219_v8, %v7348_v19  ;;  %v7354_v39 = vunpack.i.h.bf16 %v7352_v20  ;;  %v7353_v4 = vunpack.i.l.bf16 %v7352_v20 }
 0x267   :  { %v2253_v46 = vsel %vm2250_vm6, %v2236_v57, %v7303_v38  ;;  %v2254_v36 = vsel %vm2250_vm6, %v2237_v28, %v7304_v55 }
 0x268   :  { %v2270_v31 = vsel %vm2267_vm8, %v2253_v46, %v7308_v48  ;;  %v2271_v2 = vsel %vm2267_vm8, %v2254_v36, %v7309_v33  ;;  %v2303_v61 = vsel %vm1142_vm9, %v7298_v58, %v7353_v4  ;;  %v2304_v63 = vsel %vm1142_vm9, %v7299_v53, %v7354_v39 }
 0x269   :  { %v7357_v41 = vpop.permute.xlu1 %7356  ;;  %v2287_v0 = vsel %vm2284_vm10, %v2270_v31, %v7298_v58  ;;  %v2288_v27 = vsel %vm2284_vm10, %v2271_v2, %v7299_v53  ;;  %v7369_v36 = vunpack.i.h.bf16 %v7367_v26  ;;  %v7368_v33 = vunpack.i.l.bf16 %v7367_v26 }
 0x26a   :  { %v9351_v23 = vpop.permute.xlu0 %7376  ;;  %v7359_v35 = vunpack.i.h.bf16 %v7357_v41  ;;  %v7358_v51 = vunpack.i.l.bf16 %v7357_v41  ;;  %v2353_v20 = vpack.c.bf16 %v2288_v27, %v2287_v0 }
 0x26b   :  { %v2222_v2 = vsel %vm1176_vm5, %v9142_v29, %v7369_v36 }
 0x26c   :  { %v2320_v59 = vsel %vm2317_vm1, %v2303_v61, %v7358_v51  ;;  %v2321_v47 = vsel %vm2317_vm1, %v2304_v63, %v7359_v35  ;;  %v7379_v61 = vunpack.i.h.bf16 %v9351_v23  ;;  %v7378_v63 = vunpack.i.l.bf16 %v9351_v23 }
 0x26d   :  { %v7362_v60 = vpop.permute.xlu1 %7361 }
 0x26e   :  { %v9361_v37 = vpop.permute.xlu0 %7386  ;;  %v7364_v45 = vunpack.i.h.bf16 %v7362_v60  ;;  %v7363_v50 = vunpack.i.l.bf16 %v7362_v60  ;;  %v2221_v60 = vsel %vm1176_vm5, %v9062_v43, %v7368_v33 }
 0x270   :  { %v2337_v15 = vsel %vm2334_vm3, %v2320_v59, %v7363_v50  ;;  %v2338_v3 = vsel %vm2334_vm3, %v2321_v47, %v7364_v45 }
 0x271   :  { %v2354_v19 = vpack.c.bf16 %v2338_v3, %v2337_v15  ;;  %v7372_v22 = vpop.permute.xlu1 %7371 }
 0x272   :  { %v9371_v8 = vpop.permute.xlu0 %7396  ;;  %v7374_v48 = vunpack.i.h.bf16 %v7372_v22  ;;  %v7373_v39 = vunpack.i.l.bf16 %v7372_v22 }
 0x273   :  { %6150 = vmatprep.mubr.msk.bf16.mxu1 %vm2482_vm4, %v2354_v19 }
 0x274   :  { %2552 = vmatmul.mubr.bf16.gmra.mrb[4].mxu1 %v2353_v20  ;;  %v2238_v26 = vsel %vm2233_vm2, %v2221_v60, %v7373_v39  ;;  %v2239_v45 = vsel %vm2233_vm2, %v2222_v2, %v7374_v48 }
 0x275   :  { %v7382_v28 = vpop.permute.xlu1 %7381 }
 0x276   :  { %v7407_v57 = vpop.permute.xlu0 %7406  ;;  %v7384_v50 = vunpack.i.h.bf16 %v7382_v28  ;;  %v7383_v59 = vunpack.i.l.bf16 %v7382_v28 }
 0x278   :  { %v2307_v28 = vsel %vm1142_vm9, %v7378_v63, %v7383_v59 }
 0x279   :  { %v7392_v55 = vpop.permute.xlu1 %7391 }
 0x27a   :  { %v7417_v38 = vpop.permute.xlu0 %7416  ;;  %v7394_v47 = vunpack.i.h.bf16 %v7392_v55  ;;  %v7393_v0 = vunpack.i.l.bf16 %v7392_v55  ;;  %v2308_v55 = vsel %vm1142_vm9, %v7379_v61, %v7384_v50 }
 0x27b   :  { %v7419_v4 = vunpack.i.h.bf16 %v7417_v38  ;;  %v7418_v35 = vunpack.i.l.bf16 %v7417_v38  ;;  %v7409_v38 = vunpack.i.h.bf16 %v7407_v57 }
 0x27d   :  { %v7402_v41 = vpop.permute.xlu1 %7401  ;;  %v2255_v27 = vsel %vm2250_vm6, %v2238_v26, %v7418_v35  ;;  %v2256_v15 = vsel %vm2250_vm6, %v2239_v45, %v7419_v4  ;;  %v2324_v4 = vsel %vm2317_vm1, %v2307_v28, %v7393_v0  ;;  %v2325_v35 = vsel %vm2317_vm1, %v2308_v55, %v7394_v47 }
 0x27e   :  { %v7427_v46 = vpop.permute.xlu0 %7426  ;;  %v7404_v48 = vunpack.i.h.bf16 %v7402_v41  ;;  %v7403_v39 = vunpack.i.l.bf16 %v7402_v41 }
 0x27f   :  { %v7429_v58 = vunpack.i.h.bf16 %v7427_v46  ;;  %v7428_v31 = vunpack.i.l.bf16 %v7427_v46  ;;  %v7408_v46 = vunpack.i.l.bf16 %v7407_v57 }
 0x280   :  { %v2341_v47 = vsel %vm2334_vm3, %v2324_v4, %v7403_v39  ;;  %v7399_v4 = vunpack.i.h.bf16 %v9371_v8 }
 0x281   :  { %v7412_v51 = vpop.permute.xlu1 %7411  ;;  %v2272_v43 = vsel %vm2267_vm8, %v2255_v27, %v7428_v31  ;;  %v2273_v19 = vsel %vm2267_vm8, %v2256_v15, %v7429_v58  ;;  %v2342_v27 = vsel %vm2334_vm3, %v2325_v35, %v7404_v48  ;;  %v7398_v35 = vunpack.i.l.bf16 %v9371_v8 }
 0x282   :  { %v7437_v53 = vpop.permute.xlu0 %7436  ;;  %v7414_v22 = vunpack.i.h.bf16 %v7412_v51  ;;  %v7413_v20 = vunpack.i.l.bf16 %v7412_v51  ;;  %v2289_v57 = vsel %vm2284_vm10, %v2272_v43, %v7408_v46  ;;  %v2290_v31 = vsel %vm2284_vm10, %v2273_v19, %v7409_v38 }
 0x283   :  { %v7439_v50 = vunpack.i.h.bf16 %v7437_v53  ;;  %v7438_v59 = vunpack.i.l.bf16 %v7437_v53 }
 0x284   :  { %v2305_v2 = vsel %vm1142_vm9, %v7408_v46, %v7413_v20  ;;  %v2306_v60 = vsel %vm1142_vm9, %v7409_v38, %v7414_v22  ;;  %v7389_v22 = vunpack.i.h.bf16 %v9361_v37  ;;  %v2355_v46 = vpack.c.bf16 %v2290_v31, %v2289_v57 }
 0x285   :  { %v7422_v29 = vpop.permute.xlu1 %7421  ;;  %v2224_v28 = vsel %vm1176_vm5, %v9160_v44, %v7439_v50  ;;  %v2223_v55 = vsel %vm1176_vm5, %v9168_v62, %v7438_v59 }
 0x286   :  { %v9384_v3 = vpop.permute.xlu0 %7446  ;;  %v7424_v36 = vunpack.i.h.bf16 %v7422_v29  ;;  %v7423_v33 = vunpack.i.l.bf16 %v7422_v29 }
 0x287   :  { %v7449_v50 = vunpack.i.h.bf16 %v9384_v3  ;;  %v7448_v59 = vunpack.i.l.bf16 %v9384_v3 }
 0x288   :  { %v2322_v41 = vsel %vm2317_vm1, %v2305_v2, %v7423_v33  ;;  %v2323_v0 = vsel %vm2317_vm1, %v2306_v60, %v7424_v36  ;;  %v7388_v33 = vunpack.i.l.bf16 %v9361_v37  ;;  %v2358_v36 = vpack.c.bf16 %v2342_v27, %v2341_v47  ;;  %v1568_v47 = vld [vmem:[#allocation3 + $0xa0] sm:$0xff] }
 0x289   :  { %v7432_v58 = vpop.permute.xlu1 %7431 }
 0x28a   :  { %v9396_v51 = vpop.permute.xlu0 %7456  ;;  %v7434_v26 = vunpack.i.h.bf16 %v7432_v58  ;;  %v7433_v45 = vunpack.i.l.bf16 %v7432_v58 }
 0x28c   :  { %v2339_v15 = vsel %vm2334_vm3, %v2322_v41, %v7433_v45  ;;  %v2340_v29 = vsel %vm2334_vm3, %v2323_v0, %v7434_v26 }
 0x28d   :  { %v2356_v43 = vpack.c.bf16 %v2340_v29, %v2339_v15  ;;  %v7442_v19 = vpop.permute.xlu1 %7441 }
 0x28e   :  { %v9408_v20 = vpop.permute.xlu0 %7461  ;;  %v7444_v38 = vunpack.i.h.bf16 %v7442_v19  ;;  %v7443_v53 = vunpack.i.l.bf16 %v7442_v19 }
 0x28f   :  { %6151 = vmatprep.mubr.msk.bf16.mxu1 %vm2482_vm4, %v2356_v43 }
 0x290   :  { %v2240_v48 = vsel %vm2233_vm2, %v2223_v55, %v7443_v53  ;;  %v2241_v39 = vsel %vm2233_vm2, %v2224_v28, %v7444_v38  ;;  %2560 = vmatmul.mubr.bf16.gmra.mrb[8].mxu1 %v2355_v46  ;;  %v2226_v53 = vsel %vm1176_vm5, %v9247_v24, %v7449_v50  ;;  %v2225_v46 = vsel %vm1176_vm5, %v1568_v47, %v7448_v59 }
 0x291   :  { %v2257_v37 = vsel %vm2250_vm6, %v2240_v48, %v7388_v33  ;;  %v2258_v58 = vsel %vm2250_vm6, %v2241_v39, %v7389_v22  ;;  %v7452_v57 = vpop.permute.xlu1 %7451  ;;  %6152 = vmatprep.mubr.msk.bf16.mxu1 %vm2482_vm4, %v2358_v36 }
 0x292   :  { %v9423_v44 = vpop.permute.xlu0 %7466  ;;  %v2274_v62 = vsel %vm2267_vm8, %v2257_v37, %v7398_v35  ;;  %v2275_v31 = vsel %vm2267_vm8, %v2258_v58, %v7399_v4  ;;  %v7454_v41 = vunpack.i.h.bf16 %v7452_v57  ;;  %v7453_v0 = vunpack.i.l.bf16 %v7452_v57 }
 0x293   :  { %v2291_v2 = vsel %vm2284_vm10, %v2274_v62, %v7378_v63  ;;  %v2292_v8 = vsel %vm2284_vm10, %v2275_v31, %v7379_v61 }
 0x294   :  { %v2357_v45 = vpack.c.bf16 %v2292_v8, %v2291_v2  ;;  %v2242_v3 = vsel %vm2233_vm2, %v2225_v46, %v7453_v0  ;;  %v2243_v33 = vsel %vm2233_vm2, %v2226_v53, %v7454_v41  ;;  %v7463_v53 = vunpack.i.l.bf16 %v9408_v20 }
 0x295   :  { %v7477_v60 = vpop.permute.xlu1 %7476 }
 0x296   :  { %v7472_v26 = vpop.permute.xlu0 %7471  ;;  %v7479_v27 = vunpack.i.h.bf16 %v7477_v60  ;;  %v7478_v15 = vunpack.i.l.bf16 %v7477_v60 }
 0x297   :  { %v7474_v29 = vunpack.i.h.bf16 %v7472_v26  ;;  %v7473_v43 = vunpack.i.l.bf16 %v7472_v26 }
 0x298   :  { %2568 = vmatmul.mubr.bf16.gmra.mrb[12].mxu1 %v2357_v45 }
 0x299   :  { %v7487_v63 = vpop.permute.xlu1 %7486  ;;  %v2310_v36 = vsel %vm1142_vm9, %v7474_v29, %v7479_v27  ;;  %v2309_v28 = vsel %vm1142_vm9, %v7473_v43, %v7478_v15 }
 0x29a   :  { %v7482_v19 = vpop.permute.xlu0 %7481  ;;  %v7489_v23 = vunpack.i.h.bf16 %v7487_v63  ;;  %v7488_v22 = vunpack.i.l.bf16 %v7487_v63 }
 0x29b   :  { %v7484_v61 = vunpack.i.h.bf16 %v7482_v19  ;;  %v7483_v38 = vunpack.i.l.bf16 %v7482_v19 }
 0x29c   :  { %v2326_v58 = vsel %vm2317_vm1, %v2309_v28, %v7488_v22  ;;  %v2327_v24 = vsel %vm2317_vm1, %v2310_v36, %v7489_v23  ;;  %v7468_v36 = vunpack.i.l.bf16 %v9423_v44 }
 0x29d   :  { %v7497_v55 = vpop.permute.xlu1 %7496  ;;  %v2259_v57 = vsel %vm2250_vm6, %v2242_v3, %v7483_v38  ;;  %v2260_v62 = vsel %vm2250_vm6, %v2243_v33, %v7484_v61  ;;  %v7464_v38 = vunpack.i.h.bf16 %v9408_v20 }
 0x29e   :  { %v7492_v48 = vpop.permute.xlu0 %7491  ;;  %v7499_v39 = vunpack.i.h.bf16 %v7497_v55  ;;  %v7498_v4 = vunpack.i.l.bf16 %v7497_v55 }
 0x29f   :  { %v7494_v35 = vunpack.i.h.bf16 %v7492_v48  ;;  %v7493_v37 = vunpack.i.l.bf16 %v7492_v48 }
 0x2a0   :  { %v2343_v31 = vsel %vm2334_vm3, %v2326_v58, %v7498_v4  ;;  %v2344_v2 = vsel %vm2334_vm3, %v2327_v24, %v7499_v39  ;;  %v7459_v4 = vunpack.i.h.bf16 %v9396_v51 }
 0x2a1   :  { %v2276_v8 = vsel %vm2267_vm8, %v2259_v57, %v7493_v37  ;;  %v2277_v60 = vsel %vm2267_vm8, %v2260_v62, %v7494_v35  ;;  %v2360_v26 = vpack.c.bf16 %v2344_v2, %v2343_v31  ;;  %v7507_v45 = vpop.permute.xlu1 %7506  ;;  %v7458_v35 = vunpack.i.l.bf16 %v9396_v51 }
 0x2a2   :  { %v7502_v50 = vpop.permute.xlu0 %7501  ;;  %v2293_v59 = vsel %vm2284_vm10, %v2276_v8, %v7473_v43  ;;  %v2294_v41 = vsel %vm2284_vm10, %v2277_v60, %v7474_v29  ;;  %v7509_v0 = vunpack.i.h.bf16 %v7507_v45  ;;  %v7508_v47 = vunpack.i.l.bf16 %v7507_v45 }
 0x2a3   :  { %v7504_v27 = vunpack.i.h.bf16 %v7502_v50  ;;  %v7503_v15 = vunpack.i.l.bf16 %v7502_v50  ;;  %6153 = vmatprep.mubr.msk.bf16.mxu1 %vm2482_vm4, %v2360_v26  ;;  %v2359_v63 = vpack.c.bf16 %v2294_v41, %v2293_v59 }
 0x2a5   :  { %v2228_v19 = vsel %vm1176_vm5, %v9233_v54, %v7504_v27  ;;  %v2227_v23 = vsel %vm1176_vm5, %v9239_v12, %v7503_v15  ;;  %2576 = vmatmul.mubr.bf16.gmra.mrb[16].mxu1 %v2359_v63  ;;  %v7512_v22 = vpop.permute.xlu1 %7511  ;;  %v7469_v12 = vunpack.i.h.bf16 %v9423_v44 }
 0x2a6   :  { %v7527_v61 = vpop.permute.xlu0 %7526  ;;  %v2245_v43 = vsel %vm2233_vm2, %v2228_v19, %v7509_v0  ;;  %v2244_v29 = vsel %vm2233_vm2, %v2227_v23, %v7508_v47  ;;  %v7514_v28 = vunpack.i.h.bf16 %v7512_v22  ;;  %v7513_v55 = vunpack.i.l.bf16 %v7512_v22 }
 0x2a7   :  { %v2261_v33 = vsel %vm2250_vm6, %v2244_v29, %v7463_v53  ;;  %v2262_v54 = vsel %vm2250_vm6, %v2245_v43, %v7464_v38  ;;  %v7529_v63 = vunpack.i.h.bf16 %v7527_v61  ;;  %v7528_v19 = vunpack.i.l.bf16 %v7527_v61 }
 0x2a8   :  { %v2278_v20 = vsel %vm2267_vm8, %v2261_v33, %v7468_v36  ;;  %v2279_v37 = vsel %vm2267_vm8, %v2262_v54, %v7469_v12  ;;  %v2311_v57 = vsel %vm1142_vm9, %v7458_v35, %v7513_v55  ;;  %v2312_v62 = vsel %vm1142_vm9, %v7459_v4, %v7514_v28 }
 0x2a9   :  { %v7517_v46 = vpop.permute.xlu1 %7516  ;;  %v2295_v60 = vsel %vm2284_vm10, %v2278_v20, %v7458_v35  ;;  %v2296_v51 = vsel %vm2284_vm10, %v2279_v37, %v7459_v4  ;;  %v2230_v54 = vsel %vm1176_vm5, %v9278_v30, %v7529_v63  ;;  %v2229_v12 = vsel %vm1176_vm5, %v9229_v52, %v7528_v19 }
 0x2aa   :  { %v9462_v3 = vpop.permute.xlu0 %7536  ;;  %v7519_v48 = vunpack.i.h.bf16 %v7517_v46  ;;  %v7518_v39 = vunpack.i.l.bf16 %v7517_v46  ;;  %v2361_v0 = vpack.c.bf16 %v2296_v51, %v2295_v60 }
 0x2ac   :  { %v2328_v2 = vsel %vm2317_vm1, %v2311_v57, %v7518_v39  ;;  %v2329_v8 = vsel %vm2317_vm1, %v2312_v62, %v7519_v48 }
 0x2ad   :  { %v7522_v58 = vpop.permute.xlu1 %7521 }
 0x2ae   :  { %v9472_v24 = vpop.permute.xlu0 %7546  ;;  %v7524_v44 = vunpack.i.h.bf16 %v7522_v58  ;;  %v7523_v31 = vunpack.i.l.bf16 %v7522_v58 }
 0x2af   :  { %v7549_v19 = vunpack.i.h.bf16 %v9472_v24 }
 0x2b0   :  { %v2345_v26 = vsel %vm2334_vm3, %v2328_v2, %v7523_v31  ;;  %v2346_v45 = vsel %vm2334_vm3, %v2329_v8, %v7524_v44 }
 0x2b1   :  { %v2362_v50 = vpack.c.bf16 %v2346_v45, %v2345_v26  ;;  %v7532_v59 = vpop.permute.xlu1 %7531 }
 0x2b2   :  { %v7557_v41 = vpop.permute.xlu0 %7556  ;;  %v7534_v22 = vunpack.i.h.bf16 %v7532_v59  ;;  %v7533_v43 = vunpack.i.l.bf16 %v7532_v59 }
 0x2b3   :  { %6154 = vmatprep.mubr.msk.bf16.mxu1 %vm2482_vm4, %v2362_v50  ;;  %v7559_v37 = vunpack.i.h.bf16 %v7557_v41  ;;  %v7558_v30 = vunpack.i.l.bf16 %v7557_v41  ;;  %v7539_v41 = vunpack.i.h.bf16 %v9462_v3 }
 0x2b4   :  { %2584 = vmatmul.mubr.bf16.gmra.mrb[20].mxu1 %v2361_v0  ;;  %v2246_v36 = vsel %vm2233_vm2, %v2229_v12, %v7533_v43  ;;  %v2247_v28 = vsel %vm2233_vm2, %v2230_v54, %v7534_v22  ;;  %v7538_v0 = vunpack.i.l.bf16 %v9462_v3 }
 0x2b5   :  { %v9483_v47 = vpop.permute.xlu1 %7541 }
 0x2b6   :  { %v7567_v27 = vpop.permute.xlu0 %7566  ;;  %v7543_v22 = vunpack.i.l.bf16 %v9483_v47 }
 0x2b7   :  { %v7569_v29 = vunpack.i.h.bf16 %v7567_v27  ;;  %v7568_v38 = vunpack.i.l.bf16 %v7567_v27 }
 0x2b9   :  { %v9485_v15 = vpop.permute.xlu1 %7551  ;;  %v2263_v61 = vsel %vm2250_vm6, %v2246_v36, %v7568_v38  ;;  %v2264_v55 = vsel %vm2250_vm6, %v2247_v28, %v7569_v29 }
 0x2ba   :  { %v7577_v23 = vpop.permute.xlu0 %7576  ;;  %v7554_v3 = vunpack.i.h.bf16 %v9485_v15  ;;  %v7553_v12 = vunpack.i.l.bf16 %v9485_v15 }
 0x2bb   :  { %v7579_v46 = vunpack.i.h.bf16 %v7577_v23  ;;  %v7578_v33 = vunpack.i.l.bf16 %v7577_v23  ;;  %v7544_v23 = vunpack.i.h.bf16 %v9483_v47 }
 0x2bd   :  { %v7562_v53 = vpop.permute.xlu1 %7561  ;;  %v2280_v39 = vsel %vm2267_vm8, %v2263_v61, %v7578_v33  ;;  %v2281_v4 = vsel %vm2267_vm8, %v2264_v55, %v7579_v46 }
 0x2be   :  { %v7564_v35 = vunpack.i.h.bf16 %v7562_v53  ;;  %v7563_v20 = vunpack.i.l.bf16 %v7562_v53  ;;  %v7587_v58 = vpop.permute.xlu0 %7586  ;;  %v2297_v44 = vsel %vm2284_vm10, %v2280_v39, %v7558_v30  ;;  %v2298_v31 = vsel %vm2284_vm10, %v2281_v4, %v7559_v37 }
 0x2bf   :  { %v7589_v26 = vunpack.i.h.bf16 %v7587_v58  ;;  %v7588_v45 = vunpack.i.l.bf16 %v7587_v58  ;;  %v7548_v53 = vunpack.i.l.bf16 %v9472_v24  ;;  %v2363_v54 = vpack.c.bf16 %v2298_v31, %v2297_v44 }
 0x2c0   :  { %v2313_v2 = vsel %vm1142_vm9, %v7558_v30, %v7563_v20  ;;  %v2314_v8 = vsel %vm1142_vm9, %v7559_v37, %v7564_v35  ;;  %v2316_v39 = vsel %vm1142_vm9, %v7539_v41, %v7544_v23 }
 0x2c1   :  { %v7572_v48 = vpop.permute.xlu1 %7571  ;;  %v2232_v36 = vsel %vm1176_vm5, %v9289_v56, %v7589_v26  ;;  %v2231_v28 = vsel %vm1176_vm5, %v9295_v34, %v7588_v45  ;;  %v2333_v58 = vsel %vm2317_vm1, %v2316_v39, %v7554_v3  ;;  %v9545_v26 = vld [vmem:[%s11056_s1] ss:$0 sm:$0xff] }
 0x2c2   :  { %v7574_v57 = vunpack.i.h.bf16 %v7572_v48  ;;  %v7573_v52 = vunpack.i.l.bf16 %v7572_v48  ;;  %v7597_v43 = vpop.permute.xlu0 %7596  ;;  %v2315_v48 = vsel %vm1142_vm9, %v7538_v0, %v7543_v22  ;;  %vm3151_vm9 = vcmask 386048  }
 0x2c3   :  { %v7599_v47 = vunpack.i.h.bf16 %v7597_v43  ;;  %v7598_v61 = vunpack.i.l.bf16 %v7597_v43  ;;  %v2332_v30 = vsel %vm2317_vm1, %v2315_v48, %v7553_v12  ;;  %3152 = vst.msk [vmem:[#allocation4 + $0x8] sm:$0x3] %vm3151_vm9, %v8157_v1  ;;  %3154 = vst.msk [vmem:[#allocation4 + $0xa8] sm:$0x3] %vm3151_vm9, %v8157_v1 }
 0x2c4   :  { %v2330_v50 = vsel %vm2317_vm1, %v2313_v2, %v7573_v52  ;;  %v2331_v59 = vsel %vm2317_vm1, %v2314_v8, %v7574_v57  ;;  %v7622_v8 = vld [vmem:[%s11055_s3] sm:$0xff]  }
 0x2c5   :  { %v7582_v62 = vpop.permute.xlu1 %7581  ;;  %6652 = vmatprep.subr.bf16.mxu0 %v7622_v8 }
 0x2c6   :  { %v7584_v60 = vunpack.i.h.bf16 %v7582_v62  ;;  %v7583_v51 = vunpack.i.l.bf16 %v7582_v62  ;;  %6653 = vmatpush3.bf16.msra.mxu0 %v7622_v8 }
 0x2c8   :  { %v2347_v27 = vsel %vm2334_vm3, %v2330_v50, %v7583_v51  ;;  %v2348_v63 = vsel %vm2334_vm3, %v2331_v59, %v7584_v60  ;;  %v7623_v60 = vld [vmem:[%s11055_s3 + $0x8] ss:$0 sps:$4 sm:$0xff]  }
 0x2c9   :  { %v2364_v29 = vpack.c.bf16 %v2348_v63, %v2347_v27  ;;  %v7592_v38 = vpop.permute.xlu1 %7591  ;;  %6943 = vmatprep.subr.msk.bf16.mxu0 %vm2507_vm0, %v7623_v60  ;;  %v2772_v51 = vsel %vm2507_vm0, %v7623_v60, 0 }
 0x2ca   :  { %v7594_v46 = vunpack.i.h.bf16 %v7592_v38  ;;  %v7593_v33 = vunpack.i.l.bf16 %v7592_v38  ;;  %6655 = vmatpush3.bf16.msra.mxu0 %v2772_v51 }
 0x2cb   :  { %6155 = vmatprep.mubr.msk.bf16.mxu1 %vm2482_vm4, %v2364_v29 }
 0x2cc   :  { %v2248_v55 = vsel %vm2233_vm2, %v2231_v28, %v7593_v33  ;;  %v2249_v24 = vsel %vm2233_vm2, %v2232_v36, %v7594_v46  ;;  %2592 = vmatmul.mubr.bf16.gmra.mrb[24].mxu1 %v2363_v54 }
 0x2cd   :  { %v2265_v15 = vsel %vm2250_vm6, %v2248_v55, %v7548_v53  ;;  %v2266_v56 = vsel %vm2250_vm6, %v2249_v24, %v7549_v19  ;;  %v7602_v4 = vpop.permute.xlu1 %7601 }
 0x2ce   :  { %v7604_v35 = vunpack.i.h.bf16 %v7602_v4  ;;  %v7603_v34 = vunpack.i.l.bf16 %v7602_v4  ;;  %v2282_v20 = vsel %vm2267_vm8, %v2265_v15, %v7598_v61  ;;  %v2283_v37 = vsel %vm2267_vm8, %v2266_v56, %v7599_v47 }
 0x2cf   :  { %v2299_v57 = vsel %vm2284_vm10, %v2282_v20, %v7538_v0  ;;  %v2300_v52 = vsel %vm2284_vm10, %v2283_v37, %v7539_v41 }
 0x2d0   :  { %v2349_v62 = vsel %vm2334_vm3, %v2332_v30, %v7603_v34  ;;  %v2350_v44 = vsel %vm2334_vm3, %v2333_v58, %v7604_v35  ;;  %v2365_v2 = vpack.c.bf16 %v2300_v52, %v2299_v57 }
 0x2d1   :  { %v2366_v31 = vpack.c.bf16 %v2350_v44, %v2349_v62 }
 0x2d3   :  { %6156 = vmatprep.mubr.msk.bf16.mxu1 %vm2482_vm4, %v2366_v31 }
 0x2d4   :  { %2600 = vmatmul.mubr.bf16.gmra.mrb[28].mxu1 %v2365_v2 }
 0x2d5   :  { %4280 = vmatprep.mubr.bf16.mxu1 %v8165_v49 }
 0x338   :  { %v2545_v45 = vpop.f32.mrb[0].mxu1 }
 0x339   :  { %v2546_v50 = vadd.f32 %v9545_v26, %v2545_v45  ;;  %v2547_v59 = vpop.f32.mrb[1].mxu1 }
 0x33a   :  { %v2548_v41 = vpop.f32.mrb[2].mxu1 }
 0x33b   :  { %v6157_v0 = vmul.f32 -1.442695, %v2546_v50  ;;  %v2549_v27 = vadd.f32 %v9545_v26, %v2548_v41  ;;  %v2550_v63 = vpop.f32.mrb[3].mxu1 }
 0x33d   :  { %7738 = vpow2.f32 %v6157_v0  ;;  %v6158_v19 = vmul.f32 -1.442695, %v2549_v27 }
 0x33f   :  { %7740 = vpow2.f32 %v6158_v19 }
 0x347   :  { %v7739_v23 = vpop.eup %7738  ;;  %v2553_v43 = vpop.f32.mrb[4].mxu1 }
 0x348   :  { %v2656_v22 = vadd.f32 1.0, %v7739_v23  ;;  %v2554_v38 = vadd.f32 %v9545_v26, %v2553_v43  ;;  %v2555_v53 = vpop.f32.mrb[5].mxu1 }
 0x349   :  { %v7741_v29 = vpop.eup %7740  ;;  %v2556_v33 = vpop.f32.mrb[6].mxu1 }
 0x34a   :  { %7742 = vrcp.f32 %v2656_v22  ;;  %v2657_v46 = vadd.f32 1.0, %v7741_v29  ;;  %v6159_v54 = vmul.f32 -1.442695, %v2554_v38  ;;  %v2557_v3 = vadd.f32 %v9545_v26, %v2556_v33  ;;  %v2558_v12 = vpop.f32.mrb[7].mxu1 }
 0x34c   :  { %7744 = vrcp.f32 %v2657_v46  ;;  %v6160_v36 = vmul.f32 -1.442695, %v2557_v3 }
 0x34d   :  { %7746 = vpow2.f32 %v6159_v54 }
 0x34e   :  { %7748 = vpow2.f32 %v6160_v36 }
 0x354   :  { %v7743_v28 = vpop.eup %7742 }
 0x355   :  { %v2704_v55 = vmul.f32 %v7743_v28, %v2546_v50 }
 0x356   :  { %v7745_v47 = vpop.eup %7744 }
 0x357   :  { %v7747_v61 = vpop.eup %7746  ;;  %v2705_v24 = vmul.f32 %v7745_v47, %v2549_v27 }
 0x358   :  { %v2658_v48 = vadd.f32 1.0, %v7747_v61  ;;  %v7749_v39 = vpop.eup %7748 }
 0x359   :  { %v2720_v15 = vpack.c.bf16 %v2705_v24, %v2704_v55  ;;  %v2659_v56 = vadd.f32 1.0, %v7749_v39 }
 0x35a   :  { %7750 = vrcp.f32 %v2658_v48 }
 0x35b   :  { %6656 = vmatprep.mubr.msk.bf16.mxu0 %vm1176_vm5, %v2720_v15  ;;  %7752 = vrcp.f32 %v2659_v56 }
 0x363   :  { %v2561_v35 = vpop.f32.mrb[8].mxu1 }
 0x364   :  { %v7751_v4 = vpop.eup %7750  ;;  %v2562_v34 = vadd.f32 %v9545_v26, %v2561_v35  ;;  %v2563_v20 = vpop.f32.mrb[9].mxu1 }
 0x365   :  { %v7753_v37 = vpop.eup %7752  ;;  %v2564_v30 = vpop.f32.mrb[10].mxu1  ;;  %v2706_v58 = vmul.f32 %v7751_v4, %v2554_v38 }
 0x366   :  { %v2707_v57 = vmul.f32 %v7753_v37, %v2557_v3  ;;  %v6161_v52 = vmul.f32 -1.442695, %v2562_v34  ;;  %v2565_v62 = vadd.f32 %v9545_v26, %v2564_v30  ;;  %v2566_v44 = vpop.f32.mrb[11].mxu1 }
 0x368   :  { %v2721_v31 = vpack.c.bf16 %v2707_v57, %v2706_v58  ;;  %7754 = vpow2.f32 %v6161_v52  ;;  %v6162_v2 = vmul.f32 -1.442695, %v2565_v62 }
 0x36a   :  { %7756 = vpow2.f32 %v6162_v2  ;;  %6657 = vmatmul.mubr.msk.bf16.vlgmr.msra.gmra.mrb[16].mxu0 %vm1176_vm5, %v2721_v31 }
 0x36b   :  { %v2569_v8 = vpop.f32.mrb[12].mxu1 }
 0x36c   :  { %v2570_v60 = vadd.f32 %v9545_v26, %v2569_v8  ;;  %v2571_v51 = vpop.f32.mrb[13].mxu1 }
 0x36d   :  { %v2572_v45 = vpop.f32.mrb[14].mxu1 }
 0x36e   :  { %v6163_v50 = vmul.f32 -1.442695, %v2570_v60  ;;  %v2573_v59 = vadd.f32 %v9545_v26, %v2572_v45  ;;  %v2574_v41 = vpop.f32.mrb[15].mxu1 }
 0x370   :  { %7758 = vpow2.f32 %v6163_v50  ;;  %v6164_v0 = vmul.f32 -1.442695, %v2573_v59 }
 0x372   :  { %v7755_v27 = vpop.eup %7754  ;;  %7760 = vpow2.f32 %v6164_v0 }
 0x373   :  { %v2660_v63 = vadd.f32 1.0, %v7755_v27 }
 0x374   :  { %v7757_v19 = vpop.eup %7756 }
 0x375   :  { %7762 = vrcp.f32 %v2660_v63  ;;  %v2661_v23 = vadd.f32 1.0, %v7757_v19 }
 0x377   :  { %7764 = vrcp.f32 %v2661_v23 }
 0x378   :  { %v2577_v22 = vpop.f32.mrb[16].mxu1 }
 0x379   :  { %v2578_v43 = vadd.f32 %v9545_v26, %v2577_v22  ;;  %v2579_v29 = vpop.f32.mrb[17].mxu1 }
 0x37a   :  { %v7759_v38 = vpop.eup %7758  ;;  %v2580_v53 = vpop.f32.mrb[18].mxu1 }
 0x37b   :  { %v2662_v46 = vadd.f32 1.0, %v7759_v38  ;;  %v6165_v33 = vmul.f32 -1.442695, %v2578_v43  ;;  %v2581_v54 = vadd.f32 %v9545_v26, %v2580_v53  ;;  %v2582_v3 = vpop.f32.mrb[19].mxu1 }
 0x37c   :  { %v7761_v12 = vpop.eup %7760 }
 0x37d   :  { %7766 = vrcp.f32 %v2662_v46  ;;  %v2663_v36 = vadd.f32 1.0, %v7761_v12  ;;  %v6166_v28 = vmul.f32 -1.442695, %v2581_v54 }
 0x37e   :  { %7768 = vpow2.f32 %v6165_v33 }
 0x37f   :  { %v7763_v47 = vpop.eup %7762  ;;  %7770 = vrcp.f32 %v2663_v36 }
 0x380   :  { %7772 = vpow2.f32 %v6166_v28  ;;  %v2708_v55 = vmul.f32 %v7763_v47, %v2562_v34 }
 0x381   :  { %v7765_v61 = vpop.eup %7764 }
 0x382   :  { %v2709_v24 = vmul.f32 %v7765_v61, %v2565_v62 }
 0x384   :  { %v2722_v48 = vpack.c.bf16 %v2709_v24, %v2708_v55 }
 0x386   :  { %6660 = vmatprep.mubr.msk.bf16.mxu0 %vm1176_vm5, %v2722_v48 }
 0x387   :  { %v7767_v39 = vpop.eup %7766  ;;  %v2585_v15 = vpop.f32.mrb[20].mxu1 }
 0x388   :  { %v7769_v56 = vpop.eup %7768  ;;  %v2586_v4 = vadd.f32 %v9545_v26, %v2585_v15  ;;  %v2587_v35 = vpop.f32.mrb[21].mxu1  ;;  %v2710_v57 = vmul.f32 %v7767_v39, %v2570_v60 }
 0x389   :  { %v7771_v20 = vpop.eup %7770  ;;  %v2664_v37 = vadd.f32 1.0, %v7769_v56  ;;  %v2588_v30 = vpop.f32.mrb[22].mxu1 }
 0x38a   :  { %v7773_v58 = vpop.eup %7772  ;;  %v2711_v52 = vmul.f32 %v7771_v20, %v2573_v59  ;;  %v6167_v44 = vmul.f32 -1.442695, %v2586_v4  ;;  %v2589_v31 = vadd.f32 %v9545_v26, %v2588_v30  ;;  %v2590_v34 = vpop.f32.mrb[23].mxu1 }
 0x38b   :  { %7774 = vrcp.f32 %v2664_v37  ;;  %v2665_v62 = vadd.f32 1.0, %v7773_v58 }
 0x38c   :  { %v2723_v2 = vpack.c.bf16 %v2711_v52, %v2710_v57  ;;  %7776 = vpow2.f32 %v6167_v44  ;;  %v6168_v8 = vmul.f32 -1.442695, %v2589_v31 }
 0x38d   :  { %7778 = vrcp.f32 %v2665_v62  ;;  %v7624_v62 = vld [vmem:[%s10950_s7] sm:$0xff]  }
 0x38e   :  { %7780 = vpow2.f32 %v6168_v8  ;;  %6661 = vmatmul.mubr.msk.bf16.gmra.mrb[20].mxu0 %vm1176_vm5, %v2723_v2  ;;  %6672 = vmatprep.subr.bf16.mxu0 %v7624_v62 }
 0x38f   :  { %6673 = vmatpush3.bf16.msra.mxu0 %v7624_v62 }
 0x395   :  { %v7775_v51 = vpop.eup %7774 }
 0x396   :  { %v7777_v45 = vpop.eup %7776  ;;  %v2712_v60 = vmul.f32 %v7775_v51, %v2578_v43  ;;  %v7625_v51 = vld [vmem:[%s10950_s7 + $0x8] ss:$0 sps:$4 sm:$0xff]  }
 0x397   :  { %v7779_v50 = vpop.eup %7778  ;;  %v2666_v41 = vadd.f32 1.0, %v7777_v45  ;;  %6944 = vmatprep.subr.msk.bf16.mxu0 %vm2507_vm0, %v7625_v51 }
 0x398   :  { %v7781_v0 = vpop.eup %7780  ;;  %v2713_v59 = vmul.f32 %v7779_v50, %v2581_v54 }
 0x399   :  { %7782 = vrcp.f32 %v2666_v41  ;;  %v2667_v27 = vadd.f32 1.0, %v7781_v0  ;;  %v2939_v41 = vsel %vm2507_vm0, %v7625_v51, 0 }
 0x39a   :  { %v2724_v63 = vpack.c.bf16 %v2713_v59, %v2712_v60  ;;  %6675 = vmatpush3.bf16.msra.mxu0 %v2939_v41  ;;  %v6173_v60 = vld [vmem:[%s10949_s6] ss:$0 sm:$0xff] }
 0x39b   :  { %7784 = vrcp.f32 %v2667_v27  ;;  %6692 = vmatprep.subr.bf16.mxu0 %v8157_v1 }
 0x39c   :  { %6664 = vmatprep.mubr.msk.bf16.mxu0 %vm1176_vm5, %v2724_v63 }
 0x39f   :  { %v2593_v19 = vpop.f32.mrb[24].mxu1 }
 0x3a0   :  { %v2594_v23 = vadd.f32 %v9545_v26, %v2593_v19  ;;  %v2595_v22 = vpop.f32.mrb[25].mxu1 }
 0x3a1   :  { %v2596_v29 = vpop.f32.mrb[26].mxu1 }
 0x3a2   :  { %v6169_v38 = vmul.f32 -1.442695, %v2594_v23  ;;  %v2597_v53 = vadd.f32 %v9545_v26, %v2596_v29  ;;  %v2598_v46 = vpop.f32.mrb[27].mxu1 }
 0x3a3   :  { %v7783_v33 = vpop.eup %7782 }
 0x3a4   :  { %7786 = vpow2.f32 %v6169_v38  ;;  %v6170_v3 = vmul.f32 -1.442695, %v2597_v53  ;;  %v2714_v54 = vmul.f32 %v7783_v33, %v2586_v4 }
 0x3a5   :  { %v7785_v43 = vpop.eup %7784 }
 0x3a6   :  { %v2715_v12 = vmul.f32 %v7785_v43, %v2589_v31  ;;  %7788 = vpow2.f32 %v6170_v3 }
 0x3a7   :  { %v2601_v36 = vpop.f32.mrb[28].mxu1 }
 0x3a8   :  { %v2725_v28 = vpack.c.bf16 %v2715_v12, %v2714_v54  ;;  %v2602_v47 = vadd.f32 %v9545_v26, %v2601_v36  ;;  %v2603_v61 = vpop.f32.mrb[29].mxu1 }
 0x3a9   :  { %v2604_v55 = vpop.f32.mrb[30].mxu1 }
 0x3aa   :  { %v6171_v24 = vmul.f32 -1.442695, %v2602_v47  ;;  %v2605_v48 = vadd.f32 %v9545_v26, %v2604_v55  ;;  %v2606_v39 = vpop.f32.mrb[31].mxu1  ;;  %6665 = vmatmul.mubr.msk.bf16.gmra.mrb[24].mxu0 %vm1176_vm5, %v2725_v28 }
 0x3ac   :  { %7790 = vpow2.f32 %v6171_v24  ;;  %v6172_v15 = vmul.f32 -1.442695, %v2605_v48 }
 0x3ae   :  { %v7787_v56 = vpop.eup %7786  ;;  %7792 = vpow2.f32 %v6172_v15 }
 0x3af   :  { %v2668_v35 = vadd.f32 1.0, %v7787_v56 }
 0x3b0   :  { %v7789_v4 = vpop.eup %7788 }
 0x3b1   :  { %7794 = vrcp.f32 %v2668_v35  ;;  %v2669_v20 = vadd.f32 1.0, %v7789_v4 }
 0x3b3   :  { %7796 = vrcp.f32 %v2669_v20 }
 0x3b6   :  { %v7791_v37 = vpop.eup %7790 }
 0x3b7   :  { %v2670_v30 = vadd.f32 1.0, %v7791_v37 }
 0x3b8   :  { %v7793_v58 = vpop.eup %7792 }
 0x3b9   :  { %7798 = vrcp.f32 %v2670_v30  ;;  %v2671_v57 = vadd.f32 1.0, %v7793_v58 }
 0x3bb   :  { %v7795_v52 = vpop.eup %7794  ;;  %7800 = vrcp.f32 %v2671_v57 }
 0x3bc   :  { %v2716_v44 = vmul.f32 %v7795_v52, %v2594_v23 }
 0x3bd   :  { %v7797_v26 = vpop.eup %7796 }
 0x3be   :  { %v2717_v31 = vmul.f32 %v7797_v26, %v2597_v53 }
 0x3c0   :  { %v2726_v34 = vpack.c.bf16 %v2717_v31, %v2716_v44 }
 0x3c2   :  { %6668 = vmatprep.mubr.msk.bf16.mxu0 %vm1176_vm5, %v2726_v34 }
 0x3c3   :  { %v7799_v2 = vpop.eup %7798 }
 0x3c4   :  { %v2718_v45 = vmul.f32 %v7799_v2, %v2602_v47 }
 0x3c5   :  { %v7801_v8 = vpop.eup %7800 }
 0x3c6   :  { %v2719_v50 = vmul.f32 %v7801_v8, %v2605_v48 }
 0x3c8   :  { %v2727_v0 = vpack.c.bf16 %v2719_v50, %v2718_v45 }
 0x3ca   :  { %6669 = vmatmul.mubr.msk.bf16.gmra.mrb[28].mxu0 %vm1176_vm5, %v2727_v0 }
 0x43d   :  { %v6658_v59 = vpop.f32.mrb[16].mxu0 }
 0x43e   :  { %v2817_v27 = vadd.f32 %v6658_v59, %v6173_v60  ;;  %v2808_v63 = vpop.f32.mrb[17].mxu0 }
 0x43f   :  { %v2809_v19 = vadd.f32 %v6173_v60, %v2808_v63  ;;  %v6659_v23 = vpop.f32.mrb[18].mxu0 }
 0x440   :  { %v2820_v22 = vadd.f32 %v6659_v23, %v6173_v60  ;;  %v2811_v29 = vpop.f32.mrb[19].mxu0  ;;  %v2873_v53 = vadd.f32 %v2817_v27, %v8996_v7 }
 0x441   :  { %v2812_v38 = vadd.f32 %v6173_v60, %v2811_v29  ;;  %v2871_v33 = vadd.f32 %v2809_v19, %v8999_v9 }
 0x442   :  { %v2874_v46 = vadd.f32 %v2820_v22, %v9003_v11 }
 0x443   :  { %v2872_v3 = vadd.f32 %v2812_v38, %v9010_v13 }
 0x444   :  { %v2888_v43 = vpack.c.bf16 %v2874_v46, %v2873_v53 }
 0x445   :  { %v2887_v54 = vpack.c.bf16 %v2872_v3, %v2871_v33 }
 0x447   :  { %6676 = vmatprep.mubr.msk.bf16.mxu0 %vm1176_vm5, %v2887_v54 }
 0x448   :  { %6677 = vmatmul.mubr.msk.bf16.vlgmr.msra.gmra.mrb[32].mxu0 %vm1176_vm5, %v2888_v43 }
 0x461   :  { %v6662_v12 = vpop.f32.mrb[20].mxu0 }
 0x462   :  { %v2833_v36 = vadd.f32 %v6662_v12, %v6173_v60  ;;  %v2824_v28 = vpop.f32.mrb[21].mxu0 }
 0x463   :  { %v2825_v47 = vadd.f32 %v6173_v60, %v2824_v28  ;;  %v6663_v61 = vpop.f32.mrb[22].mxu0  ;;  %v7627_v28 = vld [vmem:[%s10954_s11 + $0x8] sm:$0xff]  }
 0x464   :  { %v2836_v55 = vadd.f32 %v6663_v61, %v6173_v60  ;;  %v2827_v24 = vpop.f32.mrb[23].mxu0  ;;  %v2877_v11 = vadd.f32 %v2833_v36, %v9101_v6  ;;  %v7626_v36 = vld [vmem:[%s10954_s11] sm:$0xff]  }
 0x465   :  { %v2828_v7 = vadd.f32 %v6173_v60, %v2827_v24  ;;  %v2875_v13 = vadd.f32 %v2825_v47, %v9104_v10  ;;  %6693 = vmatpush3.bf16.msra.mxu0 %v7626_v36  ;;  %v3211_v36 = vld [vmem:[#allocation4] ss:$2 sm:$0xf] }
 0x466   :  { %v2878_v9 = vadd.f32 %v2836_v55, %v9110_v14  ;;  %6694 = vmatprep.subr.bf16.mxu0 %v8157_v1 }
 0x467   :  { %v2876_v48 = vadd.f32 %v2828_v7, %v9115_v16 }
 0x468   :  { %v2890_v39 = vpack.c.bf16 %v2878_v9, %v2877_v11 }
 0x469   :  { %v2889_v15 = vpack.c.bf16 %v2876_v48, %v2875_v13  ;;  %6695 = vmatpush3.bf16.msra.mxu0 %v7627_v28  ;;  %v7628_v13 = vld [vmem:[%s10954_s11 + $0x10] sm:$0xff]  }
 0x46a   :  { %6696 = vmatprep.subr.bf16.mxu0 %v8157_v1 }
 0x46b   :  { %6680 = vmatprep.mubr.msk.bf16.mxu0 %vm1176_vm5, %v2889_v15 }
 0x46c   :  { %6681 = vmatmul.mubr.msk.bf16.gmra.mrb[36].mxu0 %vm1176_vm5, %v2890_v39 }
 0x46d   :  { %6697 = vmatpush3.bf16.msra.mxu0 %v7628_v13 }
 0x46e   :  { %6702 = vmatprep.subr.bf16.mxu0 %v8157_v1 }
 0x47d   :  { %v6666_v56 = vpop.f32.mrb[24].mxu0 }
 0x47e   :  { %v2849_v35 = vadd.f32 %v6666_v56, %v6173_v60  ;;  %v2840_v4 = vpop.f32.mrb[25].mxu0 }
 0x47f   :  { %v2841_v20 = vadd.f32 %v6173_v60, %v2840_v4  ;;  %v6667_v37 = vpop.f32.mrb[26].mxu0 }
 0x480   :  { %v2852_v30 = vadd.f32 %v6667_v37, %v6173_v60  ;;  %v2843_v58 = vpop.f32.mrb[27].mxu0  ;;  %v2881_v14 = vadd.f32 %v2849_v35, %v9175_v5 }
 0x481   :  { %v2844_v6 = vadd.f32 %v6173_v60, %v2843_v58  ;;  %v2879_v16 = vadd.f32 %v2841_v20, %v9178_v17 }
 0x482   :  { %v2882_v10 = vadd.f32 %v2852_v30, %v9185_v21 }
 0x483   :  { %v2880_v57 = vadd.f32 %v2844_v6, %v9190_v18 }
 0x484   :  { %v2892_v52 = vpack.c.bf16 %v2882_v10, %v2881_v14 }
 0x485   :  { %v2891_v26 = vpack.c.bf16 %v2880_v57, %v2879_v16 }
 0x487   :  { %6684 = vmatprep.mubr.msk.bf16.mxu0 %vm1176_vm5, %v2891_v26 }
 0x488   :  { %6685 = vmatmul.mubr.msk.bf16.gmra.mrb[40].mxu0 %vm1176_vm5, %v2892_v52 }
 0x49d   :  { %v6670_v44 = vpop.f32.mrb[28].mxu0 }
 0x49e   :  { %v2865_v31 = vadd.f32 %v6670_v44, %v6173_v60  ;;  %v2856_v34 = vpop.f32.mrb[29].mxu0 }
 0x49f   :  { %v2857_v62 = vadd.f32 %v6173_v60, %v2856_v34  ;;  %v6671_v2 = vpop.f32.mrb[30].mxu0 }
 0x4a0   :  { %v2868_v8 = vadd.f32 %v6671_v2, %v6173_v60  ;;  %v2859_v51 = vpop.f32.mrb[31].mxu0  ;;  %v2885_v21 = vadd.f32 %v2865_v31, %v9252_v32  ;;  %v9612_v32 = vld [vmem:[%s10951_s8] ss:$0 sm:$0xff] }
 0x4a1   :  { %v2860_v5 = vadd.f32 %v6173_v60, %v2859_v51  ;;  %v2883_v18 = vadd.f32 %v2857_v62, %v9255_v40 }
 0x4a2   :  { %v2886_v17 = vadd.f32 %v2868_v8, %v9262_v42 }
 0x4a3   :  { %v2884_v45 = vadd.f32 %v2860_v5, %v9267_v25 }
 0x4a4   :  { %v2894_v50 = vpack.c.bf16 %v2886_v17, %v2885_v21 }
 0x4a5   :  { %v2893_v41 = vpack.c.bf16 %v2884_v45, %v2883_v18 }
 0x4a7   :  { %6688 = vmatprep.mubr.msk.bf16.mxu0 %vm1176_vm5, %v2893_v41 }
 0x4a8   :  { %6689 = vmatmul.mubr.msk.bf16.gmra.mrb[44].mxu0 %vm1176_vm5, %v2894_v50  ;;  %vm8172_vm5 = vmmov 0  }
 0x4a9   :  { %6698 = vmatprep.mubr.msk.bf16.mxu0 %vm8172_vm5, %v8157_v1 }
 0x51b   :  { %v6678_v42 = vpop.f32.mrb[32].mxu0 }
 0x51c   :  { %v2984_v40 = vadd.f32 %v6678_v42, %v9612_v32  ;;  %v2975_v25 = vpop.f32.mrb[33].mxu0 }
 0x51d   :  { %v2976_v0 = vadd.f32 %v9612_v32, %v2975_v25  ;;  %v6679_v60 = vpop.f32.mrb[34].mxu0 }
 0x51e   :  { %v6197_v59 = vmul.f32 -1.442695, %v2984_v40  ;;  %v2987_v27 = vadd.f32 %v6679_v60, %v9612_v32  ;;  %v2978_v63 = vpop.f32.mrb[35].mxu0 }
 0x51f   :  { %v6195_v19 = vmul.f32 -1.442695, %v2976_v0  ;;  %v2979_v23 = vadd.f32 %v9612_v32, %v2978_v63 }
 0x520   :  { %7802 = vpow2.f32 %v6197_v59  ;;  %v6198_v22 = vmul.f32 -1.442695, %v2987_v27 }
 0x521   :  { %7804 = vpow2.f32 %v6195_v19  ;;  %v6196_v29 = vmul.f32 -1.442695, %v2979_v23 }
 0x522   :  { %7806 = vpow2.f32 %v6198_v22 }
 0x523   :  { %7808 = vpow2.f32 %v6196_v29 }
 0x52a   :  { %v7803_v38 = vpop.eup %7802 }
 0x52b   :  { %v7805_v53 = vpop.eup %7804  ;;  %v3088_v46 = vadd.f32 1.0, %v7803_v38 }
 0x52c   :  { %v7807_v33 = vpop.eup %7806  ;;  %v3086_v3 = vadd.f32 1.0, %v7805_v53 }
 0x52d   :  { %v7809_v43 = vpop.eup %7808  ;;  %7810 = vrcp.f32 %v3088_v46  ;;  %v3089_v54 = vadd.f32 1.0, %v7807_v33 }
 0x52e   :  { %7812 = vrcp.f32 %v3086_v3  ;;  %v3087_v12 = vadd.f32 1.0, %v7809_v43 }
 0x52f   :  { %7814 = vrcp.f32 %v3089_v54  ;;  %v9657_v54 = vld [vmem:[%s10952_s9] ss:$0 sm:$0xff] }
 0x530   :  { %7816 = vrcp.f32 %v3087_v12  ;;  %v9662_v12 = vld [vmem:[%s10952_s9 + $0x1] ss:$0 sm:$0xff] }
 0x537   :  { %v7811_v47 = vpop.eup %7810 }
 0x538   :  { %v7813_v61 = vpop.eup %7812  ;;  %v3136_v55 = vmul.f32 %v7811_v47, %v2984_v40 }
 0x539   :  { %v7815_v24 = vpop.eup %7814  ;;  %v3134_v7 = vmul.f32 %v7813_v61, %v2976_v0  ;;  %v3248_v61 = vld [vmem:[#allocation4 + $0x1] ss:$2 sm:$0xf] }
 0x53a   :  { %v7817_v11 = vpop.eup %7816  ;;  %3196 = vst.msk [vmem:[#allocation4 + $0x31] sm:$0xff] %vm2233_vm2, %v3136_v55  ;;  %v3137_v9 = vmul.f32 %v7815_v24, %v2987_v27 }
 0x53b   :  { %3194 = vst.msk [vmem:[#allocation4 + $0x11] sm:$0xff] %vm2233_vm2, %v3134_v7  ;;  %v3135_v48 = vmul.f32 %v7817_v11, %v2979_v23 }
 0x53c   :  { %3197 = vst.msk [vmem:[#allocation4 + $0x41] sm:$0xff] %vm2233_vm2, %v3137_v9 }
 0x53d   :  { %3195 = vst.msk [vmem:[#allocation4 + $0x21] sm:$0xff] %vm2233_vm2, %v3135_v48  ;;  %v3230_v48 = vmul.f32 %v9657_v54, %v3211_v36 }
 0x53f   :  { %v6682_v39 = vpop.f32.mrb[36].mxu0 }
 0x540   :  { %v2991_v15 = vpop.f32.mrb[37].mxu0  ;;  %v3000_v56 = vadd.f32 %v6682_v39, %v9612_v32  ;;  %v3267_v39 = vmul.f32 %v9662_v12, %v3248_v61 }
 0x541   :  { %v2992_v35 = vadd.f32 %v9612_v32, %v2991_v15  ;;  %v6683_v20 = vpop.f32.mrb[38].mxu0 }
 0x542   :  { %v6201_v4 = vmul.f32 -1.442695, %v3000_v56  ;;  %v3003_v30 = vadd.f32 %v6683_v20, %v9612_v32  ;;  %v2994_v58 = vpop.f32.mrb[39].mxu0 }
 0x543   :  { %v6199_v37 = vmul.f32 -1.442695, %v2992_v35  ;;  %v2995_v6 = vadd.f32 %v9612_v32, %v2994_v58  ;;  %v3215_v58 = vld [vmem:[#allocation4 + $0x40] ss:$2 sm:$0xf] }
 0x544   :  { %7818 = vpow2.f32 %v6201_v4  ;;  %v6202_v14 = vmul.f32 -1.442695, %v3003_v30  ;;  %v3213_v33 = vld [vmem:[#allocation4 + $0x20] ss:$2 sm:$0xf] }
 0x545   :  { %7820 = vpow2.f32 %v6199_v37  ;;  %v6200_v10 = vmul.f32 -1.442695, %v2995_v6  ;;  %v3250_v3 = vld [vmem:[#allocation4 + $0x21] ss:$2 sm:$0xf]  ;;  %v3231_v28 = vmul.f32 %v9657_v54, %v3213_v33 }
 0x546   :  { %7822 = vpow2.f32 %v6202_v14  ;;  %v3268_v47 = vmul.f32 %v9662_v12, %v3250_v3  ;;  %v3287_v9 = vld [vmem:[#allocation4 + $0x22] ss:$2 sm:$0xf] }
 0x547   :  { %7824 = vpow2.f32 %v6200_v10  ;;  %v3285_v4 = vld [vmem:[#allocation4 + $0x2] ss:$2 sm:$0xf] }
 0x548   :  { %v3276_v15 = vadd.f32 %v3268_v47, %v3231_v28 }
 0x54e   :  { %v7819_v16 = vpop.eup %7818 }
 0x54f   :  { %v7821_v57 = vpop.eup %7820  ;;  %v3092_v52 = vadd.f32 1.0, %v7819_v16  ;;  %v9679_v16 = vld [vmem:[%s10952_s9 + $0x3] ss:$0 sm:$0xff] }
 0x550   :  { %v3090_v26 = vadd.f32 1.0, %v7821_v57  ;;  %v7823_v44 = vpop.eup %7822  ;;  %v3323_v57 = vld [vmem:[#allocation4 + $0x30] ss:$2 sm:$0xf] }
 0x551   :  { %7826 = vrcp.f32 %v3092_v52  ;;  %v7825_v31 = vpop.eup %7824  ;;  %v3093_v34 = vadd.f32 1.0, %v7823_v44  ;;  %v3275_v52 = vadd.f32 %v3267_v39, %v3230_v48  ;;  %v3358_v48 = vld [vmem:[#allocation4 + $0x11] ss:$2 sm:$0xf] }
 0x552   :  { %7828 = vrcp.f32 %v3090_v26  ;;  %v3091_v62 = vadd.f32 1.0, %v7825_v31 }
 0x553   :  { %7830 = vrcp.f32 %v3093_v34 }
 0x554   :  { %7832 = vrcp.f32 %v3091_v62  ;;  %v3360_v62 = vld [vmem:[#allocation4 + $0x31] ss:$2 sm:$0xf] }
 0x55b   :  { %v6686_v2 = vpop.f32.mrb[40].mxu0  ;;  %v7827_v40 = vpop.eup %7826 }
 0x55c   :  { %v3016_v8 = vadd.f32 %v6686_v2, %v9612_v32  ;;  %v3007_v51 = vpop.f32.mrb[41].mxu0  ;;  %v7829_v0 = vpop.eup %7828  ;;  %v3140_v60 = vmul.f32 %v7827_v40, %v3000_v56  ;;  %v3321_v2 = vld [vmem:[#allocation4 + $0x10] ss:$2 sm:$0xf] }
 0x55d   :  { %v3008_v5 = vadd.f32 %v9612_v32, %v3007_v51  ;;  %v6687_v21 = vpop.f32.mrb[42].mxu0  ;;  %v3138_v59 = vmul.f32 %v7829_v0, %v2992_v35  ;;  %v7831_v27 = vpop.eup %7830  ;;  %v9671_v35 = vld [vmem:[%s10952_s9 + $0x2] ss:$0 sm:$0xff]  ;;  %v3340_v28 = vmul.f32 %v9679_v16, %v3321_v2  ;;  %v9736_v2 = vld [vmem:[%s10952_s9 + $0x7] ss:$0 sm:$0xff] }
 0x55e   :  { %v6205_v17 = vmul.f32 -1.442695, %v3016_v8  ;;  %v9643_v18 = vadd.f32 %v6687_v21, %v9612_v32  ;;  %v3010_v45 = vpop.f32.mrb[43].mxu0  ;;  %3200 = vst.msk [vmem:[#allocation4 + $0x71] sm:$0xff] %vm2233_vm2, %v3140_v60  ;;  %v7833_v63 = vpop.eup %7832  ;;  %v3141_v19 = vmul.f32 %v7831_v27, %v3003_v30  ;;  %v3305_v14 = vmul.f32 %v9671_v35, %v3287_v9 }
 0x55f   :  { %v6203_v50 = vmul.f32 -1.442695, %v3008_v5  ;;  %v9646_v41 = vadd.f32 %v9612_v32, %v3010_v45  ;;  %3198 = vst.msk [vmem:[#allocation4 + $0x51] sm:$0xff] %vm2233_vm2, %v3138_v59  ;;  %v3139_v23 = vmul.f32 %v7833_v63, %v2995_v6  ;;  %v3252_v6 = vld [vmem:[#allocation4 + $0x41] ss:$2 sm:$0xf]  ;;  %v3304_v26 = vmul.f32 %v9671_v35, %v3285_v4 }
 0x560   :  { %7834 = vpow2.f32 %v6205_v17  ;;  %v6206_v42 = vmul.f32 -1.442695, %v9643_v18  ;;  %3201 = vst.msk [vmem:[#allocation4 + $0x81] sm:$0xff] %vm2233_vm2, %v3141_v19  ;;  %v3313_v44 = vadd.f32 %v3305_v14, %v3276_v15  ;;  %v3269_v51 = vmul.f32 %v9662_v12, %v3252_v6 }
 0x561   :  { %7836 = vpow2.f32 %v6203_v50  ;;  %v6204_v25 = vmul.f32 -1.442695, %v9646_v41  ;;  %3199 = vst.msk [vmem:[#allocation4 + $0x61] sm:$0xff] %vm2233_vm2, %v3139_v23  ;;  %v3341_v45 = vmul.f32 %v9679_v16, %v3323_v57  ;;  %v9693_v50 = vld [vmem:[%s10952_s9 + $0x4] ss:$0 sm:$0xff]  ;;  %v3312_v19 = vadd.f32 %v3304_v26, %v3275_v52 }
 0x562   :  { %7838 = vpow2.f32 %v6206_v42  ;;  %v3289_v42 = vld [vmem:[#allocation4 + $0x42] ss:$2 sm:$0xf]  ;;  %v3378_v36 = vmul.f32 %v9693_v50, %v3360_v62  ;;  %v3377_v6 = vmul.f32 %v9693_v50, %v3358_v48  ;;  %v3395_v52 = vld [vmem:[#allocation4 + $0x12] ss:$2 sm:$0xf] }
 0x563   :  { %7840 = vpow2.f32 %v6204_v25  ;;  %v3349_v23 = vadd.f32 %v3341_v45, %v3313_v44  ;;  %v3306_v47 = vmul.f32 %v9671_v35, %v3289_v42  ;;  %v3348_v4 = vadd.f32 %v3340_v28, %v3312_v19  ;;  %v3293_v42 = vld [vmem:[#allocation4 + $0xa2] ss:$2 sm:$0xf] }
 0x565   :  { %v3327_v0 = vld [vmem:[#allocation4 + $0x70] ss:$2 sm:$0xf]  ;;  %v3386_v9 = vadd.f32 %v3378_v36, %v3349_v23  ;;  %v3308_v36 = vmul.f32 %v9671_v35, %v3293_v42 }
 0x566   :  { %v3401_v14 = vld [vmem:[#allocation4 + $0x72] ss:$2 sm:$0xf] }
 0x568   :  { %v3217_v7 = vld [vmem:[#allocation4 + $0x60] ss:$2 sm:$0xf]  ;;  %v3254_v11 = vld [vmem:[#allocation4 + $0x61] ss:$2 sm:$0xf] }
 0x569   :  { %v3233_v20 = vmul.f32 %v9657_v54, %v3217_v7  ;;  %v3270_v37 = vmul.f32 %v9662_v12, %v3254_v11  ;;  %v3291_v31 = vld [vmem:[#allocation4 + $0x62] ss:$2 sm:$0xf]  ;;  %v3343_v7 = vmul.f32 %v9679_v16, %v3327_v0 }
 0x56a   :  { %v7835_v22 = vpop.eup %7834  ;;  %v3307_v60 = vmul.f32 %v9671_v35, %v3291_v31  ;;  %v3256_v31 = vld [vmem:[#allocation4 + $0xa1] ss:$2 sm:$0xf]  ;;  %v3508_v0 = vld [vmem:[#allocation4 + $0x42] ss:$2 sm:$0xf] }
 0x56b   :  { %v7837_v29 = vpop.eup %7836  ;;  %v3096_v38 = vadd.f32 1.0, %v7835_v22  ;;  %v3325_v22 = vld [vmem:[#allocation4 + $0x50] ss:$2 sm:$0xf] }
 0x56c   :  { %v3094_v53 = vadd.f32 1.0, %v7837_v29  ;;  %v7839_v46 = vpop.eup %7838 }
 0x56d   :  { %7842 = vrcp.f32 %v3096_v38  ;;  %v7841_v43 = vpop.eup %7840  ;;  %v3097_v55 = vadd.f32 1.0, %v7839_v46 }
 0x56e   :  { %7844 = vrcp.f32 %v3094_v53  ;;  %v3095_v24 = vadd.f32 1.0, %v7841_v43 }
 0x56f   :  { %7846 = vrcp.f32 %v3097_v55  ;;  %v9715_v55 = vld [vmem:[%s10952_s9 + $0x5] ss:$0 sm:$0xff] }
 0x570   :  { %7848 = vrcp.f32 %v3095_v24  ;;  %v3397_v24 = vld [vmem:[#allocation4 + $0x32] ss:$2 sm:$0xf] }
 0x577   :  { %v7843_v13 = vpop.eup %7842 }
 0x578   :  { %v7845_v56 = vpop.eup %7844  ;;  %v3144_v30 = vmul.f32 %v7843_v13, %v3016_v8  ;;  %v3232_v8 = vmul.f32 %v9657_v54, %v3215_v58  ;;  %v3364_v13 = vld [vmem:[#allocation4 + $0x71] ss:$2 sm:$0xf] }
 0x579   :  { %v3142_v10 = vmul.f32 %v7845_v56, %v3008_v5  ;;  %v3278_v5 = vadd.f32 %v3270_v37, %v3233_v20  ;;  %v7847_v38 = vpop.eup %7846  ;;  %v3415_v56 = vmul.f32 %v9715_v55, %v3397_v24  ;;  %v3362_v20 = vld [vmem:[#allocation4 + $0x51] ss:$2 sm:$0xf]  ;;  %v3434_v37 = vld [vmem:[#allocation4 + $0x40] ss:$2 sm:$0xf] }
 0x57a   :  { %3204 = vst.msk [vmem:[#allocation4 + $0xd1] sm:$0xff] %vm2233_vm2, %v3144_v30  ;;  %v3277_v53 = vadd.f32 %v3269_v51, %v3232_v8  ;;  %v7849_v43 = vpop.eup %7848  ;;  %v3145_v61 = vmul.f32 %v7847_v38, %v9643_v18  ;;  %v3380_v30 = vmul.f32 %v9693_v50, %v3364_v13  ;;  %v3379_v26 = vmul.f32 %v9693_v50, %v3362_v20  ;;  %v3399_v8 = vld [vmem:[#allocation4 + $0x52] ss:$2 sm:$0xf] }
 0x57b   :  { %3202 = vst.msk [vmem:[#allocation4 + $0xb1] sm:$0xff] %vm2233_vm2, %v3142_v10  ;;  %v6690_v34 = vpop.f32.mrb[44].mxu0  ;;  %v3315_v46 = vadd.f32 %v3307_v60, %v3278_v5  ;;  %v3143_v11 = vmul.f32 %v7849_v43, %v9646_v41  ;;  %v9727_v41 = vld [vmem:[%s10952_s9 + $0x6] ss:$0 sm:$0xff]  ;;  %v3423_v57 = vadd.f32 %v3415_v56, %v3386_v9  ;;  %v9741_v5 = vld [vmem:[%s10952_s9 + $0x8] ss:$0 sm:$0xff] }
 0x57c   :  { %v9687_v21 = vadd.f32 %v6690_v34, %v9612_v32  ;;  %v3023_v17 = vpop.f32.mrb[45].mxu0  ;;  %3205 = vst.msk [vmem:[#allocation4 + $0xe1] sm:$0xff] %vm2233_vm2, %v3145_v61  ;;  %v3314_v18 = vadd.f32 %v3306_v47, %v3277_v53  ;;  %v3219_v10 = vld [vmem:[#allocation4 + $0xa0] ss:$2 sm:$0xf]  ;;  %v3385_v34 = vadd.f32 %v3377_v6, %v3348_v4  ;;  %v3452_v62 = vmul.f32 %v9727_v41, %v3434_v37 }
 0x57d   :  { %v9696_v40 = vadd.f32 %v9612_v32, %v3023_v17  ;;  %v6691_v25 = vpop.f32.mrb[46].mxu0  ;;  %v3351_v39 = vadd.f32 %v3343_v7, %v3315_v46  ;;  %3203 = vst.msk [vmem:[#allocation4 + $0xc1] sm:$0xff] %vm2233_vm2, %v3143_v11  ;;  %v3471_v51 = vld [vmem:[#allocation4 + $0x41] ss:$2 sm:$0xf]  ;;  %v3417_v17 = vmul.f32 %v9715_v55, %v3401_v14  ;;  %v3526_v13 = vmul.f32 %v9741_v5, %v3508_v0 }
 0x57e   :  { %v6209_v59 = vmul.f32 -1.442695, %v9687_v21  ;;  %v9701_v27 = vadd.f32 %v6691_v25, %v9612_v32  ;;  %v3026_v63 = vpop.f32.mrb[47].mxu0  ;;  %v3414_v25 = vmul.f32 %v9715_v55, %v3395_v52  ;;  %v3438_v60 = vld [vmem:[#allocation4 + $0x80] ss:$2 sm:$0xf]  ;;  %v3460_v19 = vadd.f32 %v3452_v62, %v3423_v57 }
 0x57f   :  { %v6207_v29 = vmul.f32 -1.442695, %v9696_v40  ;;  %v9706_v3 = vadd.f32 %v9612_v32, %v3026_v63  ;;  %v3342_v32 = vmul.f32 %v9679_v16, %v3325_v22  ;;  %v3388_v44 = vadd.f32 %v3380_v30, %v3351_v39  ;;  %v3432_v22 = vld [vmem:[#allocation4 + $0x20] ss:$2 sm:$0xf] }
 0x580   :  { %v6210_v33 = vmul.f32 -1.442695, %v9701_v27  ;;  %7850 = vpow2.f32 %v6209_v59  ;;  %v3234_v59 = vmul.f32 %v9657_v54, %v3219_v10  ;;  %v3271_v63 = vmul.f32 %v9662_v12, %v3256_v31  ;;  %v3436_v38 = vld [vmem:[#allocation4 + $0x60] ss:$2 sm:$0xf] }
 0x581   :  { %7852 = vpow2.f32 %v6207_v29  ;;  %v6208_v15 = vmul.f32 -1.442695, %v9706_v3  ;;  %v3350_v58 = vadd.f32 %v3342_v32, %v3314_v18  ;;  %v3416_v29 = vmul.f32 %v9715_v55, %v3399_v8  ;;  %v3475_v18 = vld [vmem:[#allocation4 + $0x81] ss:$2 sm:$0xf] }
 0x582   :  { %7854 = vpow2.f32 %v6210_v33  ;;  %v3425_v53 = vadd.f32 %v3417_v17, %v3388_v44  ;;  %v3422_v33 = vadd.f32 %v3414_v25, %v3385_v34  ;;  %v3489_v43 = vmul.f32 %v9736_v2, %v3471_v51  ;;  %v3469_v4 = vld [vmem:[#allocation4 + $0x21] ss:$2 sm:$0xf]  ;;  %v3331_v34 = vld [vmem:[#allocation4 + $0xd0] ss:$2 sm:$0xf] }
 0x583   :  { %7856 = vpow2.f32 %v6208_v15  ;;  %v3387_v45 = vadd.f32 %v3379_v26, %v3350_v58  ;;  %v3454_v7 = vmul.f32 %v9727_v41, %v3438_v60  ;;  %v3451_v48 = vmul.f32 %v9727_v41, %v3432_v22  ;;  %v3473_v6 = vld [vmem:[#allocation4 + $0x61] ss:$2 sm:$0xf]  ;;  %v3329_v62 = vld [vmem:[#allocation4 + $0xb0] ss:$2 sm:$0xf] }
 0x584   :  { %v3221_v28 = vld [vmem:[#allocation4 + $0xc0] ss:$2 sm:$0xf]  ;;  %v3258_v47 = vld [vmem:[#allocation4 + $0xc1] ss:$2 sm:$0xf]  ;;  %v3279_v39 = vadd.f32 %v3271_v63, %v3234_v59  ;;  %v3497_v15 = vadd.f32 %v3489_v43, %v3460_v19  ;;  %v3453_v20 = vmul.f32 %v9727_v41, %v3436_v38  ;;  %v3491_v44 = vmul.f32 %v9736_v2, %v3475_v18 }
 0x585   :  { %v3424_v24 = vadd.f32 %v3416_v29, %v3387_v45  ;;  %v3235_v32 = vmul.f32 %v9657_v54, %v3221_v28  ;;  %v3272_v11 = vmul.f32 %v9662_v12, %v3258_v47  ;;  %v3295_v9 = vld [vmem:[#allocation4 + $0xc2] ss:$2 sm:$0xf]  ;;  %v3462_v58 = vadd.f32 %v3454_v7, %v3425_v53  ;;  %v3368_v22 = vld [vmem:[#allocation4 + $0xd1] ss:$2 sm:$0xf] }
 0x586   :  { %v3309_v14 = vmul.f32 %v9671_v35, %v3295_v9  ;;  %v3459_v26 = vadd.f32 %v3451_v48, %v3422_v33  ;;  %v3512_v8 = vld [vmem:[#allocation4 + $0x82] ss:$2 sm:$0xf]  ;;  %v3534_v17 = vadd.f32 %v3526_v13, %v3497_v15  ;;  %v3488_v45 = vmul.f32 %v9736_v2, %v3469_v4  ;;  %v9766_v53 = vld [vmem:[%s10953_s10] ss:$0 sm:$0xff] }
 0x587   :  { %v3280_v37 = vadd.f32 %v3272_v11, %v3235_v32  ;;  %v3461_v31 = vadd.f32 %v3453_v20, %v3424_v24  ;;  %v3490_v42 = vmul.f32 %v9736_v2, %v3473_v6  ;;  %v3499_v25 = vadd.f32 %v3491_v44, %v3462_v58  ;;  %v3506_v0 = vld [vmem:[#allocation4 + $0x22] ss:$2 sm:$0xf]  ;;  %v3366_v28 = vld [vmem:[#allocation4 + $0xb1] ss:$2 sm:$0xf] }
 0x588   :  { %v3510_v60 = vld [vmem:[#allocation4 + $0x62] ss:$2 sm:$0xf]  ;;  %v3345_v59 = vmul.f32 %v9679_v16, %v3331_v34  ;;  %v3316_v63 = vadd.f32 %v3308_v36, %v3279_v39  ;;  %v3344_v19 = vmul.f32 %v9679_v16, %v3329_v62  ;;  %v3496_v29 = vadd.f32 %v3488_v45, %v3459_v26  ;;  %v3405_v7 = vld [vmem:[#allocation4 + $0xd2] ss:$2 sm:$0xf] }
 0x589   :  { %v3317_v51 = vadd.f32 %v3309_v14, %v3280_v37  ;;  %v3498_v38 = vadd.f32 %v3490_v42, %v3461_v31  ;;  %v9769_v33 = vadd.f32 %v9766_v53, %v3534_v17  ;;  %v3525_v43 = vmul.f32 %v9741_v5, %v3506_v0  ;;  %v3403_v39 = vld [vmem:[#allocation4 + $0xb2] ss:$2 sm:$0xf]  ;;  %v3223_v37 = vld [vmem:[#allocation4 + $0xe0] ss:$2 sm:$0xf] }
 0x58a   :  { %v7851_v23 = vpop.eup %7850  ;;  %v3527_v36 = vmul.f32 %v9741_v5, %v3510_v60  ;;  %v3352_v24 = vadd.f32 %v3344_v19, %v3316_v63  ;;  %v3381_v9 = vmul.f32 %v9693_v50, %v3366_v28  ;;  %v3419_v4 = vmul.f32 %v9715_v55, %v3405_v7  ;;  %v3442_v14 = vld [vmem:[#allocation4 + $0xe0] ss:$2 sm:$0xf]  ;;  %v3479_v42 = vld [vmem:[#allocation4 + $0xe1] ss:$2 sm:$0xf] }
 0x58b   :  { %v7853_v46 = vpop.eup %7852  ;;  %v3100_v30 = vadd.f32 1.0, %v7851_v23  ;;  %v3528_v23 = vmul.f32 %v9741_v5, %v3512_v8  ;;  %v3533_v32 = vadd.f32 %v3525_v43, %v3496_v29  ;;  %v6222_v48 = vmul.f32 -1.442695, %v9769_v33  ;;  %v3477_v63 = vld [vmem:[#allocation4 + $0xc1] ss:$2 sm:$0xf] }
 0x58c   :  { %v7855_v61 = vpop.eup %7854  ;;  %v3098_v10 = vadd.f32 1.0, %v7853_v46  ;;  %v3353_v46 = vadd.f32 %v3345_v59, %v3317_v51  ;;  %v3535_v11 = vadd.f32 %v3527_v36, %v3498_v38  ;;  %v3389_v20 = vadd.f32 %v3381_v9, %v3352_v24  ;;  %v3516_v29 = vld [vmem:[#allocation4 + $0xe2] ss:$2 sm:$0xf] }
 0x58d   :  { %v7857_v56 = vpop.eup %7856  ;;  %v3101_v57 = vadd.f32 1.0, %v7855_v61  ;;  %7858 = vrcp.f32 %v3100_v30  ;;  %v3536_v47 = vadd.f32 %v3528_v23, %v3499_v25  ;;  %v3382_v61 = vmul.f32 %v9693_v50, %v3368_v22  ;;  %v3260_v30 = vld [vmem:[#allocation4 + $0xe1] ss:$2 sm:$0xf] }
 0x58e   :  { %v3099_v52 = vadd.f32 1.0, %v7857_v56  ;;  %7860 = vrcp.f32 %v3098_v10  ;;  %v3418_v44 = vmul.f32 %v9715_v55, %v3403_v39  ;;  %v3273_v62 = vmul.f32 %v9662_v12, %v3260_v30  ;;  %v3297_v25 = vld [vmem:[#allocation4 + $0xe2] ss:$2 sm:$0xf] }
 0x58f   :  { %7862 = vrcp.f32 %v3101_v57  ;;  %v3390_v13 = vadd.f32 %v3382_v61, %v3353_v46  ;;  %v9777_v15 = vadd.f32 %v9766_v53, %v3536_v47  ;;  %v9783_v57 = vadd.f32 %v9766_v53, %v3533_v32  ;;  %v3514_v28 = vld [vmem:[#allocation4 + $0xc2] ss:$2 sm:$0xf] }
 0x590   :  { %7864 = vrcp.f32 %v3099_v52  ;;  %v9786_v52 = vadd.f32 %v9766_v53, %v3535_v11  ;;  %v3426_v17 = vadd.f32 %v3418_v44, %v3389_v20  ;;  %v3456_v45 = vmul.f32 %v9727_v41, %v3442_v14 }
 0x591   :  { %v3427_v34 = vadd.f32 %v3419_v4, %v3390_v13  ;;  %7866 = vpow2.f32 %v6222_v48  ;;  %v6224_v51 = vmul.f32 -1.442695, %v9777_v15  ;;  %v3493_v19 = vmul.f32 %v9736_v2, %v3479_v42 }
 0x592   :  { %v3310_v22 = vmul.f32 %v9671_v35, %v3297_v25  ;;  %v3492_v38 = vmul.f32 %v9736_v2, %v3477_v63  ;;  %v3530_v7 = vmul.f32 %v9741_v5, %v3516_v29 }
 0x593   :  { %v3464_v60 = vadd.f32 %v3456_v45, %v3427_v34  ;;  %7868 = vpow2.f32 %v6224_v51 }
 0x595   :  { %v3501_v43 = vadd.f32 %v3493_v19, %v3464_v60 }
 0x597   :  { %v7859_v18 = vpop.eup %7858  ;;  %v3538_v20 = vadd.f32 %v3530_v7, %v3501_v43 }
 0x598   :  { %v7861_v56 = vpop.eup %7860  ;;  %v3148_v58 = vmul.f32 %v7859_v18, %v9687_v21  ;;  %v3236_v21 = vmul.f32 %v9657_v54, %v3223_v37  ;;  %v3529_v18 = vmul.f32 %v9741_v5, %v3514_v28 }
 0x599   :  { %v7863_v6 = vpop.eup %7862  ;;  %v3146_v10 = vmul.f32 %v7861_v56, %v9696_v40  ;;  %v3440_v40 = vld [vmem:[#allocation4 + $0xc0] ss:$2 sm:$0xf]  ;;  %v9815_v51 = vadd.f32 %v9766_v53, %v3538_v20 }
 0x59a   :  { %v7865_v26 = vpop.eup %7864  ;;  %3208 = vst.msk [vmem:[#allocation4 + $0x111] sm:$0xff] %vm2233_vm2, %v3148_v58  ;;  %v3149_v31 = vmul.f32 %v7863_v6, %v9701_v27  ;;  %v6223_v27 = vmul.f32 -1.442695, %v9786_v52  ;;  %v3455_v0 = vmul.f32 %v9727_v41, %v3440_v40  ;;  %v3281_v59 = vadd.f32 %v3273_v62, %v3236_v21 }
 0x59b   :  { %3206 = vst.msk [vmem:[#allocation4 + $0xf1] sm:$0xff] %vm2233_vm2, %v3146_v10  ;;  %v3147_v8 = vmul.f32 %v7865_v26, %v9706_v3  ;;  %v6221_v3 = vmul.f32 -1.442695, %v9783_v57  ;;  %v7867_v24 = vpop.eup %7866 }
 0x59c   :  { %3209 = vst.msk [vmem:[#allocation4 + $0x121] sm:$0xff] %vm2233_vm2, %v3149_v31  ;;  %v3463_v23 = vadd.f32 %v3455_v0, %v3426_v17  ;;  %7870 = vpow2.f32 %v6223_v27  ;;  %v3318_v36 = vadd.f32 %v3310_v22, %v3281_v59  ;;  %v3581_v14 = vadd.f32 1.0, %v7867_v24 }
 0x59d   :  { %3207 = vst.msk [vmem:[#allocation4 + $0x101] sm:$0xff] %vm2233_vm2, %v3147_v8  ;;  %7872 = vpow2.f32 %v6221_v3  ;;  %v7869_v31 = vpop.eup %7868 }
 0x59e   :  { %v3500_v11 = vadd.f32 %v3492_v38, %v3463_v23  ;;  %v3583_v60 = vadd.f32 1.0, %v7869_v31  ;;  %7874 = vrcp.f32 %v3581_v14 }
 0x5a0   :  { %v3537_v44 = vadd.f32 %v3529_v18, %v3500_v11  ;;  %7876 = vrcp.f32 %v3583_v60 }
 0x5a1   :  { %v3335_v10 = vld [vmem:[#allocation4 + $0x110] ss:$2 sm:$0xf]  ;;  %v3372_v40 = vld [vmem:[#allocation4 + $0x111] ss:$2 sm:$0xf] }
 0x5a2   :  { %v3333_v46 = vld [vmem:[#allocation4 + $0xf0] ss:$2 sm:$0xf]  ;;  %v3370_v61 = vld [vmem:[#allocation4 + $0xf1] ss:$2 sm:$0xf]  ;;  %v9820_v0 = vadd.f32 %v9766_v53, %v3537_v44  ;;  %v3384_v59 = vmul.f32 %v9693_v50, %v3372_v40 }
 0x5a3   :  { %v3346_v47 = vmul.f32 %v9679_v16, %v3333_v46  ;;  %v3407_v32 = vld [vmem:[#allocation4 + $0xf2] ss:$2 sm:$0xf]  ;;  %v3383_v13 = vmul.f32 %v9693_v50, %v3370_v61  ;;  %v3446_v23 = vld [vmem:[#allocation4 + $0x120] ss:$2 sm:$0xf] }
 0x5a4   :  { %v3225_v48 = vld [vmem:[#allocation4 + $0x100] ss:$2 sm:$0xf]  ;;  %v3262_v56 = vld [vmem:[#allocation4 + $0x101] ss:$2 sm:$0xf]  ;;  %v3420_v30 = vmul.f32 %v9715_v55, %v3407_v32  ;;  %v3458_v28 = vmul.f32 %v9727_v41, %v3446_v23 }
 0x5a5   :  { %v3354_v9 = vadd.f32 %v3346_v47, %v3318_v36  ;;  %v3237_v39 = vmul.f32 %v9657_v54, %v3225_v48  ;;  %v3299_v4 = vld [vmem:[#allocation4 + $0x102] ss:$2 sm:$0xf]  ;;  %v3274_v58 = vmul.f32 %v9662_v12, %v3262_v56  ;;  %v3481_v26 = vld [vmem:[#allocation4 + $0x101] ss:$2 sm:$0xf]  ;;  %v3347_v12 = vmul.f32 %v9679_v16, %v3335_v10 }
 0x5a6   :  { %v3444_v6 = vld [vmem:[#allocation4 + $0x100] ss:$2 sm:$0xf]  ;;  %v3311_v62 = vmul.f32 %v9671_v35, %v3299_v4  ;;  %v7871_v17 = vpop.eup %7870  ;;  %v3494_v27 = vmul.f32 %v9736_v2, %v3481_v26  ;;  %v3409_v25 = vld [vmem:[#allocation4 + $0x112] ss:$2 sm:$0xf] }
 0x5a7   :  { %v3391_v37 = vadd.f32 %v3383_v13, %v3354_v9  ;;  %v3282_v21 = vadd.f32 %v3274_v58, %v3237_v39  ;;  %v3457_v54 = vmul.f32 %v9727_v41, %v3444_v6  ;;  %v3518_v8 = vld [vmem:[#allocation4 + $0x102] ss:$2 sm:$0xf]  ;;  %v7873_v35 = vpop.eup %7872  ;;  %v3582_v22 = vadd.f32 1.0, %v7871_v17 }
 0x5a8   :  { %v3531_v3 = vmul.f32 %v9741_v5, %v3518_v8  ;;  %v3421_v16 = vmul.f32 %v9715_v55, %v3409_v25  ;;  %v6226_v46 = vmul.f32 -1.442695, %v9815_v51  ;;  %v3483_v43 = vld [vmem:[#allocation4 + $0x121] ss:$2 sm:$0xf]  ;;  %v3580_v36 = vadd.f32 1.0, %v7873_v35  ;;  %v7875_v41 = vpop.eup %7874 }
 0x5a9   :  { %v3428_v34 = vadd.f32 %v3420_v30, %v3391_v37  ;;  %v3319_v45 = vadd.f32 %v3311_v62, %v3282_v21  ;;  %v6225_v61 = vmul.f32 -1.442695, %v9820_v0  ;;  %v3520_v24 = vld [vmem:[#allocation4 + $0x122] ss:$2 sm:$0xf]  ;;  %7878 = vrcp.f32 %v3582_v22 }
 0x5aa   :  { %v3495_v7 = vmul.f32 %v9736_v2, %v3483_v43  ;;  %7880 = vpow2.f32 %v6226_v46  ;;  %v3532_v11 = vmul.f32 %v9741_v5, %v3520_v24  ;;  %v7877_v18 = vpop.eup %7876  ;;  %v9836_v30 = vmul.f32 %v7875_v41, %v9769_v33 }
 0x5ab   :  { %v3465_v42 = vadd.f32 %v3457_v54, %v3428_v34  ;;  %v3355_v63 = vadd.f32 %v3347_v12, %v3319_v45  ;;  %7882 = vrcp.f32 %v3580_v36  ;;  %v9833_v2 = vmul.f32 %v7877_v18, %v9777_v15 }
 0x5ac   :  { %7884 = vpow2.f32 %v6225_v61 }
 0x5ad   :  { %v3502_v19 = vadd.f32 %v3494_v27, %v3465_v42  ;;  %v3392_v29 = vadd.f32 %v3384_v59, %v3355_v63 }
 0x5af   :  { %v3539_v38 = vadd.f32 %v3531_v3, %v3502_v19  ;;  %v3429_v47 = vadd.f32 %v3421_v16, %v3392_v29 }
 0x5b1   :  { %v3554_v50 = vadd.f32 %v9766_v53, %v3539_v38  ;;  %v3466_v32 = vadd.f32 %v3458_v28, %v3429_v47 }
 0x5b3   :  { %v6227_v55 = vmul.f32 -1.442695, %v3554_v50  ;;  %v3503_v9 = vadd.f32 %v3495_v7, %v3466_v32  ;;  %v7879_v56 = vpop.eup %7878  ;;  %v3740_v7 = vld [vmem:[%s10956_s13] sm:$0xf] }
 0x5b4   :  { %v7881_v4 = vpop.eup %7880  ;;  %v9839_v5 = vmul.f32 %v7879_v56, %v9786_v52  ;;  %v3752_v32 = vsel %vm2507_vm0, %v3740_v7, 0 }
 0x5b5   :  { %v3540_v13 = vadd.f32 %v3532_v11, %v3503_v9  ;;  %7886 = vpow2.f32 %v6227_v55  ;;  %v7883_v20 = vpop.eup %7882  ;;  %v3585_v58 = vadd.f32 1.0, %v7881_v4  ;;  %v6229_v55 = vld [vmem:[%s10955_s12] ss:$0 sm:$0xff] }
 0x5b6   :  { %v7885_v37 = vpop.eup %7884  ;;  %v3621_v14 = vcombine.low %v9839_v5, %v9833_v2 }
 0x5b7   :  { %v3555_v48 = vadd.f32 %v9766_v53, %v3540_v13  ;;  %v9842_v53 = vmul.f32 %v7883_v20, %v9783_v57  ;;  %v3584_v10 = vadd.f32 1.0, %v7885_v37  ;;  %v7629_v37 = vld [vmem:[%s10958_s15] sm:$0xff]  }
 0x5b8   :  { %v3629_v33 = vsel %vm2233_vm2, %v3621_v14, 0.0  ;;  %v7632_v14 = vld [vmem:[%s10960_s17 + $0x8] ss:$56 sps:$4 sm:$0xff]  }
 0x5b9   :  { %v6228_v39 = vmul.f32 -1.442695, %v3555_v48  ;;  %v3620_v15 = vcombine.low %v9842_v53, %v9836_v30 }
 0x5bb   :  { %7888 = vpow2.f32 %v6228_v39  ;;  %v3628_v52 = vsel %vm2233_vm2, %v3620_v15, 0.0  ;;  %v7637_v15 = vld [vmem:[%s10960_s17 + $0x4] ss:$56 sps:$4 sm:$0xff]  }
 0x5bc   :  { %7890 = vrcp.f32 %v3585_v58  ;;  %v3630_v34 = vadd.f32 %v3629_v33, %v3628_v52  ;;  %v7630_v58 = vld [vmem:[%s10958_s15 + $0x8] sm:$0xff]  }
 0x5bd   :  { %7892 = vrcp.f32 %v3584_v10  ;;  %v7634_v10 = vld [vmem:[%s10960_s17 + $0xc] ss:$56 sps:$4 sm:$0xff]  }
 0x5be   :  { %v3631_v57 = vrot.slane %v3630_v34, 4  ;;  %4248 = vmatprep.subr.bf16.mxu1 %v7634_v10  ;;  %v7658_v10 = vld [vmem:[%s10960_s17 + $0x24] ss:$56 sps:$4 sm:$0xff]  }
 0x5bf   :  { %v7887_v6 = vpop.eup %7886  ;;  %4249 = vmatpush1.bf16.msra.mxu1 %v7632_v14  ;;  %v7653_v14 = vld [vmem:[%s10960_s17 + $0x88] ss:$56 sps:$4 sm:$0xff]  }
 0x5c0   :  { %v3586_v26 = vadd.f32 1.0, %v7887_v6  ;;  %v3632_v54 = vadd.f32 %v3631_v57, %v3630_v34  ;;  %v7631_v6 = vld [vmem:[%s10958_s15 + $0x10] sm:$0xff]  }
 0x5c2   :  { %7894 = vrcp.f32 %v3586_v26  ;;  %v3633_v45 = vrot.slane %v3632_v54, 2  ;;  %v6235_v26 = vld [vmem:[%s10957_s14] ss:$0 sm:$0xff] }
 0x5c4   :  { %v3634_v35 = vadd.f32 %v3633_v45, %v3632_v54  ;;  %v8173_v54 = vmov 1966171168  }
 0x5c5   :  { %v7889_v44 = vpop.eup %7888 }
 0x5c6   :  { %v3587_v31 = vadd.f32 1.0, %v7889_v44  ;;  %v7891_v21 = vpop.eup %7890 }
 0x5c7   :  { %v7893_v62 = vpop.eup %7892  ;;  %v9851_v40 = vmul.f32 %v7891_v21, %v9815_v51 }
 0x5c8   :  { %7896 = vrcp.f32 %v3587_v31  ;;  %v9854_v17 = vmul.f32 %v7893_v62, %v9820_v0  ;;  %v3635_v0 = vrot.slane %v3634_v35, 1 }
 0x5ca   :  { %v3622_v25 = vcombine.low %v9854_v17, %v9851_v40  ;;  %v3636_v23 = vadd.f32 %v3635_v0, %v3634_v35 }
 0x5cc   :  { %v7895_v8 = vpop.eup %7894  ;;  %v3637_v51 = vsel %vm2233_vm2, %v3622_v25, 0.0  ;;  %v3647_v38 = vmul.f32 0.0625, %v3636_v23 }
 0x5cd   :  { %v9856_v42 = vmul.f32 %v7895_v8, %v3554_v50  ;;  %v3802_v8 = vunpack.c.l.s4 %v8173_v54  ;;  %v7671_v54 = vld [vmem:[%s10960_s17 + $0xa0] ss:$56 sps:$4 sm:$0xff]  }
 0x5ce   :  { %v3649_v36 = vpack.c.bf16 %v3647_v38, %v3647_v38 }
 0x5cf   :  { %v3803_v45 = vunpack.c.0.s8 %v3802_v8  ;;  %v5198_v8 = vld [vmem:[#allocation6 + $0x80] sm:$0xff] }
 0x5d0   :  { %v3666_v47 = vunpack.c.l.b16 %v3649_v36 }
 0x5d2   :  { %v7897_v12 = vpop.eup %7896 }
 0x5d3   :  { %v9858_v27 = vmul.f32 %v7897_v12, %v3555_v48  ;;  %v3804_v12 = vlaneseq }
 0x5d5   :  { %v3623_v60 = vcombine.low %v9856_v42, %v9858_v27  ;;  %v9899_v25 = vshrl.u32 %v3804_v12, 7  ;;  %v5199_v12 = vld [vmem:[#allocation6 + $0x88] sm:$0xff] }
 0x5d7   :  { %v3638_v59 = vsel %vm2233_vm2, %v3623_v60, 0.0  ;;  %v3806_v60 = vsub.s32 %v3803_v45, %v9899_v25  ;;  %v5230_v45 = vld [vmem:[#allocation6 + $0x180] sm:$0xff] }
 0x5d8   :  { %v3639_v63 = vadd.f32 %v3638_v59, %v3637_v51  ;;  %v9903_v59 = vsub.s32 0, %v9899_v25 }
 0x5da   :  { %v3640_v3 = vrot.slane %v3639_v63, 4 }
 0x5dc   :  { %v3641_v19 = vadd.f32 %v3640_v3, %v3639_v63 }
 0x5de   :  { %v3642_v22 = vrot.slane %v3641_v19, 2 }
 0x5e0   :  { %v3643_v16 = vadd.f32 %v3642_v22, %v3641_v19 }
 0x5e2   :  { %v3644_v29 = vrot.slane %v3643_v16, 1 }
 0x5e4   :  { %v3645_v46 = vadd.f32 %v3644_v29, %v3643_v16 }
 0x5e6   :  { %v3648_v43 = vmul.f32 0.0625, %v3645_v46 }
 0x5e8   :  { %v3650_v28 = vpack.c.bf16 %v3648_v43, %v3648_v43 }
 0x5ea   :  { %v3667_v50 = vunpack.c.l.b16 %v3650_v28 }
 0x5ec   :  { %v3669_v61 = vsel %vm3668_vm11, %v3667_v50, %v3666_v47 }
 0x5ed   :  { %v3670_v24 = vpack.c.b16 %v3669_v61, %v3669_v61 }
 0x5ef   :  { %6699 = vmatmul.mubr.msk.bf16.vlgmr.msra.gmra.mrb[48].mxu0 %vm2233_vm2, %v3670_v24 }
 0x5f0   :  { %6704 = vmatprep.mubr.msk.bf16.mxu0 %vm8172_vm5, %v8157_v1  ;;  %6703 = vmatpush3.bf16.msra.mxu0 %v3752_v32 }
 0x5f1   :  { %6708 = vmatprep.subr.bf16.mxu0 %v7629_v37 }
 0x6c2   :  { %v3726_v11 = vpop.f32.mrb[48].mxu0 }
 0x6c3   :  { %v3727_v9 = vadd.f32 %v6229_v55, %v3726_v11  ;;  %v6700_v13 = vpop.f32.mrb[49].mxu0  ;;  %v6238_v55 = vld [vmem:[%s10959_s16] ss:$0 sm:$0xff] }
 0x6c4   :  { %v3729_v41 = vpop.f32.mrb[50].mxu0 }
 0x6c5   :  { %v6234_v48 = vmul.f32 -1.442695, %v3727_v9  ;;  %v6701_v18 = vpop.f32.mrb[51].mxu0 }
 0x6c7   :  { %7898 = vpow2.f32 %v6234_v48 }
 0x6d1   :  { %v7899_v39 = vpop.eup %7898 }
 0x6d2   :  { %v3735_v1 = vadd.f32 1.0, %v7899_v39 }
 0x6d4   :  { %7900 = vrcp.f32 %v3735_v1 }
 0x6de   :  { %v7901_v56 = vpop.eup %7900 }
 0x6df   :  { %v3738_v4 = vmul.f32 %v7901_v56, %v3727_v9 }
 0x6e1   :  { %v3739_v20 = vpack.c.bf16 %v3738_v4, %v3738_v4  ;;  %v7644_v4 = vld [vmem:[%s10960_s17 + $0x10] ss:$56 sps:$4 sm:$0xff]  }
 0x6e3   :  { %6705 = vmatmul.mubr.msk.bf16.vlgmr.msra.gmra.mrb[52].mxu0 %vm1108_vm7, %v3739_v20  ;;  %v7647_v20 = vld [vmem:[%s10960_s17 + $0x18] ss:$56 sps:$4 sm:$0xff]  }
 0x6e4   :  { %6709 = vmatpush3.bf16.msra.mxu0 %v7629_v37  ;;  %v7652_v37 = vld [vmem:[%s10960_s17 + $0x84] ss:$56 sps:$4 sm:$0xff]  }
 0x6e5   :  { %6710 = vmatprep.subr.bf16.mxu0 %v7630_v58 }
 0x6e8   :  { %6711 = vmatpush3.bf16.msra.mxu0 %v7630_v58  ;;  %v7655_v58 = vld [vmem:[%s10960_s17 + $0x8c] ss:$56 sps:$4 sm:$0xff]  }
 0x6e9   :  { %6712 = vmatprep.subr.bf16.mxu0 %v7631_v6 }
 0x6ec   :  { %6713 = vmatpush3.bf16.msra.mxu0 %v7631_v6  ;;  %v7650_v6 = vld [vmem:[%s10960_s17 + $0x80] ss:$56 sps:$4 sm:$0xff]  }
 0x6ed   :  { %4195 = vmatprep.subr.bf16.mxu0 %v7637_v15  ;;  %v7661_v15 = vld [vmem:[%s10960_s17 + $0x2c] ss:$56 sps:$4 sm:$0xff]  }
 0x7b6   :  { %v3788_v33 = vpop.f32.mrb[52].mxu0 }
 0x7b7   :  { %v3789_v44 = vadd.f32 %v6235_v26, %v3788_v33  ;;  %v6706_v52 = vpop.f32.mrb[53].mxu0  ;;  %v7656_v26 = vld [vmem:[%s10960_s17 + $0x20] ss:$56 sps:$4 sm:$0xff]  }
 0x7b8   :  { %v3791_v31 = vpop.f32.mrb[54].mxu0  ;;  %v7659_v33 = vld [vmem:[%s10960_s17 + $0x28] ss:$56 sps:$4 sm:$0xff]   ;;  %v7667_v52 = vld [vmem:[%s10960_s17 + $0x9c] ss:$56 sps:$4 sm:$0xff]  }
 0x7b9   :  { %v6237_v34 = vmul.f32 -1.442695, %v3789_v44  ;;  %v6707_v57 = vpop.f32.mrb[55].mxu0  ;;  %v7664_v44 = vld [vmem:[%s10960_s17 + $0x94] ss:$56 sps:$4 sm:$0xff]  }
 0x7ba   :  { %v7662_v31 = vld [vmem:[%s10960_s17 + $0x90] ss:$56 sps:$4 sm:$0xff]   ;;  %v7670_v57 = vld [vmem:[%s10960_s17 + $0x34] ss:$56 sps:$4 sm:$0xff]  }
 0x7bb   :  { %7902 = vpow2.f32 %v6237_v34  ;;  %v7665_v34 = vld [vmem:[%s10960_s17 + $0x98] ss:$56 sps:$4 sm:$0xff]  }
 0x7c5   :  { %v7903_v21 = vpop.eup %7902 }
 0x7c6   :  { %v3797_v62 = vadd.f32 1.0, %v7903_v21  ;;  %v7668_v21 = vld [vmem:[%s10960_s17 + $0x30] ss:$56 sps:$4 sm:$0xff]  }
 0x7c8   :  { %7904 = vrcp.f32 %v3797_v62  ;;  %v7673_v62 = vld [vmem:[%s10960_s17 + $0xa4] ss:$56 sps:$4 sm:$0xff]  }
 0x7d2   :  { %v7905_v35 = vpop.eup %7904 }
 0x7d3   :  { %v3807_v51 = vrot.slane %v7905_v35, %v3806_v60  ;;  %v5231_v35 = vld [vmem:[#allocation6 + $0x188] sm:$0xff] }
 0x7d5   :  { %v3808_v63 = vcombine.high %v3807_v51, %v3807_v51  ;;  %v3815_v0 = vrot.slane %v3807_v51, %v3806_v60  ;;  %v5182_v51 = vld [vmem:[#allocation6] sm:$0xff] }
 0x7d7   :  { %v3822_v3 = vrot.slane %v3808_v63, %v3806_v60  ;;  %v3826_v19 = vrot.slane %v3815_v0, %v9903_v59  ;;  %v6718_v60 = vpack.c.bf16 %v5199_v12, %v5198_v8  ;;  %v5183_v63 = vld [vmem:[#allocation6 + $0x8] sm:$0xff]  ;;  %v6750_v0 = vpack.c.bf16 %v5231_v35, %v5230_v45  ;;  %v5240_v8 = vld [vmem:[#allocation6 + $0x1d0] sm:$0xff]  ;;  %v5241_v45 = vld [vmem:[#allocation6 + $0x1d8] sm:$0xff] }
 0x7d8   :  { %v5193_v35 = vld [vmem:[#allocation6 + $0x58] sm:$0xff] }
 0x7d9   :  { %v3830_v23 = vrot.slane %v3822_v3, %v9903_v59  ;;  %v3833_v22 = vmul.f32 %v3826_v19, %v9842_v53  ;;  %v3834_v16 = vmul.f32 %v3826_v19, %v9836_v30  ;;  %v3835_v29 = vmul.f32 %v3826_v19, %v9839_v5  ;;  %v7635_v30 = vld [vmem:[%s10960_s17] ss:$56 sps:$4 sm:$0xff]   ;;  %v7638_v5 = vld [vmem:[%s10960_s17 + $0x70] ss:$56 sps:$4 sm:$0xff]   ;;  %v7640_v53 = vld [vmem:[%s10960_s17 + $0x74] ss:$56 sps:$4 sm:$0xff]  }
 0x7da   :  { %v3836_v38 = vmul.f32 %v3826_v19, %v9833_v2  ;;  %v6720_v3 = vpack.c.bf16 %v5183_v63, %v5182_v51  ;;  %v5214_v19 = vld [vmem:[#allocation6 + $0x100] sm:$0xff]  ;;  %v6770_v51 = vpack.c.bf16 %v5241_v45, %v5240_v8 }
 0x7db   :  { %v3849_v46 = vcombine.low %v3833_v22, %v3834_v16  ;;  %v3837_v43 = vmul.f32 %v3830_v23, %v9854_v17  ;;  %v3838_v36 = vmul.f32 %v3830_v23, %v9851_v40  ;;  %v3839_v28 = vmul.f32 %v3830_v23, %v9856_v42  ;;  %v7641_v40 = vld [vmem:[%s10960_s17 + $0x78] ss:$56 sps:$4 sm:$0xff]   ;;  %v7643_v17 = vld [vmem:[%s10960_s17 + $0x7c] ss:$56 sps:$4 sm:$0xff]   ;;  %v10070_v8 = vld [vmem:[#allocation6 + $0x300] sm:$0xff] }
 0x7dc   :  { %v3850_v47 = vcombine.low %v3835_v29, %v3836_v38  ;;  %v3840_v50 = vmul.f32 %v3830_v23, %v9858_v27  ;;  %4250 = vmatprep.subr.bf16.mxu1 %v7643_v17  ;;  %v7646_v42 = vld [vmem:[%s10960_s17 + $0x14] ss:$56 sps:$4 sm:$0xff]   ;;  %11059 = vst [vmem:[#allocation11_spill] sm:$0xff] %v10070_v8 }
 0x7dd   :  { %v3851_v61 = vcombine.low %v3837_v43, %v3838_v36  ;;  %4251 = vmatpush1.bf16.msra.mxu1 %v7641_v40  ;;  %v7649_v27 = vld [vmem:[%s10960_s17 + $0x1c] ss:$56 sps:$4 sm:$0xff]   ;;  %v5215_v23 = vld [vmem:[#allocation6 + $0x108] sm:$0xff]  ;;  %v5186_v40 = vld [vmem:[#allocation6 + $0x20] sm:$0xff] }
 0x7de   :  { %v3857_v24 = vpack.c.bf16 %v3850_v47, %v3849_v46  ;;  %v3852_v7 = vcombine.low %v3839_v28, %v3840_v50  ;;  %4354 = vmatprep.subr.bf16.mxu1 %v7649_v27  ;;  %v6752_v22 = vpack.c.bf16 %v5215_v23, %v5214_v19  ;;  %v5200_v16 = vld [vmem:[#allocation6 + $0x90] sm:$0xff]  ;;  %v5233_v46 = vld [vmem:[#allocation6 + $0x198] sm:$0xff]  ;;  %v5187_v17 = vld [vmem:[#allocation6 + $0x28] sm:$0xff] }
 0x7df   :  { %v5232_v29 = vld [vmem:[#allocation6 + $0x190] sm:$0xff]  ;;  %v5185_v36 = vld [vmem:[#allocation6 + $0x18] sm:$0xff]  ;;  %v6728_v27 = vpack.c.bf16 %v5187_v17, %v5186_v40  ;;  %v5210_v23 = vld [vmem:[#allocation6 + $0xe0] sm:$0xff] }
 0x7e0   :  { %6714 = vmatprep.mubr.msk.bf16.mxu0 %vm2233_vm2, %v3857_v24  ;;  %v3858_v2 = vpack.c.bf16 %v3852_v7, %v3851_v61  ;;  %v5184_v43 = vld [vmem:[#allocation6 + $0x10] sm:$0xff]  ;;  %v6754_v28 = vpack.c.bf16 %v5233_v46, %v5232_v29  ;;  %v5217_v61 = vld [vmem:[#allocation6 + $0x118] sm:$0xff]  ;;  %v5202_v7 = vld [vmem:[#allocation6 + $0xa0] sm:$0xff] }
 0x7e1   :  { %v6724_v47 = vpack.c.bf16 %v5185_v36, %v5184_v43  ;;  %v5216_v50 = vld [vmem:[#allocation6 + $0x110] sm:$0xff]  ;;  %v5243_v29 = vld [vmem:[#allocation6 + $0x1e8] sm:$0xff] }
 0x7e2   :  { %6715 = vmatmul.mubr.msk.bf16.vlgmr.msra.gmra.mrb[56].mxu0 %vm2233_vm2, %v3858_v2  ;;  %v6756_v24 = vpack.c.bf16 %v5217_v61, %v5216_v50  ;;  %v5234_v2 = vld [vmem:[#allocation6 + $0x1a0] sm:$0xff]  ;;  %v5195_v46 = vld [vmem:[#allocation6 + $0x68] sm:$0xff]  ;;  %v5212_v61 = vld [vmem:[#allocation6 + $0xf0] sm:$0xff]  ;;  %vm5959_vm2 = vcmask 1024  }
 0x7e3   :  { %4196 = vmatpush1.bf16.msra.mxu0 %v7635_v30  ;;  %4227 = vmatprep.mubr.bf16.mxu0 %v8165_v49  ;;  %v5203_v30 = vld [vmem:[#allocation6 + $0xa8] sm:$0xff] }
 0x7e4   :  { %4197 = vmatprep.subr.bf16.mxu0 %v7640_v53  ;;  %v5235_v53 = vld [vmem:[#allocation6 + $0x1a8] sm:$0xff] }
 0x7e7   :  { %4198 = vmatpush1.bf16.msra.mxu0 %v7638_v5  ;;  %v6726_v5 = vpack.c.bf16 %v5203_v30, %v5202_v7  ;;  %v5244_v7 = vld [vmem:[#allocation6 + $0x1f0] sm:$0xff] }
 0x7e8   :  { %4301 = vmatprep.subr.bf16.mxu0 %v7646_v42  ;;  %v6758_v42 = vpack.c.bf16 %v5235_v53, %v5234_v2  ;;  %v5245_v2 = vld [vmem:[#allocation6 + $0x1f8] sm:$0xff] }
 0x7e9   :  { %v5197_v53 = vld [vmem:[#allocation6 + $0x78] sm:$0xff]  ;;  %v6778_v40 = vpack.c.bf16 %v5245_v2, %v5244_v7 }
 0x8b5   :  { %v6716_v32 = vpop.f32.mrb[56].mxu0 }
 0x8b6   :  { %v3930_v11 = vpop.f32.mrb[57].mxu0  ;;  %v3939_v13 = vadd.f32 %v6716_v32, %v6238_v55  ;;  %v5218_v32 = vld [vmem:[#allocation6 + $0x120] sm:$0xff] }
 0x8b7   :  { %v6717_v9 = vpop.f32.mrb[58].mxu0  ;;  %v3931_v18 = vadd.f32 %v6238_v55, %v3930_v11 }
 0x8b8   :  { %v3942_v41 = vadd.f32 %v6717_v9, %v6238_v55  ;;  %v3933_v48 = vpop.f32.mrb[59].mxu0  ;;  %v5204_v9 = vld [vmem:[#allocation6 + $0xb0] sm:$0xff] }
 0x8b9   :  { %v3934_v39 = vadd.f32 %v6238_v55, %v3933_v48  ;;  %v5219_v55 = vld [vmem:[#allocation6 + $0x128] sm:$0xff] }
 0x8ba   :  { %v9942_v1 = vpack.c.bf16 %v3942_v41, %v3939_v13  ;;  %v6760_v11 = vpack.c.bf16 %v5219_v55, %v5218_v32  ;;  %v5205_v13 = vld [vmem:[#allocation6 + $0xb8] sm:$0xff]  ;;  %v5236_v41 = vld [vmem:[#allocation6 + $0x1b0] sm:$0xff]  ;;  %v5262_v55 = vld [vmem:[#allocation6 + $0x280] sm:$0xff] }
 0x8bb   :  { %v3945_v56 = vpack.c.bf16 %v3934_v39, %v3931_v18  ;;  %v6730_v48 = vpack.c.bf16 %v5205_v13, %v5204_v9  ;;  %v5237_v18 = vld [vmem:[#allocation6 + $0x1b8] sm:$0xff]  ;;  %v5188_v39 = vld [vmem:[#allocation6 + $0x30] sm:$0xff]  ;;  %v5294_v9 = vld [vmem:[#allocation6 + $0x380] sm:$0xff] }
 0x8bd   :  { %6272 = vmatmul.mubr.msk.bf16.vlgmr.msra.gmra.mrb[60].mxu0 %vm1210_vm12, %v3945_v56  ;;  %6274 = vmatmul.mubr.msk.bf16.vlgmr.msra.gmra.mrb[32].mxu1 %vm1210_vm12, %v3945_v56 }
 0x8be   :  { %4237 = vmatprep.mubr.bf16.mxu0 %v8165_v49  ;;  %4290 = vmatprep.mubr.bf16.mxu1 %v8165_v49 }
 0x8bf   :  { %4302 = vmatpush1.bf16.msra.mxu0 %v7644_v4  ;;  %4355 = vmatpush1.bf16.msra.mxu1 %v7647_v20  ;;  %v5220_v20 = vld [vmem:[#allocation6 + $0x130] sm:$0xff] }
 0x8c0   :  { %4303 = vmatprep.subr.bf16.mxu0 %v7652_v37  ;;  %4356 = vmatprep.subr.bf16.mxu1 %v7655_v58  ;;  %v5221_v37 = vld [vmem:[#allocation6 + $0x138] sm:$0xff] }
 0x8c1   :  { %v6764_v58 = vpack.c.bf16 %v5221_v37, %v5220_v20  ;;  %v4005_v20 = vsub.s32 6, %v9899_v25  ;;  %v4001_v37 = vsub.s32 5, %v9899_v25 }
 0x8c3   :  { %4304 = vmatpush1.bf16.msra.mxu0 %v7650_v6  ;;  %4357 = vmatpush1.bf16.msra.mxu1 %v7653_v14  ;;  %v5206_v6 = vld [vmem:[#allocation6 + $0xc0] sm:$0xff]  ;;  %v5207_v14 = vld [vmem:[#allocation6 + $0xc8] sm:$0xff] }
 0x8c4   :  { %4407 = vmatprep.subr.bf16.mxu0 %v7658_v10  ;;  %4460 = vmatprep.subr.bf16.mxu1 %v7661_v15  ;;  %v5238_v10 = vld [vmem:[#allocation6 + $0x1c0] sm:$0xff]  ;;  %v6734_v15 = vpack.c.bf16 %v5207_v14, %v5206_v6 }
 0x8c5   :  { %6273 = vmatmul.mubr.msk.bf16.gmra.mrb[64].mxu0 %vm1210_vm12, %v9942_v1  ;;  %6275 = vmatmul.mubr.msk.bf16.gmra.mrb[36].mxu1 %vm1210_vm12, %v9942_v1 }
 0x8c6   :  { %4333 = vmatprep.mubr.bf16.mxu0 %v8165_v49  ;;  %4386 = vmatprep.mubr.bf16.mxu1 %v8165_v49 }
 0x8cd   :  { %6276 = vmatmul.mubr.msk.bf16.vlgmr.msra.gmra.mrb[68].mxu0 %vm1210_vm12, %v3945_v56  ;;  %6278 = vmatmul.mubr.msk.bf16.vlgmr.msra.gmra.mrb[40].mxu1 %vm1210_vm12, %v3945_v56 }
 0x8ce   :  { %4343 = vmatprep.mubr.bf16.mxu0 %v8165_v49  ;;  %4396 = vmatprep.mubr.bf16.mxu1 %v8165_v49 }
 0x8cf   :  { %4408 = vmatpush1.bf16.msra.mxu0 %v7656_v26  ;;  %4461 = vmatpush1.bf16.msra.mxu1 %v7659_v33  ;;  %v5239_v26 = vld [vmem:[#allocation6 + $0x1c8] sm:$0xff]  ;;  %v5190_v33 = vld [vmem:[#allocation6 + $0x40] sm:$0xff] }
 0x8d0   :  { %4409 = vmatprep.subr.bf16.mxu0 %v7664_v44  ;;  %4462 = vmatprep.subr.bf16.mxu1 %v7667_v52  ;;  %v5191_v44 = vld [vmem:[#allocation6 + $0x48] sm:$0xff]  ;;  %v6766_v52 = vpack.c.bf16 %v5239_v26, %v5238_v10 }
 0x8d1   :  { %v3976_v10 = vld [vmem:[%s10961_s18 + $0x8] sm:$0x3f] }
 0x8d3   :  { %4410 = vmatpush1.bf16.msra.mxu0 %v7662_v31  ;;  %4463 = vmatpush1.bf16.msra.mxu1 %v7665_v34  ;;  %v6736_v31 = vpack.c.bf16 %v5191_v44, %v5190_v33  ;;  %v5222_v34 = vld [vmem:[#allocation6 + $0x140] sm:$0xff] }
 0x8d4   :  { %4513 = vmatprep.subr.bf16.mxu0 %v7670_v57  ;;  %6719 = vmatprep.subr.bf16.mxu1 %v6718_v60  ;;  %v5223_v57 = vld [vmem:[#allocation6 + $0x148] sm:$0xff]  ;;  %v5192_v60 = vld [vmem:[#allocation6 + $0x50] sm:$0xff] }
 0x8d5   :  { %6277 = vmatmul.mubr.msk.bf16.gmra.mrb[72].mxu0 %vm1210_vm12, %v9942_v1  ;;  %6279 = vmatmul.mubr.msk.bf16.gmra.mrb[44].mxu1 %vm1210_vm12, %v9942_v1  ;;  %v6740_v63 = vpack.c.bf16 %v5193_v35, %v5192_v60 }
 0x8d6   :  { %4439 = vmatprep.mubr.bf16.mxu0 %v8165_v49  ;;  %4492 = vmatprep.mubr.bf16.mxu1 %v8165_v49 }
 0x8dd   :  { %6280 = vmatmul.mubr.msk.bf16.vlgmr.msra.gmra.mrb[76].mxu0 %vm1210_vm12, %v3945_v56  ;;  %6282 = vmatmul.mubr.msk.bf16.vlgmr.msra.gmra.mrb[48].mxu1 %vm1210_vm12, %v3945_v56 }
 0x8de   :  { %4449 = vmatprep.mubr.bf16.mxu0 %v8165_v49  ;;  %4502 = vmatprep.mubr.bf16.mxu1 %v8165_v49 }
 0x8df   :  { %4514 = vmatpush1.bf16.msra.mxu0 %v7668_v21  ;;  %6721 = vmatpush3.bf16.msra.mxu1 %v6720_v3  ;;  %v6768_v21 = vpack.c.bf16 %v5223_v57, %v5222_v34  ;;  %v5225_v3 = vld [vmem:[#allocation6 + $0x158] sm:$0xff]  ;;  %v10062_v57 = vrot.slane %v3976_v10, %v9903_v59 }
 0x8e0   :  { %4515 = vmatprep.subr.bf16.mxu0 %v7673_v62  ;;  %v5208_v62 = vld [vmem:[#allocation6 + $0xd0] sm:$0xff] }
 0x8e3   :  { %4516 = vmatpush1.bf16.msra.mxu0 %v7671_v54  ;;  %v5209_v54 = vld [vmem:[#allocation6 + $0xd8] sm:$0xff] }
 0x8e4   :  { %6751 = vmatprep.subr.bf16.mxu0 %v6750_v0  ;;  %v6738_v12 = vpack.c.bf16 %v5209_v54, %v5208_v62  ;;  %v5224_v0 = vld [vmem:[#allocation6 + $0x150] sm:$0xff]  ;;  %v10066_v62 = vld [vmem:[#allocation6 + $0x200] sm:$0xff]  ;;  %v10068_v54 = vld [vmem:[#allocation6 + $0x208] sm:$0xff] }
 0x8e5   :  { %6281 = vmatmul.mubr.msk.bf16.gmra.mrb[80].mxu0 %vm1210_vm12, %v9942_v1  ;;  %6283 = vmatmul.mubr.msk.bf16.gmra.mrb[52].mxu1 %vm1210_vm12, %v9942_v1  ;;  %v6772_v19 = vpack.c.bf16 %v5225_v3, %v5224_v0  ;;  %11057 = vst [vmem:[#allocation9_spill] sm:$0xff] %v10066_v62  ;;  %11058 = vst [vmem:[#allocation10_spill] sm:$0xff] %v10068_v54  ;;  %v10084_v0 = vld [vmem:[#allocation6 + $0x290] sm:$0xff]  ;;  %v10086_v3 = vld [vmem:[#allocation6 + $0x298] sm:$0xff] }
 0x8e6   :  { %4545 = vmatprep.mubr.bf16.mxu0 %v8165_v49  ;;  %11061 = vst [vmem:[#allocation13_spill] sm:$0xff] %v10084_v0  ;;  %11062 = vst [vmem:[#allocation14_spill] sm:$0xff] %v10086_v3 }
 0x8ed   :  { %6284 = vmatmul.mubr.msk.bf16.vlgmr.msra.gmra.mrb[84].mxu0 %vm1210_vm12, %v3945_v56  ;;  %v6762_v56 = vpack.c.bf16 %v5237_v18, %v5236_v41  ;;  %v5295_v41 = vld [vmem:[#allocation6 + $0x388] sm:$0xff]  ;;  %v3989_v18 = vsub.s32 2, %v9899_v25 }
 0x8ee   :  { %4555 = vmatprep.mubr.bf16.mxu0 %v8165_v49  ;;  %v5201_v49 = vld [vmem:[#allocation6 + $0x98] sm:$0xff]  ;;  %6753 = vmatpush3.bf16.msra.mxu0 %v6752_v22  ;;  %v5211_v22 = vld [vmem:[#allocation6 + $0xe8] sm:$0xff] }
 0x8ef   :  { %v6722_v38 = vpack.c.bf16 %v5201_v49, %v5200_v16  ;;  %6755 = vmatprep.subr.bf16.mxu0 %v6754_v28  ;;  %v5242_v16 = vld [vmem:[#allocation6 + $0x1e0] sm:$0xff]  ;;  %v6742_v49 = vpack.c.bf16 %v5211_v22, %v5210_v23  ;;  %v10090_v23 = vld [vmem:[#allocation6 + $0x398] sm:$0xff] }
 0x8f0   :  { %v6774_v43 = vpack.c.bf16 %v5243_v29, %v5242_v16  ;;  %v5226_v28 = vld [vmem:[#allocation6 + $0x160] sm:$0xff]  ;;  %11064 = vst [vmem:[#allocation16_spill] sm:$0xff] %v10090_v23 }
 0x8f1   :  { %6723 = vmatprep.subr.bf16.mxu1 %v6722_v38  ;;  %v5194_v38 = vld [vmem:[#allocation6 + $0x60] sm:$0xff] }
 0x8f2   :  { %6725 = vmatpush3.bf16.msra.mxu1 %v6724_v47  ;;  %6757 = vmatpush3.bf16.msra.mxu0 %v6756_v24  ;;  %v6744_v36 = vpack.c.bf16 %v5195_v46, %v5194_v38  ;;  %v5227_v47 = vld [vmem:[#allocation6 + $0x168] sm:$0xff]  ;;  %v5213_v24 = vld [vmem:[#allocation6 + $0xf8] sm:$0xff]  ;;  %v10100_v46 = vrot.slane %v3976_v10, %v4001_v37 }
 0x8f3   :  { %6727 = vmatprep.subr.bf16.mxu1 %v6726_v5  ;;  %6759 = vmatprep.subr.bf16.mxu0 %v6758_v42  ;;  %v6776_v50 = vpack.c.bf16 %v5227_v47, %v5226_v28  ;;  %v6746_v30 = vpack.c.bf16 %v5213_v24, %v5212_v61  ;;  %v5196_v5 = vld [vmem:[#allocation6 + $0x70] sm:$0xff] }
 0x8f4   :  { %v6748_v17 = vpack.c.bf16 %v5197_v53, %v5196_v5  ;;  %v5228_v42 = vld [vmem:[#allocation6 + $0x170] sm:$0xff]  ;;  %11066 = vst [vmem:[#allocation18_spill] sm:$0xff] %v10100_v46 }
 0x8f5   :  { %6285 = vmatmul.mubr.msk.bf16.gmra.mrb[88].mxu0 %vm1210_vm12, %v9942_v1  ;;  %v5189_v1 = vld [vmem:[#allocation6 + $0x38] sm:$0xff]  ;;  %v10106_v28 = vld [vmem:[#allocation6 + $0x310] sm:$0xff] }
 0x8f6   :  { %6729 = vmatpush3.bf16.msra.mxu1 %v6728_v27  ;;  %6761 = vmatpush3.bf16.msra.mxu0 %v6760_v11  ;;  %v6732_v4 = vpack.c.bf16 %v5189_v1, %v5188_v39  ;;  %v5229_v27 = vld [vmem:[#allocation6 + $0x178] sm:$0xff]  ;;  %v5263_v11 = vld [vmem:[#allocation6 + $0x288] sm:$0xff]  ;;  %v3985_v1 = vsub.s32 1, %v9899_v25  ;;  %11069 = vst [vmem:[#allocation21_spill] sm:$0xff] %v10106_v28 }
 0x8f7   :  { %6731 = vmatprep.subr.bf16.mxu1 %v6730_v48  ;;  %6763 = vmatprep.subr.bf16.mxu0 %v6762_v56  ;;  %v6780_v32 = vpack.c.bf16 %v5229_v27, %v5228_v42  ;;  %v6782_v13 = vpack.c.bf16 %v5263_v11, %v5262_v55  ;;  %v6814_v48 = vpack.c.bf16 %v5295_v41, %v5294_v9  ;;  %v3975_v39 = vld [vmem:[%s10961_s18] sm:$0xff]  ;;  %v3993_v56 = vsub.s32 3, %v9899_v25  ;;  %v10133_v11 = vld [vmem:[#allocation6 + $0x2a8] sm:$0xff] }
 0x8f8   :  { %v10042_v6 = vrot.slane %v3975_v39, %v9903_v59  ;;  %v10044_v14 = vrot.slane %v3975_v39, %v3989_v18  ;;  %v10055_v44 = vrot.slane %v3975_v39, %v4005_v20  ;;  %v10080_v59 = vrot.slane %v3976_v10, %v3985_v1  ;;  %v10126_v42 = vld [vmem:[#allocation6 + $0x2a0] sm:$0xff]  ;;  %11072 = vst [vmem:[#allocation24_spill] sm:$0xff] %v10133_v11  ;;  %v10180_v20 = vld [vmem:[#allocation6 + $0x238] sm:$0xff] }
 0x8f9   :  { %v10051_v26 = vrot.slane %v3975_v39, %v3993_v56  ;;  %11071 = vst [vmem:[#allocation23_spill] sm:$0xff] %v10126_v42  ;;  %v10135_v9 = vld [vmem:[#allocation6 + $0x3a0] sm:$0xff]  ;;  %11084 = vst [vmem:[#allocation36_spill] sm:$0xff] %v10180_v20  ;;  %v10223_v42 = vld [vmem:[#allocation6 + $0x348] sm:$0xff] }
 0x8fa   :  { %6733 = vmatpush3.bf16.msra.mxu1 %v6732_v4  ;;  %6765 = vmatpush3.bf16.msra.mxu0 %v6764_v58  ;;  %v3997_v4 = vsub.s32 4, %v9899_v25  ;;  %v4009_v58 = vsub.s32 7, %v9899_v25  ;;  %v10057_v25 = vrot.slane %v3975_v39, %v4001_v37  ;;  %11073 = vst [vmem:[#allocation25_spill] sm:$0xff] %v10135_v9  ;;  %11094 = vst [vmem:[#allocation46_spill] sm:$0xff] %v10223_v42  ;;  %v10270_v42 = vld [vmem:[#allocation6 + $0x2e8] sm:$0xff] }
 0x8fb   :  { %6735 = vmatprep.subr.bf16.mxu1 %v6734_v15  ;;  %6767 = vmatprep.subr.bf16.mxu0 %v6766_v52  ;;  %v10049_v15 = vrot.slane %v3975_v39, %v3985_v1  ;;  %v10146_v1 = vld [vmem:[#allocation6 + $0x228] sm:$0xff]  ;;  %11104 = vst [vmem:[#allocation56_spill] sm:$0xff] %v10270_v42 }
 0x8fc   :  { %v10053_v33 = vrot.slane %v3975_v39, %v3997_v4  ;;  %v10059_v34 = vrot.slane %v3975_v39, %v4009_v58  ;;  %v10098_v38 = vrot.slane %v3976_v10, %v3997_v4  ;;  %v10144_v39 = vld [vmem:[#allocation6 + $0x220] sm:$0xff]  ;;  %11076 = vst [vmem:[#allocation28_spill] sm:$0xff] %v10146_v1  ;;  %v10155_v58 = vld [vmem:[#allocation6 + $0x328] sm:$0xff] }
 0x8fd   :  { %11075 = vst [vmem:[#allocation27_spill] sm:$0xff] %v10144_v39  ;;  %11078 = vst [vmem:[#allocation30_spill] sm:$0xff] %v10155_v58  ;;  %v10198_v39 = vld [vmem:[#allocation6 + $0x3c0] sm:$0xff]  ;;  %v10200_v1 = vld [vmem:[#allocation6 + $0x3c8] sm:$0xff] }
 0x8fe   :  { %6737 = vmatpush3.bf16.msra.mxu1 %v6736_v31  ;;  %6769 = vmatpush3.bf16.msra.mxu0 %v6768_v21  ;;  %v10064_v21 = vrot.slane %v3976_v10, %v3989_v18  ;;  %11065 = vst [vmem:[#allocation17_spill] sm:$0xff] %v10098_v38  ;;  %v10184_v18 = vld [vmem:[#allocation6 + $0x338] sm:$0xff]  ;;  %11089 = vst [vmem:[#allocation41_spill] sm:$0xff] %v10198_v39  ;;  %v10211_v58 = vld [vmem:[#allocation6 + $0x240] sm:$0xff] }
 0x8ff   :  { %6739 = vmatprep.subr.bf16.mxu1 %v6738_v12  ;;  %6771 = vmatprep.subr.bf16.mxu0 %v6770_v51  ;;  %v10072_v12 = vld [vmem:[#allocation6 + $0x308] sm:$0xff]  ;;  %11086 = vst [vmem:[#allocation38_spill] sm:$0xff] %v10184_v18  ;;  %11090 = vst [vmem:[#allocation42_spill] sm:$0xff] %v10200_v1 }
 0x900   :  { %11060 = vst [vmem:[#allocation12_spill] sm:$0xff] %v10072_v12  ;;  %11091 = vst [vmem:[#allocation43_spill] sm:$0xff] %v10211_v58 }
 0x902   :  { %6741 = vmatpush3.bf16.msra.mxu1 %v6740_v63  ;;  %6773 = vmatpush3.bf16.msra.mxu0 %v6772_v19  ;;  %v10082_v63 = vrot.slane %v3976_v10, %v3993_v56  ;;  %v10088_v19 = vld [vmem:[#allocation6 + $0x390] sm:$0xff]  ;;  %v10148_v56 = vld [vmem:[#allocation6 + $0x320] sm:$0xff] }
 0x903   :  { %6743 = vmatprep.subr.bf16.mxu1 %v6742_v49  ;;  %6775 = vmatprep.subr.bf16.mxu0 %v6774_v43  ;;  %11063 = vst [vmem:[#allocation15_spill] sm:$0xff] %v10088_v19  ;;  %v10102_v43 = vld [vmem:[#allocation6 + $0x210] sm:$0xff]  ;;  %11077 = vst [vmem:[#allocation29_spill] sm:$0xff] %v10148_v56  ;;  %v10244_v56 = vld [vmem:[#allocation6 + $0x3d8] sm:$0xff] }
 0x904   :  { %11067 = vst [vmem:[#allocation19_spill] sm:$0xff] %v10102_v43  ;;  %v10157_v10 = vld [vmem:[#allocation6 + $0x2b0] sm:$0xff]  ;;  %11098 = vst [vmem:[#allocation50_spill] sm:$0xff] %v10244_v56 }
 0x905   :  { %11079 = vst [vmem:[#allocation31_spill] sm:$0xff] %v10157_v10 }
 0x906   :  { %6745 = vmatpush3.bf16.msra.mxu1 %v6744_v36  ;;  %6777 = vmatpush3.bf16.msra.mxu0 %v6776_v50  ;;  %v10104_v36 = vld [vmem:[#allocation6 + $0x218] sm:$0xff] }
 0x907   :  { %6747 = vmatprep.subr.bf16.mxu1 %v6746_v30  ;;  %6779 = vmatprep.subr.bf16.mxu0 %v6778_v40  ;;  %11068 = vst [vmem:[#allocation20_spill] sm:$0xff] %v10104_v36 }
 0x90a   :  { %6749 = vmatpush3.bf16.msra.mxu1 %v6748_v17  ;;  %6781 = vmatpush3.bf16.msra.mxu0 %v6780_v32  ;;  %v10124_v17 = vld [vmem:[#allocation6 + $0x318] sm:$0xff]  ;;  %v10196_v32 = vld [vmem:[#allocation6 + $0x2c8] sm:$0xff] }
 0x90b   :  { %6783 = vmatprep.subr.bf16.mxu1 %v6782_v13  ;;  %6815 = vmatprep.subr.bf16.mxu0 %v6814_v48  ;;  %11070 = vst [vmem:[#allocation22_spill] sm:$0xff] %v10124_v17  ;;  %v10137_v13 = vld [vmem:[#allocation6 + $0x3a8] sm:$0xff]  ;;  %11088 = vst [vmem:[#allocation40_spill] sm:$0xff] %v10196_v32 }
 0x90c   :  { %11074 = vst [vmem:[#allocation26_spill] sm:$0xff] %v10137_v13 }
 0x990   :  { %v4229_v52 = vpop.f32.mrb[60].mxu0  ;;  %v4282_v31 = vpop.f32.mrb[32].mxu1 }
 0x991   :  { %v10075_v45 = vadd.f32 %v4229_v52, %v10042_v6  ;;  %v10078_v60 = vadd.f32 %v4282_v31, %v10044_v14  ;;  %v4231_v35 = vpop.f32.mrb[61].mxu0  ;;  %v4284_v51 = vpop.f32.mrb[33].mxu1  ;;  %v10159_v52 = vld [vmem:[#allocation6 + $0x2b8] sm:$0xff] }
 0x992   :  { %v10093_v22 = vadd.f32 %v4231_v35, %v10049_v15  ;;  %v10096_v16 = vadd.f32 %v4284_v51, %v10051_v26  ;;  %v4233_v49 = vpop.f32.mrb[62].mxu0  ;;  %v4286_v29 = vpop.f32.mrb[34].mxu1  ;;  %11080 = vst [vmem:[#allocation32_spill] sm:$0xff] %v10159_v52  ;;  %v10231_v52 = vld [vmem:[#allocation6 + $0x2d0] sm:$0xff] }
 0x993   :  { %v6286_v47 = vmul.f32 -1.442695, %v10075_v45  ;;  %v6288_v50 = vmul.f32 -1.442695, %v10078_v60  ;;  %v10111_v61 = vadd.f32 %v4233_v49, %v10042_v6  ;;  %v10114_v24 = vadd.f32 %v4286_v29, %v10044_v14  ;;  %v4235_v7 = vpop.f32.mrb[63].mxu0  ;;  %v4288_v30 = vpop.f32.mrb[35].mxu1 }
 0x994   :  { %v6287_v2 = vmul.f32 -1.442695, %v10093_v22  ;;  %v6289_v5 = vmul.f32 -1.442695, %v10096_v16  ;;  %v10119_v53 = vadd.f32 %v4235_v7, %v10049_v15  ;;  %v10122_v40 = vadd.f32 %v4288_v30, %v10051_v26  ;;  %v10178_v49 = vld [vmem:[#allocation6 + $0x230] sm:$0xff]  ;;  %11095 = vst [vmem:[#allocation47_spill] sm:$0xff] %v10231_v52 }
 0x995   :  { %7906 = vpow2.f32 %v6286_v47  ;;  %v6300_v27 = vmul.f32 -1.442695, %v10111_v61  ;;  %v6302_v41 = vmul.f32 -1.442695, %v10114_v24  ;;  %v10166_v47 = vld [vmem:[#allocation6 + $0x3b0] sm:$0xff]  ;;  %11083 = vst [vmem:[#allocation35_spill] sm:$0xff] %v10178_v49 }
 0x996   :  { %7908 = vpow2.f32 %v6288_v50  ;;  %v6301_v4 = vmul.f32 -1.442695, %v10119_v53  ;;  %v6303_v31 = vmul.f32 -1.442695, %v10122_v40  ;;  %11081 = vst [vmem:[#allocation33_spill] sm:$0xff] %v10166_v47  ;;  %v10168_v50 = vld [vmem:[#allocation6 + $0x3b8] sm:$0xff] }
 0x997   :  { %7910 = vpow2.f32 %v6287_v2  ;;  %11082 = vst [vmem:[#allocation34_spill] sm:$0xff] %v10168_v50  ;;  %v10182_v29 = vld [vmem:[#allocation6 + $0x330] sm:$0xff] }
 0x998   :  { %7912 = vpow2.f32 %v6289_v5  ;;  %v4239_v35 = vpop.f32.mrb[64].mxu0  ;;  %v4292_v51 = vpop.f32.mrb[36].mxu1  ;;  %11085 = vst [vmem:[#allocation37_spill] sm:$0xff] %v10182_v29  ;;  %v10248_v29 = vld [vmem:[#allocation6 + $0x258] sm:$0xff] }
 0x999   :  { %7914 = vpow2.f32 %v6300_v27  ;;  %v10171_v7 = vadd.f32 %v4239_v35, %v10042_v6  ;;  %v10174_v30 = vadd.f32 %v4292_v51, %v10044_v14  ;;  %v4241_v2 = vpop.f32.mrb[65].mxu0  ;;  %v4294_v5 = vpop.f32.mrb[37].mxu1  ;;  %v10186_v27 = vld [vmem:[#allocation6 + $0x2c0] sm:$0xff]  ;;  %11100 = vst [vmem:[#allocation52_spill] sm:$0xff] %v10248_v29 }
 0x99a   :  { %11087 = vst [vmem:[#allocation39_spill] sm:$0xff] %v10186_v27  ;;  %7916 = vpow2.f32 %v6302_v41  ;;  %v10189_v35 = vadd.f32 %v4241_v2, %v10049_v15  ;;  %v10192_v51 = vadd.f32 %v4294_v5, %v10051_v26  ;;  %v4243_v55 = vpop.f32.mrb[66].mxu0  ;;  %v4296_v48 = vpop.f32.mrb[38].mxu1 }
 0x99b   :  { %7918 = vpow2.f32 %v6301_v4  ;;  %v6314_v41 = vmul.f32 -1.442695, %v10171_v7  ;;  %v6316_v2 = vmul.f32 -1.442695, %v10174_v30  ;;  %v10205_v9 = vadd.f32 %v4243_v55, %v10042_v6  ;;  %v4245_v5 = vpop.f32.mrb[67].mxu0  ;;  %v4298_v13 = vpop.f32.mrb[39].mxu1 }
 0x99c   :  { %7920 = vpow2.f32 %v6303_v31  ;;  %v6315_v28 = vmul.f32 -1.442695, %v10189_v35  ;;  %v6317_v37 = vmul.f32 -1.442695, %v10192_v51  ;;  %v10213_v4 = vld [vmem:[#allocation6 + $0x248] sm:$0xff]  ;;  %v10217_v6 = vadd.f32 %v4296_v48, %v10044_v14  ;;  %v10221_v31 = vld [vmem:[#allocation6 + $0x340] sm:$0xff] }
 0x99d   :  { %11092 = vst [vmem:[#allocation44_spill] sm:$0xff] %v10213_v4  ;;  %7922 = vpow2.f32 %v6314_v41  ;;  %v6328_v17 = vmul.f32 -1.442695, %v10205_v9  ;;  %11093 = vst [vmem:[#allocation45_spill] sm:$0xff] %v10221_v31  ;;  %v10233_v14 = vld [vmem:[#allocation6 + $0x2d8] sm:$0xff]  ;;  %v10235_v48 = vld [vmem:[#allocation6 + $0x3d0] sm:$0xff]  ;;  %v10238_v47 = vadd.f32 %v4245_v5, %v10049_v15 }
 0x99e   :  { %7924 = vpow2.f32 %v6316_v2  ;;  %11096 = vst [vmem:[#allocation48_spill] sm:$0xff] %v10233_v14  ;;  %11097 = vst [vmem:[#allocation49_spill] sm:$0xff] %v10235_v48  ;;  %v10246_v41 = vld [vmem:[#allocation6 + $0x250] sm:$0xff]  ;;  %v10256_v10 = vmul.f32 -1.442695, %v10217_v6  ;;  %v10268_v31 = vld [vmem:[#allocation6 + $0x2e0] sm:$0xff] }
 0x99f   :  { %v7907_v55 = vpop.eup %7906  ;;  %7926 = vpow2.f32 %v6315_v28  ;;  %11099 = vst [vmem:[#allocation51_spill] sm:$0xff] %v10246_v41  ;;  %v10251_v28 = vadd.f32 %v4298_v13, %v10051_v26  ;;  %11103 = vst [vmem:[#allocation55_spill] sm:$0xff] %v10268_v31  ;;  %v10278_v2 = vld [vmem:[#allocation6 + $0x3e0] sm:$0xff]  ;;  %v10280_v48 = vld [vmem:[#allocation6 + $0x3e8] sm:$0xff] }
 0x9a0   :  { %v7909_v18 = vpop.eup %7908  ;;  %v4734_v27 = vadd.f32 1.0, %v7907_v55  ;;  %7928 = vpow2.f32 %v6317_v37  ;;  %v4335_v15 = vpop.f32.mrb[68].mxu0  ;;  %v10260_v37 = vld [vmem:[#allocation6 + $0x350] sm:$0xff]  ;;  %11105 = vst [vmem:[#allocation57_spill] sm:$0xff] %v10278_v2  ;;  %11106 = vst [vmem:[#allocation58_spill] sm:$0xff] %v10280_v48 }
 0x9a1   :  { %v4388_v5 = vpop.f32.mrb[40].mxu1  ;;  %v7911_v39 = vpop.eup %7910  ;;  %v4736_v1 = vadd.f32 1.0, %v7909_v18  ;;  %7930 = vpow2.f32 %v6328_v17  ;;  %11101 = vst [vmem:[#allocation53_spill] sm:$0xff] %v10260_v37  ;;  %v10266_v18 = vld [vmem:[#allocation6 + $0x358] sm:$0xff]  ;;  %v10283_v29 = vmul.f32 -1.442695, %v10251_v28 }
 0x9a2   :  { %v4337_v58 = vpop.f32.mrb[69].mxu0  ;;  %v4390_v4 = vpop.f32.mrb[41].mxu1  ;;  %7932 = vrcp.f32 %v4734_v27  ;;  %v4735_v13 = vadd.f32 1.0, %v7911_v39  ;;  %11102 = vst [vmem:[#allocation54_spill] sm:$0xff] %v10266_v18  ;;  %v10273_v27 = vmul.f32 -1.442695, %v10238_v47  ;;  %v10276_v39 = vadd.f32 %v4335_v15, %v10053_v33 }
 0x9a3   :  { %v7913_v26 = vpop.eup %7912  ;;  %v4339_v32 = vpop.f32.mrb[70].mxu0  ;;  %7934 = vrcp.f32 %v4736_v1  ;;  %v10286_v1 = vadd.f32 %v4388_v5, %v10055_v44 }
 0x9a4   :  { %v4392_v49 = vpop.f32.mrb[42].mxu1  ;;  %v7915_v55 = vpop.eup %7914  ;;  %v4737_v52 = vadd.f32 1.0, %v7913_v26  ;;  %7936 = vrcp.f32 %v4735_v13 }
 0x9a5   :  { %v4341_v14 = vpop.f32.mrb[71].mxu0  ;;  %v7917_v17 = vpop.eup %7916  ;;  %v4748_v41 = vadd.f32 1.0, %v7915_v55  ;;  %v10293_v55 = vadd.f32 %v4337_v58, %v10057_v25  ;;  %v10307_v58 = vadd.f32 %v4339_v32, %v10053_v33 }
 0x9a6   :  { %v4394_v26 = vpop.f32.mrb[43].mxu1  ;;  %v7919_v56 = vpop.eup %7918  ;;  %7938 = vrcp.f32 %v4737_v52  ;;  %v4750_v20 = vadd.f32 1.0, %v7917_v17  ;;  %v10298_v52 = vmul.f32 -1.442695, %v10276_v39  ;;  %v10301_v17 = vadd.f32 %v4390_v4, %v10059_v34 }
 0x9a7   :  { %v7921_v11 = vpop.eup %7920  ;;  %7940 = vrcp.f32 %v4748_v41  ;;  %v4749_v13 = vadd.f32 1.0, %v7919_v56  ;;  %v10304_v56 = vmul.f32 -1.442695, %v10286_v1  ;;  %v10313_v2 = vadd.f32 %v4341_v14, %v10057_v25 }
 0x9a8   :  { %v7923_v43 = vpop.eup %7922  ;;  %7942 = vrcp.f32 %v4750_v20  ;;  %v4751_v36 = vadd.f32 1.0, %v7921_v11  ;;  %11107 = vst [vmem:[#allocation59_spill] sm:$0xff] %v10301_v17  ;;  %v4345_v41 = vpop.f32.mrb[72].mxu0  ;;  %v10310_v11 = vadd.f32 %v4392_v49, %v10055_v44  ;;  %v10316_v37 = vadd.f32 %v4394_v26, %v10059_v34 }
 0x9a9   :  { %v7925_v15 = vpop.eup %7924  ;;  %7944 = vrcp.f32 %v4749_v13  ;;  %v4762_v50 = vadd.f32 1.0, %v7923_v43  ;;  %11108 = vst [vmem:[#allocation60_spill] sm:$0xff] %v10313_v2  ;;  %v4398_v4 = vpop.f32.mrb[44].mxu1  ;;  %v10319_v32 = vadd.f32 %v4345_v41, %v10053_v33  ;;  %v6291_v19 = vmul.f32 -1.442695, %v10293_v55 }
 0x9aa   :  { %v7927_v5 = vpop.eup %7926  ;;  %7946 = vrcp.f32 %v4751_v36  ;;  %v4764_v20 = vadd.f32 1.0, %v7925_v15  ;;  %v4347_v48 = vpop.f32.mrb[73].mxu0  ;;  %11109 = vst [vmem:[#allocation61_spill] sm:$0xff] %v10316_v37  ;;  %v10322_v31 = vadd.f32 %v4398_v4, %v10055_v44  ;;  %v6304_v4 = vmul.f32 -1.442695, %v10307_v58 }
 0x9ab   :  { %v7929_v13 = vpop.eup %7928  ;;  %7948 = vrcp.f32 %v4762_v50  ;;  %v4763_v43 = vadd.f32 1.0, %v7927_v5  ;;  %11110 = vst [vmem:[#allocation62_spill] sm:$0xff] %v10319_v32  ;;  %v4400_v18 = vpop.f32.mrb[45].mxu1  ;;  %v10325_v14 = vadd.f32 %v4347_v48, %v10057_v25  ;;  %v6306_v48 = vmul.f32 -1.442695, %v10310_v11 }
 0x9ac   :  { %v4349_v36 = vpop.f32.mrb[74].mxu0  ;;  %v7931_v15 = vpop.eup %7930  ;;  %7950 = vrcp.f32 %v4764_v20  ;;  %v4765_v49 = vadd.f32 1.0, %v7929_v13  ;;  %11111 = vst [vmem:[#allocation63_spill] sm:$0xff] %v10322_v31  ;;  %v10329_v41 = vadd.f32 %v4400_v18, %v10059_v34  ;;  %v6293_v20 = vmul.f32 -1.442695, %v10301_v17 }
 0x9ad   :  { %11112 = vst [vmem:[#allocation64_spill] sm:$0xff] %v10325_v14  ;;  %v4402_v42 = vpop.f32.mrb[46].mxu1  ;;  %v4351_v50 = vpop.f32.mrb[75].mxu0  ;;  %7952 = vrcp.f32 %v4763_v43  ;;  %v4776_v26 = vadd.f32 1.0, %v7931_v15  ;;  %v6305_v12 = vmul.f32 -1.442695, %v10313_v2  ;;  %v10349_v3 = vadd.f32 %v4349_v36, %v10053_v33 }
 0x9ae   :  { %v7933_v5 = vpop.eup %7932  ;;  %11113 = vst [vmem:[#allocation65_spill] sm:$0xff] %v10329_v41  ;;  %v4404_v23 = vpop.f32.mrb[47].mxu1  ;;  %7954 = vrcp.f32 %v4765_v49  ;;  %v10336_v43 = vmul.f32 -1.442695, %v10316_v37  ;;  %v10339_v15 = vmul.f32 -1.442695, %v10319_v32  ;;  %v10360_v33 = vadd.f32 %v4402_v42, %v10055_v44 }
 0x9af   :  { %v7935_v8 = vpop.eup %7934  ;;  %7956 = vrcp.f32 %v4776_v26  ;;  %v10343_v49 = vmul.f32 -1.442695, %v10322_v31  ;;  %v10346_v0 = vmul.f32 -1.442695, %v10325_v14  ;;  %11114 = vst [vmem:[#allocation66_spill] sm:$0xff] %v10349_v3  ;;  %v4902_v62 = vmul.f32 %v7933_v5, %v10075_v45 }
 0x9b0   :  { %v7937_v13 = vpop.eup %7936  ;;  %7958 = vpow2.f32 %v10256_v10  ;;  %v4904_v54 = vmul.f32 %v7935_v8, %v10078_v60  ;;  %v10355_v46 = vmul.f32 -1.442695, %v10329_v41  ;;  %v4441_v10 = vpop.f32.mrb[76].mxu0  ;;  %11115 = vst [vmem:[#allocation67_spill] sm:$0xff] %v10360_v33  ;;  %v10363_v36 = vadd.f32 %v4351_v50, %v10057_v25 }
 0x9b1   :  { %v7939_v18 = vpop.eup %7938  ;;  %7960 = vpow2.f32 %v10273_v27  ;;  %v4494_v38 = vpop.f32.mrb[48].mxu1  ;;  %v4903_v27 = vmul.f32 %v7937_v13, %v10093_v22 }
 0x9b2   :  { %v7941_v26 = vpop.eup %7940  ;;  %7962 = vpow2.f32 %v10283_v29  ;;  %11116 = vst [vmem:[#allocation68_spill] sm:$0xff] %v10363_v36  ;;  %v10365_v45 = vpop.f32.mrb[77].mxu0 }
 0x9b3   :  { %v7943_v31 = vpop.eup %7942  ;;  %v4916_v32 = vmul.f32 %v7941_v26, %v10111_v61  ;;  %v10367_v8 = vpop.f32.mrb[49].mxu1  ;;  %7964 = vpow2.f32 %v10298_v52  ;;  %v10373_v61 = vadd.f32 %v4494_v38, %v10064_v21  ;;  %v10382_v26 = vmul.f32 -1.442695, %v10349_v3 }
 0x9b4   :  { %v7945_v60 = vpop.eup %7944  ;;  %v4918_v5 = vmul.f32 %v7943_v31, %v10114_v24  ;;  %v10375_v29 = vpop.f32.mrb[78].mxu0  ;;  %7966 = vpow2.f32 %v10304_v56  ;;  %v4905_v38 = vmul.f32 %v7939_v18, %v10096_v16  ;;  %v10396_v3 = vmul.f32 -1.442695, %v10360_v33 }
 0x9b5   :  { %11117 = vst [vmem:[#allocation69_spill] sm:$0xff] %v10373_v61  ;;  %v10377_v44 = vpop.f32.mrb[50].mxu1  ;;  %v7947_v25 = vpop.eup %7946  ;;  %v4958_v42 = vadd.f32 %v4916_v32, %v4902_v62  ;;  %v4917_v50 = vmul.f32 %v7945_v60, %v10119_v53  ;;  %7968 = vpow2.f32 %v6291_v19  ;;  %v10391_v53 = vadd.f32 %v4404_v23, %v10059_v34  ;;  %v10406_v34 = vld [vmem:[#allocation6 + $0x260] sm:$0xff]  ;;  %v10408_v23 = vld [vmem:[#allocation6 + $0x268] sm:$0xff] }
 0x9b6   :  { %v10384_v22 = vpop.f32.mrb[79].mxu0  ;;  %v10386_v24 = vpop.f32.mrb[51].mxu1  ;;  %v4972_v52 = vadd.f32 %v4918_v5, %v4904_v54  ;;  %v4919_v13 = vmul.f32 %v7947_v25, %v10122_v40  ;;  %7970 = vpow2.f32 %v6293_v20  ;;  %v10401_v19 = vmul.f32 -1.442695, %v10363_v36  ;;  %11120 = vst [vmem:[#allocation72_spill] sm:$0xff] %v10406_v34  ;;  %11121 = vst [vmem:[#allocation73_spill] sm:$0xff] %v10408_v23 }
 0x9b7   :  { %v7949_v31 = vpop.eup %7948  ;;  %v4959_v62 = vrot.slane %v4958_v42, 4  ;;  %v4965_v32 = vadd.f32 %v4917_v50, %v4903_v27  ;;  %11118 = vst [vmem:[#allocation70_spill] sm:$0xff] %v10391_v53  ;;  %7972 = vpow2.f32 %v6304_v4  ;;  %v10404_v40 = vadd.f32 %v4441_v10, %v10062_v57 }
 0x9b8   :  { %v7951_v41 = vpop.eup %7950  ;;  %v4973_v60 = vrot.slane %v4972_v52, 4  ;;  %v4979_v14 = vadd.f32 %v4919_v13, %v4905_v38  ;;  %7974 = vpow2.f32 %v6306_v48  ;;  %v10410_v5 = vpop.f32.mrb[80].mxu0  ;;  %v4930_v50 = vmul.f32 %v7949_v31, %v10171_v7 }
 0x9b9   :  { %v10393_v56 = vpop.eup %7952  ;;  %v4960_v54 = vadd.f32 %v4959_v62, %v4958_v42  ;;  %11119 = vst [vmem:[#allocation71_spill] sm:$0xff] %v10404_v40  ;;  %v4966_v4 = vrot.slane %v4965_v32, 4  ;;  %7976 = vpow2.f32 %v6305_v12  ;;  %v10412_v25 = vpop.f32.mrb[52].mxu1  ;;  %v10423_v12 = vmul.f32 -1.442695, %v10391_v53 }
 0x9ba   :  { %v10398_v16 = vpop.eup %7954  ;;  %v4974_v18 = vadd.f32 %v4973_v60, %v4972_v52  ;;  %v4980_v27 = vrot.slane %v4979_v14, 4  ;;  %7978 = vpow2.f32 %v10336_v43  ;;  %v10417_v38 = vpop.f32.mrb[81].mxu0  ;;  %v10433_v33 = vadd.f32 %v10365_v45, %v10080_v59 }
 0x9bb   :  { %v7957_v20 = vpop.eup %7956  ;;  %v4961_v42 = vrot.slane %v4960_v54, 2  ;;  %v10419_v13 = vpop.f32.mrb[53].mxu1  ;;  %7980 = vpow2.f32 %v10339_v15  ;;  %v4967_v37 = vadd.f32 %v4966_v4, %v4965_v32  ;;  %v4932_v45 = vmul.f32 %v7951_v41, %v10174_v30 }
 0x9bc   :  { %v7959_v48 = vpop.eup %7958  ;;  %v4944_v10 = vmul.f32 %v7957_v20, %v10205_v9  ;;  %v10425_v60 = vpop.f32.mrb[82].mxu0  ;;  %v4975_v43 = vrot.slane %v4974_v18, 2  ;;  %v10444_v34 = vmul.f32 -1.442695, %v10373_v61 }
 0x9bd   :  { %v7961_v52 = vpop.eup %7960  ;;  %v4778_v62 = vadd.f32 1.0, %v7959_v48  ;;  %11122 = vst [vmem:[#allocation74_spill] sm:$0xff] %v10425_v60  ;;  %v10427_v36 = vpop.f32.mrb[54].mxu1  ;;  %v4981_v60 = vadd.f32 %v4980_v27, %v4979_v14  ;;  %v4962_v17 = vadd.f32 %v4961_v42, %v4960_v54  ;;  %v4968_v54 = vrot.slane %v4967_v37, 2 }
 0x9be   :  { %11123 = vst [vmem:[#allocation75_spill] sm:$0xff] %v10427_v36  ;;  %v7963_v7 = vpop.eup %7962  ;;  %v5056_v31 = vadd.f32 %v4944_v10, %v4930_v50  ;;  %v4777_v20 = vadd.f32 1.0, %v7961_v52  ;;  %v10435_v48 = vpop.f32.mrb[83].mxu0  ;;  %v10440_v50 = vmul.f32 -1.442695, %v10404_v40  ;;  %v4976_v32 = vadd.f32 %v4975_v43, %v4974_v18 }
 0x9bf   :  { %v10437_v15 = vpop.f32.mrb[55].mxu1  ;;  %v7965_v53 = vpop.eup %7964  ;;  %7982 = vrcp.f32 %v4778_v62  ;;  %v4779_v36 = vadd.f32 1.0, %v7963_v7  ;;  %v4982_v42 = vrot.slane %v4981_v60, 2  ;;  %v4931_v18 = vmul.f32 %v10393_v56, %v10189_v35 }
 0x9c0   :  { %11124 = vst [vmem:[#allocation76_spill] sm:$0xff] %v10437_v15  ;;  %v7967_v2 = vpop.eup %7966  ;;  %v5057_v9 = vrot.slane %v5056_v31, 4  ;;  %7984 = vrcp.f32 %v4777_v20  ;;  %v4738_v52 = vadd.f32 1.0, %v7965_v53  ;;  %v10446_v20 = vpop.f32.mrb[84].mxu0  ;;  %v4963_v15 = vrot.slane %v4962_v17, 1 }
 0x9c1   :  { %v7969_v10 = vpop.eup %7968  ;;  %7986 = vrcp.f32 %v4779_v36  ;;  %v4740_v4 = vadd.f32 1.0, %v7967_v2  ;;  %v10448_v36 = vpop.f32.mrb[85].mxu0  ;;  %v10462_v61 = vadd.f32 %v4968_v54, %v4967_v37  ;;  %v10478_v37 = vadd.f32 %v10412_v25, %v10064_v21 }
 0x9c2   :  { %v7971_v23 = vpop.eup %7970  ;;  %v5058_v14 = vadd.f32 %v5057_v9, %v5056_v31  ;;  %v4739_v27 = vadd.f32 1.0, %v7969_v10  ;;  %7988 = vrcp.f32 %v4738_v52  ;;  %v10454_v9 = vadd.f32 %v10377_v44, %v10064_v21 }
 0x9c3   :  { %v7973_v62 = vpop.eup %7972  ;;  %v4741_v7 = vadd.f32 1.0, %v7971_v23  ;;  %7990 = vrcp.f32 %v4740_v4  ;;  %v10456_v23 = vpop.f32.mrb[86].mxu0  ;;  %v4977_v31 = vrot.slane %v4976_v32, 1  ;;  %v4933_v10 = vmul.f32 %v10398_v16, %v10192_v51  ;;  %11126 = vst [vmem:[#allocation78_spill] sm:$0xff] %v10478_v37 }
 0x9c4   :  { %v7975_v40 = vpop.eup %7974  ;;  %v5059_v30 = vrot.slane %v5058_v14, 2  ;;  %v4752_v41 = vadd.f32 1.0, %v7973_v62  ;;  %7992 = vrcp.f32 %v4739_v27  ;;  %11125 = vst [vmem:[#allocation77_spill] sm:$0xff] %v10456_v23  ;;  %v10460_v4 = vpop.f32.mrb[87].mxu0  ;;  %v10466_v44 = vadd.f32 %v4982_v42, %v4981_v60 }
 0x9c5   :  { %v7977_v53 = vpop.eup %7976  ;;  %v4754_v2 = vadd.f32 1.0, %v7975_v40  ;;  %7994 = vrcp.f32 %v4741_v7  ;;  %v10464_v40 = vadd.f32 %v4963_v15, %v4962_v17  ;;  %v10470_v51 = vadd.f32 %v10367_v8, %v10082_v63 }
 0x9c6   :  { %v7979_v43 = vpop.eup %7978  ;;  %v4753_v52 = vadd.f32 1.0, %v7977_v53  ;;  %v5060_v35 = vadd.f32 %v5059_v30, %v5058_v14  ;;  %7996 = vrcp.f32 %v4752_v41  ;;  %v10474_v16 = vadd.f32 %v10375_v29, %v10062_v57 }
 0x9c7   :  { %v7981_v62 = vpop.eup %7980  ;;  %v4755_v56 = vadd.f32 1.0, %v7979_v43  ;;  %7998 = vrcp.f32 %v4754_v2  ;;  %v10480_v15 = vadd.f32 %v4977_v31, %v4976_v32  ;;  %v10484_v14 = vmul.f32 -1.442695, %v10433_v33 }
 0x9c8   :  { %v4766_v27 = vadd.f32 1.0, %v7981_v62  ;;  %8000 = vrcp.f32 %v4753_v52  ;;  %v5061_v8 = vrot.slane %v5060_v35, 1  ;;  %v10489_v29 = vadd.f32 %v10384_v22, %v10080_v59  ;;  %v10491_v25 = vpop.f32.mrb[88].mxu0 }
 0x9c9   :  { %v7983_v23 = vpop.eup %7982  ;;  %8002 = vrcp.f32 %v4755_v56  ;;  %v10499_v30 = vpop.f32.mrb[89].mxu0  ;;  %v10503_v22 = vmul.f32 -1.442695, %v10470_v51  ;;  %v10506_v53 = vmul.f32 -1.442695, %v10474_v16  ;;  %v10521_v31 = vadd.f32 %v10410_v5, %v10062_v57 }
 0x9ca   :  { %v7985_v17 = vpop.eup %7984  ;;  %v4946_v60 = vmul.f32 %v7983_v23, %v10217_v6  ;;  %8004 = vrcp.f32 %v4766_v27  ;;  %v10497_v6 = vadd.f32 %v10386_v24, %v10082_v63  ;;  %v10512_v24 = vmul.f32 -1.442695, %v10454_v9 }
 0x9cb   :  { %v7987_v54 = vpop.eup %7986  ;;  %v4945_v42 = vmul.f32 %v7985_v17, %v10238_v47  ;;  %8006 = vpow2.f32 %v10343_v49  ;;  %11127 = vst [vmem:[#allocation79_spill] sm:$0xff] %v10521_v31  ;;  %v10537_v5 = vadd.f32 %v10419_v13, %v10082_v63 }
 0x9cc   :  { %v5070_v7 = vadd.f32 %v4946_v60, %v4932_v45  ;;  %v4947_v32 = vmul.f32 %v7987_v54, %v10251_v28  ;;  %v7989_v41 = vpop.eup %7988  ;;  %8008 = vpow2.f32 %v10346_v0  ;;  %v10508_v45 = vpop.f32.mrb[90].mxu0  ;;  %v10516_v0 = vadd.f32 %v5061_v8, %v5060_v35 }
 0x9cd   :  { %v5063_v47 = vadd.f32 %v4945_v42, %v4931_v18  ;;  %v7991_v28 = vpop.eup %7990  ;;  %8010 = vpow2.f32 %v10355_v46  ;;  %v10514_v23 = vpop.f32.mrb[91].mxu0  ;;  %v10525_v46 = vmul.f32 -1.442695, %v10489_v29  ;;  %11129 = vst [vmem:[#allocation81_spill] sm:$0xff] %v10537_v5 }
 0x9ce   :  { %v5071_v49 = vrot.slane %v5070_v7, 4  ;;  %v5077_v2 = vadd.f32 %v4947_v32, %v4933_v10  ;;  %v7993_v18 = vpop.eup %7992  ;;  %8012 = vpow2.f32 %v10382_v26  ;;  %v10528_v10 = vmul.f32 -1.442695, %v10497_v6 }
 0x9cf   :  { %v5064_v43 = vrot.slane %v5063_v47, 4  ;;  %v7995_v52 = vpop.eup %7994  ;;  %8014 = vpow2.f32 %v10396_v3  ;;  %v10533_v26 = vadd.f32 %v10417_v38, %v10080_v59  ;;  %v4906_v3 = vmul.f32 %v7989_v41, %v10276_v39  ;;  %v11131_v39 = vld [vmem:[#allocation60_spill] sm:$0xff] }
 0x9d0   :  { %v5072_v62 = vadd.f32 %v5071_v49, %v5070_v7  ;;  %v7997_v56 = vpop.eup %7996  ;;  %v5078_v35 = vrot.slane %v5077_v2, 4  ;;  %8016 = vpow2.f32 %v10401_v19  ;;  %v4908_v17 = vmul.f32 %v7991_v28, %v10286_v1  ;;  %v11130_v7 = vld [vmem:[#allocation59_spill] sm:$0xff] }
 0x9d1   :  { %11128 = vst [vmem:[#allocation80_spill] sm:$0xff] %v10533_v26  ;;  %v7999_v27 = vpop.eup %7998  ;;  %v4920_v60 = vmul.f32 %v7997_v56, %v10307_v58  ;;  %8018 = vpow2.f32 %v10423_v12  ;;  %v5065_v8 = vadd.f32 %v5064_v43, %v5063_v47  ;;  %v4907_v19 = vmul.f32 %v7993_v18, %v10293_v55  ;;  %v11132_v56 = vld [vmem:[#allocation61_spill] sm:$0xff] }
 0x9d2   :  { %v8001_v54 = vpop.eup %8000  ;;  %v4922_v38 = vmul.f32 %v7999_v27, %v10310_v11  ;;  %8020 = vpow2.f32 %v10440_v50  ;;  %v5073_v13 = vrot.slane %v5072_v62, 2  ;;  %v4909_v32 = vmul.f32 %v7995_v52, %v11130_v7 }
 0x9d3   :  { %v8003_v42 = vpop.eup %8002  ;;  %v4986_v49 = vadd.f32 %v4920_v60, %v4906_v3  ;;  %v4921_v41 = vmul.f32 %v8001_v54, %v11131_v39  ;;  %v5079_v28 = vadd.f32 %v5078_v35, %v5077_v2  ;;  %8022 = vpow2.f32 %v10444_v34 }
 0x9d4   :  { %v8005_v1 = vpop.eup %8004  ;;  %v5000_v58 = vadd.f32 %v4922_v38, %v4908_v17  ;;  %v4923_v12 = vmul.f32 %v8003_v42, %v11132_v56  ;;  %v10551_v11 = vmul.f32 -1.442695, %v10521_v31  ;;  %v10554_v50 = vmul.f32 -1.442695, %v10478_v37  ;;  %v11133_v37 = vld [vmem:[#allocation74_spill] sm:$0xff] }
 0x9d5   :  { %v8007_v47 = vpop.eup %8006  ;;  %v4987_v55 = vrot.slane %v4986_v49, 4  ;;  %v4993_v18 = vadd.f32 %v4921_v41, %v4907_v19  ;;  %v10557_v2 = vmul.f32 -1.442695, %v10533_v26  ;;  %v5074_v17 = vadd.f32 %v5073_v13, %v5072_v62 }
 0x9d6   :  { %v8009_v43 = vpop.eup %8008  ;;  %v5001_v52 = vrot.slane %v5000_v58, 4  ;;  %v5007_v27 = vadd.f32 %v4923_v12, %v4909_v32  ;;  %v4768_v3 = vadd.f32 1.0, %v8007_v47  ;;  %v10560_v54 = vmul.f32 -1.442695, %v10537_v5 }
 0x9d7   :  { %v8011_v35 = vpop.eup %8010  ;;  %v4994_v60 = vrot.slane %v4993_v18, 4  ;;  %v4767_v34 = vadd.f32 1.0, %v8009_v43  ;;  %v5066_v38 = vrot.slane %v5065_v8, 2  ;;  %v5080_v42 = vrot.slane %v5079_v28, 2 }
 0x9d8   :  { %v8013_v19 = vpop.eup %8012  ;;  %8024 = vrcp.f32 %v4768_v3  ;;  %v4769_v7 = vadd.f32 1.0, %v8011_v35  ;;  %v4988_v41 = vadd.f32 %v4987_v55, %v4986_v49  ;;  %v5002_v56 = vadd.f32 %v5001_v52, %v5000_v58 }
 0x9d9   :  { %v8015_v39 = vpop.eup %8014  ;;  %8026 = vrcp.f32 %v4767_v34  ;;  %v4780_v32 = vadd.f32 1.0, %v8013_v19  ;;  %v4995_v47 = vadd.f32 %v4994_v60, %v4993_v18  ;;  %v5008_v26 = vrot.slane %v5007_v27, 4 }
 0x9da   :  { %v8017_v12 = vpop.eup %8016  ;;  %8028 = vrcp.f32 %v4769_v7  ;;  %v4782_v62 = vadd.f32 1.0, %v8015_v39  ;;  %v5075_v43 = vrot.slane %v5074_v17, 1  ;;  %v10564_v31 = vadd.f32 %v11133_v37, %v10062_v57  ;;  %v11134_v7 = vld [vmem:[#allocation75_spill] sm:$0xff] }
 0x9db   :  { %v8019_v13 = vpop.eup %8018  ;;  %8030 = vrcp.f32 %v4780_v32  ;;  %v4781_v5 = vadd.f32 1.0, %v8017_v12  ;;  %v10566_v35 = vadd.f32 %v5066_v38, %v5065_v8  ;;  %v10568_v49 = vadd.f32 %v5080_v42, %v5079_v28  ;;  %v11135_v8 = vld [vmem:[#allocation62_spill] sm:$0xff]  ;;  %v11137_v42 = vld [vmem:[#allocation17_spill] sm:$0xff] }
 0x9dc   :  { %v8021_v3 = vpop.eup %8020  ;;  %8032 = vrcp.f32 %v4782_v62  ;;  %v4783_v58 = vadd.f32 1.0, %v8019_v13  ;;  %v4989_v55 = vrot.slane %v4988_v41, 2  ;;  %v5003_v18 = vrot.slane %v5002_v56, 2 }
 0x9dd   :  { %8034 = vrcp.f32 %v4781_v5  ;;  %v4742_v52 = vadd.f32 1.0, %v8021_v3  ;;  %v8023_v60 = vpop.eup %8022  ;;  %v4996_v34 = vrot.slane %v4995_v47, 2  ;;  %v10570_v19 = vadd.f32 %v5008_v26, %v5007_v27  ;;  %v11136_v26 = vld [vmem:[#allocation76_spill] sm:$0xff] }
 0x9de   :  { %8036 = vrcp.f32 %v4783_v58  ;;  %v10574_v57 = vadd.f32 %v11134_v7, %v10064_v21  ;;  %v10576_v37 = vadd.f32 %v5075_v43, %v5074_v17  ;;  %v4934_v28 = vmul.f32 %v8005_v1, %v11135_v8  ;;  %v11138_v1 = vld [vmem:[#allocation18_spill] sm:$0xff]  ;;  %v11141_v43 = vld [vmem:[#allocation63_spill] sm:$0xff] }
 0x9df   :  { %8038 = vrcp.f32 %v4742_v52  ;;  %v4744_v38 = vadd.f32 1.0, %v8023_v60  ;;  %v10582_v5 = vadd.f32 %v10435_v48, %v10080_v59  ;;  %v10586_v27 = vadd.f32 %v11136_v26, %v10082_v63  ;;  %v11139_v63 = vld [vmem:[#allocation77_spill] sm:$0xff]  ;;  %v11144_v8 = vld [vmem:[#allocation67_spill] sm:$0xff]  ;;  %v11147_v48 = vld [vmem:[#allocation70_spill] sm:$0xff] }
 0x9e0   :  { %8040 = vpow2.f32 %v10484_v14  ;;  %v10590_v21 = vadd.f32 %v10446_v20, %v11137_v42  ;;  %v10592_v17 = vadd.f32 %v4989_v55, %v4988_v41  ;;  %v10594_v39 = vadd.f32 %v5003_v18, %v5002_v56  ;;  %v11142_v55 = vld [vmem:[#allocation66_spill] sm:$0xff] }
 0x9e1   :  { %8042 = vrcp.f32 %v4744_v38  ;;  %v10598_v14 = vadd.f32 %v10448_v36, %v11138_v1  ;;  %v10600_v59 = vadd.f32 %v4996_v34, %v4995_v47  ;;  %v10606_v20 = vadd.f32 %v11139_v63, %v11137_v42  ;;  %v11143_v34 = vld [vmem:[#allocation64_spill] sm:$0xff] }
 0x9e2   :  { %v8025_v32 = vpop.eup %8024  ;;  %8044 = vpow2.f32 %v10503_v22  ;;  %v6336_v56 = vmul.f32 -1.442695, %v10564_v31  ;;  %v6338_v12 = vmul.f32 -1.442695, %v10574_v57  ;;  %v10613_v36 = vadd.f32 %v10460_v4, %v11138_v1 }
 0x9e3   :  { %11140 = vst [vmem:[#allocation59_spill] sm:$0xff] %v10606_v20  ;;  %v8027_v41 = vpop.eup %8026  ;;  %8046 = vpow2.f32 %v10506_v53  ;;  %v6337_v22 = vmul.f32 -1.442695, %v10582_v5  ;;  %v10618_v62 = vmul.f32 -1.442695, %v10586_v27  ;;  %v4936_v3 = vmul.f32 %v8025_v32, %v11141_v43  ;;  %v11145_v32 = vld [vmem:[#allocation65_spill] sm:$0xff] }
 0x9e4   :  { %v8029_v47 = vpop.eup %8028  ;;  %8048 = vpow2.f32 %v10512_v24  ;;  %v10621_v13 = vmul.f32 -1.442695, %v10590_v21  ;;  %v10626_v58 = vmul.f32 -1.442695, %v10598_v14  ;;  %v10630_v4 = vadd.f32 %v10491_v25, %v11137_v42 }
 0x9e5   :  { %v8031_v53 = vpop.eup %8030  ;;  %8050 = vpow2.f32 %v10525_v46  ;;  %v10635_v52 = vmul.f32 -1.442695, %v10606_v20  ;;  %v10639_v60 = vadd.f32 %v10499_v30, %v11138_v1  ;;  %v4935_v7 = vmul.f32 %v8027_v41, %v11143_v34 }
 0x9e6   :  { %v8033_v24 = vpop.eup %8032  ;;  %v4948_v18 = vmul.f32 %v8031_v53, %v11142_v55  ;;  %8052 = vpow2.f32 %v10528_v10  ;;  %v10645_v25 = vmul.f32 -1.442695, %v10613_v36  ;;  %v4937_v10 = vmul.f32 %v8029_v47, %v11145_v32  ;;  %v11146_v53 = vld [vmem:[#allocation68_spill] sm:$0xff] }
 0x9e7   :  { %v8035_v46 = vpop.eup %8034  ;;  %v4950_v38 = vmul.f32 %v8033_v24, %v11144_v8  ;;  %8054 = vpow2.f32 %v10551_v11  ;;  %v10654_v11 = vadd.f32 %v10508_v45, %v11137_v42  ;;  %v10664_v45 = vmul.f32 -1.442695, %v10639_v60 }
 0x9e8   :  { %v8037_v26 = vpop.eup %8036  ;;  %v5084_v63 = vadd.f32 %v4948_v18, %v4934_v28  ;;  %v4949_v43 = vmul.f32 %v8035_v46, %v11146_v53  ;;  %8056 = vpow2.f32 %v10554_v50  ;;  %v10658_v28 = vmul.f32 -1.442695, %v10630_v4  ;;  %v11148_v53 = vld [vmem:[#allocation71_spill] sm:$0xff] }
 0x9e9   :  { %v8039_v30 = vpop.eup %8038  ;;  %v5098_v55 = vadd.f32 %v4950_v38, %v4936_v3  ;;  %v4951_v20 = vmul.f32 %v8037_v26, %v11147_v48  ;;  %8058 = vpow2.f32 %v10557_v2  ;;  %v4970_v48 = vrot.slane %v10462_v61, 1 }
 0x9ea   :  { %v8041_v41 = vpop.eup %8040  ;;  %v5085_v24 = vrot.slane %v5084_v63, 4  ;;  %v5091_v34 = vadd.f32 %v4949_v43, %v4935_v7  ;;  %8060 = vpow2.f32 %v10560_v54  ;;  %v10668_v42 = vadd.f32 %v10514_v23, %v11138_v1 }
 0x9eb   :  { %v8043_v47 = vpop.eup %8042  ;;  %v10660_v50 = vadd.f32 %v4951_v20, %v4937_v10  ;;  %v4743_v3 = vadd.f32 1.0, %v8041_v41  ;;  %8062 = vpow2.f32 %v6336_v56  ;;  %v5099_v46 = vrot.slane %v5098_v55, 4  ;;  %v11149_v41 = vld [vmem:[#allocation69_spill] sm:$0xff] }
 0x9ec   :  { %v8045_v2 = vpop.eup %8044  ;;  %v5092_v18 = vrot.slane %v5091_v34, 4  ;;  %8064 = vpow2.f32 %v6338_v12  ;;  %v10671_v20 = vmul.f32 -1.442695, %v10654_v11  ;;  %v10673_v8 = vadd.f32 %v5085_v24, %v5084_v63 }
 0x9ed   :  { %v8047_v54 = vpop.eup %8046  ;;  %8066 = vrcp.f32 %v4743_v3  ;;  %v4745_v7 = vadd.f32 1.0, %v8045_v2  ;;  %v5068_v12 = vrot.slane %v10566_v35, 1  ;;  %v4971_v23 = vadd.f32 %v4970_v48, %v10462_v61 }
 0x9ee   :  { %v8049_v56 = vpop.eup %8048  ;;  %v4756_v38 = vadd.f32 1.0, %v8047_v54  ;;  %8068 = vpow2.f32 %v6337_v22  ;;  %v5093_v32 = vadd.f32 %v5092_v18, %v5091_v34  ;;  %v10678_v43 = vmul.f32 %v8039_v30, %v11148_v53 }
 0x9ef   :  { %v8051_v26 = vpop.eup %8050  ;;  %8070 = vrcp.f32 %v4745_v7  ;;  %v4758_v10 = vadd.f32 1.0, %v8049_v56  ;;  %v10681_v3 = vmul.f32 %v8043_v47, %v11149_v41  ;;  %v10683_v2 = vadd.f32 %v5099_v46, %v5098_v55 }
 0x9f0   :  { %v8053_v1 = vpop.eup %8052  ;;  %8072 = vrcp.f32 %v4756_v38  ;;  %v4757_v63 = vadd.f32 1.0, %v8051_v26  ;;  %v5106_v22 = vrot.slane %v10660_v50, 4  ;;  %v5087_v54 = vrot.slane %v10673_v8, 2 }
 0x9f1   :  { %v8055_v24 = vpop.eup %8054  ;;  %8074 = vrcp.f32 %v4758_v10  ;;  %v4759_v34 = vadd.f32 1.0, %v8053_v1  ;;  %v5069_v30 = vadd.f32 %v5068_v12, %v10566_v35  ;;  %v5094_v7 = vrot.slane %v5093_v32, 2 }
 0x9f2   :  { %v8057_v18 = vpop.eup %8056  ;;  %8076 = vrcp.f32 %v4757_v63  ;;  %v4770_v61 = vadd.f32 1.0, %v8055_v24  ;;  %v5155_v56 = vmul.f32 0.0625, %v4971_v23  ;;  %v4984_v26 = vrot.slane %v10466_v44, 1 }
 0x9f3   :  { %v8059_v48 = vpop.eup %8058  ;;  %8078 = vrcp.f32 %v4759_v34  ;;  %v4772_v47 = vadd.f32 1.0, %v8057_v18  ;;  %v5169_v46 = vmul.f32 0.0625, %v5069_v30  ;;  %v5082_v53 = vrot.slane %v10568_v49, 1 }
 0x9f4   :  { %v8061_v38 = vpop.eup %8060  ;;  %8080 = vrcp.f32 %v4770_v61  ;;  %v4771_v55 = vadd.f32 1.0, %v8059_v48  ;;  %v5154_v41 = vmul.f32 0.0625, %v10464_v40  ;;  %v4985_v23 = vadd.f32 %v4984_v26, %v10466_v44 }
 0x9f5   :  { %v8063_v10 = vpop.eup %8062  ;;  %8082 = vrcp.f32 %v4772_v47  ;;  %v4773_v1 = vadd.f32 1.0, %v8061_v38  ;;  %v5442_v12 = vsel %vm3668_vm11, %v5169_v46, %v5155_v56  ;;  %v5083_v18 = vadd.f32 %v5082_v53, %v10568_v49  ;;  %v11150_v53 = vld [vmem:[#allocation10_spill] sm:$0xff] }
 0x9f6   :  { %v8065_v63 = vpop.eup %8064  ;;  %8084 = vrcp.f32 %v4771_v55  ;;  %v4784_v35 = vadd.f32 1.0, %v8063_v10  ;;  %5533 = vmatprep.mubr.f32.mxu1 %v5442_v12  ;;  %v5168_v61 = vmul.f32 0.0625, %v10516_v0  ;;  %v5101_v48 = vrot.slane %v10683_v2, 2 }
 0x9f7   :  { %v8067_v24 = vpop.eup %8066  ;;  %8086 = vrcp.f32 %v4773_v1  ;;  %v4786_v34 = vadd.f32 1.0, %v8065_v63  ;;  %v5095_v47 = vadd.f32 %v5094_v7, %v5093_v32  ;;  %v5157_v40 = vmul.f32 0.0625, %v4985_v23 }
 0x9f8   :  { %v8069_v30 = vpop.eup %8068  ;;  %8088 = vrcp.f32 %v4784_v35  ;;  %v5171_v56 = vmul.f32 0.0625, %v5083_v18  ;;  %v5441_v44 = vsel %vm3668_vm11, %v5168_v61, %v5154_v41  ;;  %v5107_v26 = vadd.f32 %v5106_v22, %v10660_v50  ;;  %v11151_v41 = vld [vmem:[#allocation9_spill] sm:$0xff]  ;;  %v11157_v18 = vld [vmem:[#allocation11_spill] sm:$0xff] }
 0x9f9   :  { %v8071_v38 = vpop.eup %8070  ;;  %8090 = vrcp.f32 %v4786_v34  ;;  %v4785_v55 = vadd.f32 1.0, %v8069_v30  ;;  %5534 = vmatmul.mubr.f32.vlgmr.msra.gmra.mrb[56].mxu1 %v5441_v44  ;;  %v5156_v0 = vmul.f32 0.0625, %v10480_v15  ;;  %v5170_v49 = vmul.f32 0.0625, %v10576_v37  ;;  %v11154_v37 = vld [vmem:[#allocation13_spill] sm:$0xff]  ;;  %v11156_v34 = vld [vmem:[#allocation12_spill] sm:$0xff] }
 0x9fa   :  { %v8073_v46 = vpop.eup %8072  ;;  %8092 = vpow2.f32 %v10618_v62  ;;  %v4911_v32 = vmul.f32 %v8067_v24, %v10433_v33  ;;  %v5444_v1 = vsel %vm3668_vm11, %v5171_v56, %v5157_v40  ;;  %v11152_v63 = vpack.c.bf16 %v11150_v53, %v11151_v41  ;;  %v11153_v33 = vld [vmem:[#allocation14_spill] sm:$0xff]  ;;  %v11164_v56 = vld [vmem:[#allocation19_spill] sm:$0xff] }
 0x9fb   :  { %v8075_v10 = vpop.eup %8074  ;;  %v4924_v7 = vmul.f32 %v8073_v46, %v10474_v16  ;;  %8094 = vrcp.f32 %v4785_v55  ;;  %v4913_v62 = vmul.f32 %v8071_v38, %v10470_v51  ;;  %5603 = vmatprep.mubr.f32.mxu0 %v5444_v1  ;;  %v5443_v15 = vsel %vm3668_vm11, %v5170_v49, %v5156_v0  ;;  %v11161_v38 = vld [vmem:[#allocation15_spill] sm:$0xff]  ;;  %v11163_v55 = vld [vmem:[#allocation20_spill] sm:$0xff] }
 0x9fc   :  { %6785 = vmatpush3.bf16.msra.mxu1 %v11152_v63  ;;  %v8077_v50 = vpop.eup %8076  ;;  %v4926_v22 = vmul.f32 %v8075_v10, %v10454_v9  ;;  %8096 = vpow2.f32 %v10621_v13  ;;  %v11155_v16 = vpack.c.bf16 %v11153_v33, %v11154_v37  ;;  %5604 = vmatmul.mubr.f32.vlgmr.msra.gmra.mrb[92].mxu0 %v5443_v15  ;;  %v5096_v51 = vrot.slane %v5095_v47, 1  ;;  %v11167_v10 = vld [vmem:[#allocation23_spill] sm:$0xff] }
 0x9fd   :  { %v8079_v35 = vpop.eup %8078  ;;  %v5014_v12 = vadd.f32 %v4924_v7, %v10678_v43  ;;  %v4925_v23 = vmul.f32 %v8077_v50, %v10489_v29  ;;  %8098 = vpow2.f32 %v10626_v58  ;;  %v11158_v61 = vpack.c.bf16 %v11156_v34, %v11157_v18  ;;  %v11172_v37 = vld [vmem:[#allocation79_spill] sm:$0xff] }
 0x9fe   :  { %6787 = vmatprep.subr.bf16.mxu1 %v11155_v16  ;;  %v8081_v24 = vpop.eup %8080  ;;  %v5028_v9 = vadd.f32 %v4926_v22, %v10681_v3  ;;  %v4927_v13 = vmul.f32 %v8079_v35, %v10497_v6  ;;  %8100 = vpow2.f32 %v10635_v52  ;;  %v4998_v30 = vrot.slane %v10600_v59, 1  ;;  %v11160_v6 = vld [vmem:[#allocation16_spill] sm:$0xff]  ;;  %v11174_v35 = vld [vmem:[#allocation25_spill] sm:$0xff] }
 0x9ff   :  { %6817 = vmatpush3.bf16.msra.mxu0 %v11158_v61  ;;  %v8083_v43 = vpop.eup %8082  ;;  %v11159_v29 = vrot.slane %v10570_v19, 2  ;;  %v5021_v40 = vadd.f32 %v4925_v23, %v4911_v32  ;;  %8102 = vpow2.f32 %v10645_v25  ;;  %v6341_v3 = vmul.f32 -1.442695, %v10668_v42  ;;  %v11166_v25 = vld [vmem:[#allocation24_spill] sm:$0xff]  ;;  %v11177_v23 = vld [vmem:[#allocation27_spill] sm:$0xff] }
 0xa00   :  { %v11162_v52 = vpack.c.bf16 %v11160_v6, %v11161_v38  ;;  %v11165_v44 = vpack.c.bf16 %v11163_v55, %v11164_v56  ;;  %v8085_v46 = vpop.eup %8084  ;;  %v10740_v0 = vadd.f32 %v5087_v54, %v10673_v8  ;;  %v5035_v49 = vadd.f32 %v4927_v13, %v4913_v62  ;;  %v11169_v54 = vld [vmem:[#allocation22_spill] sm:$0xff]  ;;  %v11170_v62 = vld [vmem:[#allocation21_spill] sm:$0xff] }
 0xa01   :  { %v10727_v58 = vadd.f32 %v11159_v29, %v10570_v19  ;;  %v5108_v19 = vrot.slane %v5107_v26, 2  ;;  %8104 = vpow2.f32 %v10658_v28  ;;  %v11168_v32 = vpack.c.bf16 %v11166_v25, %v11167_v10  ;;  %v8087_v7 = vpop.eup %8086 }
 0xa02   :  { %6819 = vmatprep.subr.bf16.mxu0 %v11162_v52  ;;  %6789 = vmatpush3.bf16.msra.mxu1 %v11165_v44  ;;  %v5015_v1 = vrot.slane %v5014_v12, 4  ;;  %v5022_v53 = vrot.slane %v5021_v40, 4  ;;  %8106 = vpow2.f32 %v10664_v45  ;;  %v5097_v41 = vadd.f32 %v5096_v51, %v5095_v47  ;;  %v8089_v63 = vpop.eup %8088  ;;  %v11173_v47 = vld [vmem:[#allocation26_spill] sm:$0xff] }
 0xa03   :  { %6791 = vmatprep.subr.bf16.mxu1 %v11168_v32  ;;  %v10748_v50 = vadd.f32 %v5101_v48, %v10683_v2  ;;  %v5036_v8 = vrot.slane %v5035_v49, 4  ;;  %8108 = vpow2.f32 %v10671_v20  ;;  %v11171_v28 = vpack.c.bf16 %v11169_v54, %v11170_v62  ;;  %v8091_v15 = vpop.eup %8090  ;;  %v11176_v48 = vld [vmem:[#allocation28_spill] sm:$0xff]  ;;  %v11193_v62 = vld [vmem:[#allocation81_spill] sm:$0xff] }
 0xa04   :  { %v4999_v22 = vadd.f32 %v4998_v30, %v10600_v59  ;;  %v5029_v33 = vrot.slane %v5028_v9, 4  ;;  %v4938_v16 = vmul.f32 %v8081_v24, %v11172_v37  ;;  %v4952_v45 = vmul.f32 %v8089_v63, %v10564_v31  ;;  %v8093_v51 = vpop.eup %8092  ;;  %v11179_v59 = vld [vmem:[#allocation78_spill] sm:$0xff]  ;;  %v11180_v24 = vld [vmem:[#allocation32_spill] sm:$0xff]  ;;  %v11181_v30 = vld [vmem:[#allocation31_spill] sm:$0xff] }
 0xa05   :  { %6821 = vmatpush3.bf16.msra.mxu0 %v11171_v28  ;;  %8110 = vpow2.f32 %v6341_v3  ;;  %v11175_v2 = vpack.c.bf16 %v11173_v47, %v11174_v35  ;;  %v11178_v20 = vpack.c.bf16 %v11176_v48, %v11177_v23  ;;  %v10763_v13 = vadd.f32 %v5108_v19, %v5107_v26  ;;  %v8095_v29 = vpop.eup %8094  ;;  %v11183_v26 = vld [vmem:[#allocation80_spill] sm:$0xff]  ;;  %v11185_v19 = vld [vmem:[#allocation29_spill] sm:$0xff]  ;;  %v11191_v63 = vld [vmem:[#allocation35_spill] sm:$0xff] }
 0xa06   :  { %v5023_v34 = vadd.f32 %v5022_v53, %v5021_v40  ;;  %v4940_v18 = vmul.f32 %v8083_v43, %v11179_v59  ;;  %v4954_v61 = vmul.f32 %v8091_v15, %v10574_v57  ;;  %v11182_v31 = vpack.c.bf16 %v11180_v24, %v11181_v30  ;;  %v8097_v55 = vpop.eup %8096  ;;  %v11184_v57 = vld [vmem:[#allocation30_spill] sm:$0xff]  ;;  %v11188_v53 = vld [vmem:[#allocation33_spill] sm:$0xff] }
 0xa07   :  { %6823 = vmatprep.subr.bf16.mxu0 %v11175_v2  ;;  %6793 = vmatpush3.bf16.msra.mxu1 %v11178_v20  ;;  %v10770_v3 = vadd.f32 %v5015_v1, %v5014_v12  ;;  %v10772_v6 = vadd.f32 %v4952_v45, %v4938_v16  ;;  %v4787_v38 = vadd.f32 1.0, %v8093_v51  ;;  %v5173_v52 = vmul.f32 0.0625, %v5097_v41  ;;  %v8099_v10 = vpop.eup %8098  ;;  %v11187_v1 = vld [vmem:[#allocation34_spill] sm:$0xff]  ;;  %v11198_v51 = vld [vmem:[#allocation37_spill] sm:$0xff] }
 0xa08   :  { %6795 = vmatprep.subr.bf16.mxu1 %v11182_v31  ;;  %v5037_v56 = vadd.f32 %v5036_v8, %v5035_v49  ;;  %v4939_v44 = vmul.f32 %v8085_v46, %v11183_v26  ;;  %v10775_v40 = vadd.f32 %v4954_v61, %v4940_v18  ;;  %v4953_v43 = vmul.f32 %v8095_v29, %v10582_v5  ;;  %v11190_v49 = vld [vmem:[#allocation36_spill] sm:$0xff]  ;;  %v8101_v54 = vpop.eup %8100  ;;  %v11200_v30 = vld [vmem:[#allocation42_spill] sm:$0xff]  ;;  %v11201_v31 = vld [vmem:[#allocation41_spill] sm:$0xff] }
 0xa09   :  { %v11186_v25 = vpack.c.bf16 %v11184_v57, %v11185_v19  ;;  %v10781_v32 = vadd.f32 %v5029_v33, %v5028_v9  ;;  %8112 = vrcp.f32 %v4787_v38  ;;  %v4746_v12 = vadd.f32 1.0, %v8097_v55  ;;  %v11194_v9 = vld [vmem:[#allocation40_spill] sm:$0xff]  ;;  %v11195_v33 = vld [vmem:[#allocation39_spill] sm:$0xff]  ;;  %v8103_v45 = vpop.eup %8102 }
 0xa0a   :  { %v11189_v41 = vpack.c.bf16 %v11187_v1, %v11188_v53  ;;  %v11192_v46 = vpack.c.bf16 %v11190_v49, %v11191_v63  ;;  %v5159_v8 = vmul.f32 0.0625, %v4999_v22  ;;  %v5024_v5 = vrot.slane %v5023_v34, 2  ;;  %v11204_v55 = vld [vmem:[#allocation43_spill] sm:$0xff]  ;;  %v10815_v53 = vld [vmem:[#allocation6 + $0x368] sm:$0xff]  ;;  %v5277_v49 = vld [vmem:[#allocation6 + $0x2f8] sm:$0xff] }
 0xa0b   :  { %6825 = vmatpush3.bf16.msra.mxu0 %v11186_v25  ;;  %v10790_v28 = vmul.f32 %v8087_v7, %v11193_v62  ;;  %v5119_v15 = vadd.f32 %v4953_v43, %v4939_v44  ;;  %v4747_v37 = vadd.f32 1.0, %v8099_v10  ;;  %v11196_v16 = vpack.c.bf16 %v11194_v9, %v11195_v33  ;;  %v8105_v48 = vpop.eup %8104  ;;  %v11197_v7 = vld [vmem:[#allocation38_spill] sm:$0xff]  ;;  %v10808_v44 = vld [vmem:[#allocation6 + $0x360] sm:$0xff]  ;;  %v11206_v10 = vld [vmem:[#allocation48_spill] sm:$0xff] }
 0xa0c   :  { %6827 = vmatprep.subr.bf16.mxu0 %v11189_v41  ;;  %6797 = vmatpush3.bf16.msra.mxu1 %v11192_v46  ;;  %v5017_v47 = vrot.slane %v10770_v3, 2  ;;  %8114 = vrcp.f32 %v4746_v12  ;;  %v4760_v35 = vadd.f32 1.0, %v8101_v54  ;;  %v5446_v2 = vsel %vm3668_vm11, %v5173_v52, %v5159_v8  ;;  %v8107_v18 = vpop.eup %8106  ;;  %v11203_v52 = vld [vmem:[#allocation44_spill] sm:$0xff]  ;;  %v11207_v12 = vld [vmem:[#allocation47_spill] sm:$0xff]  ;;  %v11209_v33 = vld [vmem:[#allocation46_spill] sm:$0xff] }
 0xa0d   :  { %6799 = vmatprep.subr.bf16.mxu1 %v11196_v16  ;;  %v5038_v22 = vrot.slane %v5037_v56, 2  ;;  %v5120_v23 = vrot.slane %v5119_v15, 4  ;;  %8116 = vrcp.f32 %v4747_v37  ;;  %v4761_v20 = vadd.f32 1.0, %v8103_v45  ;;  %5673 = vmatprep.mubr.f32.mxu1 %v5446_v2  ;;  %v8109_v43 = vpop.eup %8108  ;;  %v5276_v41 = vld [vmem:[#allocation6 + $0x2f0] sm:$0xff]  ;;  %v11210_v16 = vld [vmem:[#allocation45_spill] sm:$0xff] }
 0xa0e   :  { %v11199_v59 = vpack.c.bf16 %v11197_v7, %v11198_v51  ;;  %v5031_v61 = vrot.slane %v10781_v32, 2  ;;  %8118 = vrcp.f32 %v4760_v35  ;;  %v4774_v24 = vadd.f32 1.0, %v8105_v48  ;;  %v10823_v62 = vld [vmem:[#allocation6 + $0x270] sm:$0xff]  ;;  %v5261_v35 = vld [vmem:[#allocation6 + $0x278] sm:$0xff]  ;;  %v11213_v7 = vld [vmem:[#allocation49_spill] sm:$0xff] }
 0xa0f   :  { %v11202_v29 = vpack.c.bf16 %v11200_v30, %v11201_v31  ;;  %v5012_v38 = vrot.slane %v10727_v58, 1  ;;  %v11205_v26 = vpack.c.bf16 %v11203_v52, %v11204_v55  ;;  %v10810_v57 = vadd.f32 %v5024_v5, %v5023_v34  ;;  %v8111_v63 = vpop.eup %8110  ;;  %v10819_v34 = vld [vmem:[#allocation6 + $0x3f0] sm:$0xff]  ;;  %v10821_v5 = vld [vmem:[#allocation6 + $0x3f8] sm:$0xff] }
 0xa10   :  { %6829 = vmatpush3.bf16.msra.mxu0 %v11199_v59  ;;  %v5121_v19 = vadd.f32 %v5120_v23, %v5119_v15  ;;  %8120 = vrcp.f32 %v4761_v20  ;;  %v4775_v25 = vadd.f32 1.0, %v8107_v18  ;;  %v11208_v1 = vpack.c.bf16 %v11206_v10, %v11207_v12  ;;  %v10830_v2 = vld [vmem:[#allocation6 + $0x370] sm:$0xff]  ;;  %v10832_v48 = vld [vmem:[#allocation6 + $0x378] sm:$0xff]  ;;  %v11212_v20 = vld [vmem:[#allocation50_spill] sm:$0xff] }
 0xa11   :  { %6831 = vmatprep.subr.bf16.mxu0 %v11202_v29  ;;  %6801 = vmatpush3.bf16.msra.mxu1 %v11205_v26  ;;  %v5113_v46 = vrot.slane %v10772_v6, 4  ;;  %8122 = vrcp.f32 %v4774_v24  ;;  %v4788_v8 = vadd.f32 1.0, %v8109_v43  ;;  %v5013_v54 = vadd.f32 %v5012_v38, %v10727_v58  ;;  %v11216_v51 = vld [vmem:[#allocation51_spill] sm:$0xff]  ;;  %v5326_v24 = vld [vmem:[#allocation6 + $0x480] sm:$0xff]  ;;  %v11218_v31 = vld [vmem:[#allocation56_spill] sm:$0xff] }
 0xa12   :  { %6803 = vmatprep.subr.bf16.mxu1 %v11208_v1  ;;  %v10825_v15 = vadd.f32 %v5038_v22, %v5037_v56  ;;  %v5122_v37 = vrot.slane %v5121_v19, 2  ;;  %8124 = vrcp.f32 %v4775_v25  ;;  %v4789_v9 = vadd.f32 1.0, %v8111_v63  ;;  %v11215_v22 = vld [vmem:[#allocation52_spill] sm:$0xff]  ;;  %v11219_v29 = vld [vmem:[#allocation55_spill] sm:$0xff]  ;;  %v5327_v26 = vld [vmem:[#allocation6 + $0x488] sm:$0xff] }
 0xa13   :  { %v11211_v45 = vpack.c.bf16 %v11209_v33, %v11210_v16  ;;  %8126 = vrcp.f32 %v4788_v8  ;;  %v5110_v58 = vrot.slane %v10763_v13, 1  ;;  %v5161_v23 = vmul.f32 0.0625, %v5013_v54  ;;  %v10850_v43 = vld [vmem:[#allocation6 + $0x580] sm:$0xff]  ;;  %v10852_v25 = vld [vmem:[#allocation6 + $0x588] sm:$0xff]  ;;  %v8113_v10 = vpop.eup %8112  ;;  %v11228_v16 = vld [vmem:[#allocation72_spill] sm:$0xff] }
 0xa14   :  { %v11214_v56 = vpack.c.bf16 %v11212_v20, %v11213_v7  ;;  %v11217_v59 = vpack.c.bf16 %v11215_v22, %v11216_v51  ;;  %v6840_v18 = vpack.c.bf16 %v10815_v53, %v10808_v44  ;;  %v10843_v30 = vadd.f32 %v5122_v37, %v5121_v19  ;;  %v11225_v37 = vld [vmem:[#allocation57_spill] sm:$0xff]  ;;  %v5311_v51 = vld [vmem:[#allocation6 + $0x408] sm:$0xff] }
 0xa15   :  { %6833 = vmatpush3.bf16.msra.mxu0 %v11211_v45  ;;  %8128 = vrcp.f32 %v4789_v9  ;;  %v11220_v38 = vpack.c.bf16 %v11218_v31, %v11219_v29  ;;  %v6810_v52 = vpack.c.bf16 %v5277_v49, %v5276_v41  ;;  %v6842_v55 = vpack.c.bf16 %v10821_v5, %v10819_v34  ;;  %v11221_v41 = vld [vmem:[#allocation54_spill] sm:$0xff]  ;;  %v11222_v49 = vld [vmem:[#allocation53_spill] sm:$0xff] }
 0xa16   :  { %6835 = vmatprep.subr.bf16.mxu0 %v11214_v56  ;;  %6805 = vmatpush3.bf16.msra.mxu1 %v11217_v59  ;;  %v5111_v44 = vadd.f32 %v5110_v58, %v10763_v13  ;;  %v6812_v19 = vpack.c.bf16 %v5261_v35, %v10823_v62  ;;  %v6844_v12 = vpack.c.bf16 %v10832_v48, %v10830_v2  ;;  %v4991_v1 = vrot.slane %v10592_v17, 1  ;;  %v8115_v13 = vpop.eup %8114  ;;  %v11224_v62 = vld [vmem:[#allocation58_spill] sm:$0xff]  ;;  %v11227_v33 = vld [vmem:[#allocation73_spill] sm:$0xff] }
 0xa17   :  { %6807 = vmatprep.subr.bf16.mxu1 %v11220_v38  ;;  %v4955_v53 = vmul.f32 %v8113_v10, %v10586_v27  ;;  %v11223_v63 = vpack.c.bf16 %v11221_v41, %v11222_v49  ;;  %v5089_v8 = vrot.slane %v10740_v0, 1  ;;  %v5005_v54 = vrot.slane %v10594_v39, 1  ;;  %v8117_v48 = vpop.eup %8116  ;;  %v5310_v22 = vld [vmem:[#allocation6 + $0x400] sm:$0xff]  ;;  %v5343_v41 = vld [vmem:[#allocation6 + $0x508] sm:$0xff] }
 0xa18   :  { %v5103_v34 = vrot.slane %v10748_v50, 1  ;;  %v5175_v5 = vmul.f32 0.0625, %v5111_v44  ;;  %v11226_v9 = vpack.c.bf16 %v11224_v62, %v11225_v37  ;;  %v11229_v45 = vpack.c.bf16 %v11227_v33, %v11228_v16  ;;  %v8119_v59 = vpop.eup %8118 }
 0xa19   :  { %6837 = vmatpush3.bf16.msra.mxu0 %v11223_v63  ;;  %v4992_v27 = vadd.f32 %v4991_v1, %v10592_v17  ;;  %v6846_v35 = vpack.c.bf16 %v5327_v26, %v5326_v24  ;;  %v6878_v2 = vpack.c.bf16 %v10852_v25, %v10850_v43  ;;  %v5133_v58 = vadd.f32 %v4955_v53, %v10790_v28  ;;  %v11230_v28 = vld [vmem:[#allocation59_spill] sm:$0xff]  ;;  %v5342_v53 = vld [vmem:[#allocation6 + $0x500] sm:$0xff] }
 0xa1a   :  { %6839 = vmatprep.subr.bf16.mxu0 %v11226_v9  ;;  %6809 = vmatpush3.bf16.msra.mxu1 %v11229_v45  ;;  %v4914_v20 = vmul.f32 %v8115_v13, %v10590_v21  ;;  %v5090_v7 = vadd.f32 %v5089_v8, %v10740_v0  ;;  %v5006_v56 = vadd.f32 %v5005_v54, %v10594_v39  ;;  %v8121_v38 = vpop.eup %8120  ;;  %v5328_v13 = vld [vmem:[#allocation6 + $0x490] sm:$0xff] }
 0xa1b   :  { %6811 = vmatprep.subr.bf16.mxu1 %v6810_v52  ;;  %v4915_v31 = vmul.f32 %v8117_v48, %v10598_v14  ;;  %v5448_v17 = vsel %vm3668_vm11, %v5175_v5, %v5161_v23  ;;  %v5158_v24 = vmul.f32 0.0625, %v4992_v27  ;;  %v5104_v29 = vadd.f32 %v5103_v34, %v10748_v50  ;;  %v8123_v52 = vpop.eup %8122  ;;  %v5329_v5 = vld [vmem:[#allocation6 + $0x498] sm:$0xff] }
 0xa1c   :  { %v5134_v26 = vrot.slane %v5133_v58, 4  ;;  %v4928_v43 = vmul.f32 %v8119_v59, %v11230_v28  ;;  %5743 = vmatprep.mubr.f32.mxu0 %v5448_v17  ;;  %v5172_v21 = vmul.f32 0.0625, %v5090_v7  ;;  %v5160_v0 = vmul.f32 0.0625, %v5006_v56  ;;  %v8125_v10 = vpop.eup %8124  ;;  %v5313_v48 = vld [vmem:[#allocation6 + $0x418] sm:$0xff]  ;;  %v5344_v56 = vld [vmem:[#allocation6 + $0x510] sm:$0xff]  ;;  %v5331_v17 = vld [vmem:[#allocation6 + $0x4a8] sm:$0xff] }
 0xa1d   :  { %6841 = vmatpush3.bf16.msra.mxu0 %v6840_v18  ;;  %v4929_v39 = vmul.f32 %v8121_v38, %v10613_v36  ;;  %v5174_v25 = vmul.f32 0.0625, %v5104_v29  ;;  %v6848_v14 = vpack.c.bf16 %v5311_v51, %v5310_v22  ;;  %v5026_v23 = vrot.slane %v10810_v57, 1  ;;  %v8127_v36 = vpop.eup %8126  ;;  %v5345_v22 = vld [vmem:[#allocation6 + $0x518] sm:$0xff]  ;;  %v5330_v51 = vld [vmem:[#allocation6 + $0x4a0] sm:$0xff]  ;;  %v5363_v29 = vld [vmem:[#allocation6 + $0x5a8] sm:$0xff] }
 0xa1e   :  { %6843 = vmatprep.subr.bf16.mxu0 %v6842_v55  ;;  %6813 = vmatpush3.bf16.msra.mxu1 %v6812_v19  ;;  %v5114_v50 = vadd.f32 %v5113_v46, %v10772_v6  ;;  %v5135_v44 = vadd.f32 %v5134_v26, %v5133_v58  ;;  %v10888_v1 = vadd.f32 %v4928_v43, %v4914_v20  ;;  %v5127_v55 = vrot.slane %v10775_v40, 4  ;;  %v5314_v43 = vld [vmem:[#allocation6 + $0x420] sm:$0xff] }
 0xa1f   :  { %v5445_v18 = vsel %vm3668_vm11, %v5172_v21, %v5158_v24  ;;  %6847 = vmatprep.subr.bf16.mxu1 %v6846_v35  ;;  %v5049_v19 = vadd.f32 %v4929_v39, %v4915_v31  ;;  %v4942_v49 = vmul.f32 %v8123_v52, %v10630_v4  ;;  %v5447_v63 = vsel %vm3668_vm11, %v5174_v25, %v5160_v0  ;;  %v8129_v8 = vpop.eup %8128  ;;  %v5362_v24 = vld [vmem:[#allocation6 + $0x5a0] sm:$0xff]  ;;  %v5315_v21 = vld [vmem:[#allocation6 + $0x428] sm:$0xff] }
 0xa20   :  { %v5136_v54 = vrot.slane %v5135_v44, 2  ;;  %v4956_v6 = vmul.f32 %v8127_v36, %v10654_v11  ;;  %v5027_v46 = vadd.f32 %v5026_v23, %v10810_v57  ;;  %v5124_v34 = vrot.slane %v10843_v30, 1  ;;  %v5361_v57 = vld [vmem:[#allocation6 + $0x598] sm:$0xff]  ;;  %v5346_v0 = vld [vmem:[#allocation6 + $0x520] sm:$0xff]  ;;  %v5332_v23 = vld [vmem:[#allocation6 + $0x4b0] sm:$0xff] }
 0xa21   :  { %6845 = vmatpush3.bf16.msra.mxu0 %v6844_v12  ;;  %5674 = vmatmul.mubr.f32.vlgmr.msra.gmra.mrb[58].mxu1 %v5445_v18  ;;  %v5050_v62 = vrot.slane %v5049_v19, 4  ;;  %v4943_v37 = vmul.f32 %v8125_v10, %v10639_v60  ;;  %v4957_v9 = vmul.f32 %v8129_v8, %v10668_v42  ;;  %v6880_v4 = vpack.c.bf16 %v5343_v41, %v5342_v53  ;;  %v5360_v12 = vld [vmem:[#allocation6 + $0x590] sm:$0xff]  ;;  %v5365_v53 = vld [vmem:[#allocation6 + $0x5b8] sm:$0xff] }
 0xa22   :  { %6879 = vmatprep.subr.bf16.mxu0 %v6878_v2  ;;  %6849 = vmatpush3.bf16.msra.mxu1 %v6848_v14  ;;  %v5115_v33 = vrot.slane %v5114_v50, 2  ;;  %v5137_v16 = vadd.f32 %v5136_v54, %v5135_v44  ;;  %v10899_v45 = vadd.f32 %v4956_v6, %v4942_v49  ;;  %v5125_v11 = vadd.f32 %v5124_v34, %v10843_v30  ;;  %v5312_v2 = vld [vmem:[#allocation6 + $0x410] sm:$0xff]  ;;  %v5347_v14 = vld [vmem:[#allocation6 + $0x528] sm:$0xff] }
 0xa23   :  { %v10905_v27 = vadd.f32 %v5017_v47, %v10770_v3  ;;  %v5147_v35 = vadd.f32 %v4957_v9, %v4943_v37  ;;  %v5040_v60 = vrot.slane %v10825_v15, 1  ;;  %v6850_v42 = vpack.c.bf16 %v5329_v5, %v5328_v13  ;;  %v5364_v18 = vld [vmem:[#allocation6 + $0x5b0] sm:$0xff]  ;;  %v5334_v37 = vld [vmem:[#allocation6 + $0x4c0] sm:$0xff]  ;;  %v5335_v9 = vld [vmem:[#allocation6 + $0x4c8] sm:$0xff] }
 0xa24   :  { %5744 = vmatmul.mubr.f32.vlgmr.msra.gmra.mrb[94].mxu0 %v5447_v63  ;;  %v10909_v58 = vadd.f32 %v5127_v55, %v10775_v40  ;;  %v5163_v20 = vmul.f32 0.0625, %v5027_v46  ;;  %v5177_v7 = vmul.f32 0.0625, %v5125_v11  ;;  %v5138_v30 = vrot.slane %v5137_v16, 1  ;;  %v5316_v6 = vld [vmem:[#allocation6 + $0x430] sm:$0xff]  ;;  %v5317_v46 = vld [vmem:[#allocation6 + $0x438] sm:$0xff] }
 0xa25   :  { %6881 = vmatpush3.bf16.msra.mxu0 %v6880_v4  ;;  %v5051_v59 = vadd.f32 %v5050_v62, %v5049_v19  ;;  %v5148_v3 = vrot.slane %v5147_v35, 4  ;;  %v5041_v47 = vadd.f32 %v5040_v60, %v10825_v15  ;;  %6851 = vmatprep.subr.bf16.mxu1 %v6850_v42  ;;  %v6882_v31 = vpack.c.bf16 %v5361_v57, %v5360_v12  ;;  %v5348_v34 = vld [vmem:[#allocation6 + $0x530] sm:$0xff]  ;;  %v5349_v62 = vld [vmem:[#allocation6 + $0x538] sm:$0xff]  ;;  %v5319_v42 = vld [vmem:[#allocation6 + $0x448] sm:$0xff] }
 0xa26   :  { %v10915_v40 = vadd.f32 %v5031_v61, %v10781_v32  ;;  %v10917_v38 = vadd.f32 %v5115_v33, %v5114_v50  ;;  %v5450_v26 = vsel %vm3668_vm11, %v5177_v7, %v5163_v20  ;;  %v5139_v28 = vadd.f32 %v5138_v30, %v5137_v16  ;;  %v5333_v32 = vld [vmem:[#allocation6 + $0x4b8] sm:$0xff]  ;;  %v5366_v33 = vld [vmem:[#allocation6 + $0x5c0] sm:$0xff]  ;;  %v5367_v16 = vld [vmem:[#allocation6 + $0x5c8] sm:$0xff] }
 0xa27   :  { %v5043_v15 = vrot.slane %v10888_v1, 4  ;;  %v5141_v52 = vrot.slane %v10899_v45, 4  ;;  %v5149_v39 = vadd.f32 %v5148_v3, %v5147_v35  ;;  %5813 = vmatprep.mubr.f32.mxu1 %v5450_v26  ;;  %6883 = vmatprep.subr.bf16.mxu0 %v6882_v31  ;;  %v6852_v25 = vpack.c.bf16 %v5313_v48, %v5312_v2  ;;  %v5350_v2 = vld [vmem:[#allocation6 + $0x540] sm:$0xff]  ;;  %v5336_v30 = vld [vmem:[#allocation6 + $0x4d0] sm:$0xff]  ;;  %v5369_v31 = vld [vmem:[#allocation6 + $0x5d8] sm:$0xff] }
 0xa28   :  { %v5165_v61 = vmul.f32 0.0625, %v5041_v47  ;;  %v5179_v10 = vmul.f32 0.0625, %v5139_v28  ;;  %v6884_v50 = vpack.c.bf16 %v5345_v22, %v5344_v56  ;;  %v6854_v44 = vpack.c.bf16 %v5331_v17, %v5330_v51  ;;  %v5337_v56 = vld [vmem:[#allocation6 + $0x4d8] sm:$0xff]  ;;  %v5368_v47 = vld [vmem:[#allocation6 + $0x5d0] sm:$0xff] }
 0xa29   :  { %v5129_v41 = vrot.slane %v10909_v58, 2  ;;  %v5052_v36 = vrot.slane %v5051_v59, 2  ;;  %6853 = vmatpush3.bf16.msra.mxu1 %v6852_v25  ;;  %v6886_v55 = vpack.c.bf16 %v5363_v29, %v5362_v24  ;;  %v6856_v19 = vpack.c.bf16 %v5315_v21, %v5314_v43  ;;  %v5320_v28 = vld [vmem:[#allocation6 + $0x450] sm:$0xff] }
 0xa2a   :  { %v5150_v49 = vrot.slane %v5149_v39, 2  ;;  %v5452_v63 = vsel %vm3668_vm11, %v5179_v10, %v5165_v61  ;;  %6885 = vmatpush3.bf16.msra.mxu0 %v6884_v50  ;;  %6855 = vmatprep.subr.bf16.mxu1 %v6854_v44  ;;  %v6888_v8 = vpack.c.bf16 %v5347_v14, %v5346_v0  ;;  %v6858_v54 = vpack.c.bf16 %v5333_v32, %v5332_v23  ;;  %v5321_v0 = vld [vmem:[#allocation6 + $0x458] sm:$0xff]  ;;  %v5338_v32 = vld [vmem:[#allocation6 + $0x4e0] sm:$0xff]  ;;  %v5371_v44 = vld [vmem:[#allocation6 + $0x5e8] sm:$0xff] }
 0xa2b   :  { %v5044_v13 = vadd.f32 %v5043_v15, %v10888_v1  ;;  %5883 = vmatprep.mubr.f32.mxu0 %v5452_v63  ;;  %6887 = vmatprep.subr.bf16.mxu0 %v6886_v55  ;;  %v6890_v5 = vpack.c.bf16 %v5365_v53, %v5364_v18  ;;  %v5142_v4 = vadd.f32 %v5141_v52, %v10899_v45  ;;  %v5019_v11 = vrot.slane %v10905_v27, 1  ;;  %v5318_v1 = vld [vmem:[#allocation6 + $0x440] sm:$0xff]  ;;  %v5351_v45 = vld [vmem:[#allocation6 + $0x548] sm:$0xff]  ;;  %v5352_v15 = vld [vmem:[#allocation6 + $0x550] sm:$0xff] }
 0xa2c   :  { %v5117_v12 = vrot.slane %v10917_v38, 1  ;;  %v5130_v57 = vadd.f32 %v5129_v41, %v10909_v58  ;;  %v5053_v35 = vadd.f32 %v5052_v36, %v5051_v59  ;;  %v6860_v60 = vpack.c.bf16 %v5317_v46, %v5316_v6  ;;  %v5370_v50 = vld [vmem:[#allocation6 + $0x5e0] sm:$0xff] }
 0xa2d   :  { %6857 = vmatpush3.bf16.msra.mxu1 %v6856_v19  ;;  %v5151_v48 = vadd.f32 %v5150_v49, %v5149_v39  ;;  %v6892_v20 = vpack.c.bf16 %v5349_v62, %v5348_v34  ;;  %v6862_v7 = vpack.c.bf16 %v5335_v9, %v5334_v37  ;;  %v5033_v22 = vrot.slane %v10915_v40, 1  ;;  %v5354_v6 = vld [vmem:[#allocation6 + $0x560] sm:$0xff]  ;;  %v5340_v62 = vld [vmem:[#allocation6 + $0x4f0] sm:$0xff]  ;;  %v5341_v37 = vld [vmem:[#allocation6 + $0x4f8] sm:$0xff] }
 0xa2e   :  { %6889 = vmatpush3.bf16.msra.mxu0 %v6888_v8  ;;  %6859 = vmatprep.subr.bf16.mxu1 %v6858_v54  ;;  %v5045_v51 = vrot.slane %v5044_v13, 2  ;;  %v6894_v3 = vpack.c.bf16 %v5367_v16, %v5366_v33  ;;  %v5143_v58 = vrot.slane %v5142_v4, 2  ;;  %v6864_v59 = vpack.c.bf16 %v5319_v42, %v5318_v1  ;;  %v5322_v8 = vld [vmem:[#allocation6 + $0x460] sm:$0xff]  ;;  %v5323_v54 = vld [vmem:[#allocation6 + $0x468] sm:$0xff]  ;;  %v5373_v33 = vld [vmem:[#allocation6 + $0x5f8] sm:$0xff] }
 0xa2f   :  { %6891 = vmatprep.subr.bf16.mxu0 %v6890_v5  ;;  %v5020_v17 = vadd.f32 %v5019_v11, %v10905_v27  ;;  %v5118_v24 = vadd.f32 %v5117_v12, %v10917_v38  ;;  %v6896_v29 = vpack.c.bf16 %v5351_v45, %v5350_v2  ;;  %v6866_v26 = vpack.c.bf16 %v5337_v56, %v5336_v30  ;;  %v5353_v27 = vld [vmem:[#allocation6 + $0x558] sm:$0xff]  ;;  %v5339_v38 = vld [vmem:[#allocation6 + $0x4e8] sm:$0xff]  ;;  %v5324_v1 = vld [vmem:[#allocation6 + $0x470] sm:$0xff] }
 0xa30   :  { %v5034_v43 = vadd.f32 %v5033_v22, %v10915_v40  ;;  %v5131_v21 = vrot.slane %v5130_v57, 1  ;;  %v5054_v25 = vrot.slane %v5053_v35, 1  ;;  %v5152_v14 = vrot.slane %v5151_v48, 1  ;;  %v5355_v5 = vld [vmem:[#allocation6 + $0x568] sm:$0xff]  ;;  %v5325_v42 = vld [vmem:[#allocation6 + $0x478] sm:$0xff]  ;;  %v5356_v2 = vld [vmem:[#allocation6 + $0x570] sm:$0xff] }
 0xa31   :  { %6861 = vmatpush3.bf16.msra.mxu1 %v6860_v60  ;;  %v5162_v52 = vmul.f32 0.0625, %v5020_v17  ;;  %v5176_v39 = vmul.f32 0.0625, %v5118_v24  ;;  %v6898_v23 = vpack.c.bf16 %v5369_v31, %v5368_v47  ;;  %v5046_v10 = vadd.f32 %v5045_v51, %v5044_v13  ;;  %v5391_v45 = vld [vmem:[#allocation6 + $0x688] sm:$0xff]  ;;  %v5374_v47 = vld [vmem:[#allocation6 + $0x600] sm:$0xff]  ;;  %v5392_v17 = vld [vmem:[#allocation6 + $0x690] sm:$0xff] }
 0xa32   :  { %6893 = vmatpush3.bf16.msra.mxu0 %v6892_v20  ;;  %6863 = vmatprep.subr.bf16.mxu1 %v6862_v7  ;;  %v5132_v61 = vadd.f32 %v5131_v21, %v5130_v57  ;;  %v5055_v18 = vadd.f32 %v5054_v25, %v5053_v35  ;;  %v5153_v53 = vadd.f32 %v5152_v14, %v5151_v48  ;;  %v5164_v55 = vmul.f32 0.0625, %v5034_v43  ;;  %v5357_v20 = vld [vmem:[#allocation6 + $0x578] sm:$0xff]  ;;  %v5390_v7 = vld [vmem:[#allocation6 + $0x680] sm:$0xff]  ;;  %v5375_v31 = vld [vmem:[#allocation6 + $0x608] sm:$0xff] }
 0xa33   :  { %6895 = vmatprep.subr.bf16.mxu0 %v6894_v3  ;;  %v10934_v40 = vsel %vm3668_vm11, %v5176_v39, %v5162_v52  ;;  %v5144_v41 = vadd.f32 %v5143_v58, %v5142_v4  ;;  %v6868_v36 = vpack.c.bf16 %v5321_v0, %v5320_v28  ;;  %v6900_v49 = vpack.c.bf16 %v5353_v27, %v5352_v15  ;;  %v5372_v4 = vld [vmem:[#allocation6 + $0x5f0] sm:$0xff]  ;;  %v5393_v24 = vld [vmem:[#allocation6 + $0x698] sm:$0xff]  ;;  %v5394_v0 = vld [vmem:[#allocation6 + $0x6a0] sm:$0xff] }
 0xa34   :  { %v5178_v19 = vmul.f32 0.0625, %v5132_v61  ;;  %v6870_v63 = vpack.c.bf16 %v5339_v38, %v5338_v32  ;;  %v5167_v46 = vmul.f32 0.0625, %v5055_v18  ;;  %v5181_v34 = vmul.f32 0.0625, %v5153_v53  ;;  %v5376_v43 = vld [vmem:[#allocation6 + $0x610] sm:$0xff]  ;;  %v5377_v21 = vld [vmem:[#allocation6 + $0x618] sm:$0xff]  ;;  %v5395_v15 = vld [vmem:[#allocation6 + $0x6a8] sm:$0xff] }
 0xa35   :  { %6865 = vmatpush3.bf16.msra.mxu1 %v6864_v59  ;;  %v6902_v13 = vpack.c.bf16 %v5371_v44, %v5370_v50  ;;  %v6872_v11 = vpack.c.bf16 %v5323_v54, %v5322_v8  ;;  %v5047_v12 = vrot.slane %v5046_v10, 1  ;;  %v5145_v57 = vrot.slane %v5144_v41, 1  ;;  %v5378_v25 = vld [vmem:[#allocation6 + $0x620] sm:$0xff]  ;;  %v5379_v14 = vld [vmem:[#allocation6 + $0x628] sm:$0xff]  ;;  %v5397_v27 = vld [vmem:[#allocation6 + $0x6b8] sm:$0xff] }
 0xa36   :  { %6897 = vmatpush3.bf16.msra.mxu0 %v6896_v29  ;;  %6867 = vmatprep.subr.bf16.mxu1 %v6866_v26  ;;  %v5451_v9 = vsel %vm3668_vm11, %v5178_v19, %v5164_v55  ;;  %v5454_v16 = vsel %vm3668_vm11, %v5181_v34, %v5167_v46  ;;  %v6904_v35 = vpack.c.bf16 %v5355_v5, %v5354_v6  ;;  %v5380_v61 = vld [vmem:[#allocation6 + $0x630] sm:$0xff]  ;;  %v5398_v50 = vld [vmem:[#allocation6 + $0x6c0] sm:$0xff]  ;;  %v5399_v44 = vld [vmem:[#allocation6 + $0x6c8] sm:$0xff] }
 0xa37   :  { %6899 = vmatprep.subr.bf16.mxu0 %v6898_v23  ;;  %v6874_v60 = vpack.c.bf16 %v5341_v37, %v5340_v62  ;;  %v6906_v48 = vpack.c.bf16 %v5373_v33, %v5372_v4  ;;  %v5048_v30 = vadd.f32 %v5047_v12, %v5046_v10  ;;  %v5146_v56 = vadd.f32 %v5145_v57, %v5144_v41  ;;  %v5396_v23 = vld [vmem:[#allocation6 + $0x6b0] sm:$0xff]  ;;  %v5381_v10 = vld [vmem:[#allocation6 + $0x638] sm:$0xff]  ;;  %v5382_v53 = vld [vmem:[#allocation6 + $0x640] sm:$0xff] }
 0xa38   :  { %v6876_v22 = vpack.c.bf16 %v5325_v42, %v5324_v1  ;;  %v6908_v58 = vpack.c.bf16 %v5357_v20, %v5356_v2  ;;  %v6910_v59 = vpack.c.bf16 %v5391_v45, %v5390_v7  ;;  %v6912_v26 = vpack.c.bf16 %v5375_v31, %v5374_v47  ;;  %v5383_v41 = vld [vmem:[#allocation6 + $0x648] sm:$0xff]  ;;  %v5401_v55 = vld [vmem:[#allocation6 + $0x6d8] sm:$0xff]  ;;  %v5402_v54 = vld [vmem:[#allocation6 + $0x6e0] sm:$0xff] }
 0xa39   :  { %6869 = vmatpush3.bf16.msra.mxu1 %v6868_v36  ;;  %v5166_v51 = vmul.f32 0.0625, %v5048_v30  ;;  %v5180_v3 = vmul.f32 0.0625, %v5146_v56  ;;  %v6914_v28 = vpack.c.bf16 %v5393_v24, %v5392_v17  ;;  %v6916_v52 = vpack.c.bf16 %v5377_v21, %v5376_v43  ;;  %v5400_v36 = vld [vmem:[#allocation6 + $0x6d0] sm:$0xff]  ;;  %v5385_v8 = vld [vmem:[#allocation6 + $0x658] sm:$0xff]  ;;  %v5403_v6 = vld [vmem:[#allocation6 + $0x6e8] sm:$0xff] }
 0xa3a   :  { %6901 = vmatpush3.bf16.msra.mxu0 %v6900_v49  ;;  %6871 = vmatprep.subr.bf16.mxu1 %v6870_v63  ;;  %v6918_v39 = vpack.c.bf16 %v5395_v15, %v5394_v0  ;;  %v6920_v32 = vpack.c.bf16 %v5379_v14, %v5378_v25  ;;  %v6922_v38 = vpack.c.bf16 %v5397_v27, %v5396_v23  ;;  %v5384_v63 = vld [vmem:[#allocation6 + $0x650] sm:$0xff]  ;;  %v5387_v5 = vld [vmem:[#allocation6 + $0x668] sm:$0xff]  ;;  %v5405_v37 = vld [vmem:[#allocation6 + $0x6f8] sm:$0xff] }
 0xa3b   :  { %6903 = vmatprep.subr.bf16.mxu0 %v6902_v13  ;;  %v5453_v29 = vsel %vm3668_vm11, %v5180_v3, %v5166_v51  ;;  %v6926_v18 = vpack.c.bf16 %v5399_v44, %v5398_v50  ;;  %v6928_v19 = vpack.c.bf16 %v5383_v41, %v5382_v53  ;;  %v6930_v49 = vpack.c.bf16 %v5401_v55, %v5400_v36  ;;  %v5386_v13 = vld [vmem:[#allocation6 + $0x660] sm:$0xff]  ;;  %v5404_v62 = vld [vmem:[#allocation6 + $0x6f0] sm:$0xff]  ;;  %v6342_v57 = vld [vmem:[#allocation5] ss:$0 sm:$0xff] }
 0xa3c   :  { %v6932_v46 = vpack.c.bf16 %v5385_v8, %v5384_v63  ;;  %v6934_v34 = vpack.c.bf16 %v5403_v6, %v5402_v54  ;;  %v6938_v4 = vpack.c.bf16 %v5405_v37, %v5404_v62  ;;  %v5388_v33 = vld [vmem:[#allocation6 + $0x670] sm:$0xff] }
 0xa3d   :  { %6873 = vmatpush3.bf16.msra.mxu1 %v6872_v11 }
 0xa3e   :  { %6905 = vmatpush3.bf16.msra.mxu0 %v6904_v35  ;;  %6875 = vmatprep.subr.bf16.mxu1 %v6874_v60 }
 0xa3f   :  { %6907 = vmatprep.subr.bf16.mxu0 %v6906_v48 }
 0xa41   :  { %6877 = vmatpush3.bf16.msra.mxu1 %v6876_v22 }
 0xa42   :  { %6909 = vmatpush3.bf16.msra.mxu0 %v6908_v58  ;;  %6911 = vmatprep.subr.bf16.mxu1 %v6910_v59 }
 0xa44   :  { %5814 = vmatmul.mubr.f32.vlgmr.msra.gmra.mrb[60].mxu1 %v10934_v40  ;;  %v6924_v40 = vpack.c.bf16 %v5381_v10, %v5380_v61 }
 0xa45   :  { %5884 = vmatmul.mubr.f32.vlgmr.msra.gmra.mrb[96].mxu0 %v5451_v9  ;;  %6913 = vmatpush3.bf16.msra.mxu1 %v6912_v26  ;;  %v6936_v9 = vpack.c.bf16 %v5387_v5, %v5386_v13 }
 0xa46   :  { %5953 = vmatprep.mubr.f32.mxu1 %v5454_v16  ;;  %6915 = vmatprep.subr.bf16.mxu1 %v6914_v28  ;;  %v5389_v16 = vld [vmem:[#allocation6 + $0x678] sm:$0xff] }
 0xa47   :  { %v6940_v11 = vpack.c.bf16 %v5389_v16, %v5388_v33 }
 0xa49   :  { %6917 = vmatpush3.bf16.msra.mxu1 %v6916_v52 }
 0xa4a   :  { %6919 = vmatprep.subr.bf16.mxu1 %v6918_v39 }
 0xa4d   :  { %6921 = vmatpush3.bf16.msra.mxu1 %v6920_v32 }
 0xa4e   :  { %6923 = vmatprep.subr.bf16.mxu1 %v6922_v38 }
 0xa51   :  { %6925 = vmatpush3.bf16.msra.mxu1 %v6924_v40 }
 0xa52   :  { %6927 = vmatprep.subr.bf16.mxu1 %v6926_v18 }
 0xa55   :  { %6929 = vmatpush3.bf16.msra.mxu1 %v6928_v19 }
 0xa56   :  { %6931 = vmatprep.subr.bf16.mxu1 %v6930_v49 }
 0xa59   :  { %6933 = vmatpush3.bf16.msra.mxu1 %v6932_v46 }
 0xa5a   :  { %6935 = vmatprep.subr.bf16.mxu1 %v6934_v34 }
 0xa5d   :  { %6937 = vmatpush3.bf16.msra.mxu1 %v6936_v9 }
 0xa5e   :  { %6939 = vmatprep.subr.bf16.mxu1 %v6938_v4 }
 0xa61   :  { %6941 = vmatpush3.bf16.msra.mxu1 %v6940_v11 }
 0xa64   :  { %5954 = vmatmul.mubr.f32.vlgmr.msra.gmra.mrb[62].mxu1 %v5453_v29 }
 0xacc   :  { %v6417_v12 = vpop.f32.mrb[56].mxu1 }
 0xacd   :  { %v6418_v35 = vpop.f32.mrb[57].mxu1 }
 0xace   :  { %v6419_v60 = vadd.f32 %v6418_v35, %v6417_v12 }
 0xacf   :  { %v6452_v1 = vpop.f32.mrb[92].mxu0 }
 0xad0   :  { %v5536_v42 = vadd.f32 %v6419_v60, %v6342_v57  ;;  %v6453_v2 = vpop.f32.mrb[93].mxu0 }
 0xad1   :  { %v6454_v48 = vadd.f32 %v6453_v2, %v6452_v1 }
 0xad3   :  { %v5606_v20 = vadd.f32 %v6454_v48, %v5536_v42 }
 0xaf4   :  { %v6487_v7 = vpop.f32.mrb[58].mxu1 }
 0xaf5   :  { %v6488_v45 = vpop.f32.mrb[59].mxu1 }
 0xaf6   :  { %v6489_v30 = vadd.f32 %v6488_v45, %v6487_v7 }
 0xaf7   :  { %v6522_v56 = vpop.f32.mrb[94].mxu0 }
 0xaf8   :  { %v5676_v22 = vadd.f32 %v6489_v30, %v5606_v20  ;;  %v6523_v51 = vpop.f32.mrb[95].mxu0 }
 0xaf9   :  { %v6524_v3 = vadd.f32 %v6523_v51, %v6522_v56 }
 0xafb   :  { %v5746_v58 = vadd.f32 %v6524_v3, %v5676_v22 }
 0xb17   :  { %v6557_v59 = vpop.f32.mrb[60].mxu1 }
 0xb18   :  { %v6592_v47 = vpop.f32.mrb[96].mxu0  ;;  %v6558_v31 = vpop.f32.mrb[61].mxu1 }
 0xb19   :  { %v6559_v17 = vadd.f32 %v6558_v31, %v6557_v59  ;;  %v6593_v24 = vpop.f32.mrb[97].mxu0 }
 0xb1a   :  { %v6594_v29 = vadd.f32 %v6593_v24, %v6592_v47 }
 0xb1b   :  { %v5816_v26 = vadd.f32 %v6559_v17, %v5746_v58 }
 0xb1d   :  { %v5886_v28 = vadd.f32 %v6594_v29, %v5816_v26 }
 0xb37   :  { %v6627_v43 = vpop.f32.mrb[62].mxu1 }
 0xb38   :  { %v6628_v21 = vpop.f32.mrb[63].mxu1 }
 0xb39   :  { %v6629_v0 = vadd.f32 %v6628_v21, %v6627_v43 }
 0xb3b   :  { %v5956_v15 = vadd.f32 %v6629_v0, %v5886_v28 }
 0xb3d   :  { %5960 = vst.msk [vmem:[%s10964_s21] sm:$0x3] %vm5959_vm2, %v5956_v15 }
 0xb3e   :  { %5965 = vsyncpa [#allocation7], 1 }

</bundles_post_ra>
